<compile_context>
chip_gen: v6e
topology: v6e:2x2x1
jax: 0.10.0
libtpu: 0.0.40
codegen_flags: <defaults>
</compile_context>

<pallas_src>
import functools

import jax
import jax.numpy as jnp
from jax import lax
from jax.experimental import pallas as pl
from jax.experimental.pallas import tpu as pltpu


# ----------------------------------------------------------------------------
# Fully fused kernel
# ----------------------------------------------------------------------------
def _metagp_kernel(x_tr_ref, x_te_ref, y_ref, eps_ref, wslab_ref, hp_ref, o_ref,
                   *, layer_meta, n_train, n_test):
    n, m = n_train, n_test

    # Hyperparameters from SMEM (runtime values -> no recompile when they change).
    ls = hp_ref[0]
    outputscale = hp_ref[1]
    noise = hp_ref[2]
    mean_c = hp_ref[3]
    inv_lsq = 1.0 / (ls * ls)

    # ---- deep kernel: one MLP pass over stacked [train; test] (BN folded in weights) ----
    x = jnp.concatenate([x_tr_ref[...], x_te_ref[...]], axis=0)          # (N+M, D)
    last = len(layer_meta) - 1
    for li, (off, fan_in, fan_out) in enumerate(layer_meta):
        w = wslab_ref[off:off + fan_in, :fan_out]                        # static slices of slab
        b = wslab_ref[off + fan_in:off + fan_in + 1, :fan_out]
        x = jnp.dot(x, w, preferred_element_type=jnp.float32) + b
        if li != last:
            x = jnp.maximum(x, 0.0)
    z = x                                                                # (N+M, dk)

    # ---- one Gram matrix for train+test, then carve the three blocks ----
    z2 = jnp.sum(z * z, axis=-1, keepdims=True)                          # (N+M, 1)
    zz = lax.dot_general(z, z, (((1,), (1,)), ((), ())),
                         preferred_element_type=jnp.float32)             # (N+M, N+M)
    sq = jnp.maximum(z2 + z2.T - 2.0 * zz, 0.0)
    gram = outputscale * jnp.exp(-0.5 * inv_lsq * sq)

    ri_n = lax.broadcasted_iota(jnp.int32, (n, n), 0)
    ci_n = lax.broadcasted_iota(jnp.int32, (n, n), 1)
    eye_n = (ri_n == ci_n).astype(jnp.float32)
    ri_m = lax.broadcasted_iota(jnp.int32, (m, m), 0)
    ci_m = lax.broadcasted_iota(jnp.int32, (m, m), 1)
    eye_m = (ri_m == ci_m).astype(jnp.float32)

    k_tt = gram[:n, :n] + noise * eye_n                                  # training covar + noise
    k_ts = gram[:n, n:]                                                  # (N, M)
    k_ss = gram[n:, n:]                                                  # (M, M)

    # ---- unrolled right-looking Cholesky (rank-1 updates, rsqrt on EUP) ----
    def chol(a, ri, ci, size):
        lmat = jnp.zeros_like(a)
        w_ = a
        for j in range(size):
            d = jnp.sum(jnp.where((ri == j) & (ci == j), w_, 0.0))       # pivot scalar
            inv = lax.rsqrt(d)
            colv = jnp.sum(jnp.where((ci == j) & (ri >= j), w_, 0.0),
                           axis=1, keepdims=True) * inv                  # (size, 1)
            roww = jnp.sum(jnp.where((ri == j) & (ci >= j), w_, 0.0),
                           axis=0, keepdims=True) * inv                  # (1, size)
            lmat = lmat + jnp.where(ci == j, colv, 0.0)
            w_ = w_ - colv * roww                                        # Schur update
        return lmat

    L = chol(k_tt, ri_n, ci_n, n)

    # ---- L^{-1} via unrolled forward substitution on the identity ----
    linv = jnp.zeros_like(L)
    lane_n = lax.broadcasted_iota(jnp.int32, (1, n), 1)
    for i in range(n):
        lrow = jnp.sum(jnp.where(ri_n == i, L, 0.0), axis=0, keepdims=True)   # (1, n)
        diag = jnp.sum(jnp.where((ri_n == i) & (ci_n == i), L, 0.0))
        lrow_s = jnp.where(lane_n < i, lrow, 0.0)                             # strict lower part
        acc = jnp.dot(lrow_s, linv, preferred_element_type=jnp.float32)       # (1, n)
        e_i = (lane_n == i).astype(jnp.float32)
        x_row = (e_i - acc) / diag
        linv = linv + jnp.where(ri_n == i, x_row, 0.0)

    # ---- exact-GP posterior (all transposes via dot_general contracting dims) ----
    resid = y_ref[...] - mean_c                                          # (N, 1)
    t = jnp.dot(linv, resid, preferred_element_type=jnp.float32)         # L^{-1} resid
    alpha = lax.dot_general(linv, t, (((0,), (0,)), ((), ())),
                            preferred_element_type=jnp.float32)          # K_tt^{-1} resid, (N,1)
    mean_row = mean_c + lax.dot_general(alpha, k_ts, (((0,), (0,)), ((), ())),
                                        preferred_element_type=jnp.float32)   # (1, M)

    v = jnp.dot(linv, k_ts, preferred_element_type=jnp.float32)          # L^{-1} K_ts, (N, M)
    vtv = lax.dot_general(v, v, (((0,), (0,)), ((), ())),
                          preferred_element_type=jnp.float32)            # V^T V, (M, M)
    cov = k_ss - vtv + noise * eye_m                                     # likelihood(posterior)

    l_pred = chol(cov, ri_m, ci_m, m)

    samples = lax.dot_general(eps_ref[...], l_pred, (((1,), (1,)), ((), ())),
                              preferred_element_type=jnp.float32)        # eps @ L_pred^T
    o_ref[...] = samples + mean_row


# ----------------------------------------------------------------------------
# Wrapper: pack weights into one slab, hyperparams into SMEM, single pallas_call
# ----------------------------------------------------------------------------
def meta_gp_forward(params, X_train, Y_train, X_test, eps):
    """MetaGP.forward: exact-GP predictive samples for X_test given (X_train, Y_train)."""
    layers = params["mlp"] or []

    # Pack all (BN-folded) weights + biases into one sublane-aligned slab.
    # With params closed over in jit this packing happens once at trace time.
    if layers:
        width = max(int(w.shape[1]) for (w, _) in layers)
        blocks, meta, off = [], [], 0
        for (w, b) in layers:
            fi, fo = int(w.shape[0]), int(w.shape[1])
            rows = -(-(fi + 1) // 8) * 8                      # pad block to sublane multiple
            blk = jnp.zeros((rows, width), jnp.float32)
            blk = blk.at[:fi, :fo].set(w)
            blk = blk.at[fi, :fo].set(jnp.reshape(b, (-1,)))
            blocks.append(blk)
            meta.append((off, fi, fo))
            off += rows
        w_slab = jnp.concatenate(blocks, axis=0)
    else:
        w_slab = jnp.zeros((8, 8), jnp.float32)               # dummy (identity deep kernel)
        meta = []

    hp = jnp.asarray([params["lengthscale"], params["outputscale"],
                      params["noise"], params["mean_const"]], jnp.float32)

    n, m, s = X_train.shape[0], X_test.shape[0], eps.shape[0]

    kernel = functools.partial(_metagp_kernel, layer_meta=tuple(meta),
                               n_train=int(n), n_test=int(m))
    vmem = lambda: pl.BlockSpec(memory_space=pltpu.MemorySpace.VMEM)

    return pl.pallas_call(
        kernel,
        out_shape=jax.ShapeDtypeStruct((s, m), jnp.float32),
        in_specs=[vmem(), vmem(), vmem(), vmem(), vmem(),
                  pl.BlockSpec(memory_space=pltpu.MemorySpace.SMEM)],
        out_specs=vmem(),
    )(X_train, X_test, Y_train, eps, w_slab, hp)


# ----------------------------------------------------------------------------
# Deterministic parameter construction (gpytorch-style defaults, BN folded)
# ----------------------------------------------------------------------------
def init_params(key, input_dim, deep_kernel_dim, hidden_units, hidden_layers):
    softplus0 = float(jnp.log(2.0))  # softplus(0): gpytorch raw-param default
    dims = [input_dim] + [hidden_units] * hidden_layers + [deep_kernel_dim]
    bn_eps = 1e-5
    # eval-mode BatchNorm1d with default stats (mean=0, var=1, gamma=1, beta=0)
    # folds into the preceding Linear: w' = w * s, b' = b * s.
    bn_scale = float(1.0 / jnp.sqrt(1.0 + bn_eps))
    layers = []
    for i in range(len(dims) - 1):
        key, kw, kb = jax.random.split(key, 3)
        fan_in, fan_out = dims[i], dims[i + 1]
        w = jax.random.normal(kw, (fan_in, fan_out), jnp.float32) * 0.1
        b = jax.random.normal(kb, (1, fan_out), jnp.float32) * 0.1
        layers.append((w * bn_scale, b * bn_scale))
    return {
        "mlp": layers,
        "lengthscale": softplus0,      # RBFKernel default
        "outputscale": softplus0,      # ScaleKernel default
        "noise": softplus0 + 1e-4,     # GaussianLikelihood default (GreaterThan(1e-4))
        "mean_const": 0.0,             # ConstantMean default
    }


if __name__ == "__main__":
    key = jax.random.PRNGKey(0)
    input_dim, deep_kernel_dim, hidden_units, hidden_layers = 8, 4, 32, 2
    N, M, samples = 16, 16, 16

    kparam, kx, ky, kxt, keps = jax.random.split(key, 5)
    params = init_params(kparam, input_dim, deep_kernel_dim, hidden_units, hidden_layers)

    X_train = jax.random.normal(kx, (N, input_dim), jnp.float32)
    Y_train = jax.random.normal(ky, (N, 1), jnp.float32)
    X_test = jax.random.normal(kxt, (M, input_dim), jnp.float32)
    # TODO(synk): torch MVN .sample() RNG has no direct Pallas equivalent; standard-normal
    # draws are generated here and the kernel applies mean + L_pred factor.
    eps = jax.random.normal(keps, (samples, M), jnp.float32)

    # One jit over the whole forward: the single pallas_call is the only device op.
    forward = jax.jit(functools.partial(meta_gp_forward, params))
    Y_pred = jax.block_until_ready(forward(X_train, Y_train, X_test, eps))

    assert Y_pred.shape == (samples, M)
    assert bool(jnp.all(jnp.isfinite(Y_pred)))
    print("KERNEL_OK")
</pallas_src>

<mosaic_0001>
module attributes {stable_mosaic.version = 11 : i64} {
  func.func @_metagp_kernel(%arg0: memref<16x8xf32, #tpu.memory_space<vmem>>, %arg1: memref<16x8xf32, #tpu.memory_space<vmem>>, %arg2: memref<16x1xf32, #tpu.memory_space<vmem>>, %arg3: memref<16x16xf32, #tpu.memory_space<vmem>>, %arg4: memref<96x32xf32, #tpu.memory_space<vmem>>, %arg5: memref<4xf32, #tpu.memory_space<smem>>, %arg6: memref<16x16xf32, #tpu.memory_space<vmem>>) attributes {dimension_semantics = [], scalar_prefetch = 0 : i64, scratch_operands = 0 : i64, tpu.core_type = #tpu.core_type<tc>} {
    %c0 = arith.constant 0 : index
    %0 = memref.load %arg5[%c0] : memref<4xf32, #tpu.memory_space<smem>>
    %c1 = arith.constant 1 : index
    %1 = memref.load %arg5[%c1] : memref<4xf32, #tpu.memory_space<smem>>
    %c2 = arith.constant 2 : index
    %2 = memref.load %arg5[%c2] : memref<4xf32, #tpu.memory_space<smem>>
    %c3 = arith.constant 3 : index
    %3 = memref.load %arg5[%c3] : memref<4xf32, #tpu.memory_space<smem>>
    %4 = arith.mulf %0, %0 : f32
    %cst = arith.constant 1.000000e+00 : f32
    %5 = arith.divf %cst, %4 : f32
    %c0_0 = arith.constant 0 : index
    %c0_1 = arith.constant 0 : index
    %6 = vector.load %arg0[%c0_0, %c0_1] : memref<16x8xf32, #tpu.memory_space<vmem>>, vector<16x8xf32>
    %c0_2 = arith.constant 0 : index
    %c0_3 = arith.constant 0 : index
    %7 = vector.load %arg1[%c0_2, %c0_3] : memref<16x8xf32, #tpu.memory_space<vmem>>, vector<16x8xf32>
    %8 = tpu.concatenate %6, %7 in 0 : vector<16x8xf32>, vector<16x8xf32> -> vector<32x8xf32>
    %c0_4 = arith.constant 0 : index
    %c0_5 = arith.constant 0 : index
    %9 = vector.load %arg4[%c0_4, %c0_5] : memref<96x32xf32, #tpu.memory_space<vmem>>, vector<8x32xf32>
    %c8 = arith.constant 8 : index
    %c0_6 = arith.constant 0 : index
    %10 = vector.load %arg4[%c8, %c0_6] : memref<96x32xf32, #tpu.memory_space<vmem>>, vector<1x32xf32>
    %cst_7 = arith.constant dense<0.000000e+00> : vector<32x32xf32>
    %11 = tpu.matmul %8, %9, %cst_7 {dimension_numbers = #tpu.dot_dimension_numbers<[1], [0], [0], [1], [0, 0, 1, 1], [], []>} : vector<32x8xf32>, vector<8x32xf32>, vector<32x32xf32> -> vector<32x32xf32>
    %12 = vector.broadcast %10 : vector<1x32xf32> to vector<32x32xf32>
    %13 = arith.addf %11, %12 : vector<32x32xf32>
    %cst_8 = arith.constant 0.000000e+00 : f32
    %14 = vector.broadcast %cst_8 : f32 to vector<32x32xf32>
    %15 = arith.maximumf %13, %14 : vector<32x32xf32>
    %c16 = arith.constant 16 : index
    %c0_9 = arith.constant 0 : index
    %16 = vector.load %arg4[%c16, %c0_9] : memref<96x32xf32, #tpu.memory_space<vmem>>, vector<32x32xf32>
    %c48 = arith.constant 48 : index
    %c0_10 = arith.constant 0 : index
    %17 = vector.load %arg4[%c48, %c0_10] : memref<96x32xf32, #tpu.memory_space<vmem>>, vector<1x32xf32>
    %cst_11 = arith.constant dense<0.000000e+00> : vector<32x32xf32>
    %18 = tpu.matmul %15, %16, %cst_11 {dimension_numbers = #tpu.dot_dimension_numbers<[1], [0], [0], [1], [0, 0, 1, 1], [], []>} : vector<32x32xf32>, vector<32x32xf32>, vector<32x32xf32> -> vector<32x32xf32>
    %19 = vector.broadcast %17 : vector<1x32xf32> to vector<32x32xf32>
    %20 = arith.addf %18, %19 : vector<32x32xf32>
    %cst_12 = arith.constant 0.000000e+00 : f32
    %21 = vector.broadcast %cst_12 : f32 to vector<32x32xf32>
    %22 = arith.maximumf %20, %21 : vector<32x32xf32>
    %c56 = arith.constant 56 : index
    %c0_13 = arith.constant 0 : index
    %23 = vector.load %arg4[%c56, %c0_13] : memref<96x32xf32, #tpu.memory_space<vmem>>, vector<32x4xf32>
    %c88 = arith.constant 88 : index
    %c0_14 = arith.constant 0 : index
    %24 = vector.load %arg4[%c88, %c0_14] : memref<96x32xf32, #tpu.memory_space<vmem>>, vector<1x4xf32>
    %cst_15 = arith.constant dense<0.000000e+00> : vector<32x4xf32>
    %25 = tpu.matmul %22, %23, %cst_15 {dimension_numbers = #tpu.dot_dimension_numbers<[1], [0], [0], [1], [0, 0, 1, 1], [], []>} : vector<32x32xf32>, vector<32x4xf32>, vector<32x4xf32> -> vector<32x4xf32>
    %26 = vector.broadcast %24 : vector<1x4xf32> to vector<32x4xf32>
    %27 = arith.addf %25, %26 : vector<32x4xf32>
    %28 = arith.mulf %27, %27 : vector<32x4xf32>
    %cst_16 = arith.constant dense<0.000000e+00> : vector<32xf32>
    %29 = vector.multi_reduction <add>, %28, %cst_16 [1] : vector<32x4xf32> to vector<32xf32>
    %30 = vector.shape_cast %29 : vector<32xf32> to vector<32x1xf32>
    %cst_17 = arith.constant dense<0.000000e+00> : vector<32x32xf32>
    %31 = tpu.matmul %27, %27, %cst_17 {dimension_numbers = #tpu.dot_dimension_numbers<[1], [1], [0], [0], [0, 0, 1, 0], [], []>} : vector<32x4xf32>, vector<32x4xf32>, vector<32x32xf32> -> vector<32x32xf32>
    %32 = tpu.transpose %30, [1, 0] : vector<32x1xf32> -> vector<1x32xf32>
    %33 = vector.broadcast %30 : vector<32x1xf32> to vector<32x32xf32>
    %34 = vector.broadcast %32 : vector<1x32xf32> to vector<32x32xf32>
    %35 = arith.addf %33, %34 : vector<32x32xf32>
    %cst_18 = arith.constant 2.000000e+00 : f32
    %36 = vector.broadcast %cst_18 : f32 to vector<32x32xf32>
    %37 = arith.mulf %36, %31 : vector<32x32xf32>
    %38 = arith.subf %35, %37 : vector<32x32xf32>
    %cst_19 = arith.constant 0.000000e+00 : f32
    %39 = vector.broadcast %cst_19 : f32 to vector<32x32xf32>
    %40 = arith.maximumf %38, %39 : vector<32x32xf32>
    %cst_20 = arith.constant -5.000000e-01 : f32
    %41 = arith.mulf %cst_20, %5 : f32
    %42 = vector.broadcast %41 : f32 to vector<32x32xf32>
    %43 = arith.mulf %42, %40 : vector<32x32xf32>
    %44 = math.exp %43 : vector<32x32xf32>
    %45 = vector.broadcast %1 : f32 to vector<32x32xf32>
    %46 = arith.mulf %45, %44 : vector<32x32xf32>
    %47 = tpu.iota {dimensions = array<i32: 0>} : vector<16x16xi32>
    %48 = tpu.iota {dimensions = array<i32: 1>} : vector<16x16xi32>
    %49 = arith.cmpi eq, %47, %48 : vector<16x16xi32>
    %50 = arith.extui %49 : vector<16x16xi1> to vector<16x16xi32>
    %51 = arith.sitofp %50 : vector<16x16xi32> to vector<16x16xf32>
    %52 = tpu.iota {dimensions = array<i32: 0>} : vector<16x16xi32>
    %53 = tpu.iota {dimensions = array<i32: 1>} : vector<16x16xi32>
    %54 = arith.cmpi eq, %52, %53 : vector<16x16xi32>
    %55 = arith.extui %54 : vector<16x16xi1> to vector<16x16xi32>
    %56 = arith.sitofp %55 : vector<16x16xi32> to vector<16x16xf32>
    %57 = vector.extract_strided_slice %46 {offsets = [0, 0], sizes = [16, 16], strides = [1, 1]} : vector<32x32xf32> to vector<16x16xf32>
    %58 = vector.broadcast %2 : f32 to vector<16x16xf32>
    %59 = arith.mulf %58, %51 : vector<16x16xf32>
    %60 = arith.addf %57, %59 : vector<16x16xf32>
    %61 = vector.extract_strided_slice %46 {offsets = [0, 16], sizes = [16, 16], strides = [1, 1]} : vector<32x32xf32> to vector<16x16xf32>
    %62 = vector.extract_strided_slice %46 {offsets = [16, 16], sizes = [16, 16], strides = [1, 1]} : vector<32x32xf32> to vector<16x16xf32>
    %cst_21 = arith.constant 0.000000e+00 : f32
    %63 = vector.broadcast %cst_21 : f32 to vector<16x16xf32>
    %c0_i32 = arith.constant 0 : i32
    %64 = vector.broadcast %c0_i32 : i32 to vector<16x16xi32>
    %65 = arith.cmpi eq, %47, %64 : vector<16x16xi32>
    %c0_i32_22 = arith.constant 0 : i32
    %66 = vector.broadcast %c0_i32_22 : i32 to vector<16x16xi32>
    %67 = arith.cmpi eq, %48, %66 : vector<16x16xi32>
    %68 = arith.andi %65, %67 : vector<16x16xi1>
    %cst_23 = arith.constant 0.000000e+00 : f32
    %69 = vector.broadcast %cst_23 : f32 to vector<16x16xf32>
    %70 = arith.select %68, %60, %69 : vector<16x16xi1>, vector<16x16xf32>
    %71 = vector.shape_cast %70 : vector<16x16xf32> to vector<1x16x16xf32>
    %cst_24 = arith.constant dense<0.000000e+00> : vector<1xf32>
    %72 = vector.multi_reduction <add>, %71, %cst_24 [1, 2] : vector<1x16x16xf32> to vector<1xf32>
    %73 = vector.shape_cast %72 : vector<1xf32> to vector<1x1x1xf32>
    %74 = vector.extract %73[0, 0, 0] : f32 from vector<1x1x1xf32>
    %75 = math.rsqrt %74 : f32
    %c0_i32_25 = arith.constant 0 : i32
    %76 = vector.broadcast %c0_i32_25 : i32 to vector<16x16xi32>
    %77 = arith.cmpi eq, %48, %76 : vector<16x16xi32>
    %c0_i32_26 = arith.constant 0 : i32
    %78 = vector.broadcast %c0_i32_26 : i32 to vector<16x16xi32>
    %79 = arith.cmpi sge, %47, %78 : vector<16x16xi32>
    %80 = arith.andi %77, %79 : vector<16x16xi1>
    %cst_27 = arith.constant 0.000000e+00 : f32
    %81 = vector.broadcast %cst_27 : f32 to vector<16x16xf32>
    %82 = arith.select %80, %60, %81 : vector<16x16xi1>, vector<16x16xf32>
    %cst_28 = arith.constant dense<0.000000e+00> : vector<16xf32>
    %83 = vector.multi_reduction <add>, %82, %cst_28 [1] : vector<16x16xf32> to vector<16xf32>
    %84 = vector.shape_cast %83 : vector<16xf32> to vector<16x1xf32>
    %85 = vector.broadcast %75 : f32 to vector<16x1xf32>
    %86 = arith.mulf %84, %85 : vector<16x1xf32>
    %c0_i32_29 = arith.constant 0 : i32
    %87 = vector.broadcast %c0_i32_29 : i32 to vector<16x16xi32>
    %88 = arith.cmpi eq, %47, %87 : vector<16x16xi32>
    %c0_i32_30 = arith.constant 0 : i32
    %89 = vector.broadcast %c0_i32_30 : i32 to vector<16x16xi32>
    %90 = arith.cmpi sge, %48, %89 : vector<16x16xi32>
    %91 = arith.andi %88, %90 : vector<16x16xi1>
    %cst_31 = arith.constant 0.000000e+00 : f32
    %92 = vector.broadcast %cst_31 : f32 to vector<16x16xf32>
    %93 = arith.select %91, %60, %92 : vector<16x16xi1>, vector<16x16xf32>
    %cst_32 = arith.constant dense<0.000000e+00> : vector<16xf32>
    %94 = vector.multi_reduction <add>, %93, %cst_32 [0] : vector<16x16xf32> to vector<16xf32>
    %95 = vector.shape_cast %94 : vector<16xf32> to vector<1x16xf32>
    %96 = vector.broadcast %75 : f32 to vector<1x16xf32>
    %97 = arith.mulf %95, %96 : vector<1x16xf32>
    %c0_i32_33 = arith.constant 0 : i32
    %98 = vector.broadcast %c0_i32_33 : i32 to vector<16x16xi32>
    %99 = arith.cmpi eq, %48, %98 : vector<16x16xi32>
    %cst_34 = arith.constant 0.000000e+00 : f32
    %100 = vector.shape_cast %86 : vector<16x1xf32> to vector<16x1xf32>
    %101 = vector.broadcast %100 : vector<16x1xf32> to vector<16x16xf32>
    %102 = vector.broadcast %cst_34 : f32 to vector<16x16xf32>
    %103 = arith.select %99, %101, %102 : vector<16x16xi1>, vector<16x16xf32>
    %104 = arith.addf %63, %103 : vector<16x16xf32>
    %105 = vector.broadcast %86 : vector<16x1xf32> to vector<16x16xf32>
    %106 = vector.broadcast %97 : vector<1x16xf32> to vector<16x16xf32>
    %107 = arith.mulf %105, %106 : vector<16x16xf32>
    %108 = arith.subf %60, %107 : vector<16x16xf32>
    %c1_i32 = arith.constant 1 : i32
    %109 = vector.broadcast %c1_i32 : i32 to vector<16x16xi32>
    %110 = arith.cmpi eq, %47, %109 : vector<16x16xi32>
    %c1_i32_35 = arith.constant 1 : i32
    %111 = vector.broadcast %c1_i32_35 : i32 to vector<16x16xi32>
    %112 = arith.cmpi eq, %48, %111 : vector<16x16xi32>
    %113 = arith.andi %110, %112 : vector<16x16xi1>
    %cst_36 = arith.constant 0.000000e+00 : f32
    %114 = vector.broadcast %cst_36 : f32 to vector<16x16xf32>
    %115 = arith.select %113, %108, %114 : vector<16x16xi1>, vector<16x16xf32>
    %116 = vector.shape_cast %115 : vector<16x16xf32> to vector<1x16x16xf32>
    %cst_37 = arith.constant dense<0.000000e+00> : vector<1xf32>
    %117 = vector.multi_reduction <add>, %116, %cst_37 [1, 2] : vector<1x16x16xf32> to vector<1xf32>
    %118 = vector.shape_cast %117 : vector<1xf32> to vector<1x1x1xf32>
    %119 = vector.extract %118[0, 0, 0] : f32 from vector<1x1x1xf32>
    %120 = math.rsqrt %119 : f32
    %c1_i32_38 = arith.constant 1 : i32
    %121 = vector.broadcast %c1_i32_38 : i32 to vector<16x16xi32>
    %122 = arith.cmpi eq, %48, %121 : vector<16x16xi32>
    %c1_i32_39 = arith.constant 1 : i32
    %123 = vector.broadcast %c1_i32_39 : i32 to vector<16x16xi32>
    %124 = arith.cmpi sge, %47, %123 : vector<16x16xi32>
    %125 = arith.andi %122, %124 : vector<16x16xi1>
    %cst_40 = arith.constant 0.000000e+00 : f32
    %126 = vector.broadcast %cst_40 : f32 to vector<16x16xf32>
    %127 = arith.select %125, %108, %126 : vector<16x16xi1>, vector<16x16xf32>
    %cst_41 = arith.constant dense<0.000000e+00> : vector<16xf32>
    %128 = vector.multi_reduction <add>, %127, %cst_41 [1] : vector<16x16xf32> to vector<16xf32>
    %129 = vector.shape_cast %128 : vector<16xf32> to vector<16x1xf32>
    %130 = vector.broadcast %120 : f32 to vector<16x1xf32>
    %131 = arith.mulf %129, %130 : vector<16x1xf32>
    %c1_i32_42 = arith.constant 1 : i32
    %132 = vector.broadcast %c1_i32_42 : i32 to vector<16x16xi32>
    %133 = arith.cmpi eq, %47, %132 : vector<16x16xi32>
    %c1_i32_43 = arith.constant 1 : i32
    %134 = vector.broadcast %c1_i32_43 : i32 to vector<16x16xi32>
    %135 = arith.cmpi sge, %48, %134 : vector<16x16xi32>
    %136 = arith.andi %133, %135 : vector<16x16xi1>
    %cst_44 = arith.constant 0.000000e+00 : f32
    %137 = vector.broadcast %cst_44 : f32 to vector<16x16xf32>
    %138 = arith.select %136, %108, %137 : vector<16x16xi1>, vector<16x16xf32>
    %cst_45 = arith.constant dense<0.000000e+00> : vector<16xf32>
    %139 = vector.multi_reduction <add>, %138, %cst_45 [0] : vector<16x16xf32> to vector<16xf32>
    %140 = vector.shape_cast %139 : vector<16xf32> to vector<1x16xf32>
    %141 = vector.broadcast %120 : f32 to vector<1x16xf32>
    %142 = arith.mulf %140, %141 : vector<1x16xf32>
    %c1_i32_46 = arith.constant 1 : i32
    %143 = vector.broadcast %c1_i32_46 : i32 to vector<16x16xi32>
    %144 = arith.cmpi eq, %48, %143 : vector<16x16xi32>
    %cst_47 = arith.constant 0.000000e+00 : f32
    %145 = vector.shape_cast %131 : vector<16x1xf32> to vector<16x1xf32>
    %146 = vector.broadcast %145 : vector<16x1xf32> to vector<16x16xf32>
    %147 = vector.broadcast %cst_47 : f32 to vector<16x16xf32>
    %148 = arith.select %144, %146, %147 : vector<16x16xi1>, vector<16x16xf32>
    %149 = arith.addf %104, %148 : vector<16x16xf32>
    %150 = vector.broadcast %131 : vector<16x1xf32> to vector<16x16xf32>
    %151 = vector.broadcast %142 : vector<1x16xf32> to vector<16x16xf32>
    %152 = arith.mulf %150, %151 : vector<16x16xf32>
    %153 = arith.subf %108, %152 : vector<16x16xf32>
    %c2_i32 = arith.constant 2 : i32
    %154 = vector.broadcast %c2_i32 : i32 to vector<16x16xi32>
    %155 = arith.cmpi eq, %47, %154 : vector<16x16xi32>
    %c2_i32_48 = arith.constant 2 : i32
    %156 = vector.broadcast %c2_i32_48 : i32 to vector<16x16xi32>
    %157 = arith.cmpi eq, %48, %156 : vector<16x16xi32>
    %158 = arith.andi %155, %157 : vector<16x16xi1>
    %cst_49 = arith.constant 0.000000e+00 : f32
    %159 = vector.broadcast %cst_49 : f32 to vector<16x16xf32>
    %160 = arith.select %158, %153, %159 : vector<16x16xi1>, vector<16x16xf32>
    %161 = vector.shape_cast %160 : vector<16x16xf32> to vector<1x16x16xf32>
    %cst_50 = arith.constant dense<0.000000e+00> : vector<1xf32>
    %162 = vector.multi_reduction <add>, %161, %cst_50 [1, 2] : vector<1x16x16xf32> to vector<1xf32>
    %163 = vector.shape_cast %162 : vector<1xf32> to vector<1x1x1xf32>
    %164 = vector.extract %163[0, 0, 0] : f32 from vector<1x1x1xf32>
    %165 = math.rsqrt %164 : f32
    %c2_i32_51 = arith.constant 2 : i32
    %166 = vector.broadcast %c2_i32_51 : i32 to vector<16x16xi32>
    %167 = arith.cmpi eq, %48, %166 : vector<16x16xi32>
    %c2_i32_52 = arith.constant 2 : i32
    %168 = vector.broadcast %c2_i32_52 : i32 to vector<16x16xi32>
    %169 = arith.cmpi sge, %47, %168 : vector<16x16xi32>
    %170 = arith.andi %167, %169 : vector<16x16xi1>
    %cst_53 = arith.constant 0.000000e+00 : f32
    %171 = vector.broadcast %cst_53 : f32 to vector<16x16xf32>
    %172 = arith.select %170, %153, %171 : vector<16x16xi1>, vector<16x16xf32>
    %cst_54 = arith.constant dense<0.000000e+00> : vector<16xf32>
    %173 = vector.multi_reduction <add>, %172, %cst_54 [1] : vector<16x16xf32> to vector<16xf32>
    %174 = vector.shape_cast %173 : vector<16xf32> to vector<16x1xf32>
    %175 = vector.broadcast %165 : f32 to vector<16x1xf32>
    %176 = arith.mulf %174, %175 : vector<16x1xf32>
    %c2_i32_55 = arith.constant 2 : i32
    %177 = vector.broadcast %c2_i32_55 : i32 to vector<16x16xi32>
    %178 = arith.cmpi eq, %47, %177 : vector<16x16xi32>
    %c2_i32_56 = arith.constant 2 : i32
    %179 = vector.broadcast %c2_i32_56 : i32 to vector<16x16xi32>
    %180 = arith.cmpi sge, %48, %179 : vector<16x16xi32>
    %181 = arith.andi %178, %180 : vector<16x16xi1>
    %cst_57 = arith.constant 0.000000e+00 : f32
    %182 = vector.broadcast %cst_57 : f32 to vector<16x16xf32>
    %183 = arith.select %181, %153, %182 : vector<16x16xi1>, vector<16x16xf32>
    %cst_58 = arith.constant dense<0.000000e+00> : vector<16xf32>
    %184 = vector.multi_reduction <add>, %183, %cst_58 [0] : vector<16x16xf32> to vector<16xf32>
    %185 = vector.shape_cast %184 : vector<16xf32> to vector<1x16xf32>
    %186 = vector.broadcast %165 : f32 to vector<1x16xf32>
    %187 = arith.mulf %185, %186 : vector<1x16xf32>
    %c2_i32_59 = arith.constant 2 : i32
    %188 = vector.broadcast %c2_i32_59 : i32 to vector<16x16xi32>
    %189 = arith.cmpi eq, %48, %188 : vector<16x16xi32>
    %cst_60 = arith.constant 0.000000e+00 : f32
    %190 = vector.shape_cast %176 : vector<16x1xf32> to vector<16x1xf32>
    %191 = vector.broadcast %190 : vector<16x1xf32> to vector<16x16xf32>
    %192 = vector.broadcast %cst_60 : f32 to vector<16x16xf32>
    %193 = arith.select %189, %191, %192 : vector<16x16xi1>, vector<16x16xf32>
    %194 = arith.addf %149, %193 : vector<16x16xf32>
    %195 = vector.broadcast %176 : vector<16x1xf32> to vector<16x16xf32>
    %196 = vector.broadcast %187 : vector<1x16xf32> to vector<16x16xf32>
    %197 = arith.mulf %195, %196 : vector<16x16xf32>
    %198 = arith.subf %153, %197 : vector<16x16xf32>
    %c3_i32 = arith.constant 3 : i32
    %199 = vector.broadcast %c3_i32 : i32 to vector<16x16xi32>
    %200 = arith.cmpi eq, %47, %199 : vector<16x16xi32>
    %c3_i32_61 = arith.constant 3 : i32
    %201 = vector.broadcast %c3_i32_61 : i32 to vector<16x16xi32>
    %202 = arith.cmpi eq, %48, %201 : vector<16x16xi32>
    %203 = arith.andi %200, %202 : vector<16x16xi1>
    %cst_62 = arith.constant 0.000000e+00 : f32
    %204 = vector.broadcast %cst_62 : f32 to vector<16x16xf32>
    %205 = arith.select %203, %198, %204 : vector<16x16xi1>, vector<16x16xf32>
    %206 = vector.shape_cast %205 : vector<16x16xf32> to vector<1x16x16xf32>
    %cst_63 = arith.constant dense<0.000000e+00> : vector<1xf32>
    %207 = vector.multi_reduction <add>, %206, %cst_63 [1, 2] : vector<1x16x16xf32> to vector<1xf32>
    %208 = vector.shape_cast %207 : vector<1xf32> to vector<1x1x1xf32>
    %209 = vector.extract %208[0, 0, 0] : f32 from vector<1x1x1xf32>
    %210 = math.rsqrt %209 : f32
    %c3_i32_64 = arith.constant 3 : i32
    %211 = vector.broadcast %c3_i32_64 : i32 to vector<16x16xi32>
    %212 = arith.cmpi eq, %48, %211 : vector<16x16xi32>
    %c3_i32_65 = arith.constant 3 : i32
    %213 = vector.broadcast %c3_i32_65 : i32 to vector<16x16xi32>
    %214 = arith.cmpi sge, %47, %213 : vector<16x16xi32>
    %215 = arith.andi %212, %214 : vector<16x16xi1>
    %cst_66 = arith.constant 0.000000e+00 : f32
    %216 = vector.broadcast %cst_66 : f32 to vector<16x16xf32>
    %217 = arith.select %215, %198, %216 : vector<16x16xi1>, vector<16x16xf32>
    %cst_67 = arith.constant dense<0.000000e+00> : vector<16xf32>
    %218 = vector.multi_reduction <add>, %217, %cst_67 [1] : vector<16x16xf32> to vector<16xf32>
    %219 = vector.shape_cast %218 : vector<16xf32> to vector<16x1xf32>
    %220 = vector.broadcast %210 : f32 to vector<16x1xf32>
    %221 = arith.mulf %219, %220 : vector<16x1xf32>
    %c3_i32_68 = arith.constant 3 : i32
    %222 = vector.broadcast %c3_i32_68 : i32 to vector<16x16xi32>
    %223 = arith.cmpi eq, %47, %222 : vector<16x16xi32>
    %c3_i32_69 = arith.constant 3 : i32
    %224 = vector.broadcast %c3_i32_69 : i32 to vector<16x16xi32>
    %225 = arith.cmpi sge, %48, %224 : vector<16x16xi32>
    %226 = arith.andi %223, %225 : vector<16x16xi1>
    %cst_70 = arith.constant 0.000000e+00 : f32
    %227 = vector.broadcast %cst_70 : f32 to vector<16x16xf32>
    %228 = arith.select %226, %198, %227 : vector<16x16xi1>, vector<16x16xf32>
    %cst_71 = arith.constant dense<0.000000e+00> : vector<16xf32>
    %229 = vector.multi_reduction <add>, %228, %cst_71 [0] : vector<16x16xf32> to vector<16xf32>
    %230 = vector.shape_cast %229 : vector<16xf32> to vector<1x16xf32>
    %231 = vector.broadcast %210 : f32 to vector<1x16xf32>
    %232 = arith.mulf %230, %231 : vector<1x16xf32>
    %c3_i32_72 = arith.constant 3 : i32
    %233 = vector.broadcast %c3_i32_72 : i32 to vector<16x16xi32>
    %234 = arith.cmpi eq, %48, %233 : vector<16x16xi32>
    %cst_73 = arith.constant 0.000000e+00 : f32
    %235 = vector.shape_cast %221 : vector<16x1xf32> to vector<16x1xf32>
    %236 = vector.broadcast %235 : vector<16x1xf32> to vector<16x16xf32>
    %237 = vector.broadcast %cst_73 : f32 to vector<16x16xf32>
    %238 = arith.select %234, %236, %237 : vector<16x16xi1>, vector<16x16xf32>
    %239 = arith.addf %194, %238 : vector<16x16xf32>
    %240 = vector.broadcast %221 : vector<16x1xf32> to vector<16x16xf32>
    %241 = vector.broadcast %232 : vector<1x16xf32> to vector<16x16xf32>
    %242 = arith.mulf %240, %241 : vector<16x16xf32>
    %243 = arith.subf %198, %242 : vector<16x16xf32>
    %c4_i32 = arith.constant 4 : i32
    %244 = vector.broadcast %c4_i32 : i32 to vector<16x16xi32>
    %245 = arith.cmpi eq, %47, %244 : vector<16x16xi32>
    %c4_i32_74 = arith.constant 4 : i32
    %246 = vector.broadcast %c4_i32_74 : i32 to vector<16x16xi32>
    %247 = arith.cmpi eq, %48, %246 : vector<16x16xi32>
    %248 = arith.andi %245, %247 : vector<16x16xi1>
    %cst_75 = arith.constant 0.000000e+00 : f32
    %249 = vector.broadcast %cst_75 : f32 to vector<16x16xf32>
    %250 = arith.select %248, %243, %249 : vector<16x16xi1>, vector<16x16xf32>
    %251 = vector.shape_cast %250 : vector<16x16xf32> to vector<1x16x16xf32>
    %cst_76 = arith.constant dense<0.000000e+00> : vector<1xf32>
    %252 = vector.multi_reduction <add>, %251, %cst_76 [1, 2] : vector<1x16x16xf32> to vector<1xf32>
    %253 = vector.shape_cast %252 : vector<1xf32> to vector<1x1x1xf32>
    %254 = vector.extract %253[0, 0, 0] : f32 from vector<1x1x1xf32>
    %255 = math.rsqrt %254 : f32
    %c4_i32_77 = arith.constant 4 : i32
    %256 = vector.broadcast %c4_i32_77 : i32 to vector<16x16xi32>
    %257 = arith.cmpi eq, %48, %256 : vector<16x16xi32>
    %c4_i32_78 = arith.constant 4 : i32
    %258 = vector.broadcast %c4_i32_78 : i32 to vector<16x16xi32>
    %259 = arith.cmpi sge, %47, %258 : vector<16x16xi32>
    %260 = arith.andi %257, %259 : vector<16x16xi1>
    %cst_79 = arith.constant 0.000000e+00 : f32
    %261 = vector.broadcast %cst_79 : f32 to vector<16x16xf32>
    %262 = arith.select %260, %243, %261 : vector<16x16xi1>, vector<16x16xf32>
    %cst_80 = arith.constant dense<0.000000e+00> : vector<16xf32>
    %263 = vector.multi_reduction <add>, %262, %cst_80 [1] : vector<16x16xf32> to vector<16xf32>
    %264 = vector.shape_cast %263 : vector<16xf32> to vector<16x1xf32>
    %265 = vector.broadcast %255 : f32 to vector<16x1xf32>
    %266 = arith.mulf %264, %265 : vector<16x1xf32>
    %c4_i32_81 = arith.constant 4 : i32
    %267 = vector.broadcast %c4_i32_81 : i32 to vector<16x16xi32>
    %268 = arith.cmpi eq, %47, %267 : vector<16x16xi32>
    %c4_i32_82 = arith.constant 4 : i32
    %269 = vector.broadcast %c4_i32_82 : i32 to vector<16x16xi32>
    %270 = arith.cmpi sge, %48, %269 : vector<16x16xi32>
    %271 = arith.andi %268, %270 : vector<16x16xi1>
    %cst_83 = arith.constant 0.000000e+00 : f32
    %272 = vector.broadcast %cst_83 : f32 to vector<16x16xf32>
    %273 = arith.select %271, %243, %272 : vector<16x16xi1>, vector<16x16xf32>
    %cst_84 = arith.constant dense<0.000000e+00> : vector<16xf32>
    %274 = vector.multi_reduction <add>, %273, %cst_84 [0] : vector<16x16xf32> to vector<16xf32>
    %275 = vector.shape_cast %274 : vector<16xf32> to vector<1x16xf32>
    %276 = vector.broadcast %255 : f32 to vector<1x16xf32>
    %277 = arith.mulf %275, %276 : vector<1x16xf32>
    %c4_i32_85 = arith.constant 4 : i32
    %278 = vector.broadcast %c4_i32_85 : i32 to vector<16x16xi32>
    %279 = arith.cmpi eq, %48, %278 : vector<16x16xi32>
    %cst_86 = arith.constant 0.000000e+00 : f32
    %280 = vector.shape_cast %266 : vector<16x1xf32> to vector<16x1xf32>
    %281 = vector.broadcast %280 : vector<16x1xf32> to vector<16x16xf32>
    %282 = vector.broadcast %cst_86 : f32 to vector<16x16xf32>
    %283 = arith.select %279, %281, %282 : vector<16x16xi1>, vector<16x16xf32>
    %284 = arith.addf %239, %283 : vector<16x16xf32>
    %285 = vector.broadcast %266 : vector<16x1xf32> to vector<16x16xf32>
    %286 = vector.broadcast %277 : vector<1x16xf32> to vector<16x16xf32>
    %287 = arith.mulf %285, %286 : vector<16x16xf32>
    %288 = arith.subf %243, %287 : vector<16x16xf32>
    %c5_i32 = arith.constant 5 : i32
    %289 = vector.broadcast %c5_i32 : i32 to vector<16x16xi32>
    %290 = arith.cmpi eq, %47, %289 : vector<16x16xi32>
    %c5_i32_87 = arith.constant 5 : i32
    %291 = vector.broadcast %c5_i32_87 : i32 to vector<16x16xi32>
    %292 = arith.cmpi eq, %48, %291 : vector<16x16xi32>
    %293 = arith.andi %290, %292 : vector<16x16xi1>
    %cst_88 = arith.constant 0.000000e+00 : f32
    %294 = vector.broadcast %cst_88 : f32 to vector<16x16xf32>
    %295 = arith.select %293, %288, %294 : vector<16x16xi1>, vector<16x16xf32>
    %296 = vector.shape_cast %295 : vector<16x16xf32> to vector<1x16x16xf32>
    %cst_89 = arith.constant dense<0.000000e+00> : vector<1xf32>
    %297 = vector.multi_reduction <add>, %296, %cst_89 [1, 2] : vector<1x16x16xf32> to vector<1xf32>
    %298 = vector.shape_cast %297 : vector<1xf32> to vector<1x1x1xf32>
    %299 = vector.extract %298[0, 0, 0] : f32 from vector<1x1x1xf32>
    %300 = math.rsqrt %299 : f32
    %c5_i32_90 = arith.constant 5 : i32
    %301 = vector.broadcast %c5_i32_90 : i32 to vector<16x16xi32>
    %302 = arith.cmpi eq, %48, %301 : vector<16x16xi32>
    %c5_i32_91 = arith.constant 5 : i32
    %303 = vector.broadcast %c5_i32_91 : i32 to vector<16x16xi32>
    %304 = arith.cmpi sge, %47, %303 : vector<16x16xi32>
    %305 = arith.andi %302, %304 : vector<16x16xi1>
    %cst_92 = arith.constant 0.000000e+00 : f32
    %306 = vector.broadcast %cst_92 : f32 to vector<16x16xf32>
    %307 = arith.select %305, %288, %306 : vector<16x16xi1>, vector<16x16xf32>
    %cst_93 = arith.constant dense<0.000000e+00> : vector<16xf32>
    %308 = vector.multi_reduction <add>, %307, %cst_93 [1] : vector<16x16xf32> to vector<16xf32>
    %309 = vector.shape_cast %308 : vector<16xf32> to vector<16x1xf32>
    %310 = vector.broadcast %300 : f32 to vector<16x1xf32>
    %311 = arith.mulf %309, %310 : vector<16x1xf32>
    %c5_i32_94 = arith.constant 5 : i32
    %312 = vector.broadcast %c5_i32_94 : i32 to vector<16x16xi32>
    %313 = arith.cmpi eq, %47, %312 : vector<16x16xi32>
    %c5_i32_95 = arith.constant 5 : i32
    %314 = vector.broadcast %c5_i32_95 : i32 to vector<16x16xi32>
    %315 = arith.cmpi sge, %48, %314 : vector<16x16xi32>
    %316 = arith.andi %313, %315 : vector<16x16xi1>
    %cst_96 = arith.constant 0.000000e+00 : f32
    %317 = vector.broadcast %cst_96 : f32 to vector<16x16xf32>
    %318 = arith.select %316, %288, %317 : vector<16x16xi1>, vector<16x16xf32>
    %cst_97 = arith.constant dense<0.000000e+00> : vector<16xf32>
    %319 = vector.multi_reduction <add>, %318, %cst_97 [0] : vector<16x16xf32> to vector<16xf32>
    %320 = vector.shape_cast %319 : vector<16xf32> to vector<1x16xf32>
    %321 = vector.broadcast %300 : f32 to vector<1x16xf32>
    %322 = arith.mulf %320, %321 : vector<1x16xf32>
    %c5_i32_98 = arith.constant 5 : i32
    %323 = vector.broadcast %c5_i32_98 : i32 to vector<16x16xi32>
    %324 = arith.cmpi eq, %48, %323 : vector<16x16xi32>
    %cst_99 = arith.constant 0.000000e+00 : f32
    %325 = vector.shape_cast %311 : vector<16x1xf32> to vector<16x1xf32>
    %326 = vector.broadcast %325 : vector<16x1xf32> to vector<16x16xf32>
    %327 = vector.broadcast %cst_99 : f32 to vector<16x16xf32>
    %328 = arith.select %324, %326, %327 : vector<16x16xi1>, vector<16x16xf32>
    %329 = arith.addf %284, %328 : vector<16x16xf32>
    %330 = vector.broadcast %311 : vector<16x1xf32> to vector<16x16xf32>
    %331 = vector.broadcast %322 : vector<1x16xf32> to vector<16x16xf32>
    %332 = arith.mulf %330, %331 : vector<16x16xf32>
    %333 = arith.subf %288, %332 : vector<16x16xf32>
    %c6_i32 = arith.constant 6 : i32
    %334 = vector.broadcast %c6_i32 : i32 to vector<16x16xi32>
    %335 = arith.cmpi eq, %47, %334 : vector<16x16xi32>
    %c6_i32_100 = arith.constant 6 : i32
    %336 = vector.broadcast %c6_i32_100 : i32 to vector<16x16xi32>
    %337 = arith.cmpi eq, %48, %336 : vector<16x16xi32>
    %338 = arith.andi %335, %337 : vector<16x16xi1>
    %cst_101 = arith.constant 0.000000e+00 : f32
    %339 = vector.broadcast %cst_101 : f32 to vector<16x16xf32>
    %340 = arith.select %338, %333, %339 : vector<16x16xi1>, vector<16x16xf32>
    %341 = vector.shape_cast %340 : vector<16x16xf32> to vector<1x16x16xf32>
    %cst_102 = arith.constant dense<0.000000e+00> : vector<1xf32>
    %342 = vector.multi_reduction <add>, %341, %cst_102 [1, 2] : vector<1x16x16xf32> to vector<1xf32>
    %343 = vector.shape_cast %342 : vector<1xf32> to vector<1x1x1xf32>
    %344 = vector.extract %343[0, 0, 0] : f32 from vector<1x1x1xf32>
    %345 = math.rsqrt %344 : f32
    %c6_i32_103 = arith.constant 6 : i32
    %346 = vector.broadcast %c6_i32_103 : i32 to vector<16x16xi32>
    %347 = arith.cmpi eq, %48, %346 : vector<16x16xi32>
    %c6_i32_104 = arith.constant 6 : i32
    %348 = vector.broadcast %c6_i32_104 : i32 to vector<16x16xi32>
    %349 = arith.cmpi sge, %47, %348 : vector<16x16xi32>
    %350 = arith.andi %347, %349 : vector<16x16xi1>
    %cst_105 = arith.constant 0.000000e+00 : f32
    %351 = vector.broadcast %cst_105 : f32 to vector<16x16xf32>
    %352 = arith.select %350, %333, %351 : vector<16x16xi1>, vector<16x16xf32>
    %cst_106 = arith.constant dense<0.000000e+00> : vector<16xf32>
    %353 = vector.multi_reduction <add>, %352, %cst_106 [1] : vector<16x16xf32> to vector<16xf32>
    %354 = vector.shape_cast %353 : vector<16xf32> to vector<16x1xf32>
    %355 = vector.broadcast %345 : f32 to vector<16x1xf32>
    %356 = arith.mulf %354, %355 : vector<16x1xf32>
    %c6_i32_107 = arith.constant 6 : i32
    %357 = vector.broadcast %c6_i32_107 : i32 to vector<16x16xi32>
    %358 = arith.cmpi eq, %47, %357 : vector<16x16xi32>
    %c6_i32_108 = arith.constant 6 : i32
    %359 = vector.broadcast %c6_i32_108 : i32 to vector<16x16xi32>
    %360 = arith.cmpi sge, %48, %359 : vector<16x16xi32>
    %361 = arith.andi %358, %360 : vector<16x16xi1>
    %cst_109 = arith.constant 0.000000e+00 : f32
    %362 = vector.broadcast %cst_109 : f32 to vector<16x16xf32>
    %363 = arith.select %361, %333, %362 : vector<16x16xi1>, vector<16x16xf32>
    %cst_110 = arith.constant dense<0.000000e+00> : vector<16xf32>
    %364 = vector.multi_reduction <add>, %363, %cst_110 [0] : vector<16x16xf32> to vector<16xf32>
    %365 = vector.shape_cast %364 : vector<16xf32> to vector<1x16xf32>
    %366 = vector.broadcast %345 : f32 to vector<1x16xf32>
    %367 = arith.mulf %365, %366 : vector<1x16xf32>
    %c6_i32_111 = arith.constant 6 : i32
    %368 = vector.broadcast %c6_i32_111 : i32 to vector<16x16xi32>
    %369 = arith.cmpi eq, %48, %368 : vector<16x16xi32>
    %cst_112 = arith.constant 0.000000e+00 : f32
    %370 = vector.shape_cast %356 : vector<16x1xf32> to vector<16x1xf32>
    %371 = vector.broadcast %370 : vector<16x1xf32> to vector<16x16xf32>
    %372 = vector.broadcast %cst_112 : f32 to vector<16x16xf32>
    %373 = arith.select %369, %371, %372 : vector<16x16xi1>, vector<16x16xf32>
    %374 = arith.addf %329, %373 : vector<16x16xf32>
    %375 = vector.broadcast %356 : vector<16x1xf32> to vector<16x16xf32>
    %376 = vector.broadcast %367 : vector<1x16xf32> to vector<16x16xf32>
    %377 = arith.mulf %375, %376 : vector<16x16xf32>
    %378 = arith.subf %333, %377 : vector<16x16xf32>
    %c7_i32 = arith.constant 7 : i32
    %379 = vector.broadcast %c7_i32 : i32 to vector<16x16xi32>
    %380 = arith.cmpi eq, %47, %379 : vector<16x16xi32>
    %c7_i32_113 = arith.constant 7 : i32
    %381 = vector.broadcast %c7_i32_113 : i32 to vector<16x16xi32>
    %382 = arith.cmpi eq, %48, %381 : vector<16x16xi32>
    %383 = arith.andi %380, %382 : vector<16x16xi1>
    %cst_114 = arith.constant 0.000000e+00 : f32
    %384 = vector.broadcast %cst_114 : f32 to vector<16x16xf32>
    %385 = arith.select %383, %378, %384 : vector<16x16xi1>, vector<16x16xf32>
    %386 = vector.shape_cast %385 : vector<16x16xf32> to vector<1x16x16xf32>
    %cst_115 = arith.constant dense<0.000000e+00> : vector<1xf32>
    %387 = vector.multi_reduction <add>, %386, %cst_115 [1, 2] : vector<1x16x16xf32> to vector<1xf32>
    %388 = vector.shape_cast %387 : vector<1xf32> to vector<1x1x1xf32>
    %389 = vector.extract %388[0, 0, 0] : f32 from vector<1x1x1xf32>
    %390 = math.rsqrt %389 : f32
    %c7_i32_116 = arith.constant 7 : i32
    %391 = vector.broadcast %c7_i32_116 : i32 to vector<16x16xi32>
    %392 = arith.cmpi eq, %48, %391 : vector<16x16xi32>
    %c7_i32_117 = arith.constant 7 : i32
    %393 = vector.broadcast %c7_i32_117 : i32 to vector<16x16xi32>
    %394 = arith.cmpi sge, %47, %393 : vector<16x16xi32>
    %395 = arith.andi %392, %394 : vector<16x16xi1>
    %cst_118 = arith.constant 0.000000e+00 : f32
    %396 = vector.broadcast %cst_118 : f32 to vector<16x16xf32>
    %397 = arith.select %395, %378, %396 : vector<16x16xi1>, vector<16x16xf32>
    %cst_119 = arith.constant dense<0.000000e+00> : vector<16xf32>
    %398 = vector.multi_reduction <add>, %397, %cst_119 [1] : vector<16x16xf32> to vector<16xf32>
    %399 = vector.shape_cast %398 : vector<16xf32> to vector<16x1xf32>
    %400 = vector.broadcast %390 : f32 to vector<16x1xf32>
    %401 = arith.mulf %399, %400 : vector<16x1xf32>
    %c7_i32_120 = arith.constant 7 : i32
    %402 = vector.broadcast %c7_i32_120 : i32 to vector<16x16xi32>
    %403 = arith.cmpi eq, %47, %402 : vector<16x16xi32>
    %c7_i32_121 = arith.constant 7 : i32
    %404 = vector.broadcast %c7_i32_121 : i32 to vector<16x16xi32>
    %405 = arith.cmpi sge, %48, %404 : vector<16x16xi32>
    %406 = arith.andi %403, %405 : vector<16x16xi1>
    %cst_122 = arith.constant 0.000000e+00 : f32
    %407 = vector.broadcast %cst_122 : f32 to vector<16x16xf32>
    %408 = arith.select %406, %378, %407 : vector<16x16xi1>, vector<16x16xf32>
    %cst_123 = arith.constant dense<0.000000e+00> : vector<16xf32>
    %409 = vector.multi_reduction <add>, %408, %cst_123 [0] : vector<16x16xf32> to vector<16xf32>
    %410 = vector.shape_cast %409 : vector<16xf32> to vector<1x16xf32>
    %411 = vector.broadcast %390 : f32 to vector<1x16xf32>
    %412 = arith.mulf %410, %411 : vector<1x16xf32>
    %c7_i32_124 = arith.constant 7 : i32
    %413 = vector.broadcast %c7_i32_124 : i32 to vector<16x16xi32>
    %414 = arith.cmpi eq, %48, %413 : vector<16x16xi32>
    %cst_125 = arith.constant 0.000000e+00 : f32
    %415 = vector.shape_cast %401 : vector<16x1xf32> to vector<16x1xf32>
    %416 = vector.broadcast %415 : vector<16x1xf32> to vector<16x16xf32>
    %417 = vector.broadcast %cst_125 : f32 to vector<16x16xf32>
    %418 = arith.select %414, %416, %417 : vector<16x16xi1>, vector<16x16xf32>
    %419 = arith.addf %374, %418 : vector<16x16xf32>
    %420 = vector.broadcast %401 : vector<16x1xf32> to vector<16x16xf32>
    %421 = vector.broadcast %412 : vector<1x16xf32> to vector<16x16xf32>
    %422 = arith.mulf %420, %421 : vector<16x16xf32>
    %423 = arith.subf %378, %422 : vector<16x16xf32>
    %c8_i32 = arith.constant 8 : i32
    %424 = vector.broadcast %c8_i32 : i32 to vector<16x16xi32>
    %425 = arith.cmpi eq, %47, %424 : vector<16x16xi32>
    %c8_i32_126 = arith.constant 8 : i32
    %426 = vector.broadcast %c8_i32_126 : i32 to vector<16x16xi32>
    %427 = arith.cmpi eq, %48, %426 : vector<16x16xi32>
    %428 = arith.andi %425, %427 : vector<16x16xi1>
    %cst_127 = arith.constant 0.000000e+00 : f32
    %429 = vector.broadcast %cst_127 : f32 to vector<16x16xf32>
    %430 = arith.select %428, %423, %429 : vector<16x16xi1>, vector<16x16xf32>
    %431 = vector.shape_cast %430 : vector<16x16xf32> to vector<1x16x16xf32>
    %cst_128 = arith.constant dense<0.000000e+00> : vector<1xf32>
    %432 = vector.multi_reduction <add>, %431, %cst_128 [1, 2] : vector<1x16x16xf32> to vector<1xf32>
    %433 = vector.shape_cast %432 : vector<1xf32> to vector<1x1x1xf32>
    %434 = vector.extract %433[0, 0, 0] : f32 from vector<1x1x1xf32>
    %435 = math.rsqrt %434 : f32
    %c8_i32_129 = arith.constant 8 : i32
    %436 = vector.broadcast %c8_i32_129 : i32 to vector<16x16xi32>
    %437 = arith.cmpi eq, %48, %436 : vector<16x16xi32>
    %c8_i32_130 = arith.constant 8 : i32
    %438 = vector.broadcast %c8_i32_130 : i32 to vector<16x16xi32>
    %439 = arith.cmpi sge, %47, %438 : vector<16x16xi32>
    %440 = arith.andi %437, %439 : vector<16x16xi1>
    %cst_131 = arith.constant 0.000000e+00 : f32
    %441 = vector.broadcast %cst_131 : f32 to vector<16x16xf32>
    %442 = arith.select %440, %423, %441 : vector<16x16xi1>, vector<16x16xf32>
    %cst_132 = arith.constant dense<0.000000e+00> : vector<16xf32>
    %443 = vector.multi_reduction <add>, %442, %cst_132 [1] : vector<16x16xf32> to vector<16xf32>
    %444 = vector.shape_cast %443 : vector<16xf32> to vector<16x1xf32>
    %445 = vector.broadcast %435 : f32 to vector<16x1xf32>
    %446 = arith.mulf %444, %445 : vector<16x1xf32>
    %c8_i32_133 = arith.constant 8 : i32
    %447 = vector.broadcast %c8_i32_133 : i32 to vector<16x16xi32>
    %448 = arith.cmpi eq, %47, %447 : vector<16x16xi32>
    %c8_i32_134 = arith.constant 8 : i32
    %449 = vector.broadcast %c8_i32_134 : i32 to vector<16x16xi32>
    %450 = arith.cmpi sge, %48, %449 : vector<16x16xi32>
    %451 = arith.andi %448, %450 : vector<16x16xi1>
    %cst_135 = arith.constant 0.000000e+00 : f32
    %452 = vector.broadcast %cst_135 : f32 to vector<16x16xf32>
    %453 = arith.select %451, %423, %452 : vector<16x16xi1>, vector<16x16xf32>
    %cst_136 = arith.constant dense<0.000000e+00> : vector<16xf32>
    %454 = vector.multi_reduction <add>, %453, %cst_136 [0] : vector<16x16xf32> to vector<16xf32>
    %455 = vector.shape_cast %454 : vector<16xf32> to vector<1x16xf32>
    %456 = vector.broadcast %435 : f32 to vector<1x16xf32>
    %457 = arith.mulf %455, %456 : vector<1x16xf32>
    %c8_i32_137 = arith.constant 8 : i32
    %458 = vector.broadcast %c8_i32_137 : i32 to vector<16x16xi32>
    %459 = arith.cmpi eq, %48, %458 : vector<16x16xi32>
    %cst_138 = arith.constant 0.000000e+00 : f32
    %460 = vector.shape_cast %446 : vector<16x1xf32> to vector<16x1xf32>
    %461 = vector.broadcast %460 : vector<16x1xf32> to vector<16x16xf32>
    %462 = vector.broadcast %cst_138 : f32 to vector<16x16xf32>
    %463 = arith.select %459, %461, %462 : vector<16x16xi1>, vector<16x16xf32>
    %464 = arith.addf %419, %463 : vector<16x16xf32>
    %465 = vector.broadcast %446 : vector<16x1xf32> to vector<16x16xf32>
    %466 = vector.broadcast %457 : vector<1x16xf32> to vector<16x16xf32>
    %467 = arith.mulf %465, %466 : vector<16x16xf32>
    %468 = arith.subf %423, %467 : vector<16x16xf32>
    %c9_i32 = arith.constant 9 : i32
    %469 = vector.broadcast %c9_i32 : i32 to vector<16x16xi32>
    %470 = arith.cmpi eq, %47, %469 : vector<16x16xi32>
    %c9_i32_139 = arith.constant 9 : i32
    %471 = vector.broadcast %c9_i32_139 : i32 to vector<16x16xi32>
    %472 = arith.cmpi eq, %48, %471 : vector<16x16xi32>
    %473 = arith.andi %470, %472 : vector<16x16xi1>
    %cst_140 = arith.constant 0.000000e+00 : f32
    %474 = vector.broadcast %cst_140 : f32 to vector<16x16xf32>
    %475 = arith.select %473, %468, %474 : vector<16x16xi1>, vector<16x16xf32>
    %476 = vector.shape_cast %475 : vector<16x16xf32> to vector<1x16x16xf32>
    %cst_141 = arith.constant dense<0.000000e+00> : vector<1xf32>
    %477 = vector.multi_reduction <add>, %476, %cst_141 [1, 2] : vector<1x16x16xf32> to vector<1xf32>
    %478 = vector.shape_cast %477 : vector<1xf32> to vector<1x1x1xf32>
    %479 = vector.extract %478[0, 0, 0] : f32 from vector<1x1x1xf32>
    %480 = math.rsqrt %479 : f32
    %c9_i32_142 = arith.constant 9 : i32
    %481 = vector.broadcast %c9_i32_142 : i32 to vector<16x16xi32>
    %482 = arith.cmpi eq, %48, %481 : vector<16x16xi32>
    %c9_i32_143 = arith.constant 9 : i32
    %483 = vector.broadcast %c9_i32_143 : i32 to vector<16x16xi32>
    %484 = arith.cmpi sge, %47, %483 : vector<16x16xi32>
    %485 = arith.andi %482, %484 : vector<16x16xi1>
    %cst_144 = arith.constant 0.000000e+00 : f32
    %486 = vector.broadcast %cst_144 : f32 to vector<16x16xf32>
    %487 = arith.select %485, %468, %486 : vector<16x16xi1>, vector<16x16xf32>
    %cst_145 = arith.constant dense<0.000000e+00> : vector<16xf32>
    %488 = vector.multi_reduction <add>, %487, %cst_145 [1] : vector<16x16xf32> to vector<16xf32>
    %489 = vector.shape_cast %488 : vector<16xf32> to vector<16x1xf32>
    %490 = vector.broadcast %480 : f32 to vector<16x1xf32>
    %491 = arith.mulf %489, %490 : vector<16x1xf32>
    %c9_i32_146 = arith.constant 9 : i32
    %492 = vector.broadcast %c9_i32_146 : i32 to vector<16x16xi32>
    %493 = arith.cmpi eq, %47, %492 : vector<16x16xi32>
    %c9_i32_147 = arith.constant 9 : i32
    %494 = vector.broadcast %c9_i32_147 : i32 to vector<16x16xi32>
    %495 = arith.cmpi sge, %48, %494 : vector<16x16xi32>
    %496 = arith.andi %493, %495 : vector<16x16xi1>
    %cst_148 = arith.constant 0.000000e+00 : f32
    %497 = vector.broadcast %cst_148 : f32 to vector<16x16xf32>
    %498 = arith.select %496, %468, %497 : vector<16x16xi1>, vector<16x16xf32>
    %cst_149 = arith.constant dense<0.000000e+00> : vector<16xf32>
    %499 = vector.multi_reduction <add>, %498, %cst_149 [0] : vector<16x16xf32> to vector<16xf32>
    %500 = vector.shape_cast %499 : vector<16xf32> to vector<1x16xf32>
    %501 = vector.broadcast %480 : f32 to vector<1x16xf32>
    %502 = arith.mulf %500, %501 : vector<1x16xf32>
    %c9_i32_150 = arith.constant 9 : i32
    %503 = vector.broadcast %c9_i32_150 : i32 to vector<16x16xi32>
    %504 = arith.cmpi eq, %48, %503 : vector<16x16xi32>
    %cst_151 = arith.constant 0.000000e+00 : f32
    %505 = vector.shape_cast %491 : vector<16x1xf32> to vector<16x1xf32>
    %506 = vector.broadcast %505 : vector<16x1xf32> to vector<16x16xf32>
    %507 = vector.broadcast %cst_151 : f32 to vector<16x16xf32>
    %508 = arith.select %504, %506, %507 : vector<16x16xi1>, vector<16x16xf32>
    %509 = arith.addf %464, %508 : vector<16x16xf32>
    %510 = vector.broadcast %491 : vector<16x1xf32> to vector<16x16xf32>
    %511 = vector.broadcast %502 : vector<1x16xf32> to vector<16x16xf32>
    %512 = arith.mulf %510, %511 : vector<16x16xf32>
    %513 = arith.subf %468, %512 : vector<16x16xf32>
    %c10_i32 = arith.constant 10 : i32
    %514 = vector.broadcast %c10_i32 : i32 to vector<16x16xi32>
    %515 = arith.cmpi eq, %47, %514 : vector<16x16xi32>
    %c10_i32_152 = arith.constant 10 : i32
    %516 = vector.broadcast %c10_i32_152 : i32 to vector<16x16xi32>
    %517 = arith.cmpi eq, %48, %516 : vector<16x16xi32>
    %518 = arith.andi %515, %517 : vector<16x16xi1>
    %cst_153 = arith.constant 0.000000e+00 : f32
    %519 = vector.broadcast %cst_153 : f32 to vector<16x16xf32>
    %520 = arith.select %518, %513, %519 : vector<16x16xi1>, vector<16x16xf32>
    %521 = vector.shape_cast %520 : vector<16x16xf32> to vector<1x16x16xf32>
    %cst_154 = arith.constant dense<0.000000e+00> : vector<1xf32>
    %522 = vector.multi_reduction <add>, %521, %cst_154 [1, 2] : vector<1x16x16xf32> to vector<1xf32>
    %523 = vector.shape_cast %522 : vector<1xf32> to vector<1x1x1xf32>
    %524 = vector.extract %523[0, 0, 0] : f32 from vector<1x1x1xf32>
    %525 = math.rsqrt %524 : f32
    %c10_i32_155 = arith.constant 10 : i32
    %526 = vector.broadcast %c10_i32_155 : i32 to vector<16x16xi32>
    %527 = arith.cmpi eq, %48, %526 : vector<16x16xi32>
    %c10_i32_156 = arith.constant 10 : i32
    %528 = vector.broadcast %c10_i32_156 : i32 to vector<16x16xi32>
    %529 = arith.cmpi sge, %47, %528 : vector<16x16xi32>
    %530 = arith.andi %527, %529 : vector<16x16xi1>
    %cst_157 = arith.constant 0.000000e+00 : f32
    %531 = vector.broadcast %cst_157 : f32 to vector<16x16xf32>
    %532 = arith.select %530, %513, %531 : vector<16x16xi1>, vector<16x16xf32>
    %cst_158 = arith.constant dense<0.000000e+00> : vector<16xf32>
    %533 = vector.multi_reduction <add>, %532, %cst_158 [1] : vector<16x16xf32> to vector<16xf32>
    %534 = vector.shape_cast %533 : vector<16xf32> to vector<16x1xf32>
    %535 = vector.broadcast %525 : f32 to vector<16x1xf32>
    %536 = arith.mulf %534, %535 : vector<16x1xf32>
    %c10_i32_159 = arith.constant 10 : i32
    %537 = vector.broadcast %c10_i32_159 : i32 to vector<16x16xi32>
    %538 = arith.cmpi eq, %47, %537 : vector<16x16xi32>
    %c10_i32_160 = arith.constant 10 : i32
    %539 = vector.broadcast %c10_i32_160 : i32 to vector<16x16xi32>
    %540 = arith.cmpi sge, %48, %539 : vector<16x16xi32>
    %541 = arith.andi %538, %540 : vector<16x16xi1>
    %cst_161 = arith.constant 0.000000e+00 : f32
    %542 = vector.broadcast %cst_161 : f32 to vector<16x16xf32>
    %543 = arith.select %541, %513, %542 : vector<16x16xi1>, vector<16x16xf32>
    %cst_162 = arith.constant dense<0.000000e+00> : vector<16xf32>
    %544 = vector.multi_reduction <add>, %543, %cst_162 [0] : vector<16x16xf32> to vector<16xf32>
    %545 = vector.shape_cast %544 : vector<16xf32> to vector<1x16xf32>
    %546 = vector.broadcast %525 : f32 to vector<1x16xf32>
    %547 = arith.mulf %545, %546 : vector<1x16xf32>
    %c10_i32_163 = arith.constant 10 : i32
    %548 = vector.broadcast %c10_i32_163 : i32 to vector<16x16xi32>
    %549 = arith.cmpi eq, %48, %548 : vector<16x16xi32>
    %cst_164 = arith.constant 0.000000e+00 : f32
    %550 = vector.shape_cast %536 : vector<16x1xf32> to vector<16x1xf32>
    %551 = vector.broadcast %550 : vector<16x1xf32> to vector<16x16xf32>
    %552 = vector.broadcast %cst_164 : f32 to vector<16x16xf32>
    %553 = arith.select %549, %551, %552 : vector<16x16xi1>, vector<16x16xf32>
    %554 = arith.addf %509, %553 : vector<16x16xf32>
    %555 = vector.broadcast %536 : vector<16x1xf32> to vector<16x16xf32>
    %556 = vector.broadcast %547 : vector<1x16xf32> to vector<16x16xf32>
    %557 = arith.mulf %555, %556 : vector<16x16xf32>
    %558 = arith.subf %513, %557 : vector<16x16xf32>
    %c11_i32 = arith.constant 11 : i32
    %559 = vector.broadcast %c11_i32 : i32 to vector<16x16xi32>
    %560 = arith.cmpi eq, %47, %559 : vector<16x16xi32>
    %c11_i32_165 = arith.constant 11 : i32
    %561 = vector.broadcast %c11_i32_165 : i32 to vector<16x16xi32>
    %562 = arith.cmpi eq, %48, %561 : vector<16x16xi32>
    %563 = arith.andi %560, %562 : vector<16x16xi1>
    %cst_166 = arith.constant 0.000000e+00 : f32
    %564 = vector.broadcast %cst_166 : f32 to vector<16x16xf32>
    %565 = arith.select %563, %558, %564 : vector<16x16xi1>, vector<16x16xf32>
    %566 = vector.shape_cast %565 : vector<16x16xf32> to vector<1x16x16xf32>
    %cst_167 = arith.constant dense<0.000000e+00> : vector<1xf32>
    %567 = vector.multi_reduction <add>, %566, %cst_167 [1, 2] : vector<1x16x16xf32> to vector<1xf32>
    %568 = vector.shape_cast %567 : vector<1xf32> to vector<1x1x1xf32>
    %569 = vector.extract %568[0, 0, 0] : f32 from vector<1x1x1xf32>
    %570 = math.rsqrt %569 : f32
    %c11_i32_168 = arith.constant 11 : i32
    %571 = vector.broadcast %c11_i32_168 : i32 to vector<16x16xi32>
    %572 = arith.cmpi eq, %48, %571 : vector<16x16xi32>
    %c11_i32_169 = arith.constant 11 : i32
    %573 = vector.broadcast %c11_i32_169 : i32 to vector<16x16xi32>
    %574 = arith.cmpi sge, %47, %573 : vector<16x16xi32>
    %575 = arith.andi %572, %574 : vector<16x16xi1>
    %cst_170 = arith.constant 0.000000e+00 : f32
    %576 = vector.broadcast %cst_170 : f32 to vector<16x16xf32>
    %577 = arith.select %575, %558, %576 : vector<16x16xi1>, vector<16x16xf32>
    %cst_171 = arith.constant dense<0.000000e+00> : vector<16xf32>
    %578 = vector.multi_reduction <add>, %577, %cst_171 [1] : vector<16x16xf32> to vector<16xf32>
    %579 = vector.shape_cast %578 : vector<16xf32> to vector<16x1xf32>
    %580 = vector.broadcast %570 : f32 to vector<16x1xf32>
    %581 = arith.mulf %579, %580 : vector<16x1xf32>
    %c11_i32_172 = arith.constant 11 : i32
    %582 = vector.broadcast %c11_i32_172 : i32 to vector<16x16xi32>
    %583 = arith.cmpi eq, %47, %582 : vector<16x16xi32>
    %c11_i32_173 = arith.constant 11 : i32
    %584 = vector.broadcast %c11_i32_173 : i32 to vector<16x16xi32>
    %585 = arith.cmpi sge, %48, %584 : vector<16x16xi32>
    %586 = arith.andi %583, %585 : vector<16x16xi1>
    %cst_174 = arith.constant 0.000000e+00 : f32
    %587 = vector.broadcast %cst_174 : f32 to vector<16x16xf32>
    %588 = arith.select %586, %558, %587 : vector<16x16xi1>, vector<16x16xf32>
    %cst_175 = arith.constant dense<0.000000e+00> : vector<16xf32>
    %589 = vector.multi_reduction <add>, %588, %cst_175 [0] : vector<16x16xf32> to vector<16xf32>
    %590 = vector.shape_cast %589 : vector<16xf32> to vector<1x16xf32>
    %591 = vector.broadcast %570 : f32 to vector<1x16xf32>
    %592 = arith.mulf %590, %591 : vector<1x16xf32>
    %c11_i32_176 = arith.constant 11 : i32
    %593 = vector.broadcast %c11_i32_176 : i32 to vector<16x16xi32>
    %594 = arith.cmpi eq, %48, %593 : vector<16x16xi32>
    %cst_177 = arith.constant 0.000000e+00 : f32
    %595 = vector.shape_cast %581 : vector<16x1xf32> to vector<16x1xf32>
    %596 = vector.broadcast %595 : vector<16x1xf32> to vector<16x16xf32>
    %597 = vector.broadcast %cst_177 : f32 to vector<16x16xf32>
    %598 = arith.select %594, %596, %597 : vector<16x16xi1>, vector<16x16xf32>
    %599 = arith.addf %554, %598 : vector<16x16xf32>
    %600 = vector.broadcast %581 : vector<16x1xf32> to vector<16x16xf32>
    %601 = vector.broadcast %592 : vector<1x16xf32> to vector<16x16xf32>
    %602 = arith.mulf %600, %601 : vector<16x16xf32>
    %603 = arith.subf %558, %602 : vector<16x16xf32>
    %c12_i32 = arith.constant 12 : i32
    %604 = vector.broadcast %c12_i32 : i32 to vector<16x16xi32>
    %605 = arith.cmpi eq, %47, %604 : vector<16x16xi32>
    %c12_i32_178 = arith.constant 12 : i32
    %606 = vector.broadcast %c12_i32_178 : i32 to vector<16x16xi32>
    %607 = arith.cmpi eq, %48, %606 : vector<16x16xi32>
    %608 = arith.andi %605, %607 : vector<16x16xi1>
    %cst_179 = arith.constant 0.000000e+00 : f32
    %609 = vector.broadcast %cst_179 : f32 to vector<16x16xf32>
    %610 = arith.select %608, %603, %609 : vector<16x16xi1>, vector<16x16xf32>
    %611 = vector.shape_cast %610 : vector<16x16xf32> to vector<1x16x16xf32>
    %cst_180 = arith.constant dense<0.000000e+00> : vector<1xf32>
    %612 = vector.multi_reduction <add>, %611, %cst_180 [1, 2] : vector<1x16x16xf32> to vector<1xf32>
    %613 = vector.shape_cast %612 : vector<1xf32> to vector<1x1x1xf32>
    %614 = vector.extract %613[0, 0, 0] : f32 from vector<1x1x1xf32>
    %615 = math.rsqrt %614 : f32
    %c12_i32_181 = arith.constant 12 : i32
    %616 = vector.broadcast %c12_i32_181 : i32 to vector<16x16xi32>
    %617 = arith.cmpi eq, %48, %616 : vector<16x16xi32>
    %c12_i32_182 = arith.constant 12 : i32
    %618 = vector.broadcast %c12_i32_182 : i32 to vector<16x16xi32>
    %619 = arith.cmpi sge, %47, %618 : vector<16x16xi32>
    %620 = arith.andi %617, %619 : vector<16x16xi1>
    %cst_183 = arith.constant 0.000000e+00 : f32
    %621 = vector.broadcast %cst_183 : f32 to vector<16x16xf32>
    %622 = arith.select %620, %603, %621 : vector<16x16xi1>, vector<16x16xf32>
    %cst_184 = arith.constant dense<0.000000e+00> : vector<16xf32>
    %623 = vector.multi_reduction <add>, %622, %cst_184 [1] : vector<16x16xf32> to vector<16xf32>
    %624 = vector.shape_cast %623 : vector<16xf32> to vector<16x1xf32>
    %625 = vector.broadcast %615 : f32 to vector<16x1xf32>
    %626 = arith.mulf %624, %625 : vector<16x1xf32>
    %c12_i32_185 = arith.constant 12 : i32
    %627 = vector.broadcast %c12_i32_185 : i32 to vector<16x16xi32>
    %628 = arith.cmpi eq, %47, %627 : vector<16x16xi32>
    %c12_i32_186 = arith.constant 12 : i32
    %629 = vector.broadcast %c12_i32_186 : i32 to vector<16x16xi32>
    %630 = arith.cmpi sge, %48, %629 : vector<16x16xi32>
    %631 = arith.andi %628, %630 : vector<16x16xi1>
    %cst_187 = arith.constant 0.000000e+00 : f32
    %632 = vector.broadcast %cst_187 : f32 to vector<16x16xf32>
    %633 = arith.select %631, %603, %632 : vector<16x16xi1>, vector<16x16xf32>
    %cst_188 = arith.constant dense<0.000000e+00> : vector<16xf32>
    %634 = vector.multi_reduction <add>, %633, %cst_188 [0] : vector<16x16xf32> to vector<16xf32>
    %635 = vector.shape_cast %634 : vector<16xf32> to vector<1x16xf32>
    %636 = vector.broadcast %615 : f32 to vector<1x16xf32>
    %637 = arith.mulf %635, %636 : vector<1x16xf32>
    %c12_i32_189 = arith.constant 12 : i32
    %638 = vector.broadcast %c12_i32_189 : i32 to vector<16x16xi32>
    %639 = arith.cmpi eq, %48, %638 : vector<16x16xi32>
    %cst_190 = arith.constant 0.000000e+00 : f32
    %640 = vector.shape_cast %626 : vector<16x1xf32> to vector<16x1xf32>
    %641 = vector.broadcast %640 : vector<16x1xf32> to vector<16x16xf32>
    %642 = vector.broadcast %cst_190 : f32 to vector<16x16xf32>
    %643 = arith.select %639, %641, %642 : vector<16x16xi1>, vector<16x16xf32>
    %644 = arith.addf %599, %643 : vector<16x16xf32>
    %645 = vector.broadcast %626 : vector<16x1xf32> to vector<16x16xf32>
    %646 = vector.broadcast %637 : vector<1x16xf32> to vector<16x16xf32>
    %647 = arith.mulf %645, %646 : vector<16x16xf32>
    %648 = arith.subf %603, %647 : vector<16x16xf32>
    %c13_i32 = arith.constant 13 : i32
    %649 = vector.broadcast %c13_i32 : i32 to vector<16x16xi32>
    %650 = arith.cmpi eq, %47, %649 : vector<16x16xi32>
    %c13_i32_191 = arith.constant 13 : i32
    %651 = vector.broadcast %c13_i32_191 : i32 to vector<16x16xi32>
    %652 = arith.cmpi eq, %48, %651 : vector<16x16xi32>
    %653 = arith.andi %650, %652 : vector<16x16xi1>
    %cst_192 = arith.constant 0.000000e+00 : f32
    %654 = vector.broadcast %cst_192 : f32 to vector<16x16xf32>
    %655 = arith.select %653, %648, %654 : vector<16x16xi1>, vector<16x16xf32>
    %656 = vector.shape_cast %655 : vector<16x16xf32> to vector<1x16x16xf32>
    %cst_193 = arith.constant dense<0.000000e+00> : vector<1xf32>
    %657 = vector.multi_reduction <add>, %656, %cst_193 [1, 2] : vector<1x16x16xf32> to vector<1xf32>
    %658 = vector.shape_cast %657 : vector<1xf32> to vector<1x1x1xf32>
    %659 = vector.extract %658[0, 0, 0] : f32 from vector<1x1x1xf32>
    %660 = math.rsqrt %659 : f32
    %c13_i32_194 = arith.constant 13 : i32
    %661 = vector.broadcast %c13_i32_194 : i32 to vector<16x16xi32>
    %662 = arith.cmpi eq, %48, %661 : vector<16x16xi32>
    %c13_i32_195 = arith.constant 13 : i32
    %663 = vector.broadcast %c13_i32_195 : i32 to vector<16x16xi32>
    %664 = arith.cmpi sge, %47, %663 : vector<16x16xi32>
    %665 = arith.andi %662, %664 : vector<16x16xi1>
    %cst_196 = arith.constant 0.000000e+00 : f32
    %666 = vector.broadcast %cst_196 : f32 to vector<16x16xf32>
    %667 = arith.select %665, %648, %666 : vector<16x16xi1>, vector<16x16xf32>
    %cst_197 = arith.constant dense<0.000000e+00> : vector<16xf32>
    %668 = vector.multi_reduction <add>, %667, %cst_197 [1] : vector<16x16xf32> to vector<16xf32>
    %669 = vector.shape_cast %668 : vector<16xf32> to vector<16x1xf32>
    %670 = vector.broadcast %660 : f32 to vector<16x1xf32>
    %671 = arith.mulf %669, %670 : vector<16x1xf32>
    %c13_i32_198 = arith.constant 13 : i32
    %672 = vector.broadcast %c13_i32_198 : i32 to vector<16x16xi32>
    %673 = arith.cmpi eq, %47, %672 : vector<16x16xi32>
    %c13_i32_199 = arith.constant 13 : i32
    %674 = vector.broadcast %c13_i32_199 : i32 to vector<16x16xi32>
    %675 = arith.cmpi sge, %48, %674 : vector<16x16xi32>
    %676 = arith.andi %673, %675 : vector<16x16xi1>
    %cst_200 = arith.constant 0.000000e+00 : f32
    %677 = vector.broadcast %cst_200 : f32 to vector<16x16xf32>
    %678 = arith.select %676, %648, %677 : vector<16x16xi1>, vector<16x16xf32>
    %cst_201 = arith.constant dense<0.000000e+00> : vector<16xf32>
    %679 = vector.multi_reduction <add>, %678, %cst_201 [0] : vector<16x16xf32> to vector<16xf32>
    %680 = vector.shape_cast %679 : vector<16xf32> to vector<1x16xf32>
    %681 = vector.broadcast %660 : f32 to vector<1x16xf32>
    %682 = arith.mulf %680, %681 : vector<1x16xf32>
    %c13_i32_202 = arith.constant 13 : i32
    %683 = vector.broadcast %c13_i32_202 : i32 to vector<16x16xi32>
    %684 = arith.cmpi eq, %48, %683 : vector<16x16xi32>
    %cst_203 = arith.constant 0.000000e+00 : f32
    %685 = vector.shape_cast %671 : vector<16x1xf32> to vector<16x1xf32>
    %686 = vector.broadcast %685 : vector<16x1xf32> to vector<16x16xf32>
    %687 = vector.broadcast %cst_203 : f32 to vector<16x16xf32>
    %688 = arith.select %684, %686, %687 : vector<16x16xi1>, vector<16x16xf32>
    %689 = arith.addf %644, %688 : vector<16x16xf32>
    %690 = vector.broadcast %671 : vector<16x1xf32> to vector<16x16xf32>
    %691 = vector.broadcast %682 : vector<1x16xf32> to vector<16x16xf32>
    %692 = arith.mulf %690, %691 : vector<16x16xf32>
    %693 = arith.subf %648, %692 : vector<16x16xf32>
    %c14_i32 = arith.constant 14 : i32
    %694 = vector.broadcast %c14_i32 : i32 to vector<16x16xi32>
    %695 = arith.cmpi eq, %47, %694 : vector<16x16xi32>
    %c14_i32_204 = arith.constant 14 : i32
    %696 = vector.broadcast %c14_i32_204 : i32 to vector<16x16xi32>
    %697 = arith.cmpi eq, %48, %696 : vector<16x16xi32>
    %698 = arith.andi %695, %697 : vector<16x16xi1>
    %cst_205 = arith.constant 0.000000e+00 : f32
    %699 = vector.broadcast %cst_205 : f32 to vector<16x16xf32>
    %700 = arith.select %698, %693, %699 : vector<16x16xi1>, vector<16x16xf32>
    %701 = vector.shape_cast %700 : vector<16x16xf32> to vector<1x16x16xf32>
    %cst_206 = arith.constant dense<0.000000e+00> : vector<1xf32>
    %702 = vector.multi_reduction <add>, %701, %cst_206 [1, 2] : vector<1x16x16xf32> to vector<1xf32>
    %703 = vector.shape_cast %702 : vector<1xf32> to vector<1x1x1xf32>
    %704 = vector.extract %703[0, 0, 0] : f32 from vector<1x1x1xf32>
    %705 = math.rsqrt %704 : f32
    %c14_i32_207 = arith.constant 14 : i32
    %706 = vector.broadcast %c14_i32_207 : i32 to vector<16x16xi32>
    %707 = arith.cmpi eq, %48, %706 : vector<16x16xi32>
    %c14_i32_208 = arith.constant 14 : i32
    %708 = vector.broadcast %c14_i32_208 : i32 to vector<16x16xi32>
    %709 = arith.cmpi sge, %47, %708 : vector<16x16xi32>
    %710 = arith.andi %707, %709 : vector<16x16xi1>
    %cst_209 = arith.constant 0.000000e+00 : f32
    %711 = vector.broadcast %cst_209 : f32 to vector<16x16xf32>
    %712 = arith.select %710, %693, %711 : vector<16x16xi1>, vector<16x16xf32>
    %cst_210 = arith.constant dense<0.000000e+00> : vector<16xf32>
    %713 = vector.multi_reduction <add>, %712, %cst_210 [1] : vector<16x16xf32> to vector<16xf32>
    %714 = vector.shape_cast %713 : vector<16xf32> to vector<16x1xf32>
    %715 = vector.broadcast %705 : f32 to vector<16x1xf32>
    %716 = arith.mulf %714, %715 : vector<16x1xf32>
    %c14_i32_211 = arith.constant 14 : i32
    %717 = vector.broadcast %c14_i32_211 : i32 to vector<16x16xi32>
    %718 = arith.cmpi eq, %47, %717 : vector<16x16xi32>
    %c14_i32_212 = arith.constant 14 : i32
    %719 = vector.broadcast %c14_i32_212 : i32 to vector<16x16xi32>
    %720 = arith.cmpi sge, %48, %719 : vector<16x16xi32>
    %721 = arith.andi %718, %720 : vector<16x16xi1>
    %cst_213 = arith.constant 0.000000e+00 : f32
    %722 = vector.broadcast %cst_213 : f32 to vector<16x16xf32>
    %723 = arith.select %721, %693, %722 : vector<16x16xi1>, vector<16x16xf32>
    %cst_214 = arith.constant dense<0.000000e+00> : vector<16xf32>
    %724 = vector.multi_reduction <add>, %723, %cst_214 [0] : vector<16x16xf32> to vector<16xf32>
    %725 = vector.shape_cast %724 : vector<16xf32> to vector<1x16xf32>
    %726 = vector.broadcast %705 : f32 to vector<1x16xf32>
    %727 = arith.mulf %725, %726 : vector<1x16xf32>
    %c14_i32_215 = arith.constant 14 : i32
    %728 = vector.broadcast %c14_i32_215 : i32 to vector<16x16xi32>
    %729 = arith.cmpi eq, %48, %728 : vector<16x16xi32>
    %cst_216 = arith.constant 0.000000e+00 : f32
    %730 = vector.shape_cast %716 : vector<16x1xf32> to vector<16x1xf32>
    %731 = vector.broadcast %730 : vector<16x1xf32> to vector<16x16xf32>
    %732 = vector.broadcast %cst_216 : f32 to vector<16x16xf32>
    %733 = arith.select %729, %731, %732 : vector<16x16xi1>, vector<16x16xf32>
    %734 = arith.addf %689, %733 : vector<16x16xf32>
    %735 = vector.broadcast %716 : vector<16x1xf32> to vector<16x16xf32>
    %736 = vector.broadcast %727 : vector<1x16xf32> to vector<16x16xf32>
    %737 = arith.mulf %735, %736 : vector<16x16xf32>
    %738 = arith.subf %693, %737 : vector<16x16xf32>
    %c15_i32 = arith.constant 15 : i32
    %739 = vector.broadcast %c15_i32 : i32 to vector<16x16xi32>
    %740 = arith.cmpi eq, %47, %739 : vector<16x16xi32>
    %c15_i32_217 = arith.constant 15 : i32
    %741 = vector.broadcast %c15_i32_217 : i32 to vector<16x16xi32>
    %742 = arith.cmpi eq, %48, %741 : vector<16x16xi32>
    %743 = arith.andi %740, %742 : vector<16x16xi1>
    %cst_218 = arith.constant 0.000000e+00 : f32
    %744 = vector.broadcast %cst_218 : f32 to vector<16x16xf32>
    %745 = arith.select %743, %738, %744 : vector<16x16xi1>, vector<16x16xf32>
    %746 = vector.shape_cast %745 : vector<16x16xf32> to vector<1x16x16xf32>
    %cst_219 = arith.constant dense<0.000000e+00> : vector<1xf32>
    %747 = vector.multi_reduction <add>, %746, %cst_219 [1, 2] : vector<1x16x16xf32> to vector<1xf32>
    %748 = vector.shape_cast %747 : vector<1xf32> to vector<1x1x1xf32>
    %749 = vector.extract %748[0, 0, 0] : f32 from vector<1x1x1xf32>
    %750 = math.rsqrt %749 : f32
    %c15_i32_220 = arith.constant 15 : i32
    %751 = vector.broadcast %c15_i32_220 : i32 to vector<16x16xi32>
    %752 = arith.cmpi eq, %48, %751 : vector<16x16xi32>
    %c15_i32_221 = arith.constant 15 : i32
    %753 = vector.broadcast %c15_i32_221 : i32 to vector<16x16xi32>
    %754 = arith.cmpi sge, %47, %753 : vector<16x16xi32>
    %755 = arith.andi %752, %754 : vector<16x16xi1>
    %cst_222 = arith.constant 0.000000e+00 : f32
    %756 = vector.broadcast %cst_222 : f32 to vector<16x16xf32>
    %757 = arith.select %755, %738, %756 : vector<16x16xi1>, vector<16x16xf32>
    %cst_223 = arith.constant dense<0.000000e+00> : vector<16xf32>
    %758 = vector.multi_reduction <add>, %757, %cst_223 [1] : vector<16x16xf32> to vector<16xf32>
    %759 = vector.shape_cast %758 : vector<16xf32> to vector<16x1xf32>
    %760 = vector.broadcast %750 : f32 to vector<16x1xf32>
    %761 = arith.mulf %759, %760 : vector<16x1xf32>
    %c15_i32_224 = arith.constant 15 : i32
    %762 = vector.broadcast %c15_i32_224 : i32 to vector<16x16xi32>
    %763 = arith.cmpi eq, %48, %762 : vector<16x16xi32>
    %cst_225 = arith.constant 0.000000e+00 : f32
    %764 = vector.shape_cast %761 : vector<16x1xf32> to vector<16x1xf32>
    %765 = vector.broadcast %764 : vector<16x1xf32> to vector<16x16xf32>
    %766 = vector.broadcast %cst_225 : f32 to vector<16x16xf32>
    %767 = arith.select %763, %765, %766 : vector<16x16xi1>, vector<16x16xf32>
    %768 = arith.addf %734, %767 : vector<16x16xf32>
    %cst_226 = arith.constant 0.000000e+00 : f32
    %769 = vector.broadcast %cst_226 : f32 to vector<16x16xf32>
    %770 = tpu.iota {dimensions = array<i32: 1>} : vector<1x16xi32>
    %c0_i32_227 = arith.constant 0 : i32
    %771 = vector.broadcast %c0_i32_227 : i32 to vector<16x16xi32>
    %772 = arith.cmpi eq, %47, %771 : vector<16x16xi32>
    %cst_228 = arith.constant 0.000000e+00 : f32
    %773 = vector.broadcast %cst_228 : f32 to vector<16x16xf32>
    %774 = arith.select %772, %768, %773 : vector<16x16xi1>, vector<16x16xf32>
    %cst_229 = arith.constant dense<0.000000e+00> : vector<16xf32>
    %775 = vector.multi_reduction <add>, %774, %cst_229 [0] : vector<16x16xf32> to vector<16xf32>
    %776 = vector.shape_cast %775 : vector<16xf32> to vector<1x16xf32>
    %c0_i32_230 = arith.constant 0 : i32
    %777 = vector.broadcast %c0_i32_230 : i32 to vector<16x16xi32>
    %778 = arith.cmpi eq, %47, %777 : vector<16x16xi32>
    %c0_i32_231 = arith.constant 0 : i32
    %779 = vector.broadcast %c0_i32_231 : i32 to vector<16x16xi32>
    %780 = arith.cmpi eq, %48, %779 : vector<16x16xi32>
    %781 = arith.andi %778, %780 : vector<16x16xi1>
    %cst_232 = arith.constant 0.000000e+00 : f32
    %782 = vector.broadcast %cst_232 : f32 to vector<16x16xf32>
    %783 = arith.select %781, %768, %782 : vector<16x16xi1>, vector<16x16xf32>
    %784 = vector.shape_cast %783 : vector<16x16xf32> to vector<1x16x16xf32>
    %cst_233 = arith.constant dense<0.000000e+00> : vector<1xf32>
    %785 = vector.multi_reduction <add>, %784, %cst_233 [1, 2] : vector<1x16x16xf32> to vector<1xf32>
    %786 = vector.shape_cast %785 : vector<1xf32> to vector<1x1x1xf32>
    %787 = vector.extract %786[0, 0, 0] : f32 from vector<1x1x1xf32>
    %c0_i32_234 = arith.constant 0 : i32
    %788 = vector.broadcast %c0_i32_234 : i32 to vector<1x16xi32>
    %789 = arith.cmpi slt, %770, %788 : vector<1x16xi32>
    %cst_235 = arith.constant 0.000000e+00 : f32
    %790 = vector.broadcast %cst_235 : f32 to vector<1x16xf32>
    %791 = arith.select %789, %776, %790 : vector<1x16xi1>, vector<1x16xf32>
    %cst_236 = arith.constant dense<0.000000e+00> : vector<1x16xf32>
    %792 = tpu.matmul %791, %769, %cst_236 {dimension_numbers = #tpu.dot_dimension_numbers<[1], [0], [0], [1], [0, 0, 1, 1], [], []>} : vector<1x16xf32>, vector<16x16xf32>, vector<1x16xf32> -> vector<1x16xf32>
    %c0_i32_237 = arith.constant 0 : i32
    %793 = vector.broadcast %c0_i32_237 : i32 to vector<1x16xi32>
    %794 = arith.cmpi eq, %770, %793 : vector<1x16xi32>
    %795 = arith.extui %794 : vector<1x16xi1> to vector<1x16xi32>
    %796 = arith.sitofp %795 : vector<1x16xi32> to vector<1x16xf32>
    %797 = arith.subf %796, %792 : vector<1x16xf32>
    %798 = vector.broadcast %787 : f32 to vector<1x16xf32>
    %799 = arith.divf %797, %798 : vector<1x16xf32>
    %c0_i32_238 = arith.constant 0 : i32
    %800 = vector.broadcast %c0_i32_238 : i32 to vector<16x16xi32>
    %801 = arith.cmpi eq, %47, %800 : vector<16x16xi32>
    %cst_239 = arith.constant 0.000000e+00 : f32
    %802 = vector.shape_cast %799 : vector<1x16xf32> to vector<1x16xf32>
    %803 = vector.broadcast %802 : vector<1x16xf32> to vector<16x16xf32>
    %804 = vector.broadcast %cst_239 : f32 to vector<16x16xf32>
    %805 = arith.select %801, %803, %804 : vector<16x16xi1>, vector<16x16xf32>
    %806 = arith.addf %769, %805 : vector<16x16xf32>
    %c1_i32_240 = arith.constant 1 : i32
    %807 = vector.broadcast %c1_i32_240 : i32 to vector<16x16xi32>
    %808 = arith.cmpi eq, %47, %807 : vector<16x16xi32>
    %cst_241 = arith.constant 0.000000e+00 : f32
    %809 = vector.broadcast %cst_241 : f32 to vector<16x16xf32>
    %810 = arith.select %808, %768, %809 : vector<16x16xi1>, vector<16x16xf32>
    %cst_242 = arith.constant dense<0.000000e+00> : vector<16xf32>
    %811 = vector.multi_reduction <add>, %810, %cst_242 [0] : vector<16x16xf32> to vector<16xf32>
    %812 = vector.shape_cast %811 : vector<16xf32> to vector<1x16xf32>
    %c1_i32_243 = arith.constant 1 : i32
    %813 = vector.broadcast %c1_i32_243 : i32 to vector<16x16xi32>
    %814 = arith.cmpi eq, %47, %813 : vector<16x16xi32>
    %c1_i32_244 = arith.constant 1 : i32
    %815 = vector.broadcast %c1_i32_244 : i32 to vector<16x16xi32>
    %816 = arith.cmpi eq, %48, %815 : vector<16x16xi32>
    %817 = arith.andi %814, %816 : vector<16x16xi1>
    %cst_245 = arith.constant 0.000000e+00 : f32
    %818 = vector.broadcast %cst_245 : f32 to vector<16x16xf32>
    %819 = arith.select %817, %768, %818 : vector<16x16xi1>, vector<16x16xf32>
    %820 = vector.shape_cast %819 : vector<16x16xf32> to vector<1x16x16xf32>
    %cst_246 = arith.constant dense<0.000000e+00> : vector<1xf32>
    %821 = vector.multi_reduction <add>, %820, %cst_246 [1, 2] : vector<1x16x16xf32> to vector<1xf32>
    %822 = vector.shape_cast %821 : vector<1xf32> to vector<1x1x1xf32>
    %823 = vector.extract %822[0, 0, 0] : f32 from vector<1x1x1xf32>
    %c1_i32_247 = arith.constant 1 : i32
    %824 = vector.broadcast %c1_i32_247 : i32 to vector<1x16xi32>
    %825 = arith.cmpi slt, %770, %824 : vector<1x16xi32>
    %cst_248 = arith.constant 0.000000e+00 : f32
    %826 = vector.broadcast %cst_248 : f32 to vector<1x16xf32>
    %827 = arith.select %825, %812, %826 : vector<1x16xi1>, vector<1x16xf32>
    %cst_249 = arith.constant dense<0.000000e+00> : vector<1x16xf32>
    %828 = tpu.matmul %827, %806, %cst_249 {dimension_numbers = #tpu.dot_dimension_numbers<[1], [0], [0], [1], [0, 0, 1, 1], [], []>} : vector<1x16xf32>, vector<16x16xf32>, vector<1x16xf32> -> vector<1x16xf32>
    %c1_i32_250 = arith.constant 1 : i32
    %829 = vector.broadcast %c1_i32_250 : i32 to vector<1x16xi32>
    %830 = arith.cmpi eq, %770, %829 : vector<1x16xi32>
    %831 = arith.extui %830 : vector<1x16xi1> to vector<1x16xi32>
    %832 = arith.sitofp %831 : vector<1x16xi32> to vector<1x16xf32>
    %833 = arith.subf %832, %828 : vector<1x16xf32>
    %834 = vector.broadcast %823 : f32 to vector<1x16xf32>
    %835 = arith.divf %833, %834 : vector<1x16xf32>
    %c1_i32_251 = arith.constant 1 : i32
    %836 = vector.broadcast %c1_i32_251 : i32 to vector<16x16xi32>
    %837 = arith.cmpi eq, %47, %836 : vector<16x16xi32>
    %cst_252 = arith.constant 0.000000e+00 : f32
    %838 = vector.shape_cast %835 : vector<1x16xf32> to vector<1x16xf32>
    %839 = vector.broadcast %838 : vector<1x16xf32> to vector<16x16xf32>
    %840 = vector.broadcast %cst_252 : f32 to vector<16x16xf32>
    %841 = arith.select %837, %839, %840 : vector<16x16xi1>, vector<16x16xf32>
    %842 = arith.addf %806, %841 : vector<16x16xf32>
    %c2_i32_253 = arith.constant 2 : i32
    %843 = vector.broadcast %c2_i32_253 : i32 to vector<16x16xi32>
    %844 = arith.cmpi eq, %47, %843 : vector<16x16xi32>
    %cst_254 = arith.constant 0.000000e+00 : f32
    %845 = vector.broadcast %cst_254 : f32 to vector<16x16xf32>
    %846 = arith.select %844, %768, %845 : vector<16x16xi1>, vector<16x16xf32>
    %cst_255 = arith.constant dense<0.000000e+00> : vector<16xf32>
    %847 = vector.multi_reduction <add>, %846, %cst_255 [0] : vector<16x16xf32> to vector<16xf32>
    %848 = vector.shape_cast %847 : vector<16xf32> to vector<1x16xf32>
    %c2_i32_256 = arith.constant 2 : i32
    %849 = vector.broadcast %c2_i32_256 : i32 to vector<16x16xi32>
    %850 = arith.cmpi eq, %47, %849 : vector<16x16xi32>
    %c2_i32_257 = arith.constant 2 : i32
    %851 = vector.broadcast %c2_i32_257 : i32 to vector<16x16xi32>
    %852 = arith.cmpi eq, %48, %851 : vector<16x16xi32>
    %853 = arith.andi %850, %852 : vector<16x16xi1>
    %cst_258 = arith.constant 0.000000e+00 : f32
    %854 = vector.broadcast %cst_258 : f32 to vector<16x16xf32>
    %855 = arith.select %853, %768, %854 : vector<16x16xi1>, vector<16x16xf32>
    %856 = vector.shape_cast %855 : vector<16x16xf32> to vector<1x16x16xf32>
    %cst_259 = arith.constant dense<0.000000e+00> : vector<1xf32>
    %857 = vector.multi_reduction <add>, %856, %cst_259 [1, 2] : vector<1x16x16xf32> to vector<1xf32>
    %858 = vector.shape_cast %857 : vector<1xf32> to vector<1x1x1xf32>
    %859 = vector.extract %858[0, 0, 0] : f32 from vector<1x1x1xf32>
    %c2_i32_260 = arith.constant 2 : i32
    %860 = vector.broadcast %c2_i32_260 : i32 to vector<1x16xi32>
    %861 = arith.cmpi slt, %770, %860 : vector<1x16xi32>
    %cst_261 = arith.constant 0.000000e+00 : f32
    %862 = vector.broadcast %cst_261 : f32 to vector<1x16xf32>
    %863 = arith.select %861, %848, %862 : vector<1x16xi1>, vector<1x16xf32>
    %cst_262 = arith.constant dense<0.000000e+00> : vector<1x16xf32>
    %864 = tpu.matmul %863, %842, %cst_262 {dimension_numbers = #tpu.dot_dimension_numbers<[1], [0], [0], [1], [0, 0, 1, 1], [], []>} : vector<1x16xf32>, vector<16x16xf32>, vector<1x16xf32> -> vector<1x16xf32>
    %c2_i32_263 = arith.constant 2 : i32
    %865 = vector.broadcast %c2_i32_263 : i32 to vector<1x16xi32>
    %866 = arith.cmpi eq, %770, %865 : vector<1x16xi32>
    %867 = arith.extui %866 : vector<1x16xi1> to vector<1x16xi32>
    %868 = arith.sitofp %867 : vector<1x16xi32> to vector<1x16xf32>
    %869 = arith.subf %868, %864 : vector<1x16xf32>
    %870 = vector.broadcast %859 : f32 to vector<1x16xf32>
    %871 = arith.divf %869, %870 : vector<1x16xf32>
    %c2_i32_264 = arith.constant 2 : i32
    %872 = vector.broadcast %c2_i32_264 : i32 to vector<16x16xi32>
    %873 = arith.cmpi eq, %47, %872 : vector<16x16xi32>
    %cst_265 = arith.constant 0.000000e+00 : f32
    %874 = vector.shape_cast %871 : vector<1x16xf32> to vector<1x16xf32>
    %875 = vector.broadcast %874 : vector<1x16xf32> to vector<16x16xf32>
    %876 = vector.broadcast %cst_265 : f32 to vector<16x16xf32>
    %877 = arith.select %873, %875, %876 : vector<16x16xi1>, vector<16x16xf32>
    %878 = arith.addf %842, %877 : vector<16x16xf32>
    %c3_i32_266 = arith.constant 3 : i32
    %879 = vector.broadcast %c3_i32_266 : i32 to vector<16x16xi32>
    %880 = arith.cmpi eq, %47, %879 : vector<16x16xi32>
    %cst_267 = arith.constant 0.000000e+00 : f32
    %881 = vector.broadcast %cst_267 : f32 to vector<16x16xf32>
    %882 = arith.select %880, %768, %881 : vector<16x16xi1>, vector<16x16xf32>
    %cst_268 = arith.constant dense<0.000000e+00> : vector<16xf32>
    %883 = vector.multi_reduction <add>, %882, %cst_268 [0] : vector<16x16xf32> to vector<16xf32>
    %884 = vector.shape_cast %883 : vector<16xf32> to vector<1x16xf32>
    %c3_i32_269 = arith.constant 3 : i32
    %885 = vector.broadcast %c3_i32_269 : i32 to vector<16x16xi32>
    %886 = arith.cmpi eq, %47, %885 : vector<16x16xi32>
    %c3_i32_270 = arith.constant 3 : i32
    %887 = vector.broadcast %c3_i32_270 : i32 to vector<16x16xi32>
    %888 = arith.cmpi eq, %48, %887 : vector<16x16xi32>
    %889 = arith.andi %886, %888 : vector<16x16xi1>
    %cst_271 = arith.constant 0.000000e+00 : f32
    %890 = vector.broadcast %cst_271 : f32 to vector<16x16xf32>
    %891 = arith.select %889, %768, %890 : vector<16x16xi1>, vector<16x16xf32>
    %892 = vector.shape_cast %891 : vector<16x16xf32> to vector<1x16x16xf32>
    %cst_272 = arith.constant dense<0.000000e+00> : vector<1xf32>
    %893 = vector.multi_reduction <add>, %892, %cst_272 [1, 2] : vector<1x16x16xf32> to vector<1xf32>
    %894 = vector.shape_cast %893 : vector<1xf32> to vector<1x1x1xf32>
    %895 = vector.extract %894[0, 0, 0] : f32 from vector<1x1x1xf32>
    %c3_i32_273 = arith.constant 3 : i32
    %896 = vector.broadcast %c3_i32_273 : i32 to vector<1x16xi32>
    %897 = arith.cmpi slt, %770, %896 : vector<1x16xi32>
    %cst_274 = arith.constant 0.000000e+00 : f32
    %898 = vector.broadcast %cst_274 : f32 to vector<1x16xf32>
    %899 = arith.select %897, %884, %898 : vector<1x16xi1>, vector<1x16xf32>
    %cst_275 = arith.constant dense<0.000000e+00> : vector<1x16xf32>
    %900 = tpu.matmul %899, %878, %cst_275 {dimension_numbers = #tpu.dot_dimension_numbers<[1], [0], [0], [1], [0, 0, 1, 1], [], []>} : vector<1x16xf32>, vector<16x16xf32>, vector<1x16xf32> -> vector<1x16xf32>
    %c3_i32_276 = arith.constant 3 : i32
    %901 = vector.broadcast %c3_i32_276 : i32 to vector<1x16xi32>
    %902 = arith.cmpi eq, %770, %901 : vector<1x16xi32>
    %903 = arith.extui %902 : vector<1x16xi1> to vector<1x16xi32>
    %904 = arith.sitofp %903 : vector<1x16xi32> to vector<1x16xf32>
    %905 = arith.subf %904, %900 : vector<1x16xf32>
    %906 = vector.broadcast %895 : f32 to vector<1x16xf32>
    %907 = arith.divf %905, %906 : vector<1x16xf32>
    %c3_i32_277 = arith.constant 3 : i32
    %908 = vector.broadcast %c3_i32_277 : i32 to vector<16x16xi32>
    %909 = arith.cmpi eq, %47, %908 : vector<16x16xi32>
    %cst_278 = arith.constant 0.000000e+00 : f32
    %910 = vector.shape_cast %907 : vector<1x16xf32> to vector<1x16xf32>
    %911 = vector.broadcast %910 : vector<1x16xf32> to vector<16x16xf32>
    %912 = vector.broadcast %cst_278 : f32 to vector<16x16xf32>
    %913 = arith.select %909, %911, %912 : vector<16x16xi1>, vector<16x16xf32>
    %914 = arith.addf %878, %913 : vector<16x16xf32>
    %c4_i32_279 = arith.constant 4 : i32
    %915 = vector.broadcast %c4_i32_279 : i32 to vector<16x16xi32>
    %916 = arith.cmpi eq, %47, %915 : vector<16x16xi32>
    %cst_280 = arith.constant 0.000000e+00 : f32
    %917 = vector.broadcast %cst_280 : f32 to vector<16x16xf32>
    %918 = arith.select %916, %768, %917 : vector<16x16xi1>, vector<16x16xf32>
    %cst_281 = arith.constant dense<0.000000e+00> : vector<16xf32>
    %919 = vector.multi_reduction <add>, %918, %cst_281 [0] : vector<16x16xf32> to vector<16xf32>
    %920 = vector.shape_cast %919 : vector<16xf32> to vector<1x16xf32>
    %c4_i32_282 = arith.constant 4 : i32
    %921 = vector.broadcast %c4_i32_282 : i32 to vector<16x16xi32>
    %922 = arith.cmpi eq, %47, %921 : vector<16x16xi32>
    %c4_i32_283 = arith.constant 4 : i32
    %923 = vector.broadcast %c4_i32_283 : i32 to vector<16x16xi32>
    %924 = arith.cmpi eq, %48, %923 : vector<16x16xi32>
    %925 = arith.andi %922, %924 : vector<16x16xi1>
    %cst_284 = arith.constant 0.000000e+00 : f32
    %926 = vector.broadcast %cst_284 : f32 to vector<16x16xf32>
    %927 = arith.select %925, %768, %926 : vector<16x16xi1>, vector<16x16xf32>
    %928 = vector.shape_cast %927 : vector<16x16xf32> to vector<1x16x16xf32>
    %cst_285 = arith.constant dense<0.000000e+00> : vector<1xf32>
    %929 = vector.multi_reduction <add>, %928, %cst_285 [1, 2] : vector<1x16x16xf32> to vector<1xf32>
    %930 = vector.shape_cast %929 : vector<1xf32> to vector<1x1x1xf32>
    %931 = vector.extract %930[0, 0, 0] : f32 from vector<1x1x1xf32>
    %c4_i32_286 = arith.constant 4 : i32
    %932 = vector.broadcast %c4_i32_286 : i32 to vector<1x16xi32>
    %933 = arith.cmpi slt, %770, %932 : vector<1x16xi32>
    %cst_287 = arith.constant 0.000000e+00 : f32
    %934 = vector.broadcast %cst_287 : f32 to vector<1x16xf32>
    %935 = arith.select %933, %920, %934 : vector<1x16xi1>, vector<1x16xf32>
    %cst_288 = arith.constant dense<0.000000e+00> : vector<1x16xf32>
    %936 = tpu.matmul %935, %914, %cst_288 {dimension_numbers = #tpu.dot_dimension_numbers<[1], [0], [0], [1], [0, 0, 1, 1], [], []>} : vector<1x16xf32>, vector<16x16xf32>, vector<1x16xf32> -> vector<1x16xf32>
    %c4_i32_289 = arith.constant 4 : i32
    %937 = vector.broadcast %c4_i32_289 : i32 to vector<1x16xi32>
    %938 = arith.cmpi eq, %770, %937 : vector<1x16xi32>
    %939 = arith.extui %938 : vector<1x16xi1> to vector<1x16xi32>
    %940 = arith.sitofp %939 : vector<1x16xi32> to vector<1x16xf32>
    %941 = arith.subf %940, %936 : vector<1x16xf32>
    %942 = vector.broadcast %931 : f32 to vector<1x16xf32>
    %943 = arith.divf %941, %942 : vector<1x16xf32>
    %c4_i32_290 = arith.constant 4 : i32
    %944 = vector.broadcast %c4_i32_290 : i32 to vector<16x16xi32>
    %945 = arith.cmpi eq, %47, %944 : vector<16x16xi32>
    %cst_291 = arith.constant 0.000000e+00 : f32
    %946 = vector.shape_cast %943 : vector<1x16xf32> to vector<1x16xf32>
    %947 = vector.broadcast %946 : vector<1x16xf32> to vector<16x16xf32>
    %948 = vector.broadcast %cst_291 : f32 to vector<16x16xf32>
    %949 = arith.select %945, %947, %948 : vector<16x16xi1>, vector<16x16xf32>
    %950 = arith.addf %914, %949 : vector<16x16xf32>
    %c5_i32_292 = arith.constant 5 : i32
    %951 = vector.broadcast %c5_i32_292 : i32 to vector<16x16xi32>
    %952 = arith.cmpi eq, %47, %951 : vector<16x16xi32>
    %cst_293 = arith.constant 0.000000e+00 : f32
    %953 = vector.broadcast %cst_293 : f32 to vector<16x16xf32>
    %954 = arith.select %952, %768, %953 : vector<16x16xi1>, vector<16x16xf32>
    %cst_294 = arith.constant dense<0.000000e+00> : vector<16xf32>
    %955 = vector.multi_reduction <add>, %954, %cst_294 [0] : vector<16x16xf32> to vector<16xf32>
    %956 = vector.shape_cast %955 : vector<16xf32> to vector<1x16xf32>
    %c5_i32_295 = arith.constant 5 : i32
    %957 = vector.broadcast %c5_i32_295 : i32 to vector<16x16xi32>
    %958 = arith.cmpi eq, %47, %957 : vector<16x16xi32>
    %c5_i32_296 = arith.constant 5 : i32
    %959 = vector.broadcast %c5_i32_296 : i32 to vector<16x16xi32>
    %960 = arith.cmpi eq, %48, %959 : vector<16x16xi32>
    %961 = arith.andi %958, %960 : vector<16x16xi1>
    %cst_297 = arith.constant 0.000000e+00 : f32
    %962 = vector.broadcast %cst_297 : f32 to vector<16x16xf32>
    %963 = arith.select %961, %768, %962 : vector<16x16xi1>, vector<16x16xf32>
    %964 = vector.shape_cast %963 : vector<16x16xf32> to vector<1x16x16xf32>
    %cst_298 = arith.constant dense<0.000000e+00> : vector<1xf32>
    %965 = vector.multi_reduction <add>, %964, %cst_298 [1, 2] : vector<1x16x16xf32> to vector<1xf32>
    %966 = vector.shape_cast %965 : vector<1xf32> to vector<1x1x1xf32>
    %967 = vector.extract %966[0, 0, 0] : f32 from vector<1x1x1xf32>
    %c5_i32_299 = arith.constant 5 : i32
    %968 = vector.broadcast %c5_i32_299 : i32 to vector<1x16xi32>
    %969 = arith.cmpi slt, %770, %968 : vector<1x16xi32>
    %cst_300 = arith.constant 0.000000e+00 : f32
    %970 = vector.broadcast %cst_300 : f32 to vector<1x16xf32>
    %971 = arith.select %969, %956, %970 : vector<1x16xi1>, vector<1x16xf32>
    %cst_301 = arith.constant dense<0.000000e+00> : vector<1x16xf32>
    %972 = tpu.matmul %971, %950, %cst_301 {dimension_numbers = #tpu.dot_dimension_numbers<[1], [0], [0], [1], [0, 0, 1, 1], [], []>} : vector<1x16xf32>, vector<16x16xf32>, vector<1x16xf32> -> vector<1x16xf32>
    %c5_i32_302 = arith.constant 5 : i32
    %973 = vector.broadcast %c5_i32_302 : i32 to vector<1x16xi32>
    %974 = arith.cmpi eq, %770, %973 : vector<1x16xi32>
    %975 = arith.extui %974 : vector<1x16xi1> to vector<1x16xi32>
    %976 = arith.sitofp %975 : vector<1x16xi32> to vector<1x16xf32>
    %977 = arith.subf %976, %972 : vector<1x16xf32>
    %978 = vector.broadcast %967 : f32 to vector<1x16xf32>
    %979 = arith.divf %977, %978 : vector<1x16xf32>
    %c5_i32_303 = arith.constant 5 : i32
    %980 = vector.broadcast %c5_i32_303 : i32 to vector<16x16xi32>
    %981 = arith.cmpi eq, %47, %980 : vector<16x16xi32>
    %cst_304 = arith.constant 0.000000e+00 : f32
    %982 = vector.shape_cast %979 : vector<1x16xf32> to vector<1x16xf32>
    %983 = vector.broadcast %982 : vector<1x16xf32> to vector<16x16xf32>
    %984 = vector.broadcast %cst_304 : f32 to vector<16x16xf32>
    %985 = arith.select %981, %983, %984 : vector<16x16xi1>, vector<16x16xf32>
    %986 = arith.addf %950, %985 : vector<16x16xf32>
    %c6_i32_305 = arith.constant 6 : i32
    %987 = vector.broadcast %c6_i32_305 : i32 to vector<16x16xi32>
    %988 = arith.cmpi eq, %47, %987 : vector<16x16xi32>
    %cst_306 = arith.constant 0.000000e+00 : f32
    %989 = vector.broadcast %cst_306 : f32 to vector<16x16xf32>
    %990 = arith.select %988, %768, %989 : vector<16x16xi1>, vector<16x16xf32>
    %cst_307 = arith.constant dense<0.000000e+00> : vector<16xf32>
    %991 = vector.multi_reduction <add>, %990, %cst_307 [0] : vector<16x16xf32> to vector<16xf32>
    %992 = vector.shape_cast %991 : vector<16xf32> to vector<1x16xf32>
    %c6_i32_308 = arith.constant 6 : i32
    %993 = vector.broadcast %c6_i32_308 : i32 to vector<16x16xi32>
    %994 = arith.cmpi eq, %47, %993 : vector<16x16xi32>
    %c6_i32_309 = arith.constant 6 : i32
    %995 = vector.broadcast %c6_i32_309 : i32 to vector<16x16xi32>
    %996 = arith.cmpi eq, %48, %995 : vector<16x16xi32>
    %997 = arith.andi %994, %996 : vector<16x16xi1>
    %cst_310 = arith.constant 0.000000e+00 : f32
    %998 = vector.broadcast %cst_310 : f32 to vector<16x16xf32>
    %999 = arith.select %997, %768, %998 : vector<16x16xi1>, vector<16x16xf32>
    %1000 = vector.shape_cast %999 : vector<16x16xf32> to vector<1x16x16xf32>
    %cst_311 = arith.constant dense<0.000000e+00> : vector<1xf32>
    %1001 = vector.multi_reduction <add>, %1000, %cst_311 [1, 2] : vector<1x16x16xf32> to vector<1xf32>
    %1002 = vector.shape_cast %1001 : vector<1xf32> to vector<1x1x1xf32>
    %1003 = vector.extract %1002[0, 0, 0] : f32 from vector<1x1x1xf32>
    %c6_i32_312 = arith.constant 6 : i32
    %1004 = vector.broadcast %c6_i32_312 : i32 to vector<1x16xi32>
    %1005 = arith.cmpi slt, %770, %1004 : vector<1x16xi32>
    %cst_313 = arith.constant 0.000000e+00 : f32
    %1006 = vector.broadcast %cst_313 : f32 to vector<1x16xf32>
    %1007 = arith.select %1005, %992, %1006 : vector<1x16xi1>, vector<1x16xf32>
    %cst_314 = arith.constant dense<0.000000e+00> : vector<1x16xf32>
    %1008 = tpu.matmul %1007, %986, %cst_314 {dimension_numbers = #tpu.dot_dimension_numbers<[1], [0], [0], [1], [0, 0, 1, 1], [], []>} : vector<1x16xf32>, vector<16x16xf32>, vector<1x16xf32> -> vector<1x16xf32>
    %c6_i32_315 = arith.constant 6 : i32
    %1009 = vector.broadcast %c6_i32_315 : i32 to vector<1x16xi32>
    %1010 = arith.cmpi eq, %770, %1009 : vector<1x16xi32>
    %1011 = arith.extui %1010 : vector<1x16xi1> to vector<1x16xi32>
    %1012 = arith.sitofp %1011 : vector<1x16xi32> to vector<1x16xf32>
    %1013 = arith.subf %1012, %1008 : vector<1x16xf32>
    %1014 = vector.broadcast %1003 : f32 to vector<1x16xf32>
    %1015 = arith.divf %1013, %1014 : vector<1x16xf32>
    %c6_i32_316 = arith.constant 6 : i32
    %1016 = vector.broadcast %c6_i32_316 : i32 to vector<16x16xi32>
    %1017 = arith.cmpi eq, %47, %1016 : vector<16x16xi32>
    %cst_317 = arith.constant 0.000000e+00 : f32
    %1018 = vector.shape_cast %1015 : vector<1x16xf32> to vector<1x16xf32>
    %1019 = vector.broadcast %1018 : vector<1x16xf32> to vector<16x16xf32>
    %1020 = vector.broadcast %cst_317 : f32 to vector<16x16xf32>
    %1021 = arith.select %1017, %1019, %1020 : vector<16x16xi1>, vector<16x16xf32>
    %1022 = arith.addf %986, %1021 : vector<16x16xf32>
    %c7_i32_318 = arith.constant 7 : i32
    %1023 = vector.broadcast %c7_i32_318 : i32 to vector<16x16xi32>
    %1024 = arith.cmpi eq, %47, %1023 : vector<16x16xi32>
    %cst_319 = arith.constant 0.000000e+00 : f32
    %1025 = vector.broadcast %cst_319 : f32 to vector<16x16xf32>
    %1026 = arith.select %1024, %768, %1025 : vector<16x16xi1>, vector<16x16xf32>
    %cst_320 = arith.constant dense<0.000000e+00> : vector<16xf32>
    %1027 = vector.multi_reduction <add>, %1026, %cst_320 [0] : vector<16x16xf32> to vector<16xf32>
    %1028 = vector.shape_cast %1027 : vector<16xf32> to vector<1x16xf32>
    %c7_i32_321 = arith.constant 7 : i32
    %1029 = vector.broadcast %c7_i32_321 : i32 to vector<16x16xi32>
    %1030 = arith.cmpi eq, %47, %1029 : vector<16x16xi32>
    %c7_i32_322 = arith.constant 7 : i32
    %1031 = vector.broadcast %c7_i32_322 : i32 to vector<16x16xi32>
    %1032 = arith.cmpi eq, %48, %1031 : vector<16x16xi32>
    %1033 = arith.andi %1030, %1032 : vector<16x16xi1>
    %cst_323 = arith.constant 0.000000e+00 : f32
    %1034 = vector.broadcast %cst_323 : f32 to vector<16x16xf32>
    %1035 = arith.select %1033, %768, %1034 : vector<16x16xi1>, vector<16x16xf32>
    %1036 = vector.shape_cast %1035 : vector<16x16xf32> to vector<1x16x16xf32>
    %cst_324 = arith.constant dense<0.000000e+00> : vector<1xf32>
    %1037 = vector.multi_reduction <add>, %1036, %cst_324 [1, 2] : vector<1x16x16xf32> to vector<1xf32>
    %1038 = vector.shape_cast %1037 : vector<1xf32> to vector<1x1x1xf32>
    %1039 = vector.extract %1038[0, 0, 0] : f32 from vector<1x1x1xf32>
    %c7_i32_325 = arith.constant 7 : i32
    %1040 = vector.broadcast %c7_i32_325 : i32 to vector<1x16xi32>
    %1041 = arith.cmpi slt, %770, %1040 : vector<1x16xi32>
    %cst_326 = arith.constant 0.000000e+00 : f32
    %1042 = vector.broadcast %cst_326 : f32 to vector<1x16xf32>
    %1043 = arith.select %1041, %1028, %1042 : vector<1x16xi1>, vector<1x16xf32>
    %cst_327 = arith.constant dense<0.000000e+00> : vector<1x16xf32>
    %1044 = tpu.matmul %1043, %1022, %cst_327 {dimension_numbers = #tpu.dot_dimension_numbers<[1], [0], [0], [1], [0, 0, 1, 1], [], []>} : vector<1x16xf32>, vector<16x16xf32>, vector<1x16xf32> -> vector<1x16xf32>
    %c7_i32_328 = arith.constant 7 : i32
    %1045 = vector.broadcast %c7_i32_328 : i32 to vector<1x16xi32>
    %1046 = arith.cmpi eq, %770, %1045 : vector<1x16xi32>
    %1047 = arith.extui %1046 : vector<1x16xi1> to vector<1x16xi32>
    %1048 = arith.sitofp %1047 : vector<1x16xi32> to vector<1x16xf32>
    %1049 = arith.subf %1048, %1044 : vector<1x16xf32>
    %1050 = vector.broadcast %1039 : f32 to vector<1x16xf32>
    %1051 = arith.divf %1049, %1050 : vector<1x16xf32>
    %c7_i32_329 = arith.constant 7 : i32
    %1052 = vector.broadcast %c7_i32_329 : i32 to vector<16x16xi32>
    %1053 = arith.cmpi eq, %47, %1052 : vector<16x16xi32>
    %cst_330 = arith.constant 0.000000e+00 : f32
    %1054 = vector.shape_cast %1051 : vector<1x16xf32> to vector<1x16xf32>
    %1055 = vector.broadcast %1054 : vector<1x16xf32> to vector<16x16xf32>
    %1056 = vector.broadcast %cst_330 : f32 to vector<16x16xf32>
    %1057 = arith.select %1053, %1055, %1056 : vector<16x16xi1>, vector<16x16xf32>
    %1058 = arith.addf %1022, %1057 : vector<16x16xf32>
    %c8_i32_331 = arith.constant 8 : i32
    %1059 = vector.broadcast %c8_i32_331 : i32 to vector<16x16xi32>
    %1060 = arith.cmpi eq, %47, %1059 : vector<16x16xi32>
    %cst_332 = arith.constant 0.000000e+00 : f32
    %1061 = vector.broadcast %cst_332 : f32 to vector<16x16xf32>
    %1062 = arith.select %1060, %768, %1061 : vector<16x16xi1>, vector<16x16xf32>
    %cst_333 = arith.constant dense<0.000000e+00> : vector<16xf32>
    %1063 = vector.multi_reduction <add>, %1062, %cst_333 [0] : vector<16x16xf32> to vector<16xf32>
    %1064 = vector.shape_cast %1063 : vector<16xf32> to vector<1x16xf32>
    %c8_i32_334 = arith.constant 8 : i32
    %1065 = vector.broadcast %c8_i32_334 : i32 to vector<16x16xi32>
    %1066 = arith.cmpi eq, %47, %1065 : vector<16x16xi32>
    %c8_i32_335 = arith.constant 8 : i32
    %1067 = vector.broadcast %c8_i32_335 : i32 to vector<16x16xi32>
    %1068 = arith.cmpi eq, %48, %1067 : vector<16x16xi32>
    %1069 = arith.andi %1066, %1068 : vector<16x16xi1>
    %cst_336 = arith.constant 0.000000e+00 : f32
    %1070 = vector.broadcast %cst_336 : f32 to vector<16x16xf32>
    %1071 = arith.select %1069, %768, %1070 : vector<16x16xi1>, vector<16x16xf32>
    %1072 = vector.shape_cast %1071 : vector<16x16xf32> to vector<1x16x16xf32>
    %cst_337 = arith.constant dense<0.000000e+00> : vector<1xf32>
    %1073 = vector.multi_reduction <add>, %1072, %cst_337 [1, 2] : vector<1x16x16xf32> to vector<1xf32>
    %1074 = vector.shape_cast %1073 : vector<1xf32> to vector<1x1x1xf32>
    %1075 = vector.extract %1074[0, 0, 0] : f32 from vector<1x1x1xf32>
    %c8_i32_338 = arith.constant 8 : i32
    %1076 = vector.broadcast %c8_i32_338 : i32 to vector<1x16xi32>
    %1077 = arith.cmpi slt, %770, %1076 : vector<1x16xi32>
    %cst_339 = arith.constant 0.000000e+00 : f32
    %1078 = vector.broadcast %cst_339 : f32 to vector<1x16xf32>
    %1079 = arith.select %1077, %1064, %1078 : vector<1x16xi1>, vector<1x16xf32>
    %cst_340 = arith.constant dense<0.000000e+00> : vector<1x16xf32>
    %1080 = tpu.matmul %1079, %1058, %cst_340 {dimension_numbers = #tpu.dot_dimension_numbers<[1], [0], [0], [1], [0, 0, 1, 1], [], []>} : vector<1x16xf32>, vector<16x16xf32>, vector<1x16xf32> -> vector<1x16xf32>
    %c8_i32_341 = arith.constant 8 : i32
    %1081 = vector.broadcast %c8_i32_341 : i32 to vector<1x16xi32>
    %1082 = arith.cmpi eq, %770, %1081 : vector<1x16xi32>
    %1083 = arith.extui %1082 : vector<1x16xi1> to vector<1x16xi32>
    %1084 = arith.sitofp %1083 : vector<1x16xi32> to vector<1x16xf32>
    %1085 = arith.subf %1084, %1080 : vector<1x16xf32>
    %1086 = vector.broadcast %1075 : f32 to vector<1x16xf32>
    %1087 = arith.divf %1085, %1086 : vector<1x16xf32>
    %c8_i32_342 = arith.constant 8 : i32
    %1088 = vector.broadcast %c8_i32_342 : i32 to vector<16x16xi32>
    %1089 = arith.cmpi eq, %47, %1088 : vector<16x16xi32>
    %cst_343 = arith.constant 0.000000e+00 : f32
    %1090 = vector.shape_cast %1087 : vector<1x16xf32> to vector<1x16xf32>
    %1091 = vector.broadcast %1090 : vector<1x16xf32> to vector<16x16xf32>
    %1092 = vector.broadcast %cst_343 : f32 to vector<16x16xf32>
    %1093 = arith.select %1089, %1091, %1092 : vector<16x16xi1>, vector<16x16xf32>
    %1094 = arith.addf %1058, %1093 : vector<16x16xf32>
    %c9_i32_344 = arith.constant 9 : i32
    %1095 = vector.broadcast %c9_i32_344 : i32 to vector<16x16xi32>
    %1096 = arith.cmpi eq, %47, %1095 : vector<16x16xi32>
    %cst_345 = arith.constant 0.000000e+00 : f32
    %1097 = vector.broadcast %cst_345 : f32 to vector<16x16xf32>
    %1098 = arith.select %1096, %768, %1097 : vector<16x16xi1>, vector<16x16xf32>
    %cst_346 = arith.constant dense<0.000000e+00> : vector<16xf32>
    %1099 = vector.multi_reduction <add>, %1098, %cst_346 [0] : vector<16x16xf32> to vector<16xf32>
    %1100 = vector.shape_cast %1099 : vector<16xf32> to vector<1x16xf32>
    %c9_i32_347 = arith.constant 9 : i32
    %1101 = vector.broadcast %c9_i32_347 : i32 to vector<16x16xi32>
    %1102 = arith.cmpi eq, %47, %1101 : vector<16x16xi32>
    %c9_i32_348 = arith.constant 9 : i32
    %1103 = vector.broadcast %c9_i32_348 : i32 to vector<16x16xi32>
    %1104 = arith.cmpi eq, %48, %1103 : vector<16x16xi32>
    %1105 = arith.andi %1102, %1104 : vector<16x16xi1>
    %cst_349 = arith.constant 0.000000e+00 : f32
    %1106 = vector.broadcast %cst_349 : f32 to vector<16x16xf32>
    %1107 = arith.select %1105, %768, %1106 : vector<16x16xi1>, vector<16x16xf32>
    %1108 = vector.shape_cast %1107 : vector<16x16xf32> to vector<1x16x16xf32>
    %cst_350 = arith.constant dense<0.000000e+00> : vector<1xf32>
    %1109 = vector.multi_reduction <add>, %1108, %cst_350 [1, 2] : vector<1x16x16xf32> to vector<1xf32>
    %1110 = vector.shape_cast %1109 : vector<1xf32> to vector<1x1x1xf32>
    %1111 = vector.extract %1110[0, 0, 0] : f32 from vector<1x1x1xf32>
    %c9_i32_351 = arith.constant 9 : i32
    %1112 = vector.broadcast %c9_i32_351 : i32 to vector<1x16xi32>
    %1113 = arith.cmpi slt, %770, %1112 : vector<1x16xi32>
    %cst_352 = arith.constant 0.000000e+00 : f32
    %1114 = vector.broadcast %cst_352 : f32 to vector<1x16xf32>
    %1115 = arith.select %1113, %1100, %1114 : vector<1x16xi1>, vector<1x16xf32>
    %cst_353 = arith.constant dense<0.000000e+00> : vector<1x16xf32>
    %1116 = tpu.matmul %1115, %1094, %cst_353 {dimension_numbers = #tpu.dot_dimension_numbers<[1], [0], [0], [1], [0, 0, 1, 1], [], []>} : vector<1x16xf32>, vector<16x16xf32>, vector<1x16xf32> -> vector<1x16xf32>
    %c9_i32_354 = arith.constant 9 : i32
    %1117 = vector.broadcast %c9_i32_354 : i32 to vector<1x16xi32>
    %1118 = arith.cmpi eq, %770, %1117 : vector<1x16xi32>
    %1119 = arith.extui %1118 : vector<1x16xi1> to vector<1x16xi32>
    %1120 = arith.sitofp %1119 : vector<1x16xi32> to vector<1x16xf32>
    %1121 = arith.subf %1120, %1116 : vector<1x16xf32>
    %1122 = vector.broadcast %1111 : f32 to vector<1x16xf32>
    %1123 = arith.divf %1121, %1122 : vector<1x16xf32>
    %c9_i32_355 = arith.constant 9 : i32
    %1124 = vector.broadcast %c9_i32_355 : i32 to vector<16x16xi32>
    %1125 = arith.cmpi eq, %47, %1124 : vector<16x16xi32>
    %cst_356 = arith.constant 0.000000e+00 : f32
    %1126 = vector.shape_cast %1123 : vector<1x16xf32> to vector<1x16xf32>
    %1127 = vector.broadcast %1126 : vector<1x16xf32> to vector<16x16xf32>
    %1128 = vector.broadcast %cst_356 : f32 to vector<16x16xf32>
    %1129 = arith.select %1125, %1127, %1128 : vector<16x16xi1>, vector<16x16xf32>
    %1130 = arith.addf %1094, %1129 : vector<16x16xf32>
    %c10_i32_357 = arith.constant 10 : i32
    %1131 = vector.broadcast %c10_i32_357 : i32 to vector<16x16xi32>
    %1132 = arith.cmpi eq, %47, %1131 : vector<16x16xi32>
    %cst_358 = arith.constant 0.000000e+00 : f32
    %1133 = vector.broadcast %cst_358 : f32 to vector<16x16xf32>
    %1134 = arith.select %1132, %768, %1133 : vector<16x16xi1>, vector<16x16xf32>
    %cst_359 = arith.constant dense<0.000000e+00> : vector<16xf32>
    %1135 = vector.multi_reduction <add>, %1134, %cst_359 [0] : vector<16x16xf32> to vector<16xf32>
    %1136 = vector.shape_cast %1135 : vector<16xf32> to vector<1x16xf32>
    %c10_i32_360 = arith.constant 10 : i32
    %1137 = vector.broadcast %c10_i32_360 : i32 to vector<16x16xi32>
    %1138 = arith.cmpi eq, %47, %1137 : vector<16x16xi32>
    %c10_i32_361 = arith.constant 10 : i32
    %1139 = vector.broadcast %c10_i32_361 : i32 to vector<16x16xi32>
    %1140 = arith.cmpi eq, %48, %1139 : vector<16x16xi32>
    %1141 = arith.andi %1138, %1140 : vector<16x16xi1>
    %cst_362 = arith.constant 0.000000e+00 : f32
    %1142 = vector.broadcast %cst_362 : f32 to vector<16x16xf32>
    %1143 = arith.select %1141, %768, %1142 : vector<16x16xi1>, vector<16x16xf32>
    %1144 = vector.shape_cast %1143 : vector<16x16xf32> to vector<1x16x16xf32>
    %cst_363 = arith.constant dense<0.000000e+00> : vector<1xf32>
    %1145 = vector.multi_reduction <add>, %1144, %cst_363 [1, 2] : vector<1x16x16xf32> to vector<1xf32>
    %1146 = vector.shape_cast %1145 : vector<1xf32> to vector<1x1x1xf32>
    %1147 = vector.extract %1146[0, 0, 0] : f32 from vector<1x1x1xf32>
    %c10_i32_364 = arith.constant 10 : i32
    %1148 = vector.broadcast %c10_i32_364 : i32 to vector<1x16xi32>
    %1149 = arith.cmpi slt, %770, %1148 : vector<1x16xi32>
    %cst_365 = arith.constant 0.000000e+00 : f32
    %1150 = vector.broadcast %cst_365 : f32 to vector<1x16xf32>
    %1151 = arith.select %1149, %1136, %1150 : vector<1x16xi1>, vector<1x16xf32>
    %cst_366 = arith.constant dense<0.000000e+00> : vector<1x16xf32>
    %1152 = tpu.matmul %1151, %1130, %cst_366 {dimension_numbers = #tpu.dot_dimension_numbers<[1], [0], [0], [1], [0, 0, 1, 1], [], []>} : vector<1x16xf32>, vector<16x16xf32>, vector<1x16xf32> -> vector<1x16xf32>
    %c10_i32_367 = arith.constant 10 : i32
    %1153 = vector.broadcast %c10_i32_367 : i32 to vector<1x16xi32>
    %1154 = arith.cmpi eq, %770, %1153 : vector<1x16xi32>
    %1155 = arith.extui %1154 : vector<1x16xi1> to vector<1x16xi32>
    %1156 = arith.sitofp %1155 : vector<1x16xi32> to vector<1x16xf32>
    %1157 = arith.subf %1156, %1152 : vector<1x16xf32>
    %1158 = vector.broadcast %1147 : f32 to vector<1x16xf32>
    %1159 = arith.divf %1157, %1158 : vector<1x16xf32>
    %c10_i32_368 = arith.constant 10 : i32
    %1160 = vector.broadcast %c10_i32_368 : i32 to vector<16x16xi32>
    %1161 = arith.cmpi eq, %47, %1160 : vector<16x16xi32>
    %cst_369 = arith.constant 0.000000e+00 : f32
    %1162 = vector.shape_cast %1159 : vector<1x16xf32> to vector<1x16xf32>
    %1163 = vector.broadcast %1162 : vector<1x16xf32> to vector<16x16xf32>
    %1164 = vector.broadcast %cst_369 : f32 to vector<16x16xf32>
    %1165 = arith.select %1161, %1163, %1164 : vector<16x16xi1>, vector<16x16xf32>
    %1166 = arith.addf %1130, %1165 : vector<16x16xf32>
    %c11_i32_370 = arith.constant 11 : i32
    %1167 = vector.broadcast %c11_i32_370 : i32 to vector<16x16xi32>
    %1168 = arith.cmpi eq, %47, %1167 : vector<16x16xi32>
    %cst_371 = arith.constant 0.000000e+00 : f32
    %1169 = vector.broadcast %cst_371 : f32 to vector<16x16xf32>
    %1170 = arith.select %1168, %768, %1169 : vector<16x16xi1>, vector<16x16xf32>
    %cst_372 = arith.constant dense<0.000000e+00> : vector<16xf32>
    %1171 = vector.multi_reduction <add>, %1170, %cst_372 [0] : vector<16x16xf32> to vector<16xf32>
    %1172 = vector.shape_cast %1171 : vector<16xf32> to vector<1x16xf32>
    %c11_i32_373 = arith.constant 11 : i32
    %1173 = vector.broadcast %c11_i32_373 : i32 to vector<16x16xi32>
    %1174 = arith.cmpi eq, %47, %1173 : vector<16x16xi32>
    %c11_i32_374 = arith.constant 11 : i32
    %1175 = vector.broadcast %c11_i32_374 : i32 to vector<16x16xi32>
    %1176 = arith.cmpi eq, %48, %1175 : vector<16x16xi32>
    %1177 = arith.andi %1174, %1176 : vector<16x16xi1>
    %cst_375 = arith.constant 0.000000e+00 : f32
    %1178 = vector.broadcast %cst_375 : f32 to vector<16x16xf32>
    %1179 = arith.select %1177, %768, %1178 : vector<16x16xi1>, vector<16x16xf32>
    %1180 = vector.shape_cast %1179 : vector<16x16xf32> to vector<1x16x16xf32>
    %cst_376 = arith.constant dense<0.000000e+00> : vector<1xf32>
    %1181 = vector.multi_reduction <add>, %1180, %cst_376 [1, 2] : vector<1x16x16xf32> to vector<1xf32>
    %1182 = vector.shape_cast %1181 : vector<1xf32> to vector<1x1x1xf32>
    %1183 = vector.extract %1182[0, 0, 0] : f32 from vector<1x1x1xf32>
    %c11_i32_377 = arith.constant 11 : i32
    %1184 = vector.broadcast %c11_i32_377 : i32 to vector<1x16xi32>
    %1185 = arith.cmpi slt, %770, %1184 : vector<1x16xi32>
    %cst_378 = arith.constant 0.000000e+00 : f32
    %1186 = vector.broadcast %cst_378 : f32 to vector<1x16xf32>
    %1187 = arith.select %1185, %1172, %1186 : vector<1x16xi1>, vector<1x16xf32>
    %cst_379 = arith.constant dense<0.000000e+00> : vector<1x16xf32>
    %1188 = tpu.matmul %1187, %1166, %cst_379 {dimension_numbers = #tpu.dot_dimension_numbers<[1], [0], [0], [1], [0, 0, 1, 1], [], []>} : vector<1x16xf32>, vector<16x16xf32>, vector<1x16xf32> -> vector<1x16xf32>
    %c11_i32_380 = arith.constant 11 : i32
    %1189 = vector.broadcast %c11_i32_380 : i32 to vector<1x16xi32>
    %1190 = arith.cmpi eq, %770, %1189 : vector<1x16xi32>
    %1191 = arith.extui %1190 : vector<1x16xi1> to vector<1x16xi32>
    %1192 = arith.sitofp %1191 : vector<1x16xi32> to vector<1x16xf32>
    %1193 = arith.subf %1192, %1188 : vector<1x16xf32>
    %1194 = vector.broadcast %1183 : f32 to vector<1x16xf32>
    %1195 = arith.divf %1193, %1194 : vector<1x16xf32>
    %c11_i32_381 = arith.constant 11 : i32
    %1196 = vector.broadcast %c11_i32_381 : i32 to vector<16x16xi32>
    %1197 = arith.cmpi eq, %47, %1196 : vector<16x16xi32>
    %cst_382 = arith.constant 0.000000e+00 : f32
    %1198 = vector.shape_cast %1195 : vector<1x16xf32> to vector<1x16xf32>
    %1199 = vector.broadcast %1198 : vector<1x16xf32> to vector<16x16xf32>
    %1200 = vector.broadcast %cst_382 : f32 to vector<16x16xf32>
    %1201 = arith.select %1197, %1199, %1200 : vector<16x16xi1>, vector<16x16xf32>
    %1202 = arith.addf %1166, %1201 : vector<16x16xf32>
    %c12_i32_383 = arith.constant 12 : i32
    %1203 = vector.broadcast %c12_i32_383 : i32 to vector<16x16xi32>
    %1204 = arith.cmpi eq, %47, %1203 : vector<16x16xi32>
    %cst_384 = arith.constant 0.000000e+00 : f32
    %1205 = vector.broadcast %cst_384 : f32 to vector<16x16xf32>
    %1206 = arith.select %1204, %768, %1205 : vector<16x16xi1>, vector<16x16xf32>
    %cst_385 = arith.constant dense<0.000000e+00> : vector<16xf32>
    %1207 = vector.multi_reduction <add>, %1206, %cst_385 [0] : vector<16x16xf32> to vector<16xf32>
    %1208 = vector.shape_cast %1207 : vector<16xf32> to vector<1x16xf32>
    %c12_i32_386 = arith.constant 12 : i32
    %1209 = vector.broadcast %c12_i32_386 : i32 to vector<16x16xi32>
    %1210 = arith.cmpi eq, %47, %1209 : vector<16x16xi32>
    %c12_i32_387 = arith.constant 12 : i32
    %1211 = vector.broadcast %c12_i32_387 : i32 to vector<16x16xi32>
    %1212 = arith.cmpi eq, %48, %1211 : vector<16x16xi32>
    %1213 = arith.andi %1210, %1212 : vector<16x16xi1>
    %cst_388 = arith.constant 0.000000e+00 : f32
    %1214 = vector.broadcast %cst_388 : f32 to vector<16x16xf32>
    %1215 = arith.select %1213, %768, %1214 : vector<16x16xi1>, vector<16x16xf32>
    %1216 = vector.shape_cast %1215 : vector<16x16xf32> to vector<1x16x16xf32>
    %cst_389 = arith.constant dense<0.000000e+00> : vector<1xf32>
    %1217 = vector.multi_reduction <add>, %1216, %cst_389 [1, 2] : vector<1x16x16xf32> to vector<1xf32>
    %1218 = vector.shape_cast %1217 : vector<1xf32> to vector<1x1x1xf32>
    %1219 = vector.extract %1218[0, 0, 0] : f32 from vector<1x1x1xf32>
    %c12_i32_390 = arith.constant 12 : i32
    %1220 = vector.broadcast %c12_i32_390 : i32 to vector<1x16xi32>
    %1221 = arith.cmpi slt, %770, %1220 : vector<1x16xi32>
    %cst_391 = arith.constant 0.000000e+00 : f32
    %1222 = vector.broadcast %cst_391 : f32 to vector<1x16xf32>
    %1223 = arith.select %1221, %1208, %1222 : vector<1x16xi1>, vector<1x16xf32>
    %cst_392 = arith.constant dense<0.000000e+00> : vector<1x16xf32>
    %1224 = tpu.matmul %1223, %1202, %cst_392 {dimension_numbers = #tpu.dot_dimension_numbers<[1], [0], [0], [1], [0, 0, 1, 1], [], []>} : vector<1x16xf32>, vector<16x16xf32>, vector<1x16xf32> -> vector<1x16xf32>
    %c12_i32_393 = arith.constant 12 : i32
    %1225 = vector.broadcast %c12_i32_393 : i32 to vector<1x16xi32>
    %1226 = arith.cmpi eq, %770, %1225 : vector<1x16xi32>
    %1227 = arith.extui %1226 : vector<1x16xi1> to vector<1x16xi32>
    %1228 = arith.sitofp %1227 : vector<1x16xi32> to vector<1x16xf32>
    %1229 = arith.subf %1228, %1224 : vector<1x16xf32>
    %1230 = vector.broadcast %1219 : f32 to vector<1x16xf32>
    %1231 = arith.divf %1229, %1230 : vector<1x16xf32>
    %c12_i32_394 = arith.constant 12 : i32
    %1232 = vector.broadcast %c12_i32_394 : i32 to vector<16x16xi32>
    %1233 = arith.cmpi eq, %47, %1232 : vector<16x16xi32>
    %cst_395 = arith.constant 0.000000e+00 : f32
    %1234 = vector.shape_cast %1231 : vector<1x16xf32> to vector<1x16xf32>
    %1235 = vector.broadcast %1234 : vector<1x16xf32> to vector<16x16xf32>
    %1236 = vector.broadcast %cst_395 : f32 to vector<16x16xf32>
    %1237 = arith.select %1233, %1235, %1236 : vector<16x16xi1>, vector<16x16xf32>
    %1238 = arith.addf %1202, %1237 : vector<16x16xf32>
    %c13_i32_396 = arith.constant 13 : i32
    %1239 = vector.broadcast %c13_i32_396 : i32 to vector<16x16xi32>
    %1240 = arith.cmpi eq, %47, %1239 : vector<16x16xi32>
    %cst_397 = arith.constant 0.000000e+00 : f32
    %1241 = vector.broadcast %cst_397 : f32 to vector<16x16xf32>
    %1242 = arith.select %1240, %768, %1241 : vector<16x16xi1>, vector<16x16xf32>
    %cst_398 = arith.constant dense<0.000000e+00> : vector<16xf32>
    %1243 = vector.multi_reduction <add>, %1242, %cst_398 [0] : vector<16x16xf32> to vector<16xf32>
    %1244 = vector.shape_cast %1243 : vector<16xf32> to vector<1x16xf32>
    %c13_i32_399 = arith.constant 13 : i32
    %1245 = vector.broadcast %c13_i32_399 : i32 to vector<16x16xi32>
    %1246 = arith.cmpi eq, %47, %1245 : vector<16x16xi32>
    %c13_i32_400 = arith.constant 13 : i32
    %1247 = vector.broadcast %c13_i32_400 : i32 to vector<16x16xi32>
    %1248 = arith.cmpi eq, %48, %1247 : vector<16x16xi32>
    %1249 = arith.andi %1246, %1248 : vector<16x16xi1>
    %cst_401 = arith.constant 0.000000e+00 : f32
    %1250 = vector.broadcast %cst_401 : f32 to vector<16x16xf32>
    %1251 = arith.select %1249, %768, %1250 : vector<16x16xi1>, vector<16x16xf32>
    %1252 = vector.shape_cast %1251 : vector<16x16xf32> to vector<1x16x16xf32>
    %cst_402 = arith.constant dense<0.000000e+00> : vector<1xf32>
    %1253 = vector.multi_reduction <add>, %1252, %cst_402 [1, 2] : vector<1x16x16xf32> to vector<1xf32>
    %1254 = vector.shape_cast %1253 : vector<1xf32> to vector<1x1x1xf32>
    %1255 = vector.extract %1254[0, 0, 0] : f32 from vector<1x1x1xf32>
    %c13_i32_403 = arith.constant 13 : i32
    %1256 = vector.broadcast %c13_i32_403 : i32 to vector<1x16xi32>
    %1257 = arith.cmpi slt, %770, %1256 : vector<1x16xi32>
    %cst_404 = arith.constant 0.000000e+00 : f32
    %1258 = vector.broadcast %cst_404 : f32 to vector<1x16xf32>
    %1259 = arith.select %1257, %1244, %1258 : vector<1x16xi1>, vector<1x16xf32>
    %cst_405 = arith.constant dense<0.000000e+00> : vector<1x16xf32>
    %1260 = tpu.matmul %1259, %1238, %cst_405 {dimension_numbers = #tpu.dot_dimension_numbers<[1], [0], [0], [1], [0, 0, 1, 1], [], []>} : vector<1x16xf32>, vector<16x16xf32>, vector<1x16xf32> -> vector<1x16xf32>
    %c13_i32_406 = arith.constant 13 : i32
    %1261 = vector.broadcast %c13_i32_406 : i32 to vector<1x16xi32>
    %1262 = arith.cmpi eq, %770, %1261 : vector<1x16xi32>
    %1263 = arith.extui %1262 : vector<1x16xi1> to vector<1x16xi32>
    %1264 = arith.sitofp %1263 : vector<1x16xi32> to vector<1x16xf32>
    %1265 = arith.subf %1264, %1260 : vector<1x16xf32>
    %1266 = vector.broadcast %1255 : f32 to vector<1x16xf32>
    %1267 = arith.divf %1265, %1266 : vector<1x16xf32>
    %c13_i32_407 = arith.constant 13 : i32
    %1268 = vector.broadcast %c13_i32_407 : i32 to vector<16x16xi32>
    %1269 = arith.cmpi eq, %47, %1268 : vector<16x16xi32>
    %cst_408 = arith.constant 0.000000e+00 : f32
    %1270 = vector.shape_cast %1267 : vector<1x16xf32> to vector<1x16xf32>
    %1271 = vector.broadcast %1270 : vector<1x16xf32> to vector<16x16xf32>
    %1272 = vector.broadcast %cst_408 : f32 to vector<16x16xf32>
    %1273 = arith.select %1269, %1271, %1272 : vector<16x16xi1>, vector<16x16xf32>
    %1274 = arith.addf %1238, %1273 : vector<16x16xf32>
    %c14_i32_409 = arith.constant 14 : i32
    %1275 = vector.broadcast %c14_i32_409 : i32 to vector<16x16xi32>
    %1276 = arith.cmpi eq, %47, %1275 : vector<16x16xi32>
    %cst_410 = arith.constant 0.000000e+00 : f32
    %1277 = vector.broadcast %cst_410 : f32 to vector<16x16xf32>
    %1278 = arith.select %1276, %768, %1277 : vector<16x16xi1>, vector<16x16xf32>
    %cst_411 = arith.constant dense<0.000000e+00> : vector<16xf32>
    %1279 = vector.multi_reduction <add>, %1278, %cst_411 [0] : vector<16x16xf32> to vector<16xf32>
    %1280 = vector.shape_cast %1279 : vector<16xf32> to vector<1x16xf32>
    %c14_i32_412 = arith.constant 14 : i32
    %1281 = vector.broadcast %c14_i32_412 : i32 to vector<16x16xi32>
    %1282 = arith.cmpi eq, %47, %1281 : vector<16x16xi32>
    %c14_i32_413 = arith.constant 14 : i32
    %1283 = vector.broadcast %c14_i32_413 : i32 to vector<16x16xi32>
    %1284 = arith.cmpi eq, %48, %1283 : vector<16x16xi32>
    %1285 = arith.andi %1282, %1284 : vector<16x16xi1>
    %cst_414 = arith.constant 0.000000e+00 : f32
    %1286 = vector.broadcast %cst_414 : f32 to vector<16x16xf32>
    %1287 = arith.select %1285, %768, %1286 : vector<16x16xi1>, vector<16x16xf32>
    %1288 = vector.shape_cast %1287 : vector<16x16xf32> to vector<1x16x16xf32>
    %cst_415 = arith.constant dense<0.000000e+00> : vector<1xf32>
    %1289 = vector.multi_reduction <add>, %1288, %cst_415 [1, 2] : vector<1x16x16xf32> to vector<1xf32>
    %1290 = vector.shape_cast %1289 : vector<1xf32> to vector<1x1x1xf32>
    %1291 = vector.extract %1290[0, 0, 0] : f32 from vector<1x1x1xf32>
    %c14_i32_416 = arith.constant 14 : i32
    %1292 = vector.broadcast %c14_i32_416 : i32 to vector<1x16xi32>
    %1293 = arith.cmpi slt, %770, %1292 : vector<1x16xi32>
    %cst_417 = arith.constant 0.000000e+00 : f32
    %1294 = vector.broadcast %cst_417 : f32 to vector<1x16xf32>
    %1295 = arith.select %1293, %1280, %1294 : vector<1x16xi1>, vector<1x16xf32>
    %cst_418 = arith.constant dense<0.000000e+00> : vector<1x16xf32>
    %1296 = tpu.matmul %1295, %1274, %cst_418 {dimension_numbers = #tpu.dot_dimension_numbers<[1], [0], [0], [1], [0, 0, 1, 1], [], []>} : vector<1x16xf32>, vector<16x16xf32>, vector<1x16xf32> -> vector<1x16xf32>
    %c14_i32_419 = arith.constant 14 : i32
    %1297 = vector.broadcast %c14_i32_419 : i32 to vector<1x16xi32>
    %1298 = arith.cmpi eq, %770, %1297 : vector<1x16xi32>
    %1299 = arith.extui %1298 : vector<1x16xi1> to vector<1x16xi32>
    %1300 = arith.sitofp %1299 : vector<1x16xi32> to vector<1x16xf32>
    %1301 = arith.subf %1300, %1296 : vector<1x16xf32>
    %1302 = vector.broadcast %1291 : f32 to vector<1x16xf32>
    %1303 = arith.divf %1301, %1302 : vector<1x16xf32>
    %c14_i32_420 = arith.constant 14 : i32
    %1304 = vector.broadcast %c14_i32_420 : i32 to vector<16x16xi32>
    %1305 = arith.cmpi eq, %47, %1304 : vector<16x16xi32>
    %cst_421 = arith.constant 0.000000e+00 : f32
    %1306 = vector.shape_cast %1303 : vector<1x16xf32> to vector<1x16xf32>
    %1307 = vector.broadcast %1306 : vector<1x16xf32> to vector<16x16xf32>
    %1308 = vector.broadcast %cst_421 : f32 to vector<16x16xf32>
    %1309 = arith.select %1305, %1307, %1308 : vector<16x16xi1>, vector<16x16xf32>
    %1310 = arith.addf %1274, %1309 : vector<16x16xf32>
    %c15_i32_422 = arith.constant 15 : i32
    %1311 = vector.broadcast %c15_i32_422 : i32 to vector<16x16xi32>
    %1312 = arith.cmpi eq, %47, %1311 : vector<16x16xi32>
    %cst_423 = arith.constant 0.000000e+00 : f32
    %1313 = vector.broadcast %cst_423 : f32 to vector<16x16xf32>
    %1314 = arith.select %1312, %768, %1313 : vector<16x16xi1>, vector<16x16xf32>
    %cst_424 = arith.constant dense<0.000000e+00> : vector<16xf32>
    %1315 = vector.multi_reduction <add>, %1314, %cst_424 [0] : vector<16x16xf32> to vector<16xf32>
    %1316 = vector.shape_cast %1315 : vector<16xf32> to vector<1x16xf32>
    %c15_i32_425 = arith.constant 15 : i32
    %1317 = vector.broadcast %c15_i32_425 : i32 to vector<16x16xi32>
    %1318 = arith.cmpi eq, %47, %1317 : vector<16x16xi32>
    %c15_i32_426 = arith.constant 15 : i32
    %1319 = vector.broadcast %c15_i32_426 : i32 to vector<16x16xi32>
    %1320 = arith.cmpi eq, %48, %1319 : vector<16x16xi32>
    %1321 = arith.andi %1318, %1320 : vector<16x16xi1>
    %cst_427 = arith.constant 0.000000e+00 : f32
    %1322 = vector.broadcast %cst_427 : f32 to vector<16x16xf32>
    %1323 = arith.select %1321, %768, %1322 : vector<16x16xi1>, vector<16x16xf32>
    %1324 = vector.shape_cast %1323 : vector<16x16xf32> to vector<1x16x16xf32>
    %cst_428 = arith.constant dense<0.000000e+00> : vector<1xf32>
    %1325 = vector.multi_reduction <add>, %1324, %cst_428 [1, 2] : vector<1x16x16xf32> to vector<1xf32>
    %1326 = vector.shape_cast %1325 : vector<1xf32> to vector<1x1x1xf32>
    %1327 = vector.extract %1326[0, 0, 0] : f32 from vector<1x1x1xf32>
    %c15_i32_429 = arith.constant 15 : i32
    %1328 = vector.broadcast %c15_i32_429 : i32 to vector<1x16xi32>
    %1329 = arith.cmpi slt, %770, %1328 : vector<1x16xi32>
    %cst_430 = arith.constant 0.000000e+00 : f32
    %1330 = vector.broadcast %cst_430 : f32 to vector<1x16xf32>
    %1331 = arith.select %1329, %1316, %1330 : vector<1x16xi1>, vector<1x16xf32>
    %cst_431 = arith.constant dense<0.000000e+00> : vector<1x16xf32>
    %1332 = tpu.matmul %1331, %1310, %cst_431 {dimension_numbers = #tpu.dot_dimension_numbers<[1], [0], [0], [1], [0, 0, 1, 1], [], []>} : vector<1x16xf32>, vector<16x16xf32>, vector<1x16xf32> -> vector<1x16xf32>
    %c15_i32_432 = arith.constant 15 : i32
    %1333 = vector.broadcast %c15_i32_432 : i32 to vector<1x16xi32>
    %1334 = arith.cmpi eq, %770, %1333 : vector<1x16xi32>
    %1335 = arith.extui %1334 : vector<1x16xi1> to vector<1x16xi32>
    %1336 = arith.sitofp %1335 : vector<1x16xi32> to vector<1x16xf32>
    %1337 = arith.subf %1336, %1332 : vector<1x16xf32>
    %1338 = vector.broadcast %1327 : f32 to vector<1x16xf32>
    %1339 = arith.divf %1337, %1338 : vector<1x16xf32>
    %c15_i32_433 = arith.constant 15 : i32
    %1340 = vector.broadcast %c15_i32_433 : i32 to vector<16x16xi32>
    %1341 = arith.cmpi eq, %47, %1340 : vector<16x16xi32>
    %cst_434 = arith.constant 0.000000e+00 : f32
    %1342 = vector.shape_cast %1339 : vector<1x16xf32> to vector<1x16xf32>
    %1343 = vector.broadcast %1342 : vector<1x16xf32> to vector<16x16xf32>
    %1344 = vector.broadcast %cst_434 : f32 to vector<16x16xf32>
    %1345 = arith.select %1341, %1343, %1344 : vector<16x16xi1>, vector<16x16xf32>
    %1346 = arith.addf %1310, %1345 : vector<16x16xf32>
    %c0_435 = arith.constant 0 : index
    %c0_436 = arith.constant 0 : index
    %1347 = vector.load %arg2[%c0_435, %c0_436] : memref<16x1xf32, #tpu.memory_space<vmem>>, vector<16x1xf32>
    %1348 = vector.broadcast %3 : f32 to vector<16x1xf32>
    %1349 = arith.subf %1347, %1348 : vector<16x1xf32>
    %cst_437 = arith.constant dense<0.000000e+00> : vector<16x1xf32>
    %1350 = tpu.matmul %1346, %1349, %cst_437 {dimension_numbers = #tpu.dot_dimension_numbers<[1], [0], [0], [1], [0, 0, 1, 1], [], []>} : vector<16x16xf32>, vector<16x1xf32>, vector<16x1xf32> -> vector<16x1xf32>
    %cst_438 = arith.constant dense<0.000000e+00> : vector<16x1xf32>
    %1351 = tpu.matmul %1346, %1350, %cst_438 {dimension_numbers = #tpu.dot_dimension_numbers<[0], [0], [1], [1], [0, 1, 1, 1], [], []>} : vector<16x16xf32>, vector<16x1xf32>, vector<16x1xf32> -> vector<16x1xf32>
    %cst_439 = arith.constant dense<0.000000e+00> : vector<1x16xf32>
    %1352 = tpu.matmul %1351, %61, %cst_439 {dimension_numbers = #tpu.dot_dimension_numbers<[0], [0], [1], [1], [0, 1, 1, 1], [], []>} : vector<16x1xf32>, vector<16x16xf32>, vector<1x16xf32> -> vector<1x16xf32>
    %1353 = vector.broadcast %3 : f32 to vector<1x16xf32>
    %1354 = arith.addf %1353, %1352 : vector<1x16xf32>
    %cst_440 = arith.constant dense<0.000000e+00> : vector<16x16xf32>
    %1355 = tpu.matmul %1346, %61, %cst_440 {dimension_numbers = #tpu.dot_dimension_numbers<[1], [0], [0], [1], [0, 0, 1, 1], [], []>} : vector<16x16xf32>, vector<16x16xf32>, vector<16x16xf32> -> vector<16x16xf32>
    %cst_441 = arith.constant dense<0.000000e+00> : vector<16x16xf32>
    %1356 = tpu.matmul %1355, %1355, %cst_441 {dimension_numbers = #tpu.dot_dimension_numbers<[0], [0], [1], [1], [0, 1, 1, 1], [], []>} : vector<16x16xf32>, vector<16x16xf32>, vector<16x16xf32> -> vector<16x16xf32>
    %1357 = arith.subf %62, %1356 : vector<16x16xf32>
    %1358 = vector.broadcast %2 : f32 to vector<16x16xf32>
    %1359 = arith.mulf %1358, %56 : vector<16x16xf32>
    %1360 = arith.addf %1357, %1359 : vector<16x16xf32>
    %cst_442 = arith.constant 0.000000e+00 : f32
    %1361 = vector.broadcast %cst_442 : f32 to vector<16x16xf32>
    %c0_i32_443 = arith.constant 0 : i32
    %1362 = vector.broadcast %c0_i32_443 : i32 to vector<16x16xi32>
    %1363 = arith.cmpi eq, %52, %1362 : vector<16x16xi32>
    %c0_i32_444 = arith.constant 0 : i32
    %1364 = vector.broadcast %c0_i32_444 : i32 to vector<16x16xi32>
    %1365 = arith.cmpi eq, %53, %1364 : vector<16x16xi32>
    %1366 = arith.andi %1363, %1365 : vector<16x16xi1>
    %cst_445 = arith.constant 0.000000e+00 : f32
    %1367 = vector.broadcast %cst_445 : f32 to vector<16x16xf32>
    %1368 = arith.select %1366, %1360, %1367 : vector<16x16xi1>, vector<16x16xf32>
    %1369 = vector.shape_cast %1368 : vector<16x16xf32> to vector<1x16x16xf32>
    %cst_446 = arith.constant dense<0.000000e+00> : vector<1xf32>
    %1370 = vector.multi_reduction <add>, %1369, %cst_446 [1, 2] : vector<1x16x16xf32> to vector<1xf32>
    %1371 = vector.shape_cast %1370 : vector<1xf32> to vector<1x1x1xf32>
    %1372 = vector.extract %1371[0, 0, 0] : f32 from vector<1x1x1xf32>
    %1373 = math.rsqrt %1372 : f32
    %c0_i32_447 = arith.constant 0 : i32
    %1374 = vector.broadcast %c0_i32_447 : i32 to vector<16x16xi32>
    %1375 = arith.cmpi eq, %53, %1374 : vector<16x16xi32>
    %c0_i32_448 = arith.constant 0 : i32
    %1376 = vector.broadcast %c0_i32_448 : i32 to vector<16x16xi32>
    %1377 = arith.cmpi sge, %52, %1376 : vector<16x16xi32>
    %1378 = arith.andi %1375, %1377 : vector<16x16xi1>
    %cst_449 = arith.constant 0.000000e+00 : f32
    %1379 = vector.broadcast %cst_449 : f32 to vector<16x16xf32>
    %1380 = arith.select %1378, %1360, %1379 : vector<16x16xi1>, vector<16x16xf32>
    %cst_450 = arith.constant dense<0.000000e+00> : vector<16xf32>
    %1381 = vector.multi_reduction <add>, %1380, %cst_450 [1] : vector<16x16xf32> to vector<16xf32>
    %1382 = vector.shape_cast %1381 : vector<16xf32> to vector<16x1xf32>
    %1383 = vector.broadcast %1373 : f32 to vector<16x1xf32>
    %1384 = arith.mulf %1382, %1383 : vector<16x1xf32>
    %c0_i32_451 = arith.constant 0 : i32
    %1385 = vector.broadcast %c0_i32_451 : i32 to vector<16x16xi32>
    %1386 = arith.cmpi eq, %52, %1385 : vector<16x16xi32>
    %c0_i32_452 = arith.constant 0 : i32
    %1387 = vector.broadcast %c0_i32_452 : i32 to vector<16x16xi32>
    %1388 = arith.cmpi sge, %53, %1387 : vector<16x16xi32>
    %1389 = arith.andi %1386, %1388 : vector<16x16xi1>
    %cst_453 = arith.constant 0.000000e+00 : f32
    %1390 = vector.broadcast %cst_453 : f32 to vector<16x16xf32>
    %1391 = arith.select %1389, %1360, %1390 : vector<16x16xi1>, vector<16x16xf32>
    %cst_454 = arith.constant dense<0.000000e+00> : vector<16xf32>
    %1392 = vector.multi_reduction <add>, %1391, %cst_454 [0] : vector<16x16xf32> to vector<16xf32>
    %1393 = vector.shape_cast %1392 : vector<16xf32> to vector<1x16xf32>
    %1394 = vector.broadcast %1373 : f32 to vector<1x16xf32>
    %1395 = arith.mulf %1393, %1394 : vector<1x16xf32>
    %c0_i32_455 = arith.constant 0 : i32
    %1396 = vector.broadcast %c0_i32_455 : i32 to vector<16x16xi32>
    %1397 = arith.cmpi eq, %53, %1396 : vector<16x16xi32>
    %cst_456 = arith.constant 0.000000e+00 : f32
    %1398 = vector.shape_cast %1384 : vector<16x1xf32> to vector<16x1xf32>
    %1399 = vector.broadcast %1398 : vector<16x1xf32> to vector<16x16xf32>
    %1400 = vector.broadcast %cst_456 : f32 to vector<16x16xf32>
    %1401 = arith.select %1397, %1399, %1400 : vector<16x16xi1>, vector<16x16xf32>
    %1402 = arith.addf %1361, %1401 : vector<16x16xf32>
    %1403 = vector.broadcast %1384 : vector<16x1xf32> to vector<16x16xf32>
    %1404 = vector.broadcast %1395 : vector<1x16xf32> to vector<16x16xf32>
    %1405 = arith.mulf %1403, %1404 : vector<16x16xf32>
    %1406 = arith.subf %1360, %1405 : vector<16x16xf32>
    %c1_i32_457 = arith.constant 1 : i32
    %1407 = vector.broadcast %c1_i32_457 : i32 to vector<16x16xi32>
    %1408 = arith.cmpi eq, %52, %1407 : vector<16x16xi32>
    %c1_i32_458 = arith.constant 1 : i32
    %1409 = vector.broadcast %c1_i32_458 : i32 to vector<16x16xi32>
    %1410 = arith.cmpi eq, %53, %1409 : vector<16x16xi32>
    %1411 = arith.andi %1408, %1410 : vector<16x16xi1>
    %cst_459 = arith.constant 0.000000e+00 : f32
    %1412 = vector.broadcast %cst_459 : f32 to vector<16x16xf32>
    %1413 = arith.select %1411, %1406, %1412 : vector<16x16xi1>, vector<16x16xf32>
    %1414 = vector.shape_cast %1413 : vector<16x16xf32> to vector<1x16x16xf32>
    %cst_460 = arith.constant dense<0.000000e+00> : vector<1xf32>
    %1415 = vector.multi_reduction <add>, %1414, %cst_460 [1, 2] : vector<1x16x16xf32> to vector<1xf32>
    %1416 = vector.shape_cast %1415 : vector<1xf32> to vector<1x1x1xf32>
    %1417 = vector.extract %1416[0, 0, 0] : f32 from vector<1x1x1xf32>
    %1418 = math.rsqrt %1417 : f32
    %c1_i32_461 = arith.constant 1 : i32
    %1419 = vector.broadcast %c1_i32_461 : i32 to vector<16x16xi32>
    %1420 = arith.cmpi eq, %53, %1419 : vector<16x16xi32>
    %c1_i32_462 = arith.constant 1 : i32
    %1421 = vector.broadcast %c1_i32_462 : i32 to vector<16x16xi32>
    %1422 = arith.cmpi sge, %52, %1421 : vector<16x16xi32>
    %1423 = arith.andi %1420, %1422 : vector<16x16xi1>
    %cst_463 = arith.constant 0.000000e+00 : f32
    %1424 = vector.broadcast %cst_463 : f32 to vector<16x16xf32>
    %1425 = arith.select %1423, %1406, %1424 : vector<16x16xi1>, vector<16x16xf32>
    %cst_464 = arith.constant dense<0.000000e+00> : vector<16xf32>
    %1426 = vector.multi_reduction <add>, %1425, %cst_464 [1] : vector<16x16xf32> to vector<16xf32>
    %1427 = vector.shape_cast %1426 : vector<16xf32> to vector<16x1xf32>
    %1428 = vector.broadcast %1418 : f32 to vector<16x1xf32>
    %1429 = arith.mulf %1427, %1428 : vector<16x1xf32>
    %c1_i32_465 = arith.constant 1 : i32
    %1430 = vector.broadcast %c1_i32_465 : i32 to vector<16x16xi32>
    %1431 = arith.cmpi eq, %52, %1430 : vector<16x16xi32>
    %c1_i32_466 = arith.constant 1 : i32
    %1432 = vector.broadcast %c1_i32_466 : i32 to vector<16x16xi32>
    %1433 = arith.cmpi sge, %53, %1432 : vector<16x16xi32>
    %1434 = arith.andi %1431, %1433 : vector<16x16xi1>
    %cst_467 = arith.constant 0.000000e+00 : f32
    %1435 = vector.broadcast %cst_467 : f32 to vector<16x16xf32>
    %1436 = arith.select %1434, %1406, %1435 : vector<16x16xi1>, vector<16x16xf32>
    %cst_468 = arith.constant dense<0.000000e+00> : vector<16xf32>
    %1437 = vector.multi_reduction <add>, %1436, %cst_468 [0] : vector<16x16xf32> to vector<16xf32>
    %1438 = vector.shape_cast %1437 : vector<16xf32> to vector<1x16xf32>
    %1439 = vector.broadcast %1418 : f32 to vector<1x16xf32>
    %1440 = arith.mulf %1438, %1439 : vector<1x16xf32>
    %c1_i32_469 = arith.constant 1 : i32
    %1441 = vector.broadcast %c1_i32_469 : i32 to vector<16x16xi32>
    %1442 = arith.cmpi eq, %53, %1441 : vector<16x16xi32>
    %cst_470 = arith.constant 0.000000e+00 : f32
    %1443 = vector.shape_cast %1429 : vector<16x1xf32> to vector<16x1xf32>
    %1444 = vector.broadcast %1443 : vector<16x1xf32> to vector<16x16xf32>
    %1445 = vector.broadcast %cst_470 : f32 to vector<16x16xf32>
    %1446 = arith.select %1442, %1444, %1445 : vector<16x16xi1>, vector<16x16xf32>
    %1447 = arith.addf %1402, %1446 : vector<16x16xf32>
    %1448 = vector.broadcast %1429 : vector<16x1xf32> to vector<16x16xf32>
    %1449 = vector.broadcast %1440 : vector<1x16xf32> to vector<16x16xf32>
    %1450 = arith.mulf %1448, %1449 : vector<16x16xf32>
    %1451 = arith.subf %1406, %1450 : vector<16x16xf32>
    %c2_i32_471 = arith.constant 2 : i32
    %1452 = vector.broadcast %c2_i32_471 : i32 to vector<16x16xi32>
    %1453 = arith.cmpi eq, %52, %1452 : vector<16x16xi32>
    %c2_i32_472 = arith.constant 2 : i32
    %1454 = vector.broadcast %c2_i32_472 : i32 to vector<16x16xi32>
    %1455 = arith.cmpi eq, %53, %1454 : vector<16x16xi32>
    %1456 = arith.andi %1453, %1455 : vector<16x16xi1>
    %cst_473 = arith.constant 0.000000e+00 : f32
    %1457 = vector.broadcast %cst_473 : f32 to vector<16x16xf32>
    %1458 = arith.select %1456, %1451, %1457 : vector<16x16xi1>, vector<16x16xf32>
    %1459 = vector.shape_cast %1458 : vector<16x16xf32> to vector<1x16x16xf32>
    %cst_474 = arith.constant dense<0.000000e+00> : vector<1xf32>
    %1460 = vector.multi_reduction <add>, %1459, %cst_474 [1, 2] : vector<1x16x16xf32> to vector<1xf32>
    %1461 = vector.shape_cast %1460 : vector<1xf32> to vector<1x1x1xf32>
    %1462 = vector.extract %1461[0, 0, 0] : f32 from vector<1x1x1xf32>
    %1463 = math.rsqrt %1462 : f32
    %c2_i32_475 = arith.constant 2 : i32
    %1464 = vector.broadcast %c2_i32_475 : i32 to vector<16x16xi32>
    %1465 = arith.cmpi eq, %53, %1464 : vector<16x16xi32>
    %c2_i32_476 = arith.constant 2 : i32
    %1466 = vector.broadcast %c2_i32_476 : i32 to vector<16x16xi32>
    %1467 = arith.cmpi sge, %52, %1466 : vector<16x16xi32>
    %1468 = arith.andi %1465, %1467 : vector<16x16xi1>
    %cst_477 = arith.constant 0.000000e+00 : f32
    %1469 = vector.broadcast %cst_477 : f32 to vector<16x16xf32>
    %1470 = arith.select %1468, %1451, %1469 : vector<16x16xi1>, vector<16x16xf32>
    %cst_478 = arith.constant dense<0.000000e+00> : vector<16xf32>
    %1471 = vector.multi_reduction <add>, %1470, %cst_478 [1] : vector<16x16xf32> to vector<16xf32>
    %1472 = vector.shape_cast %1471 : vector<16xf32> to vector<16x1xf32>
    %1473 = vector.broadcast %1463 : f32 to vector<16x1xf32>
    %1474 = arith.mulf %1472, %1473 : vector<16x1xf32>
    %c2_i32_479 = arith.constant 2 : i32
    %1475 = vector.broadcast %c2_i32_479 : i32 to vector<16x16xi32>
    %1476 = arith.cmpi eq, %52, %1475 : vector<16x16xi32>
    %c2_i32_480 = arith.constant 2 : i32
    %1477 = vector.broadcast %c2_i32_480 : i32 to vector<16x16xi32>
    %1478 = arith.cmpi sge, %53, %1477 : vector<16x16xi32>
    %1479 = arith.andi %1476, %1478 : vector<16x16xi1>
    %cst_481 = arith.constant 0.000000e+00 : f32
    %1480 = vector.broadcast %cst_481 : f32 to vector<16x16xf32>
    %1481 = arith.select %1479, %1451, %1480 : vector<16x16xi1>, vector<16x16xf32>
    %cst_482 = arith.constant dense<0.000000e+00> : vector<16xf32>
    %1482 = vector.multi_reduction <add>, %1481, %cst_482 [0] : vector<16x16xf32> to vector<16xf32>
    %1483 = vector.shape_cast %1482 : vector<16xf32> to vector<1x16xf32>
    %1484 = vector.broadcast %1463 : f32 to vector<1x16xf32>
    %1485 = arith.mulf %1483, %1484 : vector<1x16xf32>
    %c2_i32_483 = arith.constant 2 : i32
    %1486 = vector.broadcast %c2_i32_483 : i32 to vector<16x16xi32>
    %1487 = arith.cmpi eq, %53, %1486 : vector<16x16xi32>
    %cst_484 = arith.constant 0.000000e+00 : f32
    %1488 = vector.shape_cast %1474 : vector<16x1xf32> to vector<16x1xf32>
    %1489 = vector.broadcast %1488 : vector<16x1xf32> to vector<16x16xf32>
    %1490 = vector.broadcast %cst_484 : f32 to vector<16x16xf32>
    %1491 = arith.select %1487, %1489, %1490 : vector<16x16xi1>, vector<16x16xf32>
    %1492 = arith.addf %1447, %1491 : vector<16x16xf32>
    %1493 = vector.broadcast %1474 : vector<16x1xf32> to vector<16x16xf32>
    %1494 = vector.broadcast %1485 : vector<1x16xf32> to vector<16x16xf32>
    %1495 = arith.mulf %1493, %1494 : vector<16x16xf32>
    %1496 = arith.subf %1451, %1495 : vector<16x16xf32>
    %c3_i32_485 = arith.constant 3 : i32
    %1497 = vector.broadcast %c3_i32_485 : i32 to vector<16x16xi32>
    %1498 = arith.cmpi eq, %52, %1497 : vector<16x16xi32>
    %c3_i32_486 = arith.constant 3 : i32
    %1499 = vector.broadcast %c3_i32_486 : i32 to vector<16x16xi32>
    %1500 = arith.cmpi eq, %53, %1499 : vector<16x16xi32>
    %1501 = arith.andi %1498, %1500 : vector<16x16xi1>
    %cst_487 = arith.constant 0.000000e+00 : f32
    %1502 = vector.broadcast %cst_487 : f32 to vector<16x16xf32>
    %1503 = arith.select %1501, %1496, %1502 : vector<16x16xi1>, vector<16x16xf32>
    %1504 = vector.shape_cast %1503 : vector<16x16xf32> to vector<1x16x16xf32>
    %cst_488 = arith.constant dense<0.000000e+00> : vector<1xf32>
    %1505 = vector.multi_reduction <add>, %1504, %cst_488 [1, 2] : vector<1x16x16xf32> to vector<1xf32>
    %1506 = vector.shape_cast %1505 : vector<1xf32> to vector<1x1x1xf32>
    %1507 = vector.extract %1506[0, 0, 0] : f32 from vector<1x1x1xf32>
    %1508 = math.rsqrt %1507 : f32
    %c3_i32_489 = arith.constant 3 : i32
    %1509 = vector.broadcast %c3_i32_489 : i32 to vector<16x16xi32>
    %1510 = arith.cmpi eq, %53, %1509 : vector<16x16xi32>
    %c3_i32_490 = arith.constant 3 : i32
    %1511 = vector.broadcast %c3_i32_490 : i32 to vector<16x16xi32>
    %1512 = arith.cmpi sge, %52, %1511 : vector<16x16xi32>
    %1513 = arith.andi %1510, %1512 : vector<16x16xi1>
    %cst_491 = arith.constant 0.000000e+00 : f32
    %1514 = vector.broadcast %cst_491 : f32 to vector<16x16xf32>
    %1515 = arith.select %1513, %1496, %1514 : vector<16x16xi1>, vector<16x16xf32>
    %cst_492 = arith.constant dense<0.000000e+00> : vector<16xf32>
    %1516 = vector.multi_reduction <add>, %1515, %cst_492 [1] : vector<16x16xf32> to vector<16xf32>
    %1517 = vector.shape_cast %1516 : vector<16xf32> to vector<16x1xf32>
    %1518 = vector.broadcast %1508 : f32 to vector<16x1xf32>
    %1519 = arith.mulf %1517, %1518 : vector<16x1xf32>
    %c3_i32_493 = arith.constant 3 : i32
    %1520 = vector.broadcast %c3_i32_493 : i32 to vector<16x16xi32>
    %1521 = arith.cmpi eq, %52, %1520 : vector<16x16xi32>
    %c3_i32_494 = arith.constant 3 : i32
    %1522 = vector.broadcast %c3_i32_494 : i32 to vector<16x16xi32>
    %1523 = arith.cmpi sge, %53, %1522 : vector<16x16xi32>
    %1524 = arith.andi %1521, %1523 : vector<16x16xi1>
    %cst_495 = arith.constant 0.000000e+00 : f32
    %1525 = vector.broadcast %cst_495 : f32 to vector<16x16xf32>
    %1526 = arith.select %1524, %1496, %1525 : vector<16x16xi1>, vector<16x16xf32>
    %cst_496 = arith.constant dense<0.000000e+00> : vector<16xf32>
    %1527 = vector.multi_reduction <add>, %1526, %cst_496 [0] : vector<16x16xf32> to vector<16xf32>
    %1528 = vector.shape_cast %1527 : vector<16xf32> to vector<1x16xf32>
    %1529 = vector.broadcast %1508 : f32 to vector<1x16xf32>
    %1530 = arith.mulf %1528, %1529 : vector<1x16xf32>
    %c3_i32_497 = arith.constant 3 : i32
    %1531 = vector.broadcast %c3_i32_497 : i32 to vector<16x16xi32>
    %1532 = arith.cmpi eq, %53, %1531 : vector<16x16xi32>
    %cst_498 = arith.constant 0.000000e+00 : f32
    %1533 = vector.shape_cast %1519 : vector<16x1xf32> to vector<16x1xf32>
    %1534 = vector.broadcast %1533 : vector<16x1xf32> to vector<16x16xf32>
    %1535 = vector.broadcast %cst_498 : f32 to vector<16x16xf32>
    %1536 = arith.select %1532, %1534, %1535 : vector<16x16xi1>, vector<16x16xf32>
    %1537 = arith.addf %1492, %1536 : vector<16x16xf32>
    %1538 = vector.broadcast %1519 : vector<16x1xf32> to vector<16x16xf32>
    %1539 = vector.broadcast %1530 : vector<1x16xf32> to vector<16x16xf32>
    %1540 = arith.mulf %1538, %1539 : vector<16x16xf32>
    %1541 = arith.subf %1496, %1540 : vector<16x16xf32>
    %c4_i32_499 = arith.constant 4 : i32
    %1542 = vector.broadcast %c4_i32_499 : i32 to vector<16x16xi32>
    %1543 = arith.cmpi eq, %52, %1542 : vector<16x16xi32>
    %c4_i32_500 = arith.constant 4 : i32
    %1544 = vector.broadcast %c4_i32_500 : i32 to vector<16x16xi32>
    %1545 = arith.cmpi eq, %53, %1544 : vector<16x16xi32>
    %1546 = arith.andi %1543, %1545 : vector<16x16xi1>
    %cst_501 = arith.constant 0.000000e+00 : f32
    %1547 = vector.broadcast %cst_501 : f32 to vector<16x16xf32>
    %1548 = arith.select %1546, %1541, %1547 : vector<16x16xi1>, vector<16x16xf32>
    %1549 = vector.shape_cast %1548 : vector<16x16xf32> to vector<1x16x16xf32>
    %cst_502 = arith.constant dense<0.000000e+00> : vector<1xf32>
    %1550 = vector.multi_reduction <add>, %1549, %cst_502 [1, 2] : vector<1x16x16xf32> to vector<1xf32>
    %1551 = vector.shape_cast %1550 : vector<1xf32> to vector<1x1x1xf32>
    %1552 = vector.extract %1551[0, 0, 0] : f32 from vector<1x1x1xf32>
    %1553 = math.rsqrt %1552 : f32
    %c4_i32_503 = arith.constant 4 : i32
    %1554 = vector.broadcast %c4_i32_503 : i32 to vector<16x16xi32>
    %1555 = arith.cmpi eq, %53, %1554 : vector<16x16xi32>
    %c4_i32_504 = arith.constant 4 : i32
    %1556 = vector.broadcast %c4_i32_504 : i32 to vector<16x16xi32>
    %1557 = arith.cmpi sge, %52, %1556 : vector<16x16xi32>
    %1558 = arith.andi %1555, %1557 : vector<16x16xi1>
    %cst_505 = arith.constant 0.000000e+00 : f32
    %1559 = vector.broadcast %cst_505 : f32 to vector<16x16xf32>
    %1560 = arith.select %1558, %1541, %1559 : vector<16x16xi1>, vector<16x16xf32>
    %cst_506 = arith.constant dense<0.000000e+00> : vector<16xf32>
    %1561 = vector.multi_reduction <add>, %1560, %cst_506 [1] : vector<16x16xf32> to vector<16xf32>
    %1562 = vector.shape_cast %1561 : vector<16xf32> to vector<16x1xf32>
    %1563 = vector.broadcast %1553 : f32 to vector<16x1xf32>
    %1564 = arith.mulf %1562, %1563 : vector<16x1xf32>
    %c4_i32_507 = arith.constant 4 : i32
    %1565 = vector.broadcast %c4_i32_507 : i32 to vector<16x16xi32>
    %1566 = arith.cmpi eq, %52, %1565 : vector<16x16xi32>
    %c4_i32_508 = arith.constant 4 : i32
    %1567 = vector.broadcast %c4_i32_508 : i32 to vector<16x16xi32>
    %1568 = arith.cmpi sge, %53, %1567 : vector<16x16xi32>
    %1569 = arith.andi %1566, %1568 : vector<16x16xi1>
    %cst_509 = arith.constant 0.000000e+00 : f32
    %1570 = vector.broadcast %cst_509 : f32 to vector<16x16xf32>
    %1571 = arith.select %1569, %1541, %1570 : vector<16x16xi1>, vector<16x16xf32>
    %cst_510 = arith.constant dense<0.000000e+00> : vector<16xf32>
    %1572 = vector.multi_reduction <add>, %1571, %cst_510 [0] : vector<16x16xf32> to vector<16xf32>
    %1573 = vector.shape_cast %1572 : vector<16xf32> to vector<1x16xf32>
    %1574 = vector.broadcast %1553 : f32 to vector<1x16xf32>
    %1575 = arith.mulf %1573, %1574 : vector<1x16xf32>
    %c4_i32_511 = arith.constant 4 : i32
    %1576 = vector.broadcast %c4_i32_511 : i32 to vector<16x16xi32>
    %1577 = arith.cmpi eq, %53, %1576 : vector<16x16xi32>
    %cst_512 = arith.constant 0.000000e+00 : f32
    %1578 = vector.shape_cast %1564 : vector<16x1xf32> to vector<16x1xf32>
    %1579 = vector.broadcast %1578 : vector<16x1xf32> to vector<16x16xf32>
    %1580 = vector.broadcast %cst_512 : f32 to vector<16x16xf32>
    %1581 = arith.select %1577, %1579, %1580 : vector<16x16xi1>, vector<16x16xf32>
    %1582 = arith.addf %1537, %1581 : vector<16x16xf32>
    %1583 = vector.broadcast %1564 : vector<16x1xf32> to vector<16x16xf32>
    %1584 = vector.broadcast %1575 : vector<1x16xf32> to vector<16x16xf32>
    %1585 = arith.mulf %1583, %1584 : vector<16x16xf32>
    %1586 = arith.subf %1541, %1585 : vector<16x16xf32>
    %c5_i32_513 = arith.constant 5 : i32
    %1587 = vector.broadcast %c5_i32_513 : i32 to vector<16x16xi32>
    %1588 = arith.cmpi eq, %52, %1587 : vector<16x16xi32>
    %c5_i32_514 = arith.constant 5 : i32
    %1589 = vector.broadcast %c5_i32_514 : i32 to vector<16x16xi32>
    %1590 = arith.cmpi eq, %53, %1589 : vector<16x16xi32>
    %1591 = arith.andi %1588, %1590 : vector<16x16xi1>
    %cst_515 = arith.constant 0.000000e+00 : f32
    %1592 = vector.broadcast %cst_515 : f32 to vector<16x16xf32>
    %1593 = arith.select %1591, %1586, %1592 : vector<16x16xi1>, vector<16x16xf32>
    %1594 = vector.shape_cast %1593 : vector<16x16xf32> to vector<1x16x16xf32>
    %cst_516 = arith.constant dense<0.000000e+00> : vector<1xf32>
    %1595 = vector.multi_reduction <add>, %1594, %cst_516 [1, 2] : vector<1x16x16xf32> to vector<1xf32>
    %1596 = vector.shape_cast %1595 : vector<1xf32> to vector<1x1x1xf32>
    %1597 = vector.extract %1596[0, 0, 0] : f32 from vector<1x1x1xf32>
    %1598 = math.rsqrt %1597 : f32
    %c5_i32_517 = arith.constant 5 : i32
    %1599 = vector.broadcast %c5_i32_517 : i32 to vector<16x16xi32>
    %1600 = arith.cmpi eq, %53, %1599 : vector<16x16xi32>
    %c5_i32_518 = arith.constant 5 : i32
    %1601 = vector.broadcast %c5_i32_518 : i32 to vector<16x16xi32>
    %1602 = arith.cmpi sge, %52, %1601 : vector<16x16xi32>
    %1603 = arith.andi %1600, %1602 : vector<16x16xi1>
    %cst_519 = arith.constant 0.000000e+00 : f32
    %1604 = vector.broadcast %cst_519 : f32 to vector<16x16xf32>
    %1605 = arith.select %1603, %1586, %1604 : vector<16x16xi1>, vector<16x16xf32>
    %cst_520 = arith.constant dense<0.000000e+00> : vector<16xf32>
    %1606 = vector.multi_reduction <add>, %1605, %cst_520 [1] : vector<16x16xf32> to vector<16xf32>
    %1607 = vector.shape_cast %1606 : vector<16xf32> to vector<16x1xf32>
    %1608 = vector.broadcast %1598 : f32 to vector<16x1xf32>
    %1609 = arith.mulf %1607, %1608 : vector<16x1xf32>
    %c5_i32_521 = arith.constant 5 : i32
    %1610 = vector.broadcast %c5_i32_521 : i32 to vector<16x16xi32>
    %1611 = arith.cmpi eq, %52, %1610 : vector<16x16xi32>
    %c5_i32_522 = arith.constant 5 : i32
    %1612 = vector.broadcast %c5_i32_522 : i32 to vector<16x16xi32>
    %1613 = arith.cmpi sge, %53, %1612 : vector<16x16xi32>
    %1614 = arith.andi %1611, %1613 : vector<16x16xi1>
    %cst_523 = arith.constant 0.000000e+00 : f32
    %1615 = vector.broadcast %cst_523 : f32 to vector<16x16xf32>
    %1616 = arith.select %1614, %1586, %1615 : vector<16x16xi1>, vector<16x16xf32>
    %cst_524 = arith.constant dense<0.000000e+00> : vector<16xf32>
    %1617 = vector.multi_reduction <add>, %1616, %cst_524 [0] : vector<16x16xf32> to vector<16xf32>
    %1618 = vector.shape_cast %1617 : vector<16xf32> to vector<1x16xf32>
    %1619 = vector.broadcast %1598 : f32 to vector<1x16xf32>
    %1620 = arith.mulf %1618, %1619 : vector<1x16xf32>
    %c5_i32_525 = arith.constant 5 : i32
    %1621 = vector.broadcast %c5_i32_525 : i32 to vector<16x16xi32>
    %1622 = arith.cmpi eq, %53, %1621 : vector<16x16xi32>
    %cst_526 = arith.constant 0.000000e+00 : f32
    %1623 = vector.shape_cast %1609 : vector<16x1xf32> to vector<16x1xf32>
    %1624 = vector.broadcast %1623 : vector<16x1xf32> to vector<16x16xf32>
    %1625 = vector.broadcast %cst_526 : f32 to vector<16x16xf32>
    %1626 = arith.select %1622, %1624, %1625 : vector<16x16xi1>, vector<16x16xf32>
    %1627 = arith.addf %1582, %1626 : vector<16x16xf32>
    %1628 = vector.broadcast %1609 : vector<16x1xf32> to vector<16x16xf32>
    %1629 = vector.broadcast %1620 : vector<1x16xf32> to vector<16x16xf32>
    %1630 = arith.mulf %1628, %1629 : vector<16x16xf32>
    %1631 = arith.subf %1586, %1630 : vector<16x16xf32>
    %c6_i32_527 = arith.constant 6 : i32
    %1632 = vector.broadcast %c6_i32_527 : i32 to vector<16x16xi32>
    %1633 = arith.cmpi eq, %52, %1632 : vector<16x16xi32>
    %c6_i32_528 = arith.constant 6 : i32
    %1634 = vector.broadcast %c6_i32_528 : i32 to vector<16x16xi32>
    %1635 = arith.cmpi eq, %53, %1634 : vector<16x16xi32>
    %1636 = arith.andi %1633, %1635 : vector<16x16xi1>
    %cst_529 = arith.constant 0.000000e+00 : f32
    %1637 = vector.broadcast %cst_529 : f32 to vector<16x16xf32>
    %1638 = arith.select %1636, %1631, %1637 : vector<16x16xi1>, vector<16x16xf32>
    %1639 = vector.shape_cast %1638 : vector<16x16xf32> to vector<1x16x16xf32>
    %cst_530 = arith.constant dense<0.000000e+00> : vector<1xf32>
    %1640 = vector.multi_reduction <add>, %1639, %cst_530 [1, 2] : vector<1x16x16xf32> to vector<1xf32>
    %1641 = vector.shape_cast %1640 : vector<1xf32> to vector<1x1x1xf32>
    %1642 = vector.extract %1641[0, 0, 0] : f32 from vector<1x1x1xf32>
    %1643 = math.rsqrt %1642 : f32
    %c6_i32_531 = arith.constant 6 : i32
    %1644 = vector.broadcast %c6_i32_531 : i32 to vector<16x16xi32>
    %1645 = arith.cmpi eq, %53, %1644 : vector<16x16xi32>
    %c6_i32_532 = arith.constant 6 : i32
    %1646 = vector.broadcast %c6_i32_532 : i32 to vector<16x16xi32>
    %1647 = arith.cmpi sge, %52, %1646 : vector<16x16xi32>
    %1648 = arith.andi %1645, %1647 : vector<16x16xi1>
    %cst_533 = arith.constant 0.000000e+00 : f32
    %1649 = vector.broadcast %cst_533 : f32 to vector<16x16xf32>
    %1650 = arith.select %1648, %1631, %1649 : vector<16x16xi1>, vector<16x16xf32>
    %cst_534 = arith.constant dense<0.000000e+00> : vector<16xf32>
    %1651 = vector.multi_reduction <add>, %1650, %cst_534 [1] : vector<16x16xf32> to vector<16xf32>
    %1652 = vector.shape_cast %1651 : vector<16xf32> to vector<16x1xf32>
    %1653 = vector.broadcast %1643 : f32 to vector<16x1xf32>
    %1654 = arith.mulf %1652, %1653 : vector<16x1xf32>
    %c6_i32_535 = arith.constant 6 : i32
    %1655 = vector.broadcast %c6_i32_535 : i32 to vector<16x16xi32>
    %1656 = arith.cmpi eq, %52, %1655 : vector<16x16xi32>
    %c6_i32_536 = arith.constant 6 : i32
    %1657 = vector.broadcast %c6_i32_536 : i32 to vector<16x16xi32>
    %1658 = arith.cmpi sge, %53, %1657 : vector<16x16xi32>
    %1659 = arith.andi %1656, %1658 : vector<16x16xi1>
    %cst_537 = arith.constant 0.000000e+00 : f32
    %1660 = vector.broadcast %cst_537 : f32 to vector<16x16xf32>
    %1661 = arith.select %1659, %1631, %1660 : vector<16x16xi1>, vector<16x16xf32>
    %cst_538 = arith.constant dense<0.000000e+00> : vector<16xf32>
    %1662 = vector.multi_reduction <add>, %1661, %cst_538 [0] : vector<16x16xf32> to vector<16xf32>
    %1663 = vector.shape_cast %1662 : vector<16xf32> to vector<1x16xf32>
    %1664 = vector.broadcast %1643 : f32 to vector<1x16xf32>
    %1665 = arith.mulf %1663, %1664 : vector<1x16xf32>
    %c6_i32_539 = arith.constant 6 : i32
    %1666 = vector.broadcast %c6_i32_539 : i32 to vector<16x16xi32>
    %1667 = arith.cmpi eq, %53, %1666 : vector<16x16xi32>
    %cst_540 = arith.constant 0.000000e+00 : f32
    %1668 = vector.shape_cast %1654 : vector<16x1xf32> to vector<16x1xf32>
    %1669 = vector.broadcast %1668 : vector<16x1xf32> to vector<16x16xf32>
    %1670 = vector.broadcast %cst_540 : f32 to vector<16x16xf32>
    %1671 = arith.select %1667, %1669, %1670 : vector<16x16xi1>, vector<16x16xf32>
    %1672 = arith.addf %1627, %1671 : vector<16x16xf32>
    %1673 = vector.broadcast %1654 : vector<16x1xf32> to vector<16x16xf32>
    %1674 = vector.broadcast %1665 : vector<1x16xf32> to vector<16x16xf32>
    %1675 = arith.mulf %1673, %1674 : vector<16x16xf32>
    %1676 = arith.subf %1631, %1675 : vector<16x16xf32>
    %c7_i32_541 = arith.constant 7 : i32
    %1677 = vector.broadcast %c7_i32_541 : i32 to vector<16x16xi32>
    %1678 = arith.cmpi eq, %52, %1677 : vector<16x16xi32>
    %c7_i32_542 = arith.constant 7 : i32
    %1679 = vector.broadcast %c7_i32_542 : i32 to vector<16x16xi32>
    %1680 = arith.cmpi eq, %53, %1679 : vector<16x16xi32>
    %1681 = arith.andi %1678, %1680 : vector<16x16xi1>
    %cst_543 = arith.constant 0.000000e+00 : f32
    %1682 = vector.broadcast %cst_543 : f32 to vector<16x16xf32>
    %1683 = arith.select %1681, %1676, %1682 : vector<16x16xi1>, vector<16x16xf32>
    %1684 = vector.shape_cast %1683 : vector<16x16xf32> to vector<1x16x16xf32>
    %cst_544 = arith.constant dense<0.000000e+00> : vector<1xf32>
    %1685 = vector.multi_reduction <add>, %1684, %cst_544 [1, 2] : vector<1x16x16xf32> to vector<1xf32>
    %1686 = vector.shape_cast %1685 : vector<1xf32> to vector<1x1x1xf32>
    %1687 = vector.extract %1686[0, 0, 0] : f32 from vector<1x1x1xf32>
    %1688 = math.rsqrt %1687 : f32
    %c7_i32_545 = arith.constant 7 : i32
    %1689 = vector.broadcast %c7_i32_545 : i32 to vector<16x16xi32>
    %1690 = arith.cmpi eq, %53, %1689 : vector<16x16xi32>
    %c7_i32_546 = arith.constant 7 : i32
    %1691 = vector.broadcast %c7_i32_546 : i32 to vector<16x16xi32>
    %1692 = arith.cmpi sge, %52, %1691 : vector<16x16xi32>
    %1693 = arith.andi %1690, %1692 : vector<16x16xi1>
    %cst_547 = arith.constant 0.000000e+00 : f32
    %1694 = vector.broadcast %cst_547 : f32 to vector<16x16xf32>
    %1695 = arith.select %1693, %1676, %1694 : vector<16x16xi1>, vector<16x16xf32>
    %cst_548 = arith.constant dense<0.000000e+00> : vector<16xf32>
    %1696 = vector.multi_reduction <add>, %1695, %cst_548 [1] : vector<16x16xf32> to vector<16xf32>
    %1697 = vector.shape_cast %1696 : vector<16xf32> to vector<16x1xf32>
    %1698 = vector.broadcast %1688 : f32 to vector<16x1xf32>
    %1699 = arith.mulf %1697, %1698 : vector<16x1xf32>
    %c7_i32_549 = arith.constant 7 : i32
    %1700 = vector.broadcast %c7_i32_549 : i32 to vector<16x16xi32>
    %1701 = arith.cmpi eq, %52, %1700 : vector<16x16xi32>
    %c7_i32_550 = arith.constant 7 : i32
    %1702 = vector.broadcast %c7_i32_550 : i32 to vector<16x16xi32>
    %1703 = arith.cmpi sge, %53, %1702 : vector<16x16xi32>
    %1704 = arith.andi %1701, %1703 : vector<16x16xi1>
    %cst_551 = arith.constant 0.000000e+00 : f32
    %1705 = vector.broadcast %cst_551 : f32 to vector<16x16xf32>
    %1706 = arith.select %1704, %1676, %1705 : vector<16x16xi1>, vector<16x16xf32>
    %cst_552 = arith.constant dense<0.000000e+00> : vector<16xf32>
    %1707 = vector.multi_reduction <add>, %1706, %cst_552 [0] : vector<16x16xf32> to vector<16xf32>
    %1708 = vector.shape_cast %1707 : vector<16xf32> to vector<1x16xf32>
    %1709 = vector.broadcast %1688 : f32 to vector<1x16xf32>
    %1710 = arith.mulf %1708, %1709 : vector<1x16xf32>
    %c7_i32_553 = arith.constant 7 : i32
    %1711 = vector.broadcast %c7_i32_553 : i32 to vector<16x16xi32>
    %1712 = arith.cmpi eq, %53, %1711 : vector<16x16xi32>
    %cst_554 = arith.constant 0.000000e+00 : f32
    %1713 = vector.shape_cast %1699 : vector<16x1xf32> to vector<16x1xf32>
    %1714 = vector.broadcast %1713 : vector<16x1xf32> to vector<16x16xf32>
    %1715 = vector.broadcast %cst_554 : f32 to vector<16x16xf32>
    %1716 = arith.select %1712, %1714, %1715 : vector<16x16xi1>, vector<16x16xf32>
    %1717 = arith.addf %1672, %1716 : vector<16x16xf32>
    %1718 = vector.broadcast %1699 : vector<16x1xf32> to vector<16x16xf32>
    %1719 = vector.broadcast %1710 : vector<1x16xf32> to vector<16x16xf32>
    %1720 = arith.mulf %1718, %1719 : vector<16x16xf32>
    %1721 = arith.subf %1676, %1720 : vector<16x16xf32>
    %c8_i32_555 = arith.constant 8 : i32
    %1722 = vector.broadcast %c8_i32_555 : i32 to vector<16x16xi32>
    %1723 = arith.cmpi eq, %52, %1722 : vector<16x16xi32>
    %c8_i32_556 = arith.constant 8 : i32
    %1724 = vector.broadcast %c8_i32_556 : i32 to vector<16x16xi32>
    %1725 = arith.cmpi eq, %53, %1724 : vector<16x16xi32>
    %1726 = arith.andi %1723, %1725 : vector<16x16xi1>
    %cst_557 = arith.constant 0.000000e+00 : f32
    %1727 = vector.broadcast %cst_557 : f32 to vector<16x16xf32>
    %1728 = arith.select %1726, %1721, %1727 : vector<16x16xi1>, vector<16x16xf32>
    %1729 = vector.shape_cast %1728 : vector<16x16xf32> to vector<1x16x16xf32>
    %cst_558 = arith.constant dense<0.000000e+00> : vector<1xf32>
    %1730 = vector.multi_reduction <add>, %1729, %cst_558 [1, 2] : vector<1x16x16xf32> to vector<1xf32>
    %1731 = vector.shape_cast %1730 : vector<1xf32> to vector<1x1x1xf32>
    %1732 = vector.extract %1731[0, 0, 0] : f32 from vector<1x1x1xf32>
    %1733 = math.rsqrt %1732 : f32
    %c8_i32_559 = arith.constant 8 : i32
    %1734 = vector.broadcast %c8_i32_559 : i32 to vector<16x16xi32>
    %1735 = arith.cmpi eq, %53, %1734 : vector<16x16xi32>
    %c8_i32_560 = arith.constant 8 : i32
    %1736 = vector.broadcast %c8_i32_560 : i32 to vector<16x16xi32>
    %1737 = arith.cmpi sge, %52, %1736 : vector<16x16xi32>
    %1738 = arith.andi %1735, %1737 : vector<16x16xi1>
    %cst_561 = arith.constant 0.000000e+00 : f32
    %1739 = vector.broadcast %cst_561 : f32 to vector<16x16xf32>
    %1740 = arith.select %1738, %1721, %1739 : vector<16x16xi1>, vector<16x16xf32>
    %cst_562 = arith.constant dense<0.000000e+00> : vector<16xf32>
    %1741 = vector.multi_reduction <add>, %1740, %cst_562 [1] : vector<16x16xf32> to vector<16xf32>
    %1742 = vector.shape_cast %1741 : vector<16xf32> to vector<16x1xf32>
    %1743 = vector.broadcast %1733 : f32 to vector<16x1xf32>
    %1744 = arith.mulf %1742, %1743 : vector<16x1xf32>
    %c8_i32_563 = arith.constant 8 : i32
    %1745 = vector.broadcast %c8_i32_563 : i32 to vector<16x16xi32>
    %1746 = arith.cmpi eq, %52, %1745 : vector<16x16xi32>
    %c8_i32_564 = arith.constant 8 : i32
    %1747 = vector.broadcast %c8_i32_564 : i32 to vector<16x16xi32>
    %1748 = arith.cmpi sge, %53, %1747 : vector<16x16xi32>
    %1749 = arith.andi %1746, %1748 : vector<16x16xi1>
    %cst_565 = arith.constant 0.000000e+00 : f32
    %1750 = vector.broadcast %cst_565 : f32 to vector<16x16xf32>
    %1751 = arith.select %1749, %1721, %1750 : vector<16x16xi1>, vector<16x16xf32>
    %cst_566 = arith.constant dense<0.000000e+00> : vector<16xf32>
    %1752 = vector.multi_reduction <add>, %1751, %cst_566 [0] : vector<16x16xf32> to vector<16xf32>
    %1753 = vector.shape_cast %1752 : vector<16xf32> to vector<1x16xf32>
    %1754 = vector.broadcast %1733 : f32 to vector<1x16xf32>
    %1755 = arith.mulf %1753, %1754 : vector<1x16xf32>
    %c8_i32_567 = arith.constant 8 : i32
    %1756 = vector.broadcast %c8_i32_567 : i32 to vector<16x16xi32>
    %1757 = arith.cmpi eq, %53, %1756 : vector<16x16xi32>
    %cst_568 = arith.constant 0.000000e+00 : f32
    %1758 = vector.shape_cast %1744 : vector<16x1xf32> to vector<16x1xf32>
    %1759 = vector.broadcast %1758 : vector<16x1xf32> to vector<16x16xf32>
    %1760 = vector.broadcast %cst_568 : f32 to vector<16x16xf32>
    %1761 = arith.select %1757, %1759, %1760 : vector<16x16xi1>, vector<16x16xf32>
    %1762 = arith.addf %1717, %1761 : vector<16x16xf32>
    %1763 = vector.broadcast %1744 : vector<16x1xf32> to vector<16x16xf32>
    %1764 = vector.broadcast %1755 : vector<1x16xf32> to vector<16x16xf32>
    %1765 = arith.mulf %1763, %1764 : vector<16x16xf32>
    %1766 = arith.subf %1721, %1765 : vector<16x16xf32>
    %c9_i32_569 = arith.constant 9 : i32
    %1767 = vector.broadcast %c9_i32_569 : i32 to vector<16x16xi32>
    %1768 = arith.cmpi eq, %52, %1767 : vector<16x16xi32>
    %c9_i32_570 = arith.constant 9 : i32
    %1769 = vector.broadcast %c9_i32_570 : i32 to vector<16x16xi32>
    %1770 = arith.cmpi eq, %53, %1769 : vector<16x16xi32>
    %1771 = arith.andi %1768, %1770 : vector<16x16xi1>
    %cst_571 = arith.constant 0.000000e+00 : f32
    %1772 = vector.broadcast %cst_571 : f32 to vector<16x16xf32>
    %1773 = arith.select %1771, %1766, %1772 : vector<16x16xi1>, vector<16x16xf32>
    %1774 = vector.shape_cast %1773 : vector<16x16xf32> to vector<1x16x16xf32>
    %cst_572 = arith.constant dense<0.000000e+00> : vector<1xf32>
    %1775 = vector.multi_reduction <add>, %1774, %cst_572 [1, 2] : vector<1x16x16xf32> to vector<1xf32>
    %1776 = vector.shape_cast %1775 : vector<1xf32> to vector<1x1x1xf32>
    %1777 = vector.extract %1776[0, 0, 0] : f32 from vector<1x1x1xf32>
    %1778 = math.rsqrt %1777 : f32
    %c9_i32_573 = arith.constant 9 : i32
    %1779 = vector.broadcast %c9_i32_573 : i32 to vector<16x16xi32>
    %1780 = arith.cmpi eq, %53, %1779 : vector<16x16xi32>
    %c9_i32_574 = arith.constant 9 : i32
    %1781 = vector.broadcast %c9_i32_574 : i32 to vector<16x16xi32>
    %1782 = arith.cmpi sge, %52, %1781 : vector<16x16xi32>
    %1783 = arith.andi %1780, %1782 : vector<16x16xi1>
    %cst_575 = arith.constant 0.000000e+00 : f32
    %1784 = vector.broadcast %cst_575 : f32 to vector<16x16xf32>
    %1785 = arith.select %1783, %1766, %1784 : vector<16x16xi1>, vector<16x16xf32>
    %cst_576 = arith.constant dense<0.000000e+00> : vector<16xf32>
    %1786 = vector.multi_reduction <add>, %1785, %cst_576 [1] : vector<16x16xf32> to vector<16xf32>
    %1787 = vector.shape_cast %1786 : vector<16xf32> to vector<16x1xf32>
    %1788 = vector.broadcast %1778 : f32 to vector<16x1xf32>
    %1789 = arith.mulf %1787, %1788 : vector<16x1xf32>
    %c9_i32_577 = arith.constant 9 : i32
    %1790 = vector.broadcast %c9_i32_577 : i32 to vector<16x16xi32>
    %1791 = arith.cmpi eq, %52, %1790 : vector<16x16xi32>
    %c9_i32_578 = arith.constant 9 : i32
    %1792 = vector.broadcast %c9_i32_578 : i32 to vector<16x16xi32>
    %1793 = arith.cmpi sge, %53, %1792 : vector<16x16xi32>
    %1794 = arith.andi %1791, %1793 : vector<16x16xi1>
    %cst_579 = arith.constant 0.000000e+00 : f32
    %1795 = vector.broadcast %cst_579 : f32 to vector<16x16xf32>
    %1796 = arith.select %1794, %1766, %1795 : vector<16x16xi1>, vector<16x16xf32>
    %cst_580 = arith.constant dense<0.000000e+00> : vector<16xf32>
    %1797 = vector.multi_reduction <add>, %1796, %cst_580 [0] : vector<16x16xf32> to vector<16xf32>
    %1798 = vector.shape_cast %1797 : vector<16xf32> to vector<1x16xf32>
    %1799 = vector.broadcast %1778 : f32 to vector<1x16xf32>
    %1800 = arith.mulf %1798, %1799 : vector<1x16xf32>
    %c9_i32_581 = arith.constant 9 : i32
    %1801 = vector.broadcast %c9_i32_581 : i32 to vector<16x16xi32>
    %1802 = arith.cmpi eq, %53, %1801 : vector<16x16xi32>
    %cst_582 = arith.constant 0.000000e+00 : f32
    %1803 = vector.shape_cast %1789 : vector<16x1xf32> to vector<16x1xf32>
    %1804 = vector.broadcast %1803 : vector<16x1xf32> to vector<16x16xf32>
    %1805 = vector.broadcast %cst_582 : f32 to vector<16x16xf32>
    %1806 = arith.select %1802, %1804, %1805 : vector<16x16xi1>, vector<16x16xf32>
    %1807 = arith.addf %1762, %1806 : vector<16x16xf32>
    %1808 = vector.broadcast %1789 : vector<16x1xf32> to vector<16x16xf32>
    %1809 = vector.broadcast %1800 : vector<1x16xf32> to vector<16x16xf32>
    %1810 = arith.mulf %1808, %1809 : vector<16x16xf32>
    %1811 = arith.subf %1766, %1810 : vector<16x16xf32>
    %c10_i32_583 = arith.constant 10 : i32
    %1812 = vector.broadcast %c10_i32_583 : i32 to vector<16x16xi32>
    %1813 = arith.cmpi eq, %52, %1812 : vector<16x16xi32>
    %c10_i32_584 = arith.constant 10 : i32
    %1814 = vector.broadcast %c10_i32_584 : i32 to vector<16x16xi32>
    %1815 = arith.cmpi eq, %53, %1814 : vector<16x16xi32>
    %1816 = arith.andi %1813, %1815 : vector<16x16xi1>
    %cst_585 = arith.constant 0.000000e+00 : f32
    %1817 = vector.broadcast %cst_585 : f32 to vector<16x16xf32>
    %1818 = arith.select %1816, %1811, %1817 : vector<16x16xi1>, vector<16x16xf32>
    %1819 = vector.shape_cast %1818 : vector<16x16xf32> to vector<1x16x16xf32>
    %cst_586 = arith.constant dense<0.000000e+00> : vector<1xf32>
    %1820 = vector.multi_reduction <add>, %1819, %cst_586 [1, 2] : vector<1x16x16xf32> to vector<1xf32>
    %1821 = vector.shape_cast %1820 : vector<1xf32> to vector<1x1x1xf32>
    %1822 = vector.extract %1821[0, 0, 0] : f32 from vector<1x1x1xf32>
    %1823 = math.rsqrt %1822 : f32
    %c10_i32_587 = arith.constant 10 : i32
    %1824 = vector.broadcast %c10_i32_587 : i32 to vector<16x16xi32>
    %1825 = arith.cmpi eq, %53, %1824 : vector<16x16xi32>
    %c10_i32_588 = arith.constant 10 : i32
    %1826 = vector.broadcast %c10_i32_588 : i32 to vector<16x16xi32>
    %1827 = arith.cmpi sge, %52, %1826 : vector<16x16xi32>
    %1828 = arith.andi %1825, %1827 : vector<16x16xi1>
    %cst_589 = arith.constant 0.000000e+00 : f32
    %1829 = vector.broadcast %cst_589 : f32 to vector<16x16xf32>
    %1830 = arith.select %1828, %1811, %1829 : vector<16x16xi1>, vector<16x16xf32>
    %cst_590 = arith.constant dense<0.000000e+00> : vector<16xf32>
    %1831 = vector.multi_reduction <add>, %1830, %cst_590 [1] : vector<16x16xf32> to vector<16xf32>
    %1832 = vector.shape_cast %1831 : vector<16xf32> to vector<16x1xf32>
    %1833 = vector.broadcast %1823 : f32 to vector<16x1xf32>
    %1834 = arith.mulf %1832, %1833 : vector<16x1xf32>
    %c10_i32_591 = arith.constant 10 : i32
    %1835 = vector.broadcast %c10_i32_591 : i32 to vector<16x16xi32>
    %1836 = arith.cmpi eq, %52, %1835 : vector<16x16xi32>
    %c10_i32_592 = arith.constant 10 : i32
    %1837 = vector.broadcast %c10_i32_592 : i32 to vector<16x16xi32>
    %1838 = arith.cmpi sge, %53, %1837 : vector<16x16xi32>
    %1839 = arith.andi %1836, %1838 : vector<16x16xi1>
    %cst_593 = arith.constant 0.000000e+00 : f32
    %1840 = vector.broadcast %cst_593 : f32 to vector<16x16xf32>
    %1841 = arith.select %1839, %1811, %1840 : vector<16x16xi1>, vector<16x16xf32>
    %cst_594 = arith.constant dense<0.000000e+00> : vector<16xf32>
    %1842 = vector.multi_reduction <add>, %1841, %cst_594 [0] : vector<16x16xf32> to vector<16xf32>
    %1843 = vector.shape_cast %1842 : vector<16xf32> to vector<1x16xf32>
    %1844 = vector.broadcast %1823 : f32 to vector<1x16xf32>
    %1845 = arith.mulf %1843, %1844 : vector<1x16xf32>
    %c10_i32_595 = arith.constant 10 : i32
    %1846 = vector.broadcast %c10_i32_595 : i32 to vector<16x16xi32>
    %1847 = arith.cmpi eq, %53, %1846 : vector<16x16xi32>
    %cst_596 = arith.constant 0.000000e+00 : f32
    %1848 = vector.shape_cast %1834 : vector<16x1xf32> to vector<16x1xf32>
    %1849 = vector.broadcast %1848 : vector<16x1xf32> to vector<16x16xf32>
    %1850 = vector.broadcast %cst_596 : f32 to vector<16x16xf32>
    %1851 = arith.select %1847, %1849, %1850 : vector<16x16xi1>, vector<16x16xf32>
    %1852 = arith.addf %1807, %1851 : vector<16x16xf32>
    %1853 = vector.broadcast %1834 : vector<16x1xf32> to vector<16x16xf32>
    %1854 = vector.broadcast %1845 : vector<1x16xf32> to vector<16x16xf32>
    %1855 = arith.mulf %1853, %1854 : vector<16x16xf32>
    %1856 = arith.subf %1811, %1855 : vector<16x16xf32>
    %c11_i32_597 = arith.constant 11 : i32
    %1857 = vector.broadcast %c11_i32_597 : i32 to vector<16x16xi32>
    %1858 = arith.cmpi eq, %52, %1857 : vector<16x16xi32>
    %c11_i32_598 = arith.constant 11 : i32
    %1859 = vector.broadcast %c11_i32_598 : i32 to vector<16x16xi32>
    %1860 = arith.cmpi eq, %53, %1859 : vector<16x16xi32>
    %1861 = arith.andi %1858, %1860 : vector<16x16xi1>
    %cst_599 = arith.constant 0.000000e+00 : f32
    %1862 = vector.broadcast %cst_599 : f32 to vector<16x16xf32>
    %1863 = arith.select %1861, %1856, %1862 : vector<16x16xi1>, vector<16x16xf32>
    %1864 = vector.shape_cast %1863 : vector<16x16xf32> to vector<1x16x16xf32>
    %cst_600 = arith.constant dense<0.000000e+00> : vector<1xf32>
    %1865 = vector.multi_reduction <add>, %1864, %cst_600 [1, 2] : vector<1x16x16xf32> to vector<1xf32>
    %1866 = vector.shape_cast %1865 : vector<1xf32> to vector<1x1x1xf32>
    %1867 = vector.extract %1866[0, 0, 0] : f32 from vector<1x1x1xf32>
    %1868 = math.rsqrt %1867 : f32
    %c11_i32_601 = arith.constant 11 : i32
    %1869 = vector.broadcast %c11_i32_601 : i32 to vector<16x16xi32>
    %1870 = arith.cmpi eq, %53, %1869 : vector<16x16xi32>
    %c11_i32_602 = arith.constant 11 : i32
    %1871 = vector.broadcast %c11_i32_602 : i32 to vector<16x16xi32>
    %1872 = arith.cmpi sge, %52, %1871 : vector<16x16xi32>
    %1873 = arith.andi %1870, %1872 : vector<16x16xi1>
    %cst_603 = arith.constant 0.000000e+00 : f32
    %1874 = vector.broadcast %cst_603 : f32 to vector<16x16xf32>
    %1875 = arith.select %1873, %1856, %1874 : vector<16x16xi1>, vector<16x16xf32>
    %cst_604 = arith.constant dense<0.000000e+00> : vector<16xf32>
    %1876 = vector.multi_reduction <add>, %1875, %cst_604 [1] : vector<16x16xf32> to vector<16xf32>
    %1877 = vector.shape_cast %1876 : vector<16xf32> to vector<16x1xf32>
    %1878 = vector.broadcast %1868 : f32 to vector<16x1xf32>
    %1879 = arith.mulf %1877, %1878 : vector<16x1xf32>
    %c11_i32_605 = arith.constant 11 : i32
    %1880 = vector.broadcast %c11_i32_605 : i32 to vector<16x16xi32>
    %1881 = arith.cmpi eq, %52, %1880 : vector<16x16xi32>
    %c11_i32_606 = arith.constant 11 : i32
    %1882 = vector.broadcast %c11_i32_606 : i32 to vector<16x16xi32>
    %1883 = arith.cmpi sge, %53, %1882 : vector<16x16xi32>
    %1884 = arith.andi %1881, %1883 : vector<16x16xi1>
    %cst_607 = arith.constant 0.000000e+00 : f32
    %1885 = vector.broadcast %cst_607 : f32 to vector<16x16xf32>
    %1886 = arith.select %1884, %1856, %1885 : vector<16x16xi1>, vector<16x16xf32>
    %cst_608 = arith.constant dense<0.000000e+00> : vector<16xf32>
    %1887 = vector.multi_reduction <add>, %1886, %cst_608 [0] : vector<16x16xf32> to vector<16xf32>
    %1888 = vector.shape_cast %1887 : vector<16xf32> to vector<1x16xf32>
    %1889 = vector.broadcast %1868 : f32 to vector<1x16xf32>
    %1890 = arith.mulf %1888, %1889 : vector<1x16xf32>
    %c11_i32_609 = arith.constant 11 : i32
    %1891 = vector.broadcast %c11_i32_609 : i32 to vector<16x16xi32>
    %1892 = arith.cmpi eq, %53, %1891 : vector<16x16xi32>
    %cst_610 = arith.constant 0.000000e+00 : f32
    %1893 = vector.shape_cast %1879 : vector<16x1xf32> to vector<16x1xf32>
    %1894 = vector.broadcast %1893 : vector<16x1xf32> to vector<16x16xf32>
    %1895 = vector.broadcast %cst_610 : f32 to vector<16x16xf32>
    %1896 = arith.select %1892, %1894, %1895 : vector<16x16xi1>, vector<16x16xf32>
    %1897 = arith.addf %1852, %1896 : vector<16x16xf32>
    %1898 = vector.broadcast %1879 : vector<16x1xf32> to vector<16x16xf32>
    %1899 = vector.broadcast %1890 : vector<1x16xf32> to vector<16x16xf32>
    %1900 = arith.mulf %1898, %1899 : vector<16x16xf32>
    %1901 = arith.subf %1856, %1900 : vector<16x16xf32>
    %c12_i32_611 = arith.constant 12 : i32
    %1902 = vector.broadcast %c12_i32_611 : i32 to vector<16x16xi32>
    %1903 = arith.cmpi eq, %52, %1902 : vector<16x16xi32>
    %c12_i32_612 = arith.constant 12 : i32
    %1904 = vector.broadcast %c12_i32_612 : i32 to vector<16x16xi32>
    %1905 = arith.cmpi eq, %53, %1904 : vector<16x16xi32>
    %1906 = arith.andi %1903, %1905 : vector<16x16xi1>
    %cst_613 = arith.constant 0.000000e+00 : f32
    %1907 = vector.broadcast %cst_613 : f32 to vector<16x16xf32>
    %1908 = arith.select %1906, %1901, %1907 : vector<16x16xi1>, vector<16x16xf32>
    %1909 = vector.shape_cast %1908 : vector<16x16xf32> to vector<1x16x16xf32>
    %cst_614 = arith.constant dense<0.000000e+00> : vector<1xf32>
    %1910 = vector.multi_reduction <add>, %1909, %cst_614 [1, 2] : vector<1x16x16xf32> to vector<1xf32>
    %1911 = vector.shape_cast %1910 : vector<1xf32> to vector<1x1x1xf32>
    %1912 = vector.extract %1911[0, 0, 0] : f32 from vector<1x1x1xf32>
    %1913 = math.rsqrt %1912 : f32
    %c12_i32_615 = arith.constant 12 : i32
    %1914 = vector.broadcast %c12_i32_615 : i32 to vector<16x16xi32>
    %1915 = arith.cmpi eq, %53, %1914 : vector<16x16xi32>
    %c12_i32_616 = arith.constant 12 : i32
    %1916 = vector.broadcast %c12_i32_616 : i32 to vector<16x16xi32>
    %1917 = arith.cmpi sge, %52, %1916 : vector<16x16xi32>
    %1918 = arith.andi %1915, %1917 : vector<16x16xi1>
    %cst_617 = arith.constant 0.000000e+00 : f32
    %1919 = vector.broadcast %cst_617 : f32 to vector<16x16xf32>
    %1920 = arith.select %1918, %1901, %1919 : vector<16x16xi1>, vector<16x16xf32>
    %cst_618 = arith.constant dense<0.000000e+00> : vector<16xf32>
    %1921 = vector.multi_reduction <add>, %1920, %cst_618 [1] : vector<16x16xf32> to vector<16xf32>
    %1922 = vector.shape_cast %1921 : vector<16xf32> to vector<16x1xf32>
    %1923 = vector.broadcast %1913 : f32 to vector<16x1xf32>
    %1924 = arith.mulf %1922, %1923 : vector<16x1xf32>
    %c12_i32_619 = arith.constant 12 : i32
    %1925 = vector.broadcast %c12_i32_619 : i32 to vector<16x16xi32>
    %1926 = arith.cmpi eq, %52, %1925 : vector<16x16xi32>
    %c12_i32_620 = arith.constant 12 : i32
    %1927 = vector.broadcast %c12_i32_620 : i32 to vector<16x16xi32>
    %1928 = arith.cmpi sge, %53, %1927 : vector<16x16xi32>
    %1929 = arith.andi %1926, %1928 : vector<16x16xi1>
    %cst_621 = arith.constant 0.000000e+00 : f32
    %1930 = vector.broadcast %cst_621 : f32 to vector<16x16xf32>
    %1931 = arith.select %1929, %1901, %1930 : vector<16x16xi1>, vector<16x16xf32>
    %cst_622 = arith.constant dense<0.000000e+00> : vector<16xf32>
    %1932 = vector.multi_reduction <add>, %1931, %cst_622 [0] : vector<16x16xf32> to vector<16xf32>
    %1933 = vector.shape_cast %1932 : vector<16xf32> to vector<1x16xf32>
    %1934 = vector.broadcast %1913 : f32 to vector<1x16xf32>
    %1935 = arith.mulf %1933, %1934 : vector<1x16xf32>
    %c12_i32_623 = arith.constant 12 : i32
    %1936 = vector.broadcast %c12_i32_623 : i32 to vector<16x16xi32>
    %1937 = arith.cmpi eq, %53, %1936 : vector<16x16xi32>
    %cst_624 = arith.constant 0.000000e+00 : f32
    %1938 = vector.shape_cast %1924 : vector<16x1xf32> to vector<16x1xf32>
    %1939 = vector.broadcast %1938 : vector<16x1xf32> to vector<16x16xf32>
    %1940 = vector.broadcast %cst_624 : f32 to vector<16x16xf32>
    %1941 = arith.select %1937, %1939, %1940 : vector<16x16xi1>, vector<16x16xf32>
    %1942 = arith.addf %1897, %1941 : vector<16x16xf32>
    %1943 = vector.broadcast %1924 : vector<16x1xf32> to vector<16x16xf32>
    %1944 = vector.broadcast %1935 : vector<1x16xf32> to vector<16x16xf32>
    %1945 = arith.mulf %1943, %1944 : vector<16x16xf32>
    %1946 = arith.subf %1901, %1945 : vector<16x16xf32>
    %c13_i32_625 = arith.constant 13 : i32
    %1947 = vector.broadcast %c13_i32_625 : i32 to vector<16x16xi32>
    %1948 = arith.cmpi eq, %52, %1947 : vector<16x16xi32>
    %c13_i32_626 = arith.constant 13 : i32
    %1949 = vector.broadcast %c13_i32_626 : i32 to vector<16x16xi32>
    %1950 = arith.cmpi eq, %53, %1949 : vector<16x16xi32>
    %1951 = arith.andi %1948, %1950 : vector<16x16xi1>
    %cst_627 = arith.constant 0.000000e+00 : f32
    %1952 = vector.broadcast %cst_627 : f32 to vector<16x16xf32>
    %1953 = arith.select %1951, %1946, %1952 : vector<16x16xi1>, vector<16x16xf32>
    %1954 = vector.shape_cast %1953 : vector<16x16xf32> to vector<1x16x16xf32>
    %cst_628 = arith.constant dense<0.000000e+00> : vector<1xf32>
    %1955 = vector.multi_reduction <add>, %1954, %cst_628 [1, 2] : vector<1x16x16xf32> to vector<1xf32>
    %1956 = vector.shape_cast %1955 : vector<1xf32> to vector<1x1x1xf32>
    %1957 = vector.extract %1956[0, 0, 0] : f32 from vector<1x1x1xf32>
    %1958 = math.rsqrt %1957 : f32
    %c13_i32_629 = arith.constant 13 : i32
    %1959 = vector.broadcast %c13_i32_629 : i32 to vector<16x16xi32>
    %1960 = arith.cmpi eq, %53, %1959 : vector<16x16xi32>
    %c13_i32_630 = arith.constant 13 : i32
    %1961 = vector.broadcast %c13_i32_630 : i32 to vector<16x16xi32>
    %1962 = arith.cmpi sge, %52, %1961 : vector<16x16xi32>
    %1963 = arith.andi %1960, %1962 : vector<16x16xi1>
    %cst_631 = arith.constant 0.000000e+00 : f32
    %1964 = vector.broadcast %cst_631 : f32 to vector<16x16xf32>
    %1965 = arith.select %1963, %1946, %1964 : vector<16x16xi1>, vector<16x16xf32>
    %cst_632 = arith.constant dense<0.000000e+00> : vector<16xf32>
    %1966 = vector.multi_reduction <add>, %1965, %cst_632 [1] : vector<16x16xf32> to vector<16xf32>
    %1967 = vector.shape_cast %1966 : vector<16xf32> to vector<16x1xf32>
    %1968 = vector.broadcast %1958 : f32 to vector<16x1xf32>
    %1969 = arith.mulf %1967, %1968 : vector<16x1xf32>
    %c13_i32_633 = arith.constant 13 : i32
    %1970 = vector.broadcast %c13_i32_633 : i32 to vector<16x16xi32>
    %1971 = arith.cmpi eq, %52, %1970 : vector<16x16xi32>
    %c13_i32_634 = arith.constant 13 : i32
    %1972 = vector.broadcast %c13_i32_634 : i32 to vector<16x16xi32>
    %1973 = arith.cmpi sge, %53, %1972 : vector<16x16xi32>
    %1974 = arith.andi %1971, %1973 : vector<16x16xi1>
    %cst_635 = arith.constant 0.000000e+00 : f32
    %1975 = vector.broadcast %cst_635 : f32 to vector<16x16xf32>
    %1976 = arith.select %1974, %1946, %1975 : vector<16x16xi1>, vector<16x16xf32>
    %cst_636 = arith.constant dense<0.000000e+00> : vector<16xf32>
    %1977 = vector.multi_reduction <add>, %1976, %cst_636 [0] : vector<16x16xf32> to vector<16xf32>
    %1978 = vector.shape_cast %1977 : vector<16xf32> to vector<1x16xf32>
    %1979 = vector.broadcast %1958 : f32 to vector<1x16xf32>
    %1980 = arith.mulf %1978, %1979 : vector<1x16xf32>
    %c13_i32_637 = arith.constant 13 : i32
    %1981 = vector.broadcast %c13_i32_637 : i32 to vector<16x16xi32>
    %1982 = arith.cmpi eq, %53, %1981 : vector<16x16xi32>
    %cst_638 = arith.constant 0.000000e+00 : f32
    %1983 = vector.shape_cast %1969 : vector<16x1xf32> to vector<16x1xf32>
    %1984 = vector.broadcast %1983 : vector<16x1xf32> to vector<16x16xf32>
    %1985 = vector.broadcast %cst_638 : f32 to vector<16x16xf32>
    %1986 = arith.select %1982, %1984, %1985 : vector<16x16xi1>, vector<16x16xf32>
    %1987 = arith.addf %1942, %1986 : vector<16x16xf32>
    %1988 = vector.broadcast %1969 : vector<16x1xf32> to vector<16x16xf32>
    %1989 = vector.broadcast %1980 : vector<1x16xf32> to vector<16x16xf32>
    %1990 = arith.mulf %1988, %1989 : vector<16x16xf32>
    %1991 = arith.subf %1946, %1990 : vector<16x16xf32>
    %c14_i32_639 = arith.constant 14 : i32
    %1992 = vector.broadcast %c14_i32_639 : i32 to vector<16x16xi32>
    %1993 = arith.cmpi eq, %52, %1992 : vector<16x16xi32>
    %c14_i32_640 = arith.constant 14 : i32
    %1994 = vector.broadcast %c14_i32_640 : i32 to vector<16x16xi32>
    %1995 = arith.cmpi eq, %53, %1994 : vector<16x16xi32>
    %1996 = arith.andi %1993, %1995 : vector<16x16xi1>
    %cst_641 = arith.constant 0.000000e+00 : f32
    %1997 = vector.broadcast %cst_641 : f32 to vector<16x16xf32>
    %1998 = arith.select %1996, %1991, %1997 : vector<16x16xi1>, vector<16x16xf32>
    %1999 = vector.shape_cast %1998 : vector<16x16xf32> to vector<1x16x16xf32>
    %cst_642 = arith.constant dense<0.000000e+00> : vector<1xf32>
    %2000 = vector.multi_reduction <add>, %1999, %cst_642 [1, 2] : vector<1x16x16xf32> to vector<1xf32>
    %2001 = vector.shape_cast %2000 : vector<1xf32> to vector<1x1x1xf32>
    %2002 = vector.extract %2001[0, 0, 0] : f32 from vector<1x1x1xf32>
    %2003 = math.rsqrt %2002 : f32
    %c14_i32_643 = arith.constant 14 : i32
    %2004 = vector.broadcast %c14_i32_643 : i32 to vector<16x16xi32>
    %2005 = arith.cmpi eq, %53, %2004 : vector<16x16xi32>
    %c14_i32_644 = arith.constant 14 : i32
    %2006 = vector.broadcast %c14_i32_644 : i32 to vector<16x16xi32>
    %2007 = arith.cmpi sge, %52, %2006 : vector<16x16xi32>
    %2008 = arith.andi %2005, %2007 : vector<16x16xi1>
    %cst_645 = arith.constant 0.000000e+00 : f32
    %2009 = vector.broadcast %cst_645 : f32 to vector<16x16xf32>
    %2010 = arith.select %2008, %1991, %2009 : vector<16x16xi1>, vector<16x16xf32>
    %cst_646 = arith.constant dense<0.000000e+00> : vector<16xf32>
    %2011 = vector.multi_reduction <add>, %2010, %cst_646 [1] : vector<16x16xf32> to vector<16xf32>
    %2012 = vector.shape_cast %2011 : vector<16xf32> to vector<16x1xf32>
    %2013 = vector.broadcast %2003 : f32 to vector<16x1xf32>
    %2014 = arith.mulf %2012, %2013 : vector<16x1xf32>
    %c14_i32_647 = arith.constant 14 : i32
    %2015 = vector.broadcast %c14_i32_647 : i32 to vector<16x16xi32>
    %2016 = arith.cmpi eq, %52, %2015 : vector<16x16xi32>
    %c14_i32_648 = arith.constant 14 : i32
    %2017 = vector.broadcast %c14_i32_648 : i32 to vector<16x16xi32>
    %2018 = arith.cmpi sge, %53, %2017 : vector<16x16xi32>
    %2019 = arith.andi %2016, %2018 : vector<16x16xi1>
    %cst_649 = arith.constant 0.000000e+00 : f32
    %2020 = vector.broadcast %cst_649 : f32 to vector<16x16xf32>
    %2021 = arith.select %2019, %1991, %2020 : vector<16x16xi1>, vector<16x16xf32>
    %cst_650 = arith.constant dense<0.000000e+00> : vector<16xf32>
    %2022 = vector.multi_reduction <add>, %2021, %cst_650 [0] : vector<16x16xf32> to vector<16xf32>
    %2023 = vector.shape_cast %2022 : vector<16xf32> to vector<1x16xf32>
    %2024 = vector.broadcast %2003 : f32 to vector<1x16xf32>
    %2025 = arith.mulf %2023, %2024 : vector<1x16xf32>
    %c14_i32_651 = arith.constant 14 : i32
    %2026 = vector.broadcast %c14_i32_651 : i32 to vector<16x16xi32>
    %2027 = arith.cmpi eq, %53, %2026 : vector<16x16xi32>
    %cst_652 = arith.constant 0.000000e+00 : f32
    %2028 = vector.shape_cast %2014 : vector<16x1xf32> to vector<16x1xf32>
    %2029 = vector.broadcast %2028 : vector<16x1xf32> to vector<16x16xf32>
    %2030 = vector.broadcast %cst_652 : f32 to vector<16x16xf32>
    %2031 = arith.select %2027, %2029, %2030 : vector<16x16xi1>, vector<16x16xf32>
    %2032 = arith.addf %1987, %2031 : vector<16x16xf32>
    %2033 = vector.broadcast %2014 : vector<16x1xf32> to vector<16x16xf32>
    %2034 = vector.broadcast %2025 : vector<1x16xf32> to vector<16x16xf32>
    %2035 = arith.mulf %2033, %2034 : vector<16x16xf32>
    %2036 = arith.subf %1991, %2035 : vector<16x16xf32>
    %c15_i32_653 = arith.constant 15 : i32
    %2037 = vector.broadcast %c15_i32_653 : i32 to vector<16x16xi32>
    %2038 = arith.cmpi eq, %52, %2037 : vector<16x16xi32>
    %c15_i32_654 = arith.constant 15 : i32
    %2039 = vector.broadcast %c15_i32_654 : i32 to vector<16x16xi32>
    %2040 = arith.cmpi eq, %53, %2039 : vector<16x16xi32>
    %2041 = arith.andi %2038, %2040 : vector<16x16xi1>
    %cst_655 = arith.constant 0.000000e+00 : f32
    %2042 = vector.broadcast %cst_655 : f32 to vector<16x16xf32>
    %2043 = arith.select %2041, %2036, %2042 : vector<16x16xi1>, vector<16x16xf32>
    %2044 = vector.shape_cast %2043 : vector<16x16xf32> to vector<1x16x16xf32>
    %cst_656 = arith.constant dense<0.000000e+00> : vector<1xf32>
    %2045 = vector.multi_reduction <add>, %2044, %cst_656 [1, 2] : vector<1x16x16xf32> to vector<1xf32>
    %2046 = vector.shape_cast %2045 : vector<1xf32> to vector<1x1x1xf32>
    %2047 = vector.extract %2046[0, 0, 0] : f32 from vector<1x1x1xf32>
    %2048 = math.rsqrt %2047 : f32
    %c15_i32_657 = arith.constant 15 : i32
    %2049 = vector.broadcast %c15_i32_657 : i32 to vector<16x16xi32>
    %2050 = arith.cmpi eq, %53, %2049 : vector<16x16xi32>
    %c15_i32_658 = arith.constant 15 : i32
    %2051 = vector.broadcast %c15_i32_658 : i32 to vector<16x16xi32>
    %2052 = arith.cmpi sge, %52, %2051 : vector<16x16xi32>
    %2053 = arith.andi %2050, %2052 : vector<16x16xi1>
    %cst_659 = arith.constant 0.000000e+00 : f32
    %2054 = vector.broadcast %cst_659 : f32 to vector<16x16xf32>
    %2055 = arith.select %2053, %2036, %2054 : vector<16x16xi1>, vector<16x16xf32>
    %cst_660 = arith.constant dense<0.000000e+00> : vector<16xf32>
    %2056 = vector.multi_reduction <add>, %2055, %cst_660 [1] : vector<16x16xf32> to vector<16xf32>
    %2057 = vector.shape_cast %2056 : vector<16xf32> to vector<16x1xf32>
    %2058 = vector.broadcast %2048 : f32 to vector<16x1xf32>
    %2059 = arith.mulf %2057, %2058 : vector<16x1xf32>
    %c15_i32_661 = arith.constant 15 : i32
    %2060 = vector.broadcast %c15_i32_661 : i32 to vector<16x16xi32>
    %2061 = arith.cmpi eq, %53, %2060 : vector<16x16xi32>
    %cst_662 = arith.constant 0.000000e+00 : f32
    %2062 = vector.shape_cast %2059 : vector<16x1xf32> to vector<16x1xf32>
    %2063 = vector.broadcast %2062 : vector<16x1xf32> to vector<16x16xf32>
    %2064 = vector.broadcast %cst_662 : f32 to vector<16x16xf32>
    %2065 = arith.select %2061, %2063, %2064 : vector<16x16xi1>, vector<16x16xf32>
    %2066 = arith.addf %2032, %2065 : vector<16x16xf32>
    %c0_663 = arith.constant 0 : index
    %c0_664 = arith.constant 0 : index
    %2067 = vector.load %arg3[%c0_663, %c0_664] : memref<16x16xf32, #tpu.memory_space<vmem>>, vector<16x16xf32>
    %cst_665 = arith.constant dense<0.000000e+00> : vector<16x16xf32>
    %2068 = tpu.matmul %2067, %2066, %cst_665 {dimension_numbers = #tpu.dot_dimension_numbers<[1], [1], [0], [0], [0, 0, 1, 0], [], []>} : vector<16x16xf32>, vector<16x16xf32>, vector<16x16xf32> -> vector<16x16xf32>
    %2069 = vector.broadcast %1354 : vector<1x16xf32> to vector<16x16xf32>
    %2070 = arith.addf %2068, %2069 : vector<16x16xf32>
    %c0_666 = arith.constant 0 : index
    %c0_667 = arith.constant 0 : index
    %2071 = vector.load %arg6[%c0_666, %c0_667] : memref<16x16xf32, #tpu.memory_space<vmem>>, vector<16x16xf32>
    tpu.vector_store %arg6[%c0_666, %c0_667], %2070 {strides = array<i32>} : memref<16x16xf32, #tpu.memory_space<vmem>>, vector<16x16xf32>,
    return
  }
}

</mosaic_0001>

<bundles_post_ra>
// kernel: meta_gp_forward.1
= control target key start
LH: loop header
LB: loop body
LE: loop exit
PB: predicated region body
PF: predicated region fallthrough
CT: control target
= control target key end

     0   :  { %11 = vsyncpa [#allocation3], 0  ;;  %s7302_s0 = inlined_call_operand.vmem [shape: f32[16,8], index: 0, kind: input, shape index: {}]   ;;  %s7303_s1 = inlined_call_operand.vmem [shape: f32[16,8], index: 1, kind: input, shape index: {}]   ;;  %s7304_s2 = inlined_call_operand.vmem [shape: f32[16,1], index: 2, kind: input, shape index: {}]   ;;  %s7305_s3 = inlined_call_operand.vmem [shape: f32[16,16], index: 3, kind: input, shape index: {}]   ;;  %s7306_s4 = inlined_call_operand.hbm [shape: f32[96,32], index: 4, kind: input, shape index: {}]   ;;  %s7307_s5 = inlined_call_operand.vmem [shape: f32[4], index: 5, kind: input, shape index: {}]   ;;  %s7308_s6 = inlined_call_operand.hbm [shape: f32[16,16], index: 6, kind: output, shape index: {}]  }
   0x1   :  { %12 = vsyncpa [#allocation5], 0 }
   0x2   :  { %13 = vsyncpa [#allocation4], 0  ;;  %s5675_s21 = smov [#allocation2]   ;;  %s40_s25 = sshll.u32 %s7307_s5, 4  ;;  %s41_s25 = int_to_ptr.vmem [resolvable:$true] %s40_s25 }
   0x3   :  { %s27_s22 = sshll.u32 %s5675_s21, 4  ;;  %s28_s22 = int_to_ptr.vmem [resolvable:$true] %s27_s22 }
   0x4   :  { %s5625_s26 = scalar_lea.vmem %s28_s22, 1536  ;;  %p5630_p1 = scmp.lt.s32.totalorder %s28_s22, %s28_s22 }
   0x5   :  { %p5626_p0 = scmp.ne.s32.totalorder %s28_s22, %s5625_s26  ;;  %p5631_p2 = scmp.lt.s32.totalorder %s5625_s26, %s5625_s26 }
   0x7   :  { %p5632_p3 = por %p5631_p2, %p5630_p1 }
   0x9   :  { %p5633_p4 = pnand %p5632_p3, %p5626_p0 }
   0xb   :  { %5636 = shalt.err (!%p5633_p4)
}
   0xc   :  { %s5676_s27 = smov 128   ;;  %s5677_s28 = smov 8  }
   0xd   :  { %33 = dma.hbm_to_vmem [thread:$0]  %s7306_s4, 1536, %s28_s22, [#allocation3], %s5676_s27, %s5676_s27, %s5677_s28  }
   0xe   :  { %s5637_s7 = scalar_lea.vmem %s41_s25, 16  ;;  %p5642_p6 = scmp.lt.s32.totalorder %s41_s25, %s41_s25 }
   0xf   :  { %p5638_p5 = scmp.ne.s32.totalorder %s41_s25, %s5637_s7  ;;  %p5643_p7 = scmp.lt.s32.totalorder %s5637_s7, %s5637_s7 }
  0x11   :  { %p5644_p8 = por %p5643_p7, %p5642_p6 }
  0x13   :  { %p5645_p9 = pnand %p5644_p8, %p5638_p5 }
  0x15   :  { %5648 = shalt.err (!%p5645_p9)
}
  0x16   :  { %s5678_s5 = smov [#allocation6]  }
  0x17   :  { %43 = dma.vmem_to_smem %s41_s25, 16, %s5678_s5, [#allocation5]  }
  0x18   :  { %5669 = dma.done.wait [#allocation3], 1536  }
  0x19   :  { %5670 = vsyncadd [#allocation3], 4294965760 }
  0x1a   :  { %5671 = dma.done.wait [#allocation5], 16  }
  0x1b   :  { %5672 = vsyncadd [#allocation5], 4294967280 }
  0x1c   :  { %50 = sfence }
  0x1d   :  { %v63_v0 = vld [vmem:[#allocation2] sm:$0xff]  ;;  %vm69_vm0 = vcmask 64512   ;;  %v60_v2 = vld [vmem:[%s7302_s0 + $0x8] sm:$0xff]  ;;  %v172_v7 = vld [vmem:[#allocation2 + $0x18] sm:$0xff]  ;;  %vm180_vm1 = vcmask 261120   ;;  %vm392_vm2 = vcmask 31744  }
  0x1e   :  { %v59_v1 = vld [vmem:[%s7302_s0] sm:$0xff]  ;;  %5154 = vmatprep.subr.mxu1 %v63_v0  ;;  %v62_v4 = vld [vmem:[%s7303_s1 + $0x8] sm:$0xff]  ;;  %v171_v8 = vld [vmem:[#allocation2 + $0x10] sm:$0xff]  ;;  %s51_s0 = sld [smem:[#allocation6]]  ;;  %v7358_v62 = vmov 0.0   ;;  %vm7316_vm7 = vcmask 130048  }
  0x1f   :  { %5156 = vmatprep.mubr.msk.f32.mxu1 %vm69_vm0, %v59_v1  ;;  %v61_v3 = vld [vmem:[%s7303_s1] sm:$0xff]  ;;  %5155 = vmatpush3.msra.mxu1 %v63_v0  ;;  %v174_v5 = vld [vmem:[#allocation2 + $0x28] sm:$0xff]  ;;  %v285_v22 = vld [vmem:[#allocation2 + $0x50] sm:$0xff]  ;;  %v534_v0 = vlaneseq  ;;  %s5774_s17 = sld [smem:[#allocation6 + $0x2]] }
  0x20   :  { %5157 = vmatmul.mubr.msk.f32.vlgmr.msra.gmra.mxu1 %vm69_vm0, %v60_v2  ;;  %5162 = vmatprep.subr.mxu1 %v174_v5  ;;  %v173_v6 = vld [vmem:[#allocation2 + $0x20] sm:$0xff]  ;;  %v4992_v9 = vld [vmem:[#allocation2 + $0x8] ss:$0 sm:$0xff]  ;;  %v282_v25 = vld [vmem:[#allocation2 + $0x38] sm:$0xff]  ;;  %s4989_s18 = sld [smem:[#allocation6 + $0x1]] }
  0x21   :  { %5159 = vmatprep.mubr.msk.f32.mxu1 %vm69_vm0, %v61_v3  ;;  %5163 = vmatpush3.msra.mxu1 %v174_v5  ;;  %v284_v23 = vld [vmem:[#allocation2 + $0x48] sm:$0xff]  ;;  %v283_v24 = vld [vmem:[#allocation2 + $0x40] sm:$0xff]  ;;  %v4997_v26 = vld [vmem:[#allocation2 + $0x30] ss:$0 sm:$0xff]  ;;  %v5768_v2 = vshrl.u32 %v534_v0, 7 }
  0x22   :  { %5164 = vmatprep.subr.mxu1 %v173_v6  ;;  %5176 = vmatprep.subr.mxu0 %v285_v22  ;;  %v5002_v40 = vld [vmem:[#allocation2 + $0x58] ss:$0 sm:$0xff] }
  0x23   :  { %5165 = vmatpush3.msra.mxu1 %v173_v6  ;;  %5177 = vmatpush3.msra.mxu0 %v285_v22  ;;  %vm7310_vm4 = vcmp.eq.s32.totalorder %v5768_v2, 0  ;;  %vm7311_vm8 = vcmp.eq.s32.totalorder %v5768_v2, 1  ;;  %vm672_vm10 = vcmp.ge.s32.totalorder %v5768_v2, 1  ;;  %vm7309_vm15 = vcmp.eq.s32.totalorder %v5768_v2, 2 }
  0x24   :  { %5160 = vmatmul.mubr.msk.f32.gmra.mxu1 %vm69_vm0, %v62_v4  ;;  %5166 = vmatprep.subr.mxu1 %v172_v7  ;;  %s55_s1 = smul.f32 %s51_s0, %s51_s0  ;;  %v5771_v4 = vsub.s32 0, %v5768_v2 }
  0x25   :  { %5167 = vmatpush3.msra.mxu1 %v172_v7  ;;  %5178 = vmatprep.subr.mxu0 %v284_v23 }
  0x26   :  { %5168 = vmatprep.subr.mxu1 %v171_v8  ;;  %5179 = vmatpush3.msra.mxu0 %v284_v23  ;;  %v56_v56 = vstv %s55_s1 }
  0x27   :  { %5169 = vmatpush3.msra.mxu1 %v171_v8  ;;  %5180 = vmatprep.subr.mxu0 %v283_v24  ;;  %5511 = vrcp.f32 %v56_v56 }
  0x28   :  { %5181 = vmatpush3.msra.mxu0 %v283_v24 }
  0x29   :  { %5182 = vmatprep.subr.mxu0 %v282_v25 }
  0x2a   :  { %5183 = vmatpush3.msra.mxu0 %v282_v25 }
  0x2b   :  { %5204 = vmatprep.subr.mxu0 %v7358_v62 }
  0x34   :  { %v5512_v57 = vpop.eup %5511 }
  0x35   :  { %5340 = vpush %v5512_v57 }
  0x66   :  { %s5341_s15 = spop %5340 }
  0x67   :  { %s554_s16 = smul.f32 -0.5, %s5341_s15 }
  0xe0   :  { %v5158_v10 = vpop.f32.mrf.mxu1 }
  0xe1   :  { %v154_v11 = vadd.f32 %v5158_v10, %v4992_v9 }
  0xe2   :  { %v148_v12 = vpop.f32.mrf.mxu1 }
  0xe3   :  { %v149_v13 = vadd.f32 %v4992_v9, %v148_v12  ;;  %v168_v17 = vmax.f32 %v154_v11, 0.0 }
  0xe4   :  { %v5161_v14 = vpop.f32.mrf.mxu1 }
  0xe5   :  { %v167_v15 = vmax.f32 %v149_v13, 0.0  ;;  %v164_v16 = vadd.f32 %v5161_v14, %v4992_v9 }
  0xe6   :  { %v158_v18 = vpop.f32.mrf.mxu1 }
  0xe7   :  { %v159_v19 = vadd.f32 %v4992_v9, %v158_v18  ;;  %5170 = vmatprep.mubr.msk.f32.mxu1 %vm180_vm1, %v167_v15  ;;  %v170_v20 = vmax.f32 %v164_v16, 0.0 }
  0xe8   :  { %5171 = vmatmul.mubr.msk.f32.vlgmr.msra.gmra.mxu1 %vm180_vm1, %v168_v17 }
  0xe9   :  { %v169_v21 = vmax.f32 %v159_v19, 0.0 }
  0xeb   :  { %5173 = vmatprep.mubr.msk.f32.mxu1 %vm180_vm1, %v169_v21 }
  0xec   :  { %5174 = vmatmul.mubr.msk.f32.gmra.mxu1 %vm180_vm1, %v170_v20  ;;  %v555_v20 = vstv %s554_s16 }
 0x1a8   :  { %v5172_v27 = vpop.f32.mrf.mxu1 }
 0x1a9   :  { %v265_v28 = vadd.f32 %v5172_v27, %v4997_v26 }
 0x1aa   :  { %v259_v29 = vpop.f32.mrf.mxu1 }
 0x1ab   :  { %v260_v30 = vadd.f32 %v4997_v26, %v259_v29  ;;  %v279_v33 = vmax.f32 %v265_v28, 0.0 }
 0x1ac   :  { %v5175_v31 = vpop.f32.mrf.mxu1 }
 0x1ad   :  { %v278_v32 = vmax.f32 %v260_v30, 0.0  ;;  %v275_v34 = vadd.f32 %v5175_v31, %v4997_v26 }
 0x1ae   :  { %v269_v35 = vpop.f32.mrf.mxu1 }
 0x1af   :  { %v270_v36 = vadd.f32 %v4997_v26, %v269_v35  ;;  %5184 = vmatprep.mubr.msk.f32.mxu0 %vm180_vm1, %v278_v32  ;;  %v281_v38 = vmax.f32 %v275_v34, 0.0  ;;  %v584_v35 = vstv %s5774_s17 }
 0x1b0   :  { %5185 = vmatmul.mubr.msk.f32.vlgmr.msra.gmra.mxu0 %vm180_vm1, %v279_v33  ;;  %v5776_v33 = vand.u32 127, %v534_v0 }
 0x1b1   :  { %v280_v37 = vmax.f32 %v270_v36, 0.0  ;;  %5205 = vmatpush3.msra.mxu0 %v7358_v62  ;;  %v568_v36 = vstv %s4989_s18 }
 0x1b2   :  { %5209 = vmatprep.subr.mxu0 %v7358_v62  ;;  %vm578_vm3 = vcmp.eq.s32.totalorder %v5768_v2, %v5776_v33  ;;  %vm7315_vm5 = vcmp.eq.s32.totalorder %v5776_v33, 0  ;;  %vm7314_vm9 = vcmp.eq.s32.totalorder %v5776_v33, 1  ;;  %vm687_vm13 = vcmp.ge.s32.totalorder %v5776_v33, 1 }
 0x1b3   :  { %5187 = vmatprep.mubr.msk.f32.mxu0 %vm180_vm1, %v280_v37  ;;  %v5015_v34 = vsel %vm578_vm3, 1.0, %v7358_v62  ;;  %vm5794_vm6 = vmand %vm7310_vm4, %vm7315_vm5  ;;  %vm7312_vm0 = vcmp.eq.s32.totalorder %v5776_v33, 2 }
 0x1b4   :  { %5188 = vmatmul.mubr.msk.f32.gmra.mxu0 %vm180_vm1, %v281_v38  ;;  %v5784_v37 = vmul.f32 %v5015_v34, %v584_v35  ;;  %vm5829_vm11 = vmand %vm7311_vm8, %vm7314_vm9  ;;  %vm732_vm1 = vcmp.ge.s32.totalorder %v5768_v2, 2 }
 0x1b5   :  { %vm5835_vm12 = vmand %vm7314_vm9, %vm672_vm10  ;;  %vm747_vm10 = vcmp.ge.s32.totalorder %v5776_v33, 2 }
 0x1b6   :  { %vm5848_vm14 = vmand %vm7311_vm8, %vm687_vm13 }
 0x1b7   :  { %vm5879_vm3 = vmand %vm7312_vm0, %vm732_vm1  ;;  %vm7313_vm1 = vcmp.eq.s32.totalorder %v5768_v2, 3 }
 0x1b8   :  { %vm5892_vm13 = vmand %vm7309_vm15, %vm747_vm10  ;;  %vm7317_vm10 = vcmp.eq.s32.totalorder %v5776_v33, 3 }
 0x270   :  { %v5186_v39 = vpop.f32.mrf.mxu0 }
 0x271   :  { %v375_v43 = vadd.f32 %v5186_v39, %v5002_v40 }
 0x272   :  { %v369_v41 = vpop.f32.mrf.mxu0 }
 0x273   :  { %v370_v42 = vadd.f32 %v5002_v40, %v369_v41  ;;  %v389_v50 = vmul.f32 %v375_v43, %v375_v43 }
 0x274   :  { %v5189_v44 = vpop.f32.mrf.mxu0 }
 0x275   :  { %v385_v45 = vadd.f32 %v5189_v44, %v5002_v40  ;;  %5198 = vmatprep.mubr.msk.f32.mxu1 %vm392_vm2, %v370_v42  ;;  %v388_v46 = vmul.f32 %v370_v42, %v370_v42  ;;  %v396_v54 = vsel %vm392_vm2, %v389_v50, 0.0 }
 0x276   :  { %v379_v47 = vpop.f32.mrf.mxu0 }
 0x277   :  { %v380_v48 = vadd.f32 %v5002_v40, %v379_v47  ;;  %5190 = vmatprep.subr.msk.mxu1 %vm392_vm2, %v385_v45  ;;  %v393_v49 = vsel %vm392_vm2, %v388_v46, 0.0  ;;  %v391_v53 = vmul.f32 %v385_v45, %v385_v45 }
 0x278   :  { %5191 = vmatpush3.xpose.msk.msra.mxu1 %vm392_vm2, %v385_v45  ;;  %394 = vadd.xlane.f32.xlu0 %v393_v49 }
 0x279   :  { %5192 = vmatprep.subr.msk.mxu1 %vm392_vm2, %v380_v48  ;;  %v390_v51 = vmul.f32 %v380_v48, %v380_v48  ;;  %v402_v55 = vsel %vm392_vm2, %v391_v53, 0.0 }
 0x27b   :  { %v399_v52 = vsel %vm392_vm2, %v390_v51, 0.0 }
 0x27c   :  { %5193 = vmatpush3.xpose.msk.msra.mxu1 %vm392_vm2, %v380_v48  ;;  %400 = vadd.xlane.f32.xlu1 %v399_v52 }
 0x27d   :  { %397 = vadd.xlane.f32.xlu0 %v396_v54  ;;  %5194 = vmatprep.subr.msk.mxu1 %vm392_vm2, %v375_v43 }
 0x280   :  { %5195 = vmatpush3.xpose.msk.msra.mxu1 %vm392_vm2, %v375_v43  ;;  %403 = vadd.xlane.f32.xlu1 %v402_v55 }
 0x281   :  { %5196 = vmatprep.subr.msk.mxu1 %vm392_vm2, %v370_v42 }
 0x284   :  { %5197 = vmatpush3.xpose.msk.msra.mxu1 %vm392_vm2, %v370_v42 }
 0x285   :  { %5224 = vmatprep.subr.mxu1 %v7358_v62 }
 0x287   :  { %5199 = vmatmul.mubr.msk.f32.vlgmr.msra.gmra.mxu1 %vm392_vm2, %v375_v43 }
 0x288   :  { %5201 = vmatprep.mubr.msk.f32.mxu1 %vm392_vm2, %v380_v48 }
 0x28b   :  { %5202 = vmatmul.mubr.msk.f32.gmra.mxu1 %vm392_vm2, %v385_v45  ;;  %vm5873_vm2 = vmand %vm7309_vm15, %vm7312_vm0  ;;  %vm792_vm15 = vcmp.ge.s32.totalorder %v5768_v2, 3 }
 0x28c   :  { %vm5921_vm8 = vmand %vm7317_vm10, %vm792_vm15  ;;  %vm807_vm15 = vcmp.ge.s32.totalorder %v5776_v33, 3 }
 0x301   :  { %v395_v58 = vpop.xlane.xlu0 %394 }
 0x302   :  { %502 = vxpose.xlu0.b32.start [1/4] (short) (narrow) %v395_v58, 8 }
 0x305   :  { %v401_v60 = vpop.xlane.xlu1 %400 }
 0x306   :  { %v398_v59 = vpop.xlane.xlu0 %397 }
 0x307   :  { %503 = vxpose.xlu0.b32.cont [2/4] (short) (narrow) %v398_v59, 8 }
 0x309   :  { %v404_v61 = vpop.xlane.xlu1 %403 }
 0x30b   :  { %504 = vxpose.xlu0.b32.cont [3/4] (short) (narrow) %v401_v60, 8 }
 0x30f   :  { %505 = vxpose.xlu0.b32.end [4/4] (short) (narrow) %v404_v61, 8 }
 0x347   :  { %v5200_v63 = vpop.f32.mrf.mxu1 }
 0x348   :  { %v543_v8 = vmul.f32 2.0, %v5200_v63 }
 0x349   :  { %v483_v1 = vpop.f32.mrf.mxu1 }
 0x34a   :  { %v542_v9 = vmul.f32 2.0, %v483_v1 }
 0x34b   :  { %v5203_v3 = vpop.f32.mrf.mxu1 }
 0x34c   :  { %v545_v10 = vmul.f32 2.0, %v5203_v3 }
 0x34d   :  { %v493_v5 = vpop.f32.mrf.mxu1 }
 0x34e   :  { %v544_v11 = vmul.f32 2.0, %v493_v5 }
 0x37f   :  { %v518_v6 = vpop.trf.xlu0 }
 0x380   :  { %v537_v7 = vrot.slane %v518_v6, %v5771_v4 }
 0x382   :  { %v538_v12 = vadd.f32 %v537_v7, %v395_v58  ;;  %v539_v13 = vadd.f32 %v537_v7, %v398_v59  ;;  %v540_v14 = vadd.f32 %v537_v7, %v401_v60  ;;  %v541_v15 = vadd.f32 %v537_v7, %v404_v61 }
 0x384   :  { %v546_v16 = vsub.f32 %v538_v12, %v542_v9  ;;  %v547_v17 = vsub.f32 %v539_v13, %v543_v8  ;;  %v548_v18 = vsub.f32 %v540_v14, %v544_v11  ;;  %v549_v19 = vsub.f32 %v541_v15, %v545_v10 }
 0x385   :  { %v7419_v15 = vmov 0 }
 0x386   :  { %v550_v21 = vmax.f32 %v546_v16, 0.0  ;;  %v551_v22 = vmax.f32 %v547_v17, 0.0  ;;  %v552_v23 = vmax.f32 %v548_v18, 0.0  ;;  %v553_v24 = vmax.f32 %v549_v19, 0.0 }
 0x387   :  { %v7420_v15 = vsel %vm5835_vm12, 4294967295, %v7419_v15 }
 0x388   :  { %v556_v25 = vmul.f32 %v555_v20, %v550_v21  ;;  %v557_v26 = vmul.f32 %v555_v20, %v551_v22  ;;  %v558_v27 = vmul.f32 %v555_v20, %v552_v23  ;;  %v559_v28 = vmul.f32 %v555_v20, %v553_v24 }
 0x38a   :  { %v560_v29 = vmul.f32 1.442695, %v556_v25  ;;  %v562_v30 = vmul.f32 1.442695, %v557_v26  ;;  %v564_v31 = vmul.f32 1.442695, %v558_v27 }
 0x38b   :  { %v566_v32 = vmul.f32 1.442695, %v559_v28 }
 0x38c   :  { %5513 = vpow2.f32 %v560_v29  ;;  %v7421_v29 = vmov 0 }
 0x38d   :  { %5515 = vpow2.f32 %v562_v30  ;;  %v7422_v29 = vsel %vm5848_vm14, 4294967295, %v7421_v29 }
 0x38e   :  { %5517 = vpow2.f32 %v564_v31 }
 0x38f   :  { %5519 = vpow2.f32 %v566_v32 }
 0x399   :  { %v5514_v38 = vpop.eup %5513 }
 0x39a   :  { %v5516_v39 = vpop.eup %5515  ;;  %v5788_v40 = vmul.f32 %v5514_v38, %v568_v36 }
 0x39b   :  { %v5518_v41 = vpop.eup %5517  ;;  %v5798_v43 = vmul.f32 %v5516_v39, %v568_v36 }
 0x39c   :  { %v5520_v44 = vpop.eup %5519  ;;  %v587_v45 = vadd.f32 %v5784_v37, %v5788_v40  ;;  %v5802_v46 = vmul.f32 %v5518_v41, %v568_v36 }
 0x39d   :  { %v5804_v47 = vmul.f32 %v5520_v44, %v568_v36 }
 0x39e   :  { %v594_v48 = vsel %vm5794_vm6, %v587_v45, 0.0  ;;  %v616_v50 = vsel %vm7315_vm5, %v587_v45, 0.0  ;;  %v630_v61 = vsel %vm7310_vm4, %v587_v45, 0.0  ;;  %vm5915_vm4 = vmand %vm7313_vm1, %vm7317_vm10 }
 0x39f   :  { %v597_v49 = vsel %vm7316_vm7, %v594_v48, 0.0  ;;  %v618_v51 = vsel %vm7316_vm7, %v616_v50, 0.0  ;;  %v632_v63 = vsel %vm7316_vm7, %v630_v61, 0.0 }
 0x3a0   :  { %600 = vadd.xlane.f32.xlu1 %v597_v49  ;;  %v635_v0 = vrot.slane %v632_v63, 4 }
 0x3a2   :  { %v636_v1 = vadd.f32 %v635_v0, %v632_v63 }
 0x3a4   :  { %619 = vadd.xlane.f32.xlu1 %v618_v51  ;;  %v637_v3 = vrot.slane %v636_v1, 2 }
 0x3a6   :  { %v638_v5 = vadd.f32 %v637_v3, %v636_v1 }
 0x3a8   :  { %v639_v6 = vrot.slane %v638_v5, 1 }
 0x3aa   :  { %v640_v7 = vadd.f32 %v639_v6, %v638_v5 }
 0x429   :  { %v601_v52 = vpop.xlane.xlu1 %600 }
 0x42a   :  { %v602_v53 = vrot.slane %v601_v52, 4 }
 0x42c   :  { %v603_v54 = vadd.f32 %v602_v53, %v601_v52 }
 0x42d   :  { %v620_v8 = vpop.xlane.xlu1 %619 }
 0x42e   :  { %v604_v55 = vrot.slane %v603_v54, 2 }
 0x430   :  { %v605_v56 = vadd.f32 %v604_v55, %v603_v54 }
 0x432   :  { %v606_v57 = vrot.slane %v605_v56, 1 }
 0x434   :  { %v607_v58 = vadd.f32 %v606_v57, %v605_v56  ;;  %v7425_v56 = vmov 0 }
 0x435   :  { %v7426_v56 = vsel %vm5879_vm3, 4294967295, %v7425_v56 }
 0x436   :  { %5342 = vpush %v607_v58 }
 0x467   :  { %s5343_s19 = spop %5342 }
 0x468   :  { %v609_v59 = vstv %s5343_s19 }
 0x469   :  { %5521 = vrsqrt.f32 %v609_v59 }
 0x476   :  { %v5522_v60 = vpop.eup %5521 }
 0x477   :  { %5344 = vpush %v5522_v60 }
 0x4a8   :  { %s5345_s20 = spop %5344 }
 0x4a9   :  { %v5815_v9 = vstv %s5345_s20 }
 0x4aa   :  { %v625_v10 = vmul.f32 %v5815_v9, %v620_v8  ;;  %v5819_v11 = vmul.f32 %v640_v7, %v5815_v9 }
 0x4ac   :  { %v646_v12 = vmul.f32 %v5819_v11, %v625_v10  ;;  %v642_v50 = vsel %vm7315_vm5, %v625_v10, 0.0  ;;  %v7427_v10 = vmov 0  ;;  %vm852_vm5 = vcmp.ge.s32.totalorder %v5768_v2, 4 }
 0x4ad   :  { %v7428_v10 = vsel %vm5892_vm13, 4294967295, %v7427_v10 }
 0x4ae   :  { %v648_v14 = vsub.f32 %v587_v45, %v646_v12 }
 0x4b0   :  { %v655_v16 = vsel %vm5829_vm11, %v648_v14, 0.0  ;;  %v676_v18 = vsel %vm5835_vm12, %v648_v14, 0.0  ;;  %v690_v30 = vsel %vm5848_vm14, %v648_v14, 0.0 }
 0x4b1   :  { %v657_v17 = vsel %vm7316_vm7, %v655_v16, 0.0  ;;  %v678_v19 = vsel %vm7316_vm7, %v676_v18, 0.0  ;;  %v692_v31 = vsel %vm7316_vm7, %v690_v30, 0.0 }
 0x4b2   :  { %660 = vadd.xlane.f32.xlu1 %v657_v17  ;;  %v695_v32 = vrot.slane %v692_v31, 4 }
 0x4b4   :  { %v696_v34 = vadd.f32 %v695_v32, %v692_v31  ;;  %v7431_v32 = vmov 0 }
 0x4b5   :  { %v7432_v32 = vsel %vm5921_vm8, 4294967295, %v7431_v32 }
 0x4b6   :  { %679 = vadd.xlane.f32.xlu1 %v678_v19  ;;  %v697_v36 = vrot.slane %v696_v34, 2 }
 0x4b8   :  { %v698_v38 = vadd.f32 %v697_v36, %v696_v34 }
 0x4ba   :  { %v699_v39 = vrot.slane %v698_v38, 1 }
 0x4bc   :  { %v700_v41 = vadd.f32 %v699_v39, %v698_v38 }
 0x53b   :  { %v661_v20 = vpop.xlane.xlu1 %660 }
 0x53c   :  { %v662_v21 = vrot.slane %v661_v20, 4 }
 0x53e   :  { %v663_v22 = vadd.f32 %v662_v21, %v661_v20 }
 0x53f   :  { %v680_v44 = vpop.xlane.xlu1 %679 }
 0x540   :  { %v664_v23 = vrot.slane %v663_v22, 2 }
 0x542   :  { %v665_v24 = vadd.f32 %v664_v23, %v663_v22 }
 0x544   :  { %v666_v25 = vrot.slane %v665_v24, 1 }
 0x546   :  { %v667_v26 = vadd.f32 %v666_v25, %v665_v24 }
 0x548   :  { %5346 = vpush %v667_v26 }
 0x579   :  { %s5347_s21 = spop %5346 }
 0x57a   :  { %v669_v27 = vstv %s5347_s21 }
 0x57b   :  { %5523 = vrsqrt.f32 %v669_v27 }
 0x588   :  { %v5524_v28 = vpop.eup %5523 }
 0x589   :  { %5348 = vpush %v5524_v28 }
 0x5ba   :  { %s5349_s22 = spop %5348 }
 0x5bb   :  { %v5855_v45 = vstv %s5349_s22 }
 0x5bc   :  { %v685_v48 = vmul.f32 %v5855_v45, %v680_v44  ;;  %v5859_v49 = vmul.f32 %v700_v41, %v5855_v45 }
 0x5be   :  { %v702_v51 = vsel %vm7314_vm9, %v685_v48, 0.0  ;;  %v706_v52 = vmul.f32 %v5859_v49, %v685_v48  ;;  %vm7319_vm9 = vcmp.eq.s32.totalorder %v5776_v33, 4 }
 0x5bf   :  { %v704_v53 = vadd.f32 %v702_v51, %v642_v50 }
 0x5c0   :  { %v708_v55 = vsub.f32 %v648_v14, %v706_v52 }
 0x5c2   :  { %v715_v57 = vsel %vm5873_vm2, %v708_v55, 0.0  ;;  %v736_v59 = vsel %vm5879_vm3, %v708_v55, 0.0  ;;  %v750_v12 = vsel %vm5892_vm13, %v708_v55, 0.0 }
 0x5c3   :  { %v717_v58 = vsel %vm7316_vm7, %v715_v57, 0.0  ;;  %v738_v60 = vsel %vm7316_vm7, %v736_v59, 0.0  ;;  %v752_v14 = vsel %vm7316_vm7, %v750_v12, 0.0 }
 0x5c4   :  { %720 = vadd.xlane.f32.xlu1 %v717_v58  ;;  %v755_v16 = vrot.slane %v752_v14, 4  ;;  %v7433_v58 = vmov 0 }
 0x5c6   :  { %v756_v17 = vadd.f32 %v755_v16, %v752_v14 }
 0x5c8   :  { %739 = vadd.xlane.f32.xlu1 %v738_v60  ;;  %v757_v18 = vrot.slane %v756_v17, 2 }
 0x5ca   :  { %v758_v19 = vadd.f32 %v757_v18, %v756_v17 }
 0x5cc   :  { %v759_v20 = vrot.slane %v758_v19, 1 }
 0x5ce   :  { %v760_v21 = vadd.f32 %v759_v20, %v758_v19 }
 0x64d   :  { %v721_v61 = vpop.xlane.xlu1 %720 }
 0x64e   :  { %v722_v63 = vrot.slane %v721_v61, 4 }
 0x650   :  { %v723_v0 = vadd.f32 %v722_v63, %v721_v61 }
 0x651   :  { %v740_v22 = vpop.xlane.xlu1 %739 }
 0x652   :  { %v724_v1 = vrot.slane %v723_v0, 2 }
 0x654   :  { %v725_v3 = vadd.f32 %v724_v1, %v723_v0 }
 0x656   :  { %v726_v5 = vrot.slane %v725_v3, 1 }
 0x658   :  { %v727_v6 = vadd.f32 %v726_v5, %v725_v3  ;;  %v5942_v5 = vadd.s32 8, %v5768_v2 }
 0x65a   :  { %5350 = vpush %v727_v6 }
 0x68b   :  { %s5351_s23 = spop %5350 }
 0x68c   :  { %v729_v7 = vstv %s5351_s23 }
 0x68d   :  { %5525 = vrsqrt.f32 %v729_v7 }
 0x69a   :  { %v5526_v8 = vpop.eup %5525 }
 0x69b   :  { %5352 = vpush %v5526_v8 }
 0x6cc   :  { %s5353_s24 = spop %5352 }
 0x6cd   :  { %v5899_v23 = vstv %s5353_s24 }
 0x6ce   :  { %v745_v24 = vmul.f32 %v5899_v23, %v740_v22  ;;  %v5903_v25 = vmul.f32 %v760_v21, %v5899_v23 }
 0x6d0   :  { %v762_v26 = vsel %vm7312_vm0, %v745_v24, 0.0  ;;  %v766_v27 = vmul.f32 %v5903_v25, %v745_v24  ;;  %vm5934_vm0 = vmand %vm7313_vm1, %vm807_vm15  ;;  %vm579_vm15 = vcmp.eq.s32.totalorder %v5942_v5, %v5776_v33  ;;  %vm7318_vm1 = vcmp.eq.s32.totalorder %v5768_v2, 4 }
 0x6d1   :  { %v764_v28 = vadd.f32 %v762_v26, %v704_v53  ;;  %v7434_v58 = vsel %vm5934_vm0, 4294967295, %v7433_v58  ;;  %v5016_v16 = vsel %vm579_vm15, 1.0, %v7358_v62  ;;  %vm5973_vm15 = vmand %vm7319_vm9, %vm852_vm5  ;;  %v7437_v24 = vmov 0 }
 0x6d2   :  { %v768_v31 = vsub.f32 %v708_v55, %v766_v27  ;;  %v5969_v22 = vmul.f32 %v5016_v16, %v584_v35  ;;  %v7438_v24 = vsel %vm5973_vm15, 4294967295, %v7437_v24  ;;  %vm7441_vm5 = vcmp.eq.s32.totalorder %v5776_v33, 0 }
 0x6d4   :  { %v775_v34 = vsel %vm5915_vm4, %v768_v31, 0.0  ;;  %v796_v38 = vsel %vm5921_vm8, %v768_v31, 0.0  ;;  %v810_v59 = vsel %vm5934_vm0, %v768_v31, 0.0  ;;  %vm7450_vm0 = vcmask 130048  }
 0x6d5   :  { %v777_v36 = vsel %vm7316_vm7, %v775_v34, 0.0  ;;  %v798_v39 = vsel %vm7316_vm7, %v796_v38, 0.0  ;;  %v812_v60 = vsel %vm7316_vm7, %v810_v59, 0.0  ;;  %vm5963_vm7 = vmand %vm7318_vm1, %vm7319_vm9 }
 0x6d6   :  { %780 = vadd.xlane.f32.xlu1 %v777_v36  ;;  %v815_v61 = vrot.slane %v812_v60, 4  ;;  %vm7456_vm13 = vmmov %vm7450_vm0 }
 0x6d8   :  { %v816_v63 = vadd.f32 %v815_v61, %v812_v60 }
 0x6da   :  { %799 = vadd.xlane.f32.xlu1 %v798_v39  ;;  %v817_v0 = vrot.slane %v816_v63, 2 }
 0x6dc   :  { %v818_v1 = vadd.f32 %v817_v0, %v816_v63 }
 0x6de   :  { %v819_v3 = vrot.slane %v818_v1, 1 }
 0x6e0   :  { %v820_v6 = vadd.f32 %v819_v3, %v818_v1 }
 0x75f   :  { %v781_v41 = vpop.xlane.xlu1 %780 }
 0x760   :  { %v782_v44 = vrot.slane %v781_v41, 4 }
 0x762   :  { %v783_v48 = vadd.f32 %v782_v44, %v781_v41 }
 0x763   :  { %v800_v7 = vpop.xlane.xlu1 %799 }
 0x764   :  { %v784_v50 = vrot.slane %v783_v48, 2 }
 0x766   :  { %v785_v51 = vadd.f32 %v784_v50, %v783_v48 }
 0x768   :  { %v786_v52 = vrot.slane %v785_v51, 1 }
 0x76a   :  { %v787_v53 = vadd.f32 %v786_v52, %v785_v51 }
 0x76c   :  { %5354 = vpush %v787_v53 }
 0x79d   :  { %s5355_s25 = spop %5354 }
 0x79e   :  { %v789_v55 = vstv %s5355_s25  ;;  %s5681_s25 = smov 112  }
 0x79f   :  { %5527 = vrsqrt.f32 %v789_v55  ;;  %v7444_v55 = vmov 0 }
 0x7ac   :  { %v5528_v57 = vpop.eup %5527 }
 0x7ad   :  { %5356 = vpush %v5528_v57 }
 0x7de   :  { %s5357_s26 = spop %5356 }
 0x7df   :  { %v5946_v8 = vstv %s5357_s26 }
 0x7e0   :  { %v805_v12 = vmul.f32 %v5946_v8, %v800_v7  ;;  %v5950_v14 = vmul.f32 %v820_v6, %v5946_v8 }
 0x7e2   :  { %v822_v17 = vsel %vm7317_vm10, %v805_v12, 0.0  ;;  %v826_v18 = vmul.f32 %v5950_v14, %v805_v12  ;;  %vm7439_vm10 = vcmask 130048  }
 0x7e3   :  { %v824_v19 = vadd.f32 %v822_v17, %v764_v28  ;;  %vm7440_vm1 = vmmov %vm7439_vm10 }
 0x7e4   :  { %v828_v21 = vsub.f32 %v768_v31, %v826_v18  ;;  %v588_v31 = vadd.f32 %v5969_v22, %v5798_v43  ;;  %vm7442_vm9 = vmmov %vm7440_vm1 }
 0x7e6   :  { %v835_v26 = vsel %vm5963_vm7, %v828_v21, 0.0  ;;  %v856_v28 = vsel %vm5973_vm15, %v828_v21, 0.0  ;;  %v617_v34 = vsel %vm7441_vm5, %v588_v31, 0.0  ;;  %vm912_vm15 = vcmp.ge.s32.totalorder %v5768_v2, 5 }
 0x7e7   :  { %v837_v27 = vsel %vm7439_vm10, %v835_v26, 0.0  ;;  %v858_v35 = vsel %vm7440_vm1, %v856_v28, 0.0  ;;  %v621_v36 = vsel %vm7442_vm9, %v617_v34, 0.0  ;;  %vm867_vm1 = vcmp.ge.s32.totalorder %v5776_v33, 4 }
 0x7e8   :  { %840 = vadd.xlane.f32.xlu1 %v837_v27  ;;  %vm7443_vm10 = vcmp.eq.s32.totalorder %v5768_v2, 4 }
 0x7e9   :  { %vm5991_vm5 = vmand %vm7443_vm10, %vm867_vm1  ;;  %vm7324_vm1 = vcmp.eq.s32.totalorder %v5768_v2, 5  ;;  %vm7326_vm10 = vcmp.eq.s32.totalorder %v5776_v33, 5 }
 0x7ea   :  { %v7445_v55 = vsel %vm5991_vm5, 4294967295, %v7444_v55  ;;  %v870_v57 = vsel %vm5991_vm5, %v828_v21, 0.0  ;;  %vm6015_vm5 = vmand %vm7324_vm1, %vm7326_vm10 }
 0x7eb   :  { %v872_v59 = vsel %vm7442_vm9, %v870_v57, 0.0  ;;  %vm7446_vm9 = vcmp.eq.s32.totalorder %v5776_v33, 4  ;;  %vm6027_vm8 = vmand %vm7326_vm10, %vm912_vm15 }
 0x7ec   :  { %859 = vadd.xlane.f32.xlu1 %v858_v35  ;;  %v875_v60 = vrot.slane %v872_v59, 4  ;;  %v7447_v35 = vmov 0  ;;  %vm7455_vm1 = vmmov %vm7450_vm0 }
 0x7ed   :  { %v7448_v35 = vsel %vm6015_vm5, 4294967295, %v7447_v35 }
 0x7ee   :  { %v876_v61 = vadd.f32 %v875_v60, %v872_v59  ;;  %7449 = vst [vmem:[#allocation11_spill] sm:$0xff] %v7448_v35 }
 0x7f0   :  { %622 = vadd.xlane.f32.xlu1 %v621_v36  ;;  %v877_v63 = vrot.slane %v876_v61, 2 }
 0x7f2   :  { %v878_v1 = vadd.f32 %v877_v63, %v876_v61 }
 0x7f4   :  { %v879_v6 = vrot.slane %v878_v1, 1 }
 0x7f6   :  { %v880_v12 = vadd.f32 %v879_v6, %v878_v1 }
 0x871   :  { %v841_v38 = vpop.xlane.xlu1 %840 }
 0x872   :  { %v842_v39 = vrot.slane %v841_v38, 4 }
 0x874   :  { %v843_v41 = vadd.f32 %v842_v39, %v841_v38  ;;  %v7452_v39 = vmov 0 }
 0x875   :  { %v860_v0 = vpop.xlane.xlu1 %859  ;;  %v7453_v39 = vsel %vm6027_vm8, 4294967295, %v7452_v39 }
 0x876   :  { %v844_v44 = vrot.slane %v843_v41, 2  ;;  %7454 = vst [vmem:[#allocation12_spill] sm:$0xff] %v7453_v39 }
 0x878   :  { %v845_v48 = vadd.f32 %v844_v44, %v843_v41 }
 0x879   :  { %v623_v3 = vpop.xlane.xlu1 %622 }
 0x87a   :  { %v846_v50 = vrot.slane %v845_v48, 1  ;;  %v626_v7 = vmul.f32 %v5815_v9, %v623_v3 }
 0x87c   :  { %v847_v51 = vadd.f32 %v846_v50, %v845_v48  ;;  %v647_v17 = vmul.f32 %v5819_v11, %v626_v7 }
 0x87e   :  { %5358 = vpush %v847_v51  ;;  %v649_v34 = vsub.f32 %v588_v31, %v647_v17 }
 0x8af   :  { %s5359_s29 = spop %5358 }
 0x8b0   :  { %v849_v52 = vstv %s5359_s29 }
 0x8b1   :  { %5529 = vrsqrt.f32 %v849_v52 }
 0x8be   :  { %v5530_v53 = vpop.eup %5529 }
 0x8bf   :  { %5360 = vpush %v5530_v53 }
 0x8f0   :  { %s5361_s30 = spop %5360 }
 0x8f1   :  { %v5999_v16 = vstv %s5361_s30 }
 0x8f2   :  { %v865_v18 = vmul.f32 %v5999_v16, %v860_v0  ;;  %v6005_v26 = vmul.f32 %v880_v12, %v5999_v16 }
 0x8f4   :  { %v882_v27 = vsel %vm7446_vm9, %v865_v18, 0.0  ;;  %v886_v9 = vmul.f32 %v6005_v26, %v865_v18  ;;  %vm7451_vm9 = vcmp.eq.s32.totalorder %v5776_v33, 1 }
 0x8f5   :  { %v884_v28 = vadd.f32 %v882_v27, %v824_v19  ;;  %v677_v19 = vsel %vm7451_vm9, %v649_v34, 0.0  ;;  %vm7458_vm15 = vmmov %vm7451_vm9  ;;  %vm927_vm9 = vcmp.ge.s32.totalorder %v5776_v33, 5 }
 0x8f6   :  { %v888_v11 = vsub.f32 %v828_v21, %v886_v9  ;;  %v681_v21 = vsel %vm7455_vm1, %v677_v19, 0.0 }
 0x8f8   :  { %v895_v36 = vsel %vm6015_vm5, %v888_v11, 0.0  ;;  %v916_v31 = vsel %vm6027_vm8, %v888_v11, 0.0  ;;  %vm7477_vm8 = vcmask 130048  }
 0x8f9   :  { %v897_v38 = vsel %vm7450_vm0, %v895_v36, 0.0  ;;  %v918_v41 = vsel %vm7456_vm13, %v916_v31, 0.0  ;;  %vm7457_vm0 = vcmp.eq.s32.totalorder %v5776_v33, 0  ;;  %vm7459_vm13 = vcmp.eq.s32.totalorder %v5776_v33, 2 }
 0x8fa   :  { %900 = vadd.xlane.f32.xlu1 %v897_v38  ;;  %v643_v57 = vsel %vm7457_vm0, %v626_v7, 0.0  ;;  %vm7460_vm0 = vcmp.eq.s32.totalorder %v5768_v2, 5 }
 0x8fe   :  { %682 = vadd.xlane.f32.xlu1 %v681_v21 }
 0x902   :  { %919 = vadd.xlane.f32.xlu1 %v918_v41 }
 0x983   :  { %v901_v44 = vpop.xlane.xlu1 %900 }
 0x984   :  { %v902_v48 = vrot.slane %v901_v44, 4 }
 0x986   :  { %v903_v50 = vadd.f32 %v902_v48, %v901_v44 }
 0x987   :  { %v683_v51 = vpop.xlane.xlu1 %682 }
 0x988   :  { %v686_v52 = vmul.f32 %v5855_v45, %v683_v51  ;;  %v904_v53 = vrot.slane %v903_v50, 2 }
 0x98a   :  { %v703_v59 = vsel %vm7458_vm15, %v686_v52, 0.0  ;;  %v707_v60 = vmul.f32 %v5859_v49, %v686_v52  ;;  %v905_v61 = vadd.f32 %v904_v53, %v903_v50  ;;  %vm6047_vm15 = vmand %vm7460_vm0, %vm927_vm9  ;;  %v7461_v49 = vmov 0 }
 0x98b   :  { %v705_v63 = vadd.f32 %v703_v59, %v643_v57  ;;  %v7462_v49 = vsel %vm6047_vm15, 4294967295, %v7461_v49  ;;  %v930_v17 = vsel %vm6047_vm15, %v888_v11, 0.0  ;;  %v920_v21 = vpop.xlane.xlu1 %919  ;;  %vm7328_vm9 = vcmp.eq.s32.totalorder %v5776_v33, 6 }
 0x98c   :  { %v906_v0 = vrot.slane %v905_v61, 1  ;;  %v709_v1 = vsub.f32 %v649_v34, %v707_v60  ;;  %7463 = vst [vmem:[#allocation13_spill] sm:$0xff] %v7462_v49  ;;  %v7465_v52 = vmov 0  ;;  %vm7476_vm15 = vcmp.eq.s32.totalorder %v5776_v33, 4 }
 0x98e   :  { %v907_v3 = vadd.f32 %v906_v0, %v905_v61  ;;  %v737_v6 = vsel %vm7459_vm13, %v709_v1, 0.0  ;;  %vm7464_vm13 = vmmov %vm7455_vm1 }
 0x98f   :  { %v741_v12 = vsel %vm7455_vm1, %v737_v6, 0.0  ;;  %v932_v18 = vsel %vm7464_vm13, %v930_v17, 0.0  ;;  %vm7327_vm1 = vcmp.eq.s32.totalorder %v5768_v2, 6 }
 0x990   :  { %5362 = vpush %v907_v3  ;;  %742 = vadd.xlane.f32.xlu1 %v741_v12  ;;  %v935_v27 = vrot.slane %v932_v18, 4  ;;  %vm6071_vm0 = vmand %vm7327_vm1, %vm7328_vm9  ;;  %vm7469_vm1 = vcmp.eq.s32.totalorder %v5776_v33, 3 }
 0x991   :  { %v7466_v52 = vsel %vm6071_vm0, 4294967295, %v7465_v52  ;;  %vm7470_vm9 = vmmov %vm7464_vm13 }
 0x992   :  { %v936_v9 = vadd.f32 %v935_v27, %v932_v18  ;;  %7467 = vst [vmem:[#allocation14_spill] sm:$0xff] %v7466_v52 }
 0x994   :  { %v937_v34 = vrot.slane %v936_v9, 2 }
 0x996   :  { %v938_v36 = vadd.f32 %v937_v34, %v936_v9 }
 0x998   :  { %v939_v38 = vrot.slane %v938_v36, 1 }
 0x99a   :  { %v940_v19 = vadd.f32 %v939_v38, %v938_v36 }
 0x9c1   :  { %s5363_s7 = spop %5362 }
 0x9c2   :  { %v909_v45 = vstv %s5363_s7 }
 0x9c3   :  { %5531 = vrsqrt.f32 %v909_v45 }
 0x9d0   :  { %v5532_v7 = vpop.eup %5531 }
 0x9d1   :  { %5364 = vpush %v5532_v7 }
 0xa02   :  { %s5365_s5 = spop %5364 }
 0xa03   :  { %v6054_v31 = vstv %s5365_s5 }
 0xa04   :  { %v925_v41 = vmul.f32 %v6054_v31, %v920_v21  ;;  %v6058_v44 = vmul.f32 %v940_v19, %v6054_v31  ;;  %v7473_v19 = vmov 0 }
 0xa06   :  { %v942_v48 = vsel %vm7326_vm10, %v925_v41, 0.0  ;;  %v946_v50 = vmul.f32 %v6058_v44, %v925_v41  ;;  %vm7468_vm10 = vcmp.eq.s32.totalorder %v5776_v33, 2 }
 0xa07   :  { %v6065_v51 = vadd.f32 %v942_v48, %v884_v28 }
 0xa08   :  { %v6075_v53 = vsub.f32 %v888_v11, %v946_v50 }
 0xa0a   :  { %v955_v57 = vsel %vm6071_vm0, %v6075_v53, 0.0 }
 0xa0b   :  { %v957_v59 = vsel %vm7464_vm13, %v955_v57, 0.0  ;;  %v7480_v57 = vmov 0 }
 0xa0c   :  { %960 = vadd.xlane.f32.xlu0 %v957_v59 }
 0xa19   :  { %v743_v60 = vpop.xlane.xlu1 %742 }
 0xa1a   :  { %v746_v28 = vmul.f32 %v5899_v23, %v743_v60 }
 0xa1c   :  { %v763_v61 = vsel %vm7468_vm10, %v746_v28, 0.0  ;;  %v767_v0 = vmul.f32 %v5903_v25, %v746_v28  ;;  %vm7471_vm10 = vmmov %vm7469_vm1 }
 0xa1d   :  { %v765_v3 = vadd.f32 %v763_v61, %v705_v63 }
 0xa1e   :  { %v769_v6 = vsub.f32 %v709_v1, %v767_v0 }
 0xa20   :  { %v797_v11 = vsel %vm7469_vm1, %v769_v6, 0.0  ;;  %vm972_vm1 = vcmp.ge.s32.totalorder %v5768_v2, 6 }
 0xa21   :  { %v801_v12 = vsel %vm7470_vm9, %v797_v11, 0.0  ;;  %vm7472_vm9 = vcmp.eq.s32.totalorder %v5776_v33, 6 }
 0xa22   :  { %802 = vadd.xlane.f32.xlu1 %v801_v12  ;;  %vm6095_vm13 = vmand %vm7472_vm9, %vm972_vm1  ;;  %vm987_vm1 = vcmp.ge.s32.totalorder %v5776_v33, 6  ;;  %vm7479_vm9 = vcmp.eq.s32.totalorder %v5768_v2, 6 }
 0xa23   :  { %v7474_v19 = vsel %vm6095_vm13, 4294967295, %v7473_v19 }
 0xa24   :  { %7475 = vst [vmem:[#allocation15_spill] sm:$0xff] %v7474_v19 }
 0xa95   :  { %v961_v45 = vpop.xlane.xlu0 %960 }
 0xa96   :  { %v962_v7 = vrot.slane %v961_v45, 4 }
 0xa98   :  { %v963_v17 = vadd.f32 %v962_v7, %v961_v45 }
 0xa9a   :  { %v964_v18 = vrot.slane %v963_v17, 2 }
 0xa9c   :  { %v965_v27 = vadd.f32 %v964_v18, %v963_v17 }
 0xa9e   :  { %v966_v9 = vrot.slane %v965_v27, 1 }
 0xaa0   :  { %v967_v23 = vadd.f32 %v966_v9, %v965_v27 }
 0xaa2   :  { %5366 = vpush %v967_v23 }
 0xaab   :  { %v803_v34 = vpop.xlane.xlu1 %802 }
 0xaac   :  { %v806_v36 = vmul.f32 %v5946_v8, %v803_v34 }
 0xaae   :  { %v823_v25 = vsel %vm7471_vm10, %v806_v36, 0.0  ;;  %v827_v63 = vmul.f32 %v5950_v14, %v806_v36  ;;  %v976_v14 = vsel %vm6095_vm13, %v6075_v53, 0.0  ;;  %vm7478_vm10 = vmmov %vm7477_vm8 }
 0xaaf   :  { %v825_v1 = vadd.f32 %v823_v25, %v765_v3  ;;  %v978_v41 = vsel %vm7478_vm10, %v976_v14, 0.0  ;;  %vm7483_vm10 = vcmp.eq.s32.totalorder %v5776_v33, 4 }
 0xab0   :  { %v829_v38 = vsub.f32 %v769_v6, %v827_v63 }
 0xab2   :  { %v857_v21 = vsel %vm7476_vm15, %v829_v38, 0.0  ;;  %vm6109_vm15 = vmand %vm7479_vm9, %vm987_vm1  ;;  %vm7333_vm1 = vcmp.eq.s32.totalorder %v5768_v2, 7  ;;  %vm7335_vm9 = vcmp.eq.s32.totalorder %v5776_v33, 7 }
 0xab3   :  { %v861_v8 = vsel %vm7477_vm8, %v857_v21, 0.0  ;;  %v7481_v57 = vsel %vm6109_vm15, 4294967295, %v7480_v57  ;;  %v990_v59 = vsel %vm6109_vm15, %v6075_v53, 0.0  ;;  %vm7485_vm15 = vcmp.eq.s32.totalorder %v5776_v33, 5  ;;  %vm6135_vm13 = vmand %vm7333_vm1, %vm7335_vm9 }
 0xab4   :  { %862 = vadd.xlane.f32.xlu1 %v861_v8  ;;  %7482 = vst [vmem:[#allocation16_spill] sm:$0xff] %v7481_v57  ;;  %v992_v60 = vsel %vm7477_vm8, %v990_v59, 0.0  ;;  %vm7484_vm8 = vcmp.eq.s32.totalorder %v5776_v33, 6 }
 0xab5   :  { %v995_v28 = vrot.slane %v992_v60, 4 }
 0xab7   :  { %v996_v61 = vadd.f32 %v995_v28, %v992_v60 }
 0xab8   :  { %979 = vadd.xlane.f32.xlu1 %v978_v41 }
 0xab9   :  { %v997_v0 = vrot.slane %v996_v61, 2 }
 0xabb   :  { %v998_v3 = vadd.f32 %v997_v0, %v996_v61 }
 0xabd   :  { %v999_v6 = vrot.slane %v998_v3, 1 }
 0xabf   :  { %v1000_v7 = vadd.f32 %v999_v6, %v998_v3 }
 0xad3   :  { %s5367_s8 = spop %5366 }
 0xad4   :  { %v969_v48 = vstv %s5367_s8 }
 0xad5   :  { %5533 = vrsqrt.f32 %v969_v48 }
 0xae2   :  { %v5534_v50 = vpop.eup %5533 }
 0xae3   :  { %5368 = vpush %v5534_v50 }
 0xb14   :  { %s5369_s9 = spop %5368 }
 0xb15   :  { %v984_v45 = vstv %s5369_s9 }
 0xb16   :  { %v1001_v23 = vmul.f32 %v1000_v7, %v984_v45 }
 0xb3d   :  { %v863_v11 = vpop.xlane.xlu1 %862 }
 0xb3e   :  { %v866_v12 = vmul.f32 %v5999_v16, %v863_v11 }
 0xb40   :  { %v883_v17 = vsel %vm7483_vm10, %v866_v12, 0.0  ;;  %v887_v18 = vmul.f32 %v6005_v26, %v866_v12  ;;  %vm7486_vm10 = vcmask 130048  }
 0xb41   :  { %v885_v27 = vadd.f32 %v883_v17, %v825_v1  ;;  %v980_v9 = vpop.xlane.xlu1 %979  ;;  %v7487_v1 = vmov 0 }
 0xb42   :  { %v985_v34 = vmul.f32 %v984_v45, %v980_v9  ;;  %v889_v36 = vsub.f32 %v829_v38, %v887_v18  ;;  %v7488_v1 = vsel %vm6135_vm13, 4294967295, %v7487_v1 }
 0xb43   :  { %7489 = vst [vmem:[#allocation17_spill] sm:$0xff] %v7488_v1 }
 0xb44   :  { %v1002_v25 = vsel %vm7484_vm8, %v985_v34, 0.0  ;;  %v1006_v16 = vmul.f32 %v1001_v23, %v985_v34  ;;  %v917_v63 = vsel %vm7485_vm15, %v889_v36, 0.0  ;;  %vm7490_vm15 = vmmov %vm7486_vm10  ;;  %vm7491_vm8 = vcmp.eq.s32.totalorder %v5776_v33, 5 }
 0xb45   :  { %v6128_v21 = vadd.f32 %v1002_v25, %v6065_v51  ;;  %v921_v26 = vsel %vm7486_vm10, %v917_v63, 0.0  ;;  %vm7492_vm10 = vcmp.eq.s32.totalorder %v5776_v33, 6  ;;  %vm7493_vm1 = vmmov %vm7490_vm15  ;;  %v7496_v63 = vmov 0 }
 0xb46   :  { %v6140_v38 = vsub.f32 %v6075_v53, %v1006_v16  ;;  %922 = vadd.xlane.f32.xlu1 %v921_v26 }
 0xb48   :  { %v1015_v8 = vsel %vm6135_vm13, %v6140_v38, 0.0 }
 0xb49   :  { %v1017_v51 = vsel %vm7490_vm15, %v1015_v8, 0.0  ;;  %vm7494_vm15 = vmmov %vm7492_vm10 }
 0xb4a   :  { %1020 = vadd.xlane.f32.xlu1 %v1017_v51 }
 0xbcf   :  { %v923_v14 = vpop.xlane.xlu1 %922 }
 0xbd0   :  { %v926_v41 = vmul.f32 %v6054_v31, %v923_v14 }
 0xbd2   :  { %v943_v48 = vsel %vm7491_vm8, %v926_v41, 0.0  ;;  %v947_v50 = vmul.f32 %v6058_v44, %v926_v41  ;;  %vm1047_vm8 = vcmp.ge.s32.totalorder %v5776_v33, 7 }
 0xbd3   :  { %v945_v59 = vadd.f32 %v943_v48, %v885_v27  ;;  %v1021_v60 = vpop.xlane.xlu1 %1020 }
 0xbd4   :  { %v1022_v53 = vrot.slane %v1021_v60, 4  ;;  %v949_v28 = vsub.f32 %v889_v36, %v947_v50 }
 0xbd6   :  { %v1023_v61 = vadd.f32 %v1022_v53, %v1021_v60  ;;  %v977_v0 = vsel %vm7492_vm10, %v949_v28, 0.0  ;;  %vm7495_vm10 = vcmp.eq.s32.totalorder %v5768_v2, 7 }
 0xbd7   :  { %v981_v3 = vsel %vm7493_vm1, %v977_v0, 0.0  ;;  %vm6161_vm3 = vmand %vm7495_vm10, %vm1047_vm8  ;;  %vm7336_vm8 = vcmp.eq.s32.totalorder %v5776_v33, 8 }
 0xbd8   :  { %982 = vadd.xlane.f32.xlu1 %v981_v3  ;;  %v1024_v6 = vrot.slane %v1023_v61, 2  ;;  %v7497_v63 = vsel %vm6161_vm3, 4294967295, %v7496_v63  ;;  %v7500_v3 = vmov 0 }
 0xbd9   :  { %7498 = vst [vmem:[#allocation18_spill] sm:$0xff] %v7497_v63 }
 0xbda   :  { %v1025_v11 = vadd.f32 %v1024_v6, %v1023_v61 }
 0xbdc   :  { %v1026_v12 = vrot.slane %v1025_v11, 1 }
 0xbde   :  { %v1027_v31 = vadd.f32 %v1026_v12, %v1025_v11 }
 0xbe0   :  { %5370 = vpush %v1027_v31 }
 0xc11   :  { %s5371_s4 = spop %5370 }
 0xc12   :  { %v1029_v7 = vstv %s5371_s4 }
 0xc13   :  { %5535 = vrsqrt.f32 %v1029_v7 }
 0xc20   :  { %v5536_v44 = vpop.eup %5535 }
 0xc21   :  { %5372 = vpush %v5536_v44 }
 0xc52   :  { %s5373_s10 = spop %5372 }
 0xc53   :  { %v6169_v48 = vstv %s5373_s10 }
 0xc61   :  { %v983_v17 = vpop.xlane.xlu1 %982 }
 0xc62   :  { %v986_v18 = vmul.f32 %v984_v45, %v983_v17  ;;  %v1050_v45 = vsel %vm6161_vm3, %v6140_v38, 0.0 }
 0xc64   :  { %v1003_v27 = vsel %vm7494_vm15, %v986_v18, 0.0  ;;  %v1007_v9 = vmul.f32 %v1001_v23, %v986_v18  ;;  %vm7499_vm15 = vmmov %vm7493_vm1 }
 0xc65   :  { %v1005_v34 = vadd.f32 %v1003_v27, %v945_v59  ;;  %v1052_v23 = vsel %vm7499_vm15, %v1050_v45, 0.0  ;;  %v7503_v45 = vmov 0 }
 0xc66   :  { %v1009_v36 = vsub.f32 %v949_v28, %v1007_v9  ;;  %v1055_v26 = vrot.slane %v1052_v23, 4 }
 0xc68   :  { %v1037_v25 = vsel %vm7335_vm9, %v1009_v36, 0.0  ;;  %v1056_v8 = vadd.f32 %v1055_v26, %v1052_v23 }
 0xc69   :  { %v1041_v16 = vsel %vm7493_vm1, %v1037_v25, 0.0  ;;  %vm7337_vm1 = vcmp.eq.s32.totalorder %v5942_v5, 8 }
 0xc6a   :  { %1042 = vadd.xlane.f32.xlu1 %v1041_v16  ;;  %v1057_v51 = vrot.slane %v1056_v8, 2  ;;  %vm6181_vm10 = vmand %vm7337_vm1, %vm7336_vm8 }
 0xc6b   :  { %v7501_v3 = vsel %vm6181_vm10, 4294967295, %v7500_v3 }
 0xc6c   :  { %v1058_v14 = vadd.f32 %v1057_v51, %v1056_v8 }
 0xc6e   :  { %v1059_v41 = vrot.slane %v1058_v14, 1 }
 0xc70   :  { %v1060_v50 = vadd.f32 %v1059_v41, %v1058_v14 }
 0xc72   :  { %v1061_v60 = vmul.f32 %v1060_v50, %v6169_v48 }
 0xcf3   :  { %v1043_v59 = vpop.xlane.xlu1 %1042 }
 0xcf4   :  { %v1046_v53 = vmul.f32 %v6169_v48, %v1043_v59 }
 0xcf6   :  { %v1063_v28 = vsel %vm7335_vm9, %v1046_v53, 0.0  ;;  %v1067_v61 = vmul.f32 %v1061_v60, %v1046_v53  ;;  %vm7502_vm9 = vmmov %vm7499_vm15 }
 0xcf7   :  { %v1065_v0 = vadd.f32 %v1063_v28, %v1005_v34 }
 0xcf8   :  { %v1069_v6 = vsub.f32 %v1009_v36, %v1067_v61 }
 0xcfa   :  { %v1076_v11 = vsel %vm6181_vm10, %v1069_v6, 0.0  ;;  %v1097_v31 = vsel %vm7336_vm8, %v1069_v6, 0.0 }
 0xcfb   :  { %v1078_v12 = vsel %vm7499_vm15, %v1076_v11, 0.0  ;;  %v1101_v7 = vsel %vm7502_vm9, %v1097_v31, 0.0  ;;  %vm1107_vm15 = vcmp.ge.s32.totalorder %v5776_v33, 8 }
 0xcfc   :  { %1080 = vadd.xlane.f32.xlu1 %v1078_v12  ;;  %vm6194_vm8 = vmand %vm7337_vm1, %vm1107_vm15  ;;  %vm7341_vm15 = vcmp.eq.s32.totalorder %v5942_v5, 9  ;;  %vm7342_vm1 = vcmp.eq.s32.totalorder %v5776_v33, 9 }
 0xcfd   :  { %v7504_v45 = vsel %vm6194_vm8, 4294967295, %v7503_v45  ;;  %v1111_v23 = vsel %vm6194_vm8, %v1069_v6, 0.0  ;;  %vm1153_vm8 = vcmp.ge.s32.totalorder %v5942_v5, 9  ;;  %vm6214_vm3 = vmand %vm7341_vm15, %vm7342_vm1 }
 0xcfe   :  { %7505 = vst [vmem:[#allocation19_spill] sm:$0xff] %v7504_v45  ;;  %v1113_v26 = vsel %vm7502_vm9, %v1111_v23, 0.0  ;;  %vm7506_vm9 = vcmp.eq.s32.totalorder %v5776_v33, 8  ;;  %vm6220_vm14 = vmand %vm7342_vm1, %vm1153_vm8  ;;  %vm1167_vm8 = vcmp.ge.s32.totalorder %v5776_v33, 9 }
 0xcff   :  { %v1115_v8 = vrot.slane %v1113_v26, 4 }
 0xd00   :  { %1102 = vadd.xlane.f32.xlu1 %v1101_v7  ;;  %v7507_v7 = vmov 0 }
 0xd01   :  { %v1116_v51 = vadd.f32 %v1115_v8, %v1113_v26  ;;  %v7508_v7 = vsel %vm6214_vm3, 4294967295, %v7507_v7 }
 0xd03   :  { %v1117_v14 = vrot.slane %v1116_v51, 2 }
 0xd05   :  { %v1118_v41 = vadd.f32 %v1117_v14, %v1116_v51  ;;  %v7515_v14 = vmov 0 }
 0xd07   :  { %v1119_v50 = vrot.slane %v1118_v41, 1 }
 0xd09   :  { %v1120_v59 = vadd.f32 %v1119_v50, %v1118_v41 }
 0xd85   :  { %v1081_v44 = vpop.xlane.xlu1 %1080 }
 0xd86   :  { %v1082_v17 = vrot.slane %v1081_v44, 4 }
 0xd88   :  { %v1083_v18 = vadd.f32 %v1082_v17, %v1081_v44  ;;  %v7509_v17 = vmov 0 }
 0xd89   :  { %v1103_v60 = vpop.xlane.xlu1 %1102  ;;  %v7510_v17 = vsel %vm6220_vm14, 4294967295, %v7509_v17 }
 0xd8a   :  { %v1084_v27 = vrot.slane %v1083_v18, 2  ;;  %7511 = vst [vmem:[#allocation20_spill] sm:$0xff] %v7510_v17 }
 0xd8c   :  { %v1085_v9 = vadd.f32 %v1084_v27, %v1083_v18 }
 0xd8e   :  { %v1086_v34 = vrot.slane %v1085_v9, 1 }
 0xd90   :  { %v1087_v25 = vadd.f32 %v1086_v34, %v1085_v9 }
 0xd92   :  { %5374 = vpush %v1087_v25 }
 0xdc3   :  { %s5375_s11 = spop %5374 }
 0xdc4   :  { %v1089_v36 = vstv %s5375_s11 }
 0xdc5   :  { %5537 = vrsqrt.f32 %v1089_v36 }
 0xdd2   :  { %v5538_v16 = vpop.eup %5537 }
 0xdd3   :  { %5376 = vpush %v5538_v16 }
 0xe04   :  { %s5377_s12 = spop %5376 }
 0xe05   :  { %v6201_v53 = vstv %s5377_s12 }
 0xe06   :  { %v1106_v28 = vmul.f32 %v6201_v53, %v1103_v60  ;;  %v1121_v61 = vmul.f32 %v1120_v59, %v6201_v53 }
 0xe08   :  { %v1123_v11 = vsel %vm7506_vm9, %v1106_v28, 0.0  ;;  %v1127_v12 = vmul.f32 %v1121_v61, %v1106_v28  ;;  %vm7512_vm9 = vcmask 130048  }
 0xe09   :  { %v1125_v31 = vadd.f32 %v1123_v11, %v1065_v0  ;;  %vm7513_vm15 = vmmov %vm7512_vm9 }
 0xe0a   :  { %v1129_v44 = vsub.f32 %v1069_v6, %v1127_v12 }
 0xe0c   :  { %v1136_v18 = vsel %vm6214_vm3, %v1129_v44, 0.0  ;;  %v1157_v27 = vsel %vm6220_vm14, %v1129_v44, 0.0 }
 0xe0d   :  { %v1138_v0 = vsel %vm7512_vm9, %v1136_v18, 0.0  ;;  %v1161_v9 = vsel %vm7513_vm15, %v1157_v27, 0.0  ;;  %vm7514_vm9 = vcmp.eq.s32.totalorder %v5942_v5, 9 }
 0xe0e   :  { %1140 = vadd.xlane.f32.xlu1 %v1138_v0  ;;  %vm6233_vm1 = vmand %vm7514_vm9, %vm1167_vm8  ;;  %vm7346_vm8 = vcmp.eq.s32.totalorder %v5776_v33, 10  ;;  %vm1213_vm9 = vcmp.ge.s32.totalorder %v5942_v5, 10 }
 0xe0f   :  { %v7516_v14 = vsel %vm6233_vm1, 4294967295, %v7515_v14  ;;  %v1171_v41 = vsel %vm6233_vm1, %v1129_v44, 0.0  ;;  %vm7518_vm1 = vcmp.eq.s32.totalorder %v5776_v33, 9  ;;  %vm6251_vm14 = vmand %vm7346_vm8, %vm1213_vm9 }
 0xe10   :  { %7517 = vst [vmem:[#allocation21_spill] sm:$0xff] %v7516_v14  ;;  %v1173_v50 = vsel %vm7513_vm15, %v1171_v41, 0.0  ;;  %vm7347_vm15 = vcmp.eq.s32.totalorder %v5942_v5, 10 }
 0xe11   :  { %v1175_v59 = vrot.slane %v1173_v50, 4  ;;  %vm6259_vm12 = vmand %vm7347_vm15, %vm7346_vm8  ;;  %vm1227_vm8 = vcmp.ge.s32.totalorder %v5776_v33, 10 }
 0xe12   :  { %1162 = vadd.xlane.f32.xlu1 %v1161_v9 }
 0xe13   :  { %v1176_v60 = vadd.f32 %v1175_v59, %v1173_v50 }
 0xe15   :  { %v1177_v28 = vrot.slane %v1176_v60, 2 }
 0xe17   :  { %v1178_v61 = vadd.f32 %v1177_v28, %v1176_v60 }
 0xe19   :  { %v1179_v11 = vrot.slane %v1178_v61, 1 }
 0xe1b   :  { %v1180_v12 = vadd.f32 %v1179_v11, %v1178_v61 }
 0xe97   :  { %v1141_v34 = vpop.xlane.xlu1 %1140 }
 0xe98   :  { %v1142_v6 = vrot.slane %v1141_v34, 4 }
 0xe9a   :  { %v1143_v25 = vadd.f32 %v1142_v6, %v1141_v34 }
 0xe9b   :  { %v1163_v18 = vpop.xlane.xlu1 %1162 }
 0xe9c   :  { %v1144_v36 = vrot.slane %v1143_v25, 2 }
 0xe9e   :  { %v1145_v16 = vadd.f32 %v1144_v36, %v1143_v25  ;;  %v7519_v25 = vmov 0 }
 0xe9f   :  { %v7520_v25 = vsel %vm6251_vm14, 4294967295, %v7519_v25 }
 0xea0   :  { %v1146_v23 = vrot.slane %v1145_v16, 1  ;;  %7521 = vst [vmem:[#allocation22_spill] sm:$0xff] %v7520_v25 }
 0xea2   :  { %v1147_v26 = vadd.f32 %v1146_v23, %v1145_v16  ;;  %v7522_v16 = vmov 0 }
 0xea3   :  { %v7523_v16 = vsel %vm6259_vm12, 4294967295, %v7522_v16 }
 0xea4   :  { %5378 = vpush %v1147_v26 }
 0xed5   :  { %s5379_s13 = spop %5378 }
 0xed6   :  { %v1149_v8 = vstv %s5379_s13 }
 0xed7   :  { %5539 = vrsqrt.f32 %v1149_v8 }
 0xee4   :  { %v5540_v51 = vpop.eup %5539 }
 0xee5   :  { %5380 = vpush %v5540_v51 }
 0xf16   :  { %s5381_s14 = spop %5380 }
 0xf17   :  { %v6240_v0 = vstv %s5381_s14 }
 0xf18   :  { %v1166_v27 = vmul.f32 %v6240_v0, %v1163_v18  ;;  %v1181_v9 = vmul.f32 %v1180_v12, %v6240_v0  ;;  %v7526_v18 = vmov 0 }
 0xf1a   :  { %v1183_v34 = vsel %vm7518_vm1, %v1166_v27, 0.0  ;;  %v1187_v6 = vmul.f32 %v1181_v9, %v1166_v27  ;;  %vm7524_vm1 = vcmask 130048  }
 0xf1b   :  { %v1185_v36 = vadd.f32 %v1183_v34, %v1125_v31  ;;  %vm7525_vm9 = vmmov %vm7524_vm1 }
 0xf1c   :  { %v1189_v23 = vsub.f32 %v1129_v44, %v1187_v6 }
 0xf1e   :  { %v1217_v26 = vsel %vm6251_vm14, %v1189_v23, 0.0  ;;  %v1196_v8 = vsel %vm6259_vm12, %v1189_v23, 0.0 }
 0xf1f   :  { %v1221_v51 = vsel %vm7524_vm1, %v1217_v26, 0.0  ;;  %v1198_v41 = vsel %vm7525_vm9, %v1196_v8, 0.0  ;;  %vm6272_vm1 = vmand %vm7347_vm15, %vm1227_vm8  ;;  %vm7352_vm8 = vcmp.eq.s32.totalorder %v5776_v33, 11  ;;  %vm1273_vm15 = vcmp.ge.s32.totalorder %v5942_v5, 11 }
 0xf20   :  { %1222 = vadd.xlane.f32.xlu1 %v1221_v51  ;;  %1200 = vadd.xlane.f32.xlu0 %v1198_v41  ;;  %v7527_v18 = vsel %vm6272_vm1, 4294967295, %v7526_v18  ;;  %v1231_v27 = vsel %vm6272_vm1, %v1189_v23, 0.0  ;;  %vm7529_vm1 = vcmp.eq.s32.totalorder %v5776_v33, 10  ;;  %vm6290_vm14 = vmand %vm7352_vm8, %vm1273_vm15  ;;  %vm7535_vm15 = vcmask 130048  }
 0xf21   :  { %7528 = vst [vmem:[#allocation23_spill] sm:$0xff] %v7527_v18  ;;  %v1233_v9 = vsel %vm7525_vm9, %v1231_v27, 0.0  ;;  %vm7353_vm9 = vcmp.eq.s32.totalorder %v5942_v5, 11 }
 0xf22   :  { %v1235_v34 = vrot.slane %v1233_v9, 4  ;;  %vm6298_vm12 = vmand %vm7353_vm9, %vm7352_vm8  ;;  %vm1287_vm8 = vcmp.ge.s32.totalorder %v5776_v33, 11 }
 0xf24   :  { %v1236_v6 = vadd.f32 %v1235_v34, %v1233_v9 }
 0xf26   :  { %v1237_v26 = vrot.slane %v1236_v6, 2 }
 0xf28   :  { %v1238_v8 = vadd.f32 %v1237_v26, %v1236_v6 }
 0xf2a   :  { %v1239_v51 = vrot.slane %v1238_v8, 1 }
 0xf2c   :  { %v1240_v41 = vadd.f32 %v1239_v51, %v1238_v8 }
 0xfa9   :  { %v1201_v31 = vpop.xlane.xlu0 %1200 }
 0xfaa   :  { %v1202_v50 = vrot.slane %v1201_v31, 4 }
 0xfac   :  { %v1203_v59 = vadd.f32 %v1202_v50, %v1201_v31  ;;  %v1223_v31 = vpop.xlane.xlu1 %1222 }
 0xfae   :  { %v1204_v60 = vrot.slane %v1203_v59, 2 }
 0xfb0   :  { %v1205_v28 = vadd.f32 %v1204_v60, %v1203_v59 }
 0xfb2   :  { %v1206_v61 = vrot.slane %v1205_v28, 1 }
 0xfb4   :  { %v1207_v11 = vadd.f32 %v1206_v61, %v1205_v28 }
 0xfb6   :  { %5382 = vpush %v1207_v11  ;;  %v7530_v11 = vmov 0 }
 0xfb7   :  { %v7531_v11 = vsel %vm6290_vm14, 4294967295, %v7530_v11 }
 0xfb8   :  { %7532 = vst [vmem:[#allocation24_spill] sm:$0xff] %v7531_v11 }
 0xfe7   :  { %s5383_s0 = spop %5382 }
 0xfe8   :  { %v1209_v44 = vstv %s5383_s0 }
 0xfe9   :  { %5541 = vrsqrt.f32 %v1209_v44 }
 0xff6   :  { %v5542_v12 = vpop.eup %5541 }
 0xff7   :  { %5384 = vpush %v5542_v12  ;;  %v7533_v12 = vmov 0 }
 0xff8   :  { %v7534_v12 = vsel %vm6298_vm12, 4294967295, %v7533_v12 }
0x1028   :  { %s5385_s1 = spop %5384 }
0x1029   :  { %v6279_v50 = vstv %s5385_s1 }
0x102a   :  { %v1226_v59 = vmul.f32 %v6279_v50, %v1223_v31  ;;  %v1241_v60 = vmul.f32 %v1240_v41, %v6279_v50 }
0x102c   :  { %v1243_v28 = vsel %vm7529_vm1, %v1226_v59, 0.0  ;;  %v1247_v61 = vmul.f32 %v1241_v60, %v1226_v59  ;;  %vm7536_vm1 = vmmov %vm7535_vm15 }
0x102d   :  { %v1245_v44 = vadd.f32 %v1243_v28, %v1185_v36 }
0x102e   :  { %v1249_v27 = vsub.f32 %v1189_v23, %v1247_v61  ;;  %v7537_v61 = vmov 0 }
0x1030   :  { %v1277_v9 = vsel %vm6290_vm14, %v1249_v27, 0.0  ;;  %v1256_v34 = vsel %vm6298_vm12, %v1249_v27, 0.0 }
0x1031   :  { %v1281_v6 = vsel %vm7535_vm15, %v1277_v9, 0.0  ;;  %v1258_v26 = vsel %vm7536_vm1, %v1256_v34, 0.0  ;;  %vm6311_vm15 = vmand %vm7353_vm9, %vm1287_vm8  ;;  %vm7362_vm8 = vcmp.eq.s32.totalorder %v5776_v33, 12  ;;  %vm1333_vm9 = vcmp.ge.s32.totalorder %v5942_v5, 12 }
0x1032   :  { %1282 = vadd.xlane.f32.xlu1 %v1281_v6  ;;  %1260 = vadd.xlane.f32.xlu0 %v1258_v26  ;;  %v7538_v61 = vsel %vm6311_vm15, 4294967295, %v7537_v61  ;;  %v1291_v9 = vsel %vm6311_vm15, %v1249_v27, 0.0  ;;  %vm7540_vm15 = vcmp.eq.s32.totalorder %v5776_v33, 11  ;;  %vm6329_vm14 = vmand %vm7362_vm8, %vm1333_vm9  ;;  %vm7546_vm9 = vcmask 130048  }
0x1033   :  { %7539 = vst [vmem:[#allocation25_spill] sm:$0xff] %v7538_v61  ;;  %v1293_v34 = vsel %vm7536_vm1, %v1291_v9, 0.0  ;;  %vm7363_vm1 = vcmp.eq.s32.totalorder %v5942_v5, 12 }
0x1034   :  { %v1295_v6 = vrot.slane %v1293_v34, 4  ;;  %vm6337_vm12 = vmand %vm7363_vm1, %vm7362_vm8  ;;  %vm1347_vm8 = vcmp.ge.s32.totalorder %v5776_v33, 12 }
0x1036   :  { %v1296_v26 = vadd.f32 %v1295_v6, %v1293_v34  ;;  %v7541_v34 = vmov 0 }
0x1037   :  { %v7542_v34 = vsel %vm6329_vm14, 4294967295, %v7541_v34 }
0x1038   :  { %7543 = vst [vmem:[#allocation26_spill] sm:$0xff] %v7542_v34 }
0x10bb   :  { %v1261_v36 = vpop.xlane.xlu0 %1260 }
0x10bc   :  { %v1262_v8 = vrot.slane %v1261_v36, 4 }
0x10be   :  { %v1263_v51 = vadd.f32 %v1262_v8, %v1261_v36  ;;  %v1297_v36 = vrot.slane %v1296_v26, 2 }
0x10c0   :  { %v1264_v41 = vrot.slane %v1263_v51, 2  ;;  %v1298_v8 = vadd.f32 %v1297_v36, %v1296_v26  ;;  %v7544_v26 = vmov 0 }
0x10c1   :  { %v7545_v26 = vsel %vm6337_vm12, 4294967295, %v7544_v26 }
0x10c2   :  { %v1265_v31 = vadd.f32 %v1264_v41, %v1263_v51  ;;  %v1299_v51 = vrot.slane %v1298_v8, 1 }
0x10c4   :  { %v1266_v59 = vrot.slane %v1265_v31, 1  ;;  %v1300_v41 = vadd.f32 %v1299_v51, %v1298_v8 }
0x10c6   :  { %v1267_v60 = vadd.f32 %v1266_v59, %v1265_v31  ;;  %v1283_v31 = vpop.xlane.xlu1 %1282 }
0x10c8   :  { %5386 = vpush %v1267_v60 }
0x10f9   :  { %s5387_s15 = spop %5386 }
0x10fa   :  { %v1269_v23 = vstv %s5387_s15  ;;  %s4991_s15 = sld [smem:[#allocation6 + $0x3]] }
0x10fb   :  { %5543 = vrsqrt.f32 %v1269_v23 }
0x1108   :  { %v5544_v28 = vpop.eup %5543 }
0x1109   :  { %5388 = vpush %v5544_v28 }
0x113a   :  { %s5389_s16 = spop %5388 }
0x113b   :  { %v6318_v59 = vstv %s5389_s16 }
0x113c   :  { %v1286_v60 = vmul.f32 %v6318_v59, %v1283_v31  ;;  %v1301_v23 = vmul.f32 %v1300_v41, %v6318_v59 }
0x113e   :  { %v1303_v28 = vsel %vm7540_vm15, %v1286_v60, 0.0  ;;  %v1307_v9 = vmul.f32 %v1301_v23, %v1286_v60  ;;  %vm7547_vm15 = vmmov %vm7546_vm9 }
0x113f   :  { %v1305_v6 = vadd.f32 %v1303_v28, %v1245_v44 }
0x1140   :  { %v1309_v36 = vsub.f32 %v1249_v27, %v1307_v9 }
0x1142   :  { %v1337_v8 = vsel %vm6329_vm14, %v1309_v36, 0.0  ;;  %v1316_v51 = vsel %vm6337_vm12, %v1309_v36, 0.0 }
0x1143   :  { %v1341_v41 = vsel %vm7546_vm9, %v1337_v8, 0.0  ;;  %v1318_v31 = vsel %vm7547_vm15, %v1316_v51, 0.0  ;;  %vm6350_vm9 = vmand %vm7363_vm1, %vm1347_vm8  ;;  %v7548_v8 = vmov 0  ;;  %vm7372_vm8 = vcmp.eq.s32.totalorder %v5776_v33, 13 }
0x1144   :  { %1342 = vadd.xlane.f32.xlu1 %v1341_v41  ;;  %1320 = vadd.xlane.f32.xlu0 %v1318_v31  ;;  %v7549_v8 = vsel %vm6350_vm9, 4294967295, %v7548_v8  ;;  %v1351_v51 = vsel %vm6350_vm9, %v1309_v36, 0.0  ;;  %vm1393_vm1 = vcmp.ge.s32.totalorder %v5942_v5, 13  ;;  %vm7551_vm9 = vcmp.eq.s32.totalorder %v5776_v33, 12 }
0x1145   :  { %7550 = vst [vmem:[#allocation27_spill] sm:$0xff] %v7549_v8  ;;  %v1353_v41 = vsel %vm7547_vm15, %v1351_v51, 0.0  ;;  %vm7373_vm15 = vcmp.eq.s32.totalorder %v5942_v5, 13  ;;  %vm6368_vm14 = vmand %vm7372_vm8, %vm1393_vm1  ;;  %vm7557_vm1 = vcmask 130048  }
0x1146   :  { %vm6376_vm12 = vmand %vm7373_vm15, %vm7372_vm8  ;;  %vm1407_vm8 = vcmp.ge.s32.totalorder %v5776_v33, 13 }
0x11cd   :  { %v1321_v44 = vpop.xlane.xlu0 %1320 }
0x11ce   :  { %v1322_v60 = vrot.slane %v1321_v44, 4 }
0x11d0   :  { %v1323_v23 = vadd.f32 %v1322_v60, %v1321_v44 }
0x11d2   :  { %v1324_v28 = vrot.slane %v1323_v23, 2 }
0x11d4   :  { %v1325_v62 = vadd.f32 %v1324_v28, %v1323_v23  ;;  %v1343_v23 = vpop.xlane.xlu1 %1342 }
0x11d6   :  { %v1326_v61 = vrot.slane %v1325_v62, 1 }
0x11d8   :  { %v1327_v11 = vadd.f32 %v1326_v61, %v1325_v62  ;;  %v1355_v62 = vrot.slane %v1353_v41, 4 }
0x11da   :  { %5390 = vpush %v1327_v11  ;;  %v1356_v11 = vadd.f32 %v1355_v62, %v1353_v41  ;;  %v7552_v62 = vmov 0 }
0x11db   :  { %v7553_v62 = vsel %vm6368_vm14, 4294967295, %v7552_v62 }
0x11dc   :  { %v1357_v61 = vrot.slane %v1356_v11, 2  ;;  %7554 = vst [vmem:[#allocation28_spill] sm:$0xff] %v7553_v62 }
0x11de   :  { %v1358_v31 = vadd.f32 %v1357_v61, %v1356_v11  ;;  %v7555_v61 = vmov 0 }
0x11df   :  { %v7556_v61 = vsel %vm6376_vm12, 4294967295, %v7555_v61 }
0x11e0   :  { %v1359_v44 = vrot.slane %v1358_v31, 1 }
0x11e2   :  { %v1360_v60 = vadd.f32 %v1359_v44, %v1358_v31 }
0x120b   :  { %s5391_s17 = spop %5390 }
0x120c   :  { %v1329_v27 = vstv %s5391_s17 }
0x120d   :  { %5545 = vrsqrt.f32 %v1329_v27 }
0x121a   :  { %v5546_v9 = vpop.eup %5545 }
0x121b   :  { %5392 = vpush %v5546_v9 }
0x124c   :  { %s5393_s18 = spop %5392 }
0x124d   :  { %v6357_v28 = vstv %s5393_s18 }
0x124e   :  { %v1346_v27 = vmul.f32 %v6357_v28, %v1343_v23  ;;  %v1361_v9 = vmul.f32 %v1360_v60, %v6357_v28 }
0x1250   :  { %v1363_v51 = vsel %vm7551_vm9, %v1346_v27, 0.0  ;;  %v1367_v41 = vmul.f32 %v1361_v9, %v1346_v27  ;;  %vm7558_vm9 = vmmov %vm7557_vm1 }
0x1251   :  { %v1365_v11 = vadd.f32 %v1363_v51, %v1305_v6 }
0x1252   :  { %v1369_v31 = vsub.f32 %v1309_v36, %v1367_v41 }
0x1254   :  { %v1397_v44 = vsel %vm6368_vm14, %v1369_v31, 0.0  ;;  %v1376_v60 = vsel %vm6376_vm12, %v1369_v31, 0.0  ;;  %vm1032_vm12 = vcmp.ge.s32.totalorder %v5768_v2, 7 }
0x1255   :  { %v1401_v23 = vsel %vm7557_vm1, %v1397_v44, 0.0  ;;  %v1378_v27 = vsel %vm7558_vm9, %v1376_v60, 0.0  ;;  %vm6389_vm1 = vmand %vm7373_vm15, %vm1407_vm8  ;;  %v7559_v44 = vmov 0  ;;  %vm7396_vm8 = vcmp.eq.s32.totalorder %v5776_v33, 14 }
0x1256   :  { %1402 = vadd.xlane.f32.xlu1 %v1401_v23  ;;  %1380 = vadd.xlane.f32.xlu0 %v1378_v27  ;;  %v7560_v44 = vsel %vm6389_vm1, 4294967295, %v7559_v44  ;;  %v1411_v60 = vsel %vm6389_vm1, %v1369_v31, 0.0  ;;  %vm1453_vm15 = vcmp.ge.s32.totalorder %v5942_v5, 14  ;;  %vm7562_vm1 = vcmp.eq.s32.totalorder %v5776_v33, 13 }
0x1257   :  { %7561 = vst [vmem:[#allocation29_spill] sm:$0xff] %v7560_v44  ;;  %vm6407_vm14 = vmand %vm7396_vm8, %vm1453_vm15  ;;  %vm7572_vm15 = vcmask 130048  }
0x1258   :  { %vm7573_vm0 = vmmov %vm7572_vm15 }
0x12df   :  { %v1381_v6 = vpop.xlane.xlu0 %1380 }
0x12e0   :  { %v1382_v9 = vrot.slane %v1381_v6, 4 }
0x12e2   :  { %v1383_v51 = vadd.f32 %v1382_v9, %v1381_v6  ;;  %v1403_v9 = vpop.xlane.xlu1 %1402 }
0x12e4   :  { %v1384_v8 = vrot.slane %v1383_v51, 2 }
0x12e6   :  { %v1385_v34 = vadd.f32 %v1384_v8, %v1383_v51  ;;  %v1413_v8 = vsel %vm7558_vm9, %v1411_v60, 0.0  ;;  %vm7391_vm9 = vcmp.eq.s32.totalorder %v5942_v5, 14 }
0x12e7   :  { %vm6416_vm10 = vmand %vm7391_vm9, %vm7396_vm8 }
0x12e8   :  { %v1386_v18 = vrot.slane %v1385_v34, 1 }
0x12ea   :  { %v1387_v25 = vadd.f32 %v1386_v18, %v1385_v34  ;;  %v1415_v18 = vrot.slane %v1413_v8, 4 }
0x12ec   :  { %5394 = vpush %v1387_v25  ;;  %v1416_v25 = vadd.f32 %v1415_v18, %v1413_v8  ;;  %v7563_v18 = vmov 0 }
0x12ed   :  { %v7564_v18 = vsel %vm6407_vm14, 4294967295, %v7563_v18 }
0x12ee   :  { %v1417_v34 = vrot.slane %v1416_v25, 2  ;;  %7565 = vst [vmem:[#allocation30_spill] sm:$0xff] %v7564_v18 }
0x12f0   :  { %v1418_v23 = vadd.f32 %v1417_v34, %v1416_v25  ;;  %v7566_v34 = vmov 0 }
0x12f1   :  { %v7567_v34 = vsel %vm6416_vm10, 4294967295, %v7566_v34 }
0x12f2   :  { %v1419_v27 = vrot.slane %v1418_v23, 1 }
0x12f4   :  { %v1420_v6 = vadd.f32 %v1419_v27, %v1418_v23  ;;  %v7569_v27 = vmov 0 }
0x131d   :  { %s5395_s19 = spop %5394 }
0x131e   :  { %v1389_v36 = vstv %s5395_s19 }
0x131f   :  { %5547 = vrsqrt.f32 %v1389_v36 }
0x132c   :  { %v5548_v41 = vpop.eup %5547 }
0x132d   :  { %5396 = vpush %v5548_v41 }
0x135e   :  { %s5397_s20 = spop %5396 }
0x135f   :  { %v6396_v51 = vstv %s5397_s20 }
0x1360   :  { %v1406_v36 = vmul.f32 %v6396_v51, %v1403_v9  ;;  %v1421_v41 = vmul.f32 %v1420_v6, %v6396_v51 }
0x1362   :  { %v1423_v60 = vsel %vm7562_vm1, %v1406_v36, 0.0  ;;  %v1427_v8 = vmul.f32 %v1421_v41, %v1406_v36  ;;  %vm7568_vm1 = vcmp.eq.s32.totalorder %v5776_v33, 7 }
0x1363   :  { %v1425_v25 = vadd.f32 %v1423_v60, %v1365_v11  ;;  %vm6422_vm3 = vmand %vm7568_vm1, %vm1032_vm12  ;;  %v7575_v60 = vmov 0.0  }
0x1364   :  { %v1429_v23 = vsub.f32 %v1369_v31, %v1427_v8  ;;  %v7570_v27 = vsel %vm6422_vm3, 4294967295, %v7569_v27  ;;  %v1036_v31 = vsel %vm6422_vm3, %v6140_v38, 0.0  ;;  %vm7574_vm12 = vmmov %vm7573_vm0 }
0x1365   :  { %7571 = vst [vmem:[#allocation31_spill] sm:$0xff] %v7570_v27  ;;  %v1038_v41 = vsel %vm7574_vm12, %v1036_v31, 0.0 }
0x1366   :  { %v1457_v6 = vsel %vm6407_vm14, %v1429_v23, 0.0  ;;  %v1436_v11 = vsel %vm6416_vm10, %v1429_v23, 0.0 }
0x1367   :  { %v1461_v9 = vsel %vm7572_vm15, %v1457_v6, 0.0  ;;  %v1438_v36 = vsel %vm7573_vm0, %v1436_v11, 0.0  ;;  %vm1467_vm0 = vcmp.ge.s32.totalorder %v5776_v33, 14  ;;  %vm7579_vm15 = vmmov %vm7574_vm12  ;;  %vm7392_vm12 = vcmp.eq.s32.totalorder %v5942_v5, 15 }
0x1368   :  { %1462 = vadd.xlane.f32.xlu1 %v1461_v9  ;;  %1440 = vadd.xlane.f32.xlu0 %v1438_v36  ;;  %vm6443_vm1 = vmand %vm7391_vm9, %vm1467_vm0  ;;  %vm7393_vm0 = vcmp.eq.s32.totalorder %v5776_v33, 15  ;;  %vm7582_vm9 = vcmask 130048  }
0x136c   :  { %1039 = vadd.xlane.f32.xlu1 %v1038_v41  ;;  %v7576_v41 = vmov 0 }
0x136d   :  { %v7577_v41 = vsel %vm6443_vm1, 4294967295, %v7576_v41 }
0x136e   :  { %7578 = vst [vmem:[#allocation32_spill] sm:$0xff] %v7577_v41 }
0x1370   :  { %1159 = vadd.xlane.f32.xlu1 %v7575_v60 }
0x1374   :  { %1279 = vadd.xlane.f32.xlu1 %v7575_v60 }
0x1378   :  { %1399 = vadd.xlane.f32.xlu1 %v7575_v60 }
0x137c   :  { %1519 = vadd.xlane.f32.xlu1 %v7575_v60 }
0x13f1   :  { %v1441_v8 = vpop.xlane.xlu0 %1440 }
0x13f2   :  { %v1442_v6 = vrot.slane %v1441_v8, 4 }
0x13f4   :  { %v1443_v11 = vadd.f32 %v1442_v6, %v1441_v8  ;;  %v1471_v8 = vsel %vm6443_vm1, %v1429_v23, 0.0 }
0x13f5   :  { %v1473_v6 = vsel %vm7579_vm15, %v1471_v8, 0.0  ;;  %vm6460_vm15 = vmand %vm7392_vm12, %vm7393_vm0  ;;  %vm7394_vm12 = vmmov 0   ;;  %vm7584_vm0 = vcmp.eq.s32.totalorder %v5776_v33, 8 }
0x13f6   :  { %v1444_v9 = vrot.slane %v1443_v11, 2  ;;  %5206 = vmatprep.mubr.msk.f32.mxu0 %vm7394_vm12, %v7575_v60  ;;  %5226 = vmatprep.mubr.msk.f32.mxu1 %vm7394_vm12, %v7575_v60 }
0x13f7   :  { %5207 = vmatmul.mubr.f32.vlgmr.msra.gmra.mxu0 %v7575_v60 }
0x13f8   :  { %v1445_v36 = vadd.f32 %v1444_v9, %v1443_v11  ;;  %5211 = vmatprep.mubr.msk.f32.mxu0 %vm7394_vm12, %v7575_v60  ;;  %vm7585_vm12 = vcmp.eq.s32.totalorder %v5776_v33, 9 }
0x13fa   :  { %v1446_v18 = vrot.slane %v1445_v36, 1 }
0x13fc   :  { %v1447_v44 = vadd.f32 %v1446_v18, %v1445_v36  ;;  %v1475_v18 = vrot.slane %v1473_v6, 4 }
0x13fe   :  { %5398 = vpush %v1447_v44  ;;  %v1476_v44 = vadd.f32 %v1475_v18, %v1473_v6  ;;  %v7580_v6 = vmov 0 }
0x13ff   :  { %v7581_v6 = vsel %vm6460_vm15, 4294967295, %v7580_v6 }
0x1400   :  { %v1477_v11 = vrot.slane %v1476_v44, 2 }
0x1402   :  { %v1478_v9 = vadd.f32 %v1477_v11, %v1476_v44 }
0x1404   :  { %v1479_v36 = vrot.slane %v1478_v9, 1 }
0x142f   :  { %s5399_s21 = spop %5398 }
0x1430   :  { %v1449_v38 = vstv %s5399_s21 }
0x1431   :  { %5549 = vrsqrt.f32 %v1449_v38  ;;  %v1480_v38 = vadd.f32 %v1479_v36, %v1478_v9 }
0x143e   :  { %v5550_v31 = vpop.eup %5549 }
0x143f   :  { %5400 = vpush %v5550_v31  ;;  %v1463_v31 = vpop.xlane.xlu1 %1462 }
0x1470   :  { %s5401_s22 = spop %5400 }
0x1471   :  { %v1464_v27 = vstv %s5401_s22 }
0x1472   :  { %v1466_v62 = vmul.f32 %v1464_v27, %v1463_v31  ;;  %v1481_v14 = vmul.f32 %v1480_v38, %v1464_v27  ;;  %v1040_v31 = vpop.xlane.xlu1 %1039 }
0x1474   :  { %v1483_v41 = vsel %vm7396_vm8, %v1466_v62, 0.0  ;;  %v1487_v17 = vmul.f32 %v1481_v14, %v1466_v62  ;;  %vm7586_vm8 = vcmp.eq.s32.totalorder %v5776_v33, 10 }
0x1475   :  { %v6454_v8 = vadd.f32 %v1483_v41, %v1425_v25 }
0x1476   :  { %v6464_v18 = vsub.f32 %v1429_v23, %v1487_v17 }
0x1478   :  { %v1496_v44 = vsel %vm6460_vm15, %v6464_v18, 0.0 }
0x1479   :  { %v1498_v11 = vsel %vm7582_vm9, %v1496_v44, 0.0  ;;  %vm7583_vm9 = vcmp.eq.s32.totalorder %v5776_v33, 7 }
0x147a   :  { %1500 = vadd.xlane.f32.xlu0 %v1498_v11  ;;  %v1045_v11 = vmul.f32 %v6169_v48, %v1040_v31 }
0x147e   :  { %1099 = vadd.xlane.f32.xlu0 %v7575_v60 }
0x1482   :  { %1219 = vadd.xlane.f32.xlu0 %v7575_v60 }
0x1486   :  { %1339 = vadd.xlane.f32.xlu0 %v7575_v60 }
0x148a   :  { %1459 = vadd.xlane.f32.xlu0 %v7575_v60 }
0x1503   :  { %v1501_v14 = vpop.xlane.xlu0 %1500 }
0x1504   :  { %v1502_v62 = vrot.slane %v1501_v14, 4 }
0x1506   :  { %v1503_v25 = vadd.f32 %v1502_v62, %v1501_v14  ;;  %v1062_v62 = vsel %vm7583_vm9, %v1045_v11, 0.0  ;;  %vm7588_vm9 = vcmp.eq.s32.totalorder %v5776_v33, 12 }
0x1507   :  { %v1100_v44 = vpop.xlane.xlu0 %1099 }
0x1508   :  { %v1504_v17 = vrot.slane %v1503_v25, 2  ;;  %v1105_v14 = vmul.f32 %v6201_v53, %v1100_v44 }
0x150a   :  { %v1505_v23 = vadd.f32 %v1504_v17, %v1503_v25  ;;  %v1160_v25 = vpop.xlane.xlu1 %1159  ;;  %v1122_v17 = vsel %vm7584_vm0, %v1105_v14, 0.0  ;;  %vm7587_vm0 = vcmp.eq.s32.totalorder %v5776_v33, 11 }
0x150c   :  { %v1506_v41 = vrot.slane %v1505_v23, 1 }
0x150e   :  { %v1507_v9 = vadd.f32 %v1506_v41, %v1505_v23  ;;  %v1064_v23 = vadd.f32 %v1062_v62, %v6128_v21  ;;  %v1220_v41 = vpop.xlane.xlu0 %1219  ;;  %v1280_v31 = vpop.xlane.xlu1 %1279 }
0x150f   :  { %v1285_v45 = vmul.f32 %v6318_v59, %v1280_v31 }
0x1510   :  { %5402 = vpush %v1507_v9  ;;  %v1165_v9 = vmul.f32 %v6240_v0, %v1160_v25 }
0x1511   :  { %v1302_v0 = vsel %vm7587_vm0, %v1285_v45, 0.0  ;;  %vm7591_vm0 = vcmp.eq.s32.totalorder %v5776_v33, 15 }
0x1512   :  { %v1182_v48 = vsel %vm7585_vm12, %v1165_v9, 0.0  ;;  %v1340_v11 = vpop.xlane.xlu0 %1339  ;;  %v1400_v62 = vpop.xlane.xlu1 %1399  ;;  %vm7590_vm12 = vcmp.eq.s32.totalorder %v5776_v33, 14 }
0x1513   :  { %v1345_v21 = vmul.f32 %v6357_v28, %v1340_v11 }
0x1541   :  { %s5403_s23 = spop %5402 }
0x1542   :  { %v1509_v36 = vstv %s5403_s23 }
0x1543   :  { %5551 = vrsqrt.f32 %v1509_v36  ;;  %v1124_v36 = vadd.f32 %v1122_v17, %v1064_v23  ;;  %v1460_v17 = vpop.xlane.xlu0 %1459  ;;  %v1405_v23 = vmul.f32 %v6396_v51, %v1400_v62 }
0x1544   :  { %v1465_v9 = vmul.f32 %v1464_v27, %v1460_v17 }
0x1545   :  { %v1184_v53 = vadd.f32 %v1182_v48, %v1124_v36 }
0x1546   :  { %v1482_v28 = vsel %vm7590_vm12, %v1465_v9, 0.0 }
0x1550   :  { %v5552_v38 = vpop.eup %5551 }
0x1551   :  { %5404 = vpush %v5552_v38  ;;  %v1225_v38 = vmul.f32 %v6279_v50, %v1220_v41  ;;  %v1362_v50 = vsel %vm7588_vm9, %v1345_v21, 0.0  ;;  %vm7592_vm9 = vcmask 130048  }
0x1553   :  { %v1242_v44 = vsel %vm7586_vm8, %v1225_v38, 0.0  ;;  %vm7589_vm8 = vcmp.eq.s32.totalorder %v5776_v33, 13  ;;  %v1520_v38 = vpop.xlane.xlu1 %1519 }
0x1554   :  { %v1244_v14 = vadd.f32 %v1242_v44, %v1184_v53  ;;  %v1422_v36 = vsel %vm7589_vm8, %v1405_v23, 0.0  ;;  %vm7593_vm8 = vmmov %vm7592_vm9 }
0x1555   :  { %vm7594_vm12 = vmmov %vm7593_vm8 }
0x1556   :  { %v1304_v25 = vadd.f32 %v1302_v0, %v1244_v14 }
0x1558   :  { %v1364_v41 = vadd.f32 %v1362_v50, %v1304_v25 }
0x155a   :  { %v1424_v59 = vadd.f32 %v1422_v36, %v1364_v41 }
0x155c   :  { %v1484_v31 = vadd.f32 %v1482_v28, %v1424_v59  ;;  %v7600_v59 = vmov 0 }
0x1582   :  { %s6505_s24 = spop %5404 }
0x1583   :  { %v7401_v45 = vstv %s6505_s24 }
0x1584   :  { %v1525_v48 = vmul.f32 %v7401_v45, %v1520_v38 }
0x1586   :  { %v1527_v51 = vsel %vm7591_vm0, %v1525_v48, 0.0  ;;  %vm7595_vm0 = vmmov %vm7593_vm8 }
0x1587   :  { %v6512_v27 = vadd.f32 %v1527_v51, %v1484_v31  ;;  %vm7597_vm3 = vmmov %vm7595_vm0  ;;  %v6557_v51 = vpop.f32.mrf.mxu0 }
0x1588   :  { %vm7603_vm14 = vmmov %vm7597_vm3 }
0x1589   :  { %v1656_v53 = vsel %vm5829_vm11, %v6512_v27, 0.0  ;;  %v1542_v44 = vsel %vm5794_vm6, %v6512_v27, 0.0  ;;  %v1884_v21 = vsel %vm5915_vm4, %v6512_v27, 0.0  ;;  %v1770_v0 = vsel %vm5873_vm2, %v6512_v27, 0.0 }
0x158a   :  { %v1658_v11 = vsel %vm7592_vm9, %v1656_v53, 0.0  ;;  %v1544_v14 = vsel %vm7593_vm8, %v1542_v44, 0.0  ;;  %v1886_v62 = vsel %vm7594_vm12, %v1884_v21, 0.0  ;;  %v1772_v25 = vsel %vm7595_vm0, %v1770_v0, 0.0  ;;  %vm7596_vm8 = vmmov %vm7595_vm0  ;;  %v5208_v53 = vpop.f32.mrf.mxu0 }
0x158b   :  { %1661 = vadd.xlane.f32.xlu1 %v1658_v11  ;;  %1547 = vadd.xlane.f32.xlu0 %v1544_v14  ;;  %v2112_v50 = vsel %vm6015_vm5, %v6512_v27, 0.0  ;;  %v1998_v17 = vsel %vm5963_vm7, %v6512_v27, 0.0  ;;  %vm1513_vm9 = vcmp.ge.s32.totalorder %v5942_v5, 15  ;;  %v2340_v9 = vsel %vm6135_vm13, %v6512_v27, 0.0 }
0x158c   :  { %v2114_v23 = vsel %vm7596_vm8, %v2112_v50, 0.0  ;;  %v2000_v41 = vsel %vm7597_vm3, %v1998_v17, 0.0  ;;  %vm7598_vm12 = vnez %v7466_v52  ;;  %vm7599_vm0 = vcmp.eq.s32.totalorder %v5776_v33, 15  ;;  %vm7604_vm8 = vmmov %vm7597_vm3 }
0x158d   :  { %v2226_v36 = vsel %vm7598_vm12, %v6512_v27, 0.0  ;;  %vm6547_vm1 = vmand %vm7599_vm0, %vm1513_vm9  ;;  %v2342_v38 = vsel %vm7603_vm14, %v2340_v9, 0.0  ;;  %vm7607_vm9 = vnez %v7508_v7 }
0x158e   :  { %v7601_v59 = vsel %vm6547_vm1, 4294967295, %v7600_v59  ;;  %v2228_v28 = vsel %vm7604_vm8, %v2226_v36, 0.0  ;;  %v1517_v48 = vsel %vm6547_vm1, %v6464_v18, 0.0  ;;  %vm7606_vm14 = vmmov %vm7599_vm0  ;;  %vm7608_vm0 = vnez %v7501_v3 }
0x158f   :  { %1889 = vadd.xlane.f32.xlu1 %v1886_v62  ;;  %1775 = vadd.xlane.f32.xlu0 %v1772_v25  ;;  %7602 = vst [vmem:[#allocation33_spill] sm:$0xff] %v7601_v59  ;;  %v1521_v31 = vsel %vm7597_vm3, %v1517_v48, 0.0  ;;  %vm7609_vm8 = vmmov %vm7597_vm3  ;;  %vm7611_vm1 = vnez %v7523_v16  ;;  %v7798_v16 = vld [vmem:[#allocation23_spill] sm:$0xff] }
0x1593   :  { %2117 = vadd.xlane.f32.xlu1 %v2114_v23  ;;  %2003 = vadd.xlane.f32.xlu0 %v2000_v41 }
0x1597   :  { %2345 = vadd.xlane.f32.xlu1 %v2342_v38  ;;  %2231 = vadd.xlane.f32.xlu0 %v2228_v28 }
0x159b   :  { %1522 = vadd.xlane.f32.xlu0 %v1521_v31 }
0x1614   :  { %v1662_v44 = vpop.xlane.xlu1 %1661  ;;  %v1548_v11 = vpop.xlane.xlu0 %1547 }
0x1615   :  { %v1663_v14 = vrot.slane %v1662_v44, 4  ;;  %v1549_v21 = vrot.slane %v1548_v11, 4 }
0x1617   :  { %v1664_v0 = vadd.f32 %v1663_v14, %v1662_v44  ;;  %v1550_v62 = vadd.f32 %v1549_v21, %v1548_v11 }
0x1618   :  { %v1890_v25 = vpop.xlane.xlu1 %1889  ;;  %v1776_v50 = vpop.xlane.xlu0 %1775 }
0x1619   :  { %v1891_v17 = vrot.slane %v1890_v25, 4  ;;  %v1777_v23 = vrot.slane %v1776_v50, 4  ;;  %v1551_v41 = vrot.slane %v1550_v62, 2  ;;  %v1665_v9 = vrot.slane %v1664_v0, 2 }
0x161b   :  { %v1892_v36 = vadd.f32 %v1891_v17, %v1890_v25  ;;  %v1778_v18 = vadd.f32 %v1777_v23, %v1776_v50  ;;  %v1552_v38 = vadd.f32 %v1551_v41, %v1550_v62  ;;  %v1666_v28 = vadd.f32 %v1665_v9, %v1664_v0 }
0x161c   :  { %v2118_v48 = vpop.xlane.xlu1 %2117  ;;  %v2004_v31 = vpop.xlane.xlu0 %2003 }
0x161d   :  { %v2119_v45 = vrot.slane %v2118_v48, 4  ;;  %v2005_v53 = vrot.slane %v2004_v31, 4  ;;  %v1553_v59 = vrot.slane %v1552_v38, 1  ;;  %v1667_v63 = vrot.slane %v1666_v28, 1 }
0x161e   :  { %v1779_v1 = vrot.slane %v1778_v18, 2  ;;  %v1893_v57 = vrot.slane %v1892_v36, 2 }
0x161f   :  { %v2120_v44 = vadd.f32 %v2119_v45, %v2118_v48  ;;  %v2006_v11 = vadd.f32 %v2005_v53, %v2004_v31  ;;  %v1554_v14 = vadd.f32 %v1553_v59, %v1552_v38  ;;  %v1668_v21 = vadd.f32 %v1667_v63, %v1666_v28 }
0x1620   :  { %v2346_v19 = vpop.xlane.xlu1 %2345  ;;  %v2232_v52 = vpop.xlane.xlu0 %2231  ;;  %v1780_v49 = vadd.f32 %v1779_v1, %v1778_v18  ;;  %v1894_v35 = vadd.f32 %v1893_v57, %v1892_v36  ;;  %v7605_v38 = vstv %s6505_s24 }
0x1621   :  { %v2347_v25 = vrot.slane %v2346_v19, 4  ;;  %v2233_v62 = vrot.slane %v2232_v52, 4  ;;  %5406 = vpush %v1554_v14  ;;  %v2007_v0 = vrot.slane %v2006_v11, 2  ;;  %v2121_v50 = vrot.slane %v2120_v44, 2 }
0x1622   :  { %5408 = vpush %v1668_v21  ;;  %v1781_v17 = vrot.slane %v1780_v49, 1  ;;  %v1895_v23 = vrot.slane %v1894_v35, 1 }
0x1623   :  { %v2348_v41 = vadd.f32 %v2347_v25, %v2346_v19  ;;  %v2234_v9 = vadd.f32 %v2233_v62, %v2232_v52  ;;  %v2008_v39 = vadd.f32 %v2007_v0, %v2006_v11  ;;  %v2122_v45 = vadd.f32 %v2121_v50, %v2120_v44 }
0x1624   :  { %v1523_v48 = vpop.xlane.xlu0 %1522  ;;  %v1782_v59 = vadd.f32 %v1781_v17, %v1780_v49  ;;  %v1896_v63 = vadd.f32 %v1895_v23, %v1894_v35 }
0x1625   :  { %v1526_v28 = vmul.f32 %v7605_v38, %v1523_v48  ;;  %v2009_v1 = vrot.slane %v2008_v39, 1  ;;  %v2123_v57 = vrot.slane %v2122_v45, 1  ;;  %v2235_v36 = vrot.slane %v2234_v9, 2 }
0x1626   :  { %5410 = vpush %v1782_v59  ;;  %v2349_v18 = vrot.slane %v2348_v41, 2 }
0x1627   :  { %v1528_v31 = vsel %vm7606_vm14, %v1526_v28, 0.0  ;;  %5412 = vpush %v1896_v63  ;;  %v2010_v53 = vadd.f32 %v2009_v1, %v2008_v39  ;;  %v2124_v14 = vadd.f32 %v2123_v57, %v2122_v45  ;;  %v2236_v19 = vadd.f32 %v2235_v36, %v2234_v9 }
0x1628   :  { %v6564_v52 = vadd.f32 %v1528_v31, %v6454_v8  ;;  %v2350_v44 = vadd.f32 %v2349_v18, %v2348_v41  ;;  %vm7610_vm14 = vnez %v7534_v12 }
0x1629   :  { %5414 = vpush %v2010_v53  ;;  %v2237_v35 = vrot.slane %v2236_v19, 1 }
0x162a   :  { %5416 = vpush %v2124_v14  ;;  %v2569_v49 = vsel %vm7607_vm9, %v6564_v52, 0.0  ;;  %v2455_v11 = vsel %vm7608_vm0, %v6564_v52, 0.0  ;;  %v2351_v21 = vrot.slane %v2350_v44, 1  ;;  %v2797_v0 = vsel %vm7610_vm14, %v6564_v52, 0.0  ;;  %vm7612_vm9 = vmmov %vm7597_vm3 }
0x162b   :  { %v2571_v39 = vsel %vm7609_vm8, %v2569_v49, 0.0  ;;  %v2457_v25 = vsel %vm7597_vm3, %v2455_v11, 0.0  ;;  %v2238_v62 = vadd.f32 %v2237_v35, %v2236_v19  ;;  %v2683_v50 = vsel %vm7611_vm1, %v6564_v52, 0.0  ;;  %vm7613_vm0 = vmmov %vm7597_vm3 }
0x162c   :  { %2573 = vadd.xlane.f32.xlu0 %v2571_v39  ;;  %2459 = vadd.xlane.f32.xlu1 %v2457_v25  ;;  %v2352_v8 = vadd.f32 %v2351_v21, %v2350_v44  ;;  %v2799_v17 = vsel %vm7612_vm9, %v2797_v0, 0.0  ;;  %v2685_v23 = vsel %vm7613_vm0, %v2683_v50, 0.0  ;;  %vm7614_vm8 = vnez %v7556_v61  ;;  %vm7616_vm14 = vmmov %vm7613_vm0  ;;  %v7823_v61 = vld [vmem:[#allocation29_spill] sm:$0xff] }
0x162d   :  { %5418 = vpush %v2238_v62  ;;  %v3025_v41 = vsel %vm7614_vm8, %v6564_v52, 0.0  ;;  %vm7615_vm3 = vnez %v7545_v26  ;;  %vm7617_vm13 = vmmov %vm7613_vm0  ;;  %v3253_v59 = vsel %vm6460_vm15, %v6564_v52, 0.0  ;;  %v3139_v63 = vsel %vm6416_vm10, %v6564_v52, 0.0  ;;  %v7815_v26 = vld [vmem:[#allocation27_spill] sm:$0xff] }
0x162e   :  { %5420 = vpush %v2352_v8  ;;  %v2911_v9 = vsel %vm7615_vm3, %v6564_v52, 0.0  ;;  %v3027_v45 = vsel %vm7616_vm14, %v3025_v41, 0.0  ;;  %vm7618_vm9 = vmmov %vm7613_vm0  ;;  %v3141_v28 = vsel %vm7613_vm0, %v3139_v63, 0.0  ;;  %vm7619_vm14 = vcmp.eq.s32.totalorder %v5768_v2, 1 }
0x162f   :  { %v2913_v48 = vsel %vm7617_vm13, %v2911_v9, 0.0  ;;  %v3255_v38 = vsel %vm7618_vm9, %v3253_v59, 0.0  ;;  %v1645_v1 = vsel %vm7619_vm14, %v6512_v27, 0.0  ;;  %vm7620_vm13 = vmmov %vm7613_vm0  ;;  %vm7621_vm9 = vcmp.eq.s32.totalorder %v5776_v33, 0 }
0x1630   :  { %2801 = vadd.xlane.f32.xlu0 %v2799_v17  ;;  %2687 = vadd.xlane.f32.xlu1 %v2685_v23  ;;  %v1647_v57 = vsel %vm7620_vm13, %v1645_v1, 0.0  ;;  %v5017_v19 = vsel %vm7621_vm9, 1.0, %v7575_v60  ;;  %vm1670_vm0 = vcmp.lt.s32.totalorder %v5776_v33, 1  ;;  %vm7622_vm14 = vcmp.eq.s32.totalorder %v5768_v2, 0 }
0x1631   :  { %v1650_v36 = vrot.slane %v1647_v57, 4  ;;  %v1633_v44 = vsub.f32 %v5017_v19, %v6557_v51  ;;  %vm7623_vm9 = vmmov 0   ;;  %vm1784_vm15 = vcmp.lt.s32.totalorder %v5776_v33, 2 }
0x1632   :  { %vm7630_vm10 = vcmp.eq.s32.totalorder %v5768_v2, 3 }
0x1633   :  { %v1651_v18 = vadd.f32 %v1650_v36, %v1647_v57 }
0x1634   :  { %3029 = vadd.xlane.f32.xlu0 %v3027_v45  ;;  %2915 = vadd.xlane.f32.xlu1 %v2913_v48 }
0x1635   :  { %v1652_v53 = vrot.slane %v1651_v18, 2 }
0x1637   :  { %v1653_v14 = vadd.f32 %v1652_v53, %v1651_v18 }
0x1638   :  { %3257 = vadd.xlane.f32.xlu0 %v3255_v38  ;;  %3143 = vadd.xlane.f32.xlu1 %v3141_v28 }
0x1639   :  { %v1654_v35 = vrot.slane %v1653_v14, 1 }
0x163b   :  { %v1655_v11 = vadd.f32 %v1654_v35, %v1653_v14 }
0x163d   :  { %v1671_v21 = vsel %vm1670_vm0, %v1655_v11, 0.0  ;;  %vm7624_vm0 = vcmp.eq.s32.totalorder %v5768_v2, 2 }
0x1649   :  { %3590 = vrot.lane.b32.xlu1 %v5798_v43, %s5681_s25 }
0x164e   :  { %3588 = vrot.lane.b32.xlu0 %v5788_v40, %s5681_s25 }
0x1652   :  { %s5407_s26 = spop %5406 }
0x1653   :  { %v1634_v31 = vstv %s5407_s26  ;;  %s5409_s29 = spop %5408 }
0x1654   :  { %5553 = vrcp.f32 %v1634_v31 }
0x1657   :  { %s5411_s30 = spop %5410 }
0x1658   :  { %s5413_s7 = spop %5412 }
0x165a   :  { %s5415_s5 = spop %5414 }
0x165b   :  { %s5417_s8 = spop %5416 }
0x165e   :  { %s5419_s9 = spop %5418 }
0x165f   :  { %s5421_s4 = spop %5420 }
0x1661   :  { %v5554_v43 = vpop.eup %5553 }
0x1662   :  { %v1636_v49 = vmul.f32 %v5554_v43, %v1633_v44 }
0x1664   :  { %v6612_v40 = vrot.slane %v1636_v49, %v5771_v4 }
0x1666   :  { %5210 = vmatpush3.msk.msra.mxu0 %vm7622_vm14, %v6612_v40  ;;  %vm7625_vm14 = vmmov %vm7620_vm13 }
0x1667   :  { %5212 = vmatmul.mubr.msk.f32.vlgmr.msra.gmra.mxu0 %vm7620_vm13, %v1671_v21  ;;  %5214 = vmatprep.subr.mxu0 %v7575_v60  ;;  %vm7626_vm13 = vcmp.eq.s32.totalorder %v5776_v33, 1 }
0x1668   :  { %5216 = vmatprep.mubr.msk.f32.mxu0 %vm7623_vm9, %v7575_v60 }
0x16b5   :  { %v2574_v51 = vpop.xlane.xlu0 %2573  ;;  %v2460_v39 = vpop.xlane.xlu1 %2459 }
0x16b6   :  { %v2575_v25 = vrot.slane %v2574_v51, 4  ;;  %v2461_v62 = vrot.slane %v2460_v39, 4 }
0x16b8   :  { %v2576_v8 = vadd.f32 %v2575_v25, %v2574_v51  ;;  %v2462_v0 = vadd.f32 %v2461_v62, %v2460_v39 }
0x16b9   :  { %v2802_v50 = vpop.xlane.xlu0 %2801  ;;  %v2688_v17 = vpop.xlane.xlu1 %2687 }
0x16ba   :  { %v2803_v23 = vrot.slane %v2802_v50, 4  ;;  %v2689_v41 = vrot.slane %v2688_v17, 4  ;;  %v2463_v9 = vrot.slane %v2462_v0, 2  ;;  %v2577_v45 = vrot.slane %v2576_v8, 2 }
0x16bc   :  { %v2804_v48 = vadd.f32 %v2803_v23, %v2802_v50  ;;  %v2690_v59 = vadd.f32 %v2689_v41, %v2688_v17  ;;  %v2464_v63 = vadd.f32 %v2463_v9, %v2462_v0  ;;  %v2578_v38 = vadd.f32 %v2577_v45, %v2576_v8 }
0x16bd   :  { %v3030_v28 = vpop.xlane.xlu0 %3029  ;;  %v2916_v1 = vpop.xlane.xlu1 %2915 }
0x16be   :  { %v3031_v57 = vrot.slane %v3030_v28, 4  ;;  %v2917_v36 = vrot.slane %v2916_v1, 4  ;;  %v2465_v18 = vrot.slane %v2464_v63, 1  ;;  %v2579_v31 = vrot.slane %v2578_v38, 1 }
0x16bf   :  { %v2691_v53 = vrot.slane %v2690_v59, 2  ;;  %v2805_v14 = vrot.slane %v2804_v48, 2 }
0x16c0   :  { %v3032_v19 = vadd.f32 %v3031_v57, %v3030_v28  ;;  %v2918_v44 = vadd.f32 %v2917_v36, %v2916_v1  ;;  %v2466_v35 = vadd.f32 %v2465_v18, %v2464_v63  ;;  %v2580_v43 = vadd.f32 %v2579_v31, %v2578_v38 }
0x16c1   :  { %v3258_v49 = vpop.xlane.xlu0 %3257  ;;  %v3144_v11 = vpop.xlane.xlu1 %3143  ;;  %v2692_v21 = vadd.f32 %v2691_v53, %v2690_v59  ;;  %v2806_v51 = vadd.f32 %v2805_v14, %v2804_v48 }
0x16c2   :  { %v3259_v39 = vrot.slane %v3258_v49, 4  ;;  %v3145_v25 = vrot.slane %v3144_v11, 4  ;;  %5422 = vpush %v2466_v35  ;;  %v2919_v62 = vrot.slane %v2918_v44, 2  ;;  %v3033_v8 = vrot.slane %v3032_v19, 2 }
0x16c3   :  { %5424 = vpush %v2580_v43  ;;  %v2693_v0 = vrot.slane %v2692_v21, 1  ;;  %v2807_v50 = vrot.slane %v2806_v51, 1  ;;  %v1748_v43 = vstv %s5409_s29 }
0x16c4   :  { %v3260_v17 = vadd.f32 %v3259_v39, %v3258_v49  ;;  %v3146_v23 = vadd.f32 %v3145_v25, %v3144_v11  ;;  %v2920_v41 = vadd.f32 %v2919_v62, %v2918_v44  ;;  %v3034_v9 = vadd.f32 %v3033_v8, %v3032_v19 }
0x16c5   :  { %v2694_v45 = vadd.f32 %v2693_v0, %v2692_v21  ;;  %v2808_v28 = vadd.f32 %v2807_v50, %v2806_v51  ;;  %v1759_v19 = vsel %vm7624_vm0, %v6512_v27, 0.0  ;;  %5555 = vrcp.f32 %v1748_v43 }
0x16c6   :  { %v2921_v63 = vrot.slane %v2920_v41, 1  ;;  %v3035_v38 = vrot.slane %v3034_v9, 1  ;;  %v3147_v1 = vrot.slane %v3146_v23, 2  ;;  %v3261_v57 = vrot.slane %v3260_v17, 2 }
0x16c7   :  { %5426 = vpush %v2694_v45  ;;  %v1761_v44 = vsel %vm7625_vm14, %v1759_v19, 0.0  ;;  %v5020_v51 = vsel %vm7626_vm13, 1.0, %v7575_v60  ;;  %vm7627_vm0 = vcmp.eq.s32.totalorder %v5768_v2, 0  ;;  %vm7628_vm14 = vcmp.eq.s32.totalorder %v5768_v2, 1 }
0x16c8   :  { %5428 = vpush %v2808_v28  ;;  %v2922_v48 = vadd.f32 %v2921_v63, %v2920_v41  ;;  %v3036_v59 = vadd.f32 %v3035_v38, %v3034_v9  ;;  %v3148_v36 = vadd.f32 %v3147_v1, %v3146_v23  ;;  %v3262_v18 = vadd.f32 %v3261_v57, %v3260_v17 }
0x16c9   :  { %v1764_v49 = vrot.slane %v1761_v44, 4  ;;  %v1641_v9 = vsel %vm7627_vm0, %v6612_v40, 0.0  ;;  %vm7629_vm13 = vcmask 130048   ;;  %v1873_v38 = vsel %vm7630_vm10, %v6512_v27, 0.0 }
0x16ca   :  { %5430 = vpush %v2922_v48  ;;  %v3149_v31 = vrot.slane %v3148_v36, 1  ;;  %v3263_v53 = vrot.slane %v3262_v18, 1  ;;  %vm7631_vm0 = vmmov %vm7629_vm13  ;;  %v1862_v1 = vstv %s5411_s30  ;;  %vm7633_vm10 = vcmp.eq.s32.totalorder %v5768_v2, 2 }
0x16cb   :  { %5432 = vpush %v3036_v59  ;;  %v1765_v11 = vadd.f32 %v1764_v49, %v1761_v44  ;;  %v1875_v40 = vsel %vm7631_vm0, %v1873_v38, 0.0  ;;  %5557 = vrcp.f32 %v1862_v1 }
0x16cc   :  { %v3150_v14 = vadd.f32 %v3149_v31, %v3148_v36  ;;  %v3264_v35 = vadd.f32 %v3263_v53, %v3262_v18  ;;  %v1878_v57 = vrot.slane %v1875_v40, 4 }
0x16cd   :  { %v1766_v21 = vrot.slane %v1765_v11, 2 }
0x16ce   :  { %5434 = vpush %v3150_v14  ;;  %v1879_v48 = vadd.f32 %v1878_v57, %v1875_v40 }
0x16cf   :  { %5436 = vpush %v3264_v35  ;;  %v1767_v39 = vadd.f32 %v1766_v21, %v1765_v11 }
0x16d0   :  { %v1880_v59 = vrot.slane %v1879_v48, 2 }
0x16d1   :  { %v1768_v50 = vrot.slane %v1767_v39, 1 }
0x16d2   :  { %v5556_v8 = vpop.eup %5555  ;;  %v1881_v18 = vadd.f32 %v1880_v59, %v1879_v48 }
0x16d3   :  { %v1769_v41 = vadd.f32 %v1768_v50, %v1767_v39 }
0x16d4   :  { %v1882_v19 = vrot.slane %v1881_v18, 1 }
0x16d5   :  { %v1785_v63 = vsel %vm1784_vm15, %v1769_v41, 0.0  ;;  %vm7632_vm15 = vcmp.eq.s32.totalorder %v5776_v33, 2 }
0x16d6   :  { %v5022_v36 = vsel %vm7632_vm15, 1.0, %v7575_v60  ;;  %v1883_v49 = vadd.f32 %v1882_v19, %v1881_v18 }
0x16d8   :  { %v5558_v14 = vpop.eup %5557 }
0x16f3   :  { %s5423_s10 = spop %5422 }
0x16f4   :  { %s5425_s11 = spop %5424 }
0x16f8   :  { %s5427_s12 = spop %5426 }
0x16f9   :  { %s5429_s13 = spop %5428 }
0x16fb   :  { %s5431_s14 = spop %5430 }
0x16fc   :  { %s5433_s0 = spop %5432 }
0x16ff   :  { %s5435_s1 = spop %5434 }
0x1700   :  { %s5437_s20 = spop %5436 }
0x1727   :  { %v1741_v25 = vpop.f32.mrf.mxu0 }
0x1728   :  { %v1747_v62 = vsub.f32 %v5020_v51, %v1741_v25 }
0x1729   :  { %v5213_v0 = vpop.f32.mrf.mxu0 }
0x172a   :  { %v1750_v17 = vmul.f32 %v5556_v8, %v1747_v62  ;;  %v1976_v62 = vstv %s5413_s7 }
0x172b   :  { %5559 = vrcp.f32 %v1976_v62 }
0x172c   :  { %v1754_v23 = vrot.slane %v1750_v17, %v5771_v4 }
0x172e   :  { %v1755_v45 = vsel %vm7628_vm14, %v1754_v23, 0.0  ;;  %vm1898_vm14 = vcmp.lt.s32.totalorder %v5776_v33, 3 }
0x172f   :  { %v1757_v28 = vadd.f32 %v1755_v45, %v1641_v9  ;;  %v1899_v51 = vsel %vm1898_vm14, %v1883_v49, 0.0  ;;  %vm7638_vm14 = vcmp.eq.s32.totalorder %v5768_v2, 3 }
0x1731   :  { %5215 = vmatpush3.msra.mxu0 %v1757_v28 }
0x1732   :  { %5217 = vmatmul.mubr.msk.f32.vlgmr.msra.gmra.mxu0 %vm7629_vm13, %v1785_v63  ;;  %5219 = vmatprep.subr.mxu0 %v7575_v60  ;;  %vm7634_vm13 = vmmov %vm7631_vm0  ;;  %vm7635_vm0 = vcmp.eq.s32.totalorder %v5768_v2, 4 }
0x1733   :  { %5221 = vmatprep.mubr.msk.f32.mxu0 %vm7623_vm9, %v7575_v60  ;;  %v1987_v39 = vsel %vm7635_vm0, %v6512_v27, 0.0  ;;  %vm7636_vm15 = vmmov %vm7634_vm13 }
0x1734   :  { %v1989_v25 = vsel %vm7636_vm15, %v1987_v39, 0.0  ;;  %vm7639_vm0 = vmmov %vm7636_vm15  ;;  %vm7640_vm15 = vcmp.eq.s32.totalorder %v5768_v2, 5 }
0x1735   :  { %v1992_v8 = vrot.slane %v1989_v25, 4 }
0x1737   :  { %v1993_v0 = vadd.f32 %v1992_v8, %v1989_v25 }
0x1738   :  { %v5560_v45 = vpop.eup %5559 }
0x1739   :  { %v1994_v50 = vrot.slane %v1993_v0, 2 }
0x173b   :  { %v1995_v23 = vadd.f32 %v1994_v50, %v1993_v0 }
0x173d   :  { %v1996_v63 = vrot.slane %v1995_v23, 1 }
0x173f   :  { %v1997_v1 = vadd.f32 %v1996_v63, %v1995_v23 }
0x17f2   :  { %v1855_v31 = vpop.f32.mrf.mxu0 }
0x17f3   :  { %v1861_v53 = vsub.f32 %v5022_v36, %v1855_v31  ;;  %v2101_v36 = vsel %vm7640_vm15, %v6512_v27, 0.0  ;;  %v2090_v31 = vstv %s5415_s5 }
0x17f4   :  { %v5218_v35 = vpop.f32.mrf.mxu0  ;;  %5561 = vrcp.f32 %v2090_v31 }
0x17f5   :  { %v1864_v44 = vmul.f32 %v5558_v14, %v1861_v53 }
0x17f7   :  { %v1868_v43 = vrot.slane %v1864_v44, %v5771_v4 }
0x17f9   :  { %v1869_v11 = vsel %vm7633_vm10, %v1868_v43, 0.0  ;;  %vm7637_vm10 = vcmp.eq.s32.totalorder %v5776_v33, 3 }
0x17fa   :  { %v1871_v21 = vadd.f32 %v1869_v11, %v1757_v28  ;;  %v5024_v17 = vsel %vm7637_vm10, 1.0, %v7575_v60  ;;  %vm7641_vm10 = vmmov %vm7639_vm0 }
0x17fb   :  { %v2103_v18 = vsel %vm7641_vm10, %v2101_v36, 0.0  ;;  %vm7644_vm15 = vmmov %vm7641_vm10  ;;  %vm7645_vm10 = vcmp.eq.s32.totalorder %v5768_v2, 6 }
0x17fc   :  { %5220 = vmatpush3.msra.mxu0 %v1871_v21  ;;  %v2106_v53 = vrot.slane %v2103_v18, 4 }
0x17fd   :  { %5222 = vmatmul.mubr.msk.f32.vlgmr.msra.gmra.mxu0 %vm7634_vm13, %v1899_v51  ;;  %5229 = vmatprep.subr.mxu0 %v7575_v60  ;;  %vm2012_vm13 = vcmp.lt.s32.totalorder %v5776_v33, 4 }
0x17fe   :  { %5231 = vmatprep.mubr.msk.f32.mxu0 %vm7623_vm9, %v7575_v60  ;;  %v2013_v59 = vsel %vm2012_vm13, %v1997_v1, 0.0  ;;  %v2107_v14 = vadd.f32 %v2106_v53, %v2103_v18  ;;  %vm7643_vm13 = vcmp.eq.s32.totalorder %v5768_v2, 4 }
0x1800   :  { %v2108_v35 = vrot.slane %v2107_v14, 2 }
0x1801   :  { %v5562_v11 = vpop.eup %5561 }
0x1802   :  { %v2109_v44 = vadd.f32 %v2108_v35, %v2107_v14 }
0x1804   :  { %v2110_v51 = vrot.slane %v2109_v44, 1 }
0x1806   :  { %v2111_v62 = vadd.f32 %v2110_v51, %v2109_v44 }
0x18bd   :  { %v1969_v41 = vpop.f32.mrf.mxu0 }
0x18be   :  { %v1975_v9 = vsub.f32 %v5024_v17, %v1969_v41  ;;  %v2215_v17 = vsel %vm7645_vm10, %v6512_v27, 0.0  ;;  %v2204_v41 = vstv %s5417_s8 }
0x18bf   :  { %v5223_v28 = vpop.f32.mrf.mxu0  ;;  %5563 = vrcp.f32 %v2204_v41 }
0x18c0   :  { %v1978_v38 = vmul.f32 %v5560_v45, %v1975_v9 }
0x18c2   :  { %v1982_v40 = vrot.slane %v1978_v38, %v5771_v4 }
0x18c4   :  { %v1983_v57 = vsel %vm7638_vm14, %v1982_v40, 0.0  ;;  %vm7642_vm14 = vcmp.eq.s32.totalorder %v5776_v33, 4 }
0x18c5   :  { %v1985_v48 = vadd.f32 %v1983_v57, %v1871_v21  ;;  %v5026_v19 = vsel %vm7642_vm14, 1.0, %v7575_v60  ;;  %vm7646_vm14 = vmmov %vm7644_vm15 }
0x18c6   :  { %v2217_v23 = vsel %vm7646_vm14, %v2215_v17, 0.0  ;;  %vm7649_vm10 = vmmov %vm7646_vm14  ;;  %vm7650_vm14 = vcmp.eq.s32.totalorder %v5768_v2, 7 }
0x18c7   :  { %5225 = vmatpush3.msra.mxu1 %v1985_v48  ;;  %v2220_v9 = vrot.slane %v2217_v23, 4 }
0x18c8   :  { %5227 = vmatmul.mubr.msk.f32.vlgmr.msra.gmra.mxu1 %vm7639_vm0, %v2013_v59  ;;  %5234 = vmatprep.subr.mxu1 %v7575_v60  ;;  %vm2126_vm0 = vcmp.lt.s32.totalorder %v5776_v33, 5 }
0x18c9   :  { %5236 = vmatprep.mubr.msk.f32.mxu1 %vm7623_vm9, %v7575_v60  ;;  %v2127_v50 = vsel %vm2126_vm0, %v2111_v62, 0.0  ;;  %v2221_v45 = vadd.f32 %v2220_v9, %v2217_v23  ;;  %vm7648_vm0 = vcmp.eq.s32.totalorder %v5768_v2, 5 }
0x18cb   :  { %v2222_v28 = vrot.slane %v2221_v45, 2 }
0x18cc   :  { %v5564_v57 = vpop.eup %5563 }
0x18cd   :  { %v2223_v38 = vadd.f32 %v2222_v28, %v2221_v45 }
0x18cf   :  { %v2224_v59 = vrot.slane %v2223_v38, 1 }
0x18d1   :  { %v2225_v31 = vadd.f32 %v2224_v59, %v2223_v38  ;;  %v2432_v38 = vstv %s5421_s4 }
0x1988   :  { %v2083_v43 = vpop.f32.mrf.mxu1 }
0x1989   :  { %v2089_v49 = vsub.f32 %v5026_v19, %v2083_v43  ;;  %v2329_v19 = vsel %vm7650_vm14, %v6512_v27, 0.0  ;;  %v2318_v43 = vstv %s5419_s9 }
0x198a   :  { %v5228_v21 = vpop.f32.mrf.mxu1  ;;  %5565 = vrcp.f32 %v2318_v43 }
0x198b   :  { %v2092_v39 = vmul.f32 %v5562_v11, %v2089_v49  ;;  %5567 = vrcp.f32 %v2432_v38 }
0x198d   :  { %v2096_v25 = vrot.slane %v2092_v39, %v5771_v4 }
0x198f   :  { %v2097_v8 = vsel %vm7643_vm13, %v2096_v25, 0.0  ;;  %vm7647_vm13 = vcmp.eq.s32.totalorder %v5776_v33, 5 }
0x1990   :  { %v2099_v0 = vadd.f32 %v2097_v8, %v1985_v48  ;;  %v5028_v63 = vsel %vm7647_vm13, 1.0, %v7575_v60  ;;  %vm7651_vm13 = vmmov %vm7649_vm10 }
0x1991   :  { %v2331_v44 = vsel %vm7651_vm13, %v2329_v19, 0.0  ;;  %vm7654_vm14 = vmmov %vm7651_vm13  ;;  %vm7655_vm13 = vcmp.eq.s32.totalorder %v5942_v5, 8 }
0x1992   :  { %5230 = vmatpush3.msra.mxu0 %v2099_v0  ;;  %v2334_v49 = vrot.slane %v2331_v44, 4  ;;  %v2444_v28 = vsel %vm7655_vm13, %v6564_v52, 0.0 }
0x1993   :  { %5232 = vmatmul.mubr.msk.f32.vlgmr.msra.gmra.mxu0 %vm7644_vm15, %v2127_v50  ;;  %5239 = vmatprep.subr.mxu0 %v7575_v60  ;;  %vm2240_vm15 = vcmp.lt.s32.totalorder %v5776_v33, 6 }
0x1994   :  { %5241 = vmatprep.mubr.msk.f32.mxu0 %vm7623_vm9, %v7575_v60  ;;  %v2241_v35 = vsel %vm2240_vm15, %v2225_v31, 0.0  ;;  %v2335_v11 = vadd.f32 %v2334_v49, %v2331_v44  ;;  %vm7653_vm15 = vcmp.eq.s32.totalorder %v5768_v2, 6 }
0x1996   :  { %v2336_v21 = vrot.slane %v2335_v11, 2 }
0x1997   :  { %v5566_v8 = vpop.eup %5565 }
0x1998   :  { %v2337_v39 = vadd.f32 %v2336_v21, %v2335_v11  ;;  %v5568_v31 = vpop.eup %5567 }
0x199a   :  { %v2338_v50 = vrot.slane %v2337_v39, 1 }
0x199c   :  { %v2339_v23 = vadd.f32 %v2338_v50, %v2337_v39 }
0x1a53   :  { %v2197_v40 = vpop.f32.mrf.mxu0 }
0x1a54   :  { %v2203_v1 = vsub.f32 %v5028_v63, %v2197_v40 }
0x1a55   :  { %v5233_v48 = vpop.f32.mrf.mxu0 }
0x1a56   :  { %v2206_v36 = vmul.f32 %v5564_v57, %v2203_v1 }
0x1a58   :  { %v2210_v18 = vrot.slane %v2206_v36, %v5771_v4 }
0x1a5a   :  { %v2211_v53 = vsel %vm7648_vm0, %v2210_v18, 0.0  ;;  %vm7652_vm0 = vcmp.eq.s32.totalorder %v5776_v33, 6 }
0x1a5b   :  { %v2213_v14 = vadd.f32 %v2211_v53, %v2099_v0  ;;  %v5030_v51 = vsel %vm7652_vm0, 1.0, %v7575_v60  ;;  %vm7656_vm0 = vmmov %vm7654_vm14 }
0x1a5c   :  { %v2446_v63 = vsel %vm7656_vm0, %v2444_v28, 0.0  ;;  %vm7659_vm13 = vmmov %vm7656_vm0  ;;  %vm7660_vm0 = vcmp.eq.s32.totalorder %v5942_v5, 9 }
0x1a5d   :  { %5235 = vmatpush3.msra.mxu1 %v2213_v14  ;;  %v2448_v40 = vrot.slane %v2446_v63, 4  ;;  %v2558_v21 = vsel %vm7660_vm0, %v6564_v52, 0.0 }
0x1a5e   :  { %5237 = vmatmul.mubr.msk.f32.vlgmr.msra.gmra.mxu1 %vm7649_vm10, %v2241_v35  ;;  %5244 = vmatprep.subr.mxu1 %v7575_v60  ;;  %vm2354_vm10 = vcmp.lt.s32.totalorder %v5776_v33, 7 }
0x1a5f   :  { %5246 = vmatprep.mubr.msk.f32.mxu1 %vm7623_vm9, %v7575_v60  ;;  %v2355_v45 = vsel %vm2354_vm10, %v2339_v23, 0.0  ;;  %v2449_v1 = vadd.f32 %v2448_v40, %v2446_v63  ;;  %vm7658_vm10 = vcmp.eq.s32.totalorder %v5768_v2, 7 }
0x1a61   :  { %v2450_v57 = vrot.slane %v2449_v1, 2 }
0x1a63   :  { %v2451_v59 = vadd.f32 %v2450_v57, %v2449_v1  ;;  %v2660_v57 = vstv %s5425_s11 }
0x1b1e   :  { %v2311_v25 = vpop.f32.mrf.mxu1 }
0x1b1f   :  { %v2317_v62 = vsub.f32 %v5030_v51, %v2311_v25  ;;  %v2546_v25 = vstv %s5423_s10 }
0x1b20   :  { %v5238_v0 = vpop.f32.mrf.mxu1  ;;  %5569 = vrcp.f32 %v2546_v25 }
0x1b21   :  { %v2320_v17 = vmul.f32 %v5566_v8, %v2317_v62  ;;  %5571 = vrcp.f32 %v2660_v57 }
0x1b23   :  { %v2324_v27 = vrot.slane %v2320_v17, %v5771_v4 }
0x1b25   :  { %v2325_v41 = vsel %vm7653_vm15, %v2324_v27, 0.0  ;;  %vm7657_vm15 = vcmp.eq.s32.totalorder %v5776_v33, 7 }
0x1b26   :  { %v2327_v9 = vadd.f32 %v2325_v41, %v2213_v14  ;;  %v5032_v48 = vsel %vm7657_vm15, 1.0, %v7575_v60  ;;  %v2452_v14 = vrot.slane %v2451_v59, 1  ;;  %vm7661_vm15 = vmmov %vm7659_vm13 }
0x1b27   :  { %v2560_v51 = vsel %vm7661_vm15, %v2558_v21, 0.0  ;;  %vm7664_vm0 = vmmov %vm7661_vm15  ;;  %vm7665_vm15 = vcmp.eq.s32.totalorder %v5942_v5, 10 }
0x1b28   :  { %5240 = vmatpush3.msra.mxu0 %v2327_v9  ;;  %v2453_v44 = vadd.f32 %v2452_v14, %v2451_v59  ;;  %v2562_v39 = vrot.slane %v2560_v51, 4  ;;  %v2672_v40 = vsel %vm7665_vm15, %v6564_v52, 0.0  ;;  %vm2696_vm15 = vcmp.lt.s32.totalorder %v5776_v33, 10 }
0x1b29   :  { %5242 = vmatmul.mubr.msk.f32.vlgmr.msra.gmra.mxu0 %vm7654_vm14, %v2355_v45  ;;  %5249 = vmatprep.subr.mxu0 %v7575_v60  ;;  %vm2468_vm14 = vcmp.lt.s32.totalorder %v5776_v33, 8 }
0x1b2a   :  { %5253 = vmatprep.mubr.msk.f32.mxu0 %vm7623_vm9, %v7575_v60  ;;  %v2469_v11 = vsel %vm2468_vm14, %v2453_v44, 0.0  ;;  %v2563_v62 = vadd.f32 %v2562_v39, %v2560_v51  ;;  %vm2582_vm14 = vcmp.lt.s32.totalorder %v5776_v33, 9 }
0x1b2c   :  { %v2564_v8 = vrot.slane %v2563_v62, 2 }
0x1b2d   :  { %v5570_v41 = vpop.eup %5569 }
0x1b2e   :  { %v2565_v0 = vadd.f32 %v2564_v8, %v2563_v62 }
0x1b30   :  { %v2566_v23 = vrot.slane %v2565_v0, 1 }
0x1b32   :  { %v2567_v63 = vadd.f32 %v2566_v23, %v2565_v0 }
0x1b34   :  { %v2583_v38 = vsel %vm2582_vm14, %v2567_v63, 0.0  ;;  %vm7667_vm14 = vcmp.eq.s32.totalorder %v5776_v33, 9 }
0x1be9   :  { %v2425_v36 = vpop.f32.mrf.mxu0 }
0x1bea   :  { %v2431_v18 = vsub.f32 %v5032_v48, %v2425_v36 }
0x1beb   :  { %v5243_v53 = vpop.f32.mrf.mxu0 }
0x1bec   :  { %v2434_v35 = vmul.f32 %v5568_v31, %v2431_v18  ;;  %v5037_v18 = vsel %vm7667_vm14, 1.0, %v7575_v60  ;;  %vm7669_vm14 = vcmp.eq.s32.totalorder %v5942_v5, 11 }
0x1bed   :  { %v2786_v8 = vsel %vm7669_vm14, %v6564_v52, 0.0 }
0x1bee   :  { %v2438_v19 = vrot.slane %v2434_v35, %v5771_v4  ;;  %v5572_v35 = vpop.eup %5571 }
0x1bf0   :  { %v2439_v43 = vsel %vm7658_vm10, %v2438_v19, 0.0  ;;  %vm7662_vm10 = vcmp.eq.s32.totalorder %v5776_v33, 8 }
0x1bf1   :  { %v6725_v49 = vadd.f32 %v2439_v43, %v2327_v9  ;;  %v5034_v50 = vsel %vm7662_vm10, 1.0, %v7575_v60  ;;  %vm7666_vm10 = vmmov %vm7664_vm0 }
0x1bf2   :  { %v2674_v1 = vsel %vm7666_vm10, %v2672_v40, 0.0 }
0x1bf3   :  { %5245 = vmatpush3.msra.mxu1 %v6725_v49  ;;  %3441 = vxpose.xlu1.b32.start [1/2] (short) (narrow) %v6725_v49, 16  ;;  %v2676_v48 = vrot.slane %v2674_v1, 4 }
0x1bf4   :  { %5247 = vmatmul.mubr.msk.f32.vlgmr.msra.gmra.mxu1 %vm7659_vm13, %v2469_v11  ;;  %5256 = vmatprep.subr.mxu1 %v7575_v60  ;;  %vm7663_vm13 = vcmp.eq.s32.totalorder %v5942_v5, 8 }
0x1bf5   :  { %5260 = vmatprep.mubr.msk.f32.mxu1 %vm7623_vm9, %v7575_v60  ;;  %v2677_v59 = vadd.f32 %v2676_v48, %v2674_v1 }
0x1bf7   :  { %v2678_v36 = vrot.slane %v2677_v59, 2 }
0x1bf9   :  { %v2679_v53 = vadd.f32 %v2678_v36, %v2677_v59 }
0x1bfb   :  { %v2680_v43 = vrot.slane %v2679_v53, 1 }
0x1bfd   :  { %v2681_v25 = vadd.f32 %v2680_v43, %v2679_v53 }
0x1bff   :  { %v2697_v62 = vsel %vm2696_vm15, %v2681_v25, 0.0  ;;  %vm7672_vm15 = vcmp.eq.s32.totalorder %v5942_v5, 10 }
0x1cb4   :  { %v2539_v17 = vpop.f32.mrf.mxu1 }
0x1cb5   :  { %v2545_v27 = vsub.f32 %v5034_v50, %v2539_v17  ;;  %v2774_v50 = vstv %s5427_s12 }
0x1cb6   :  { %v5248_v9 = vpop.f32.mrf.mxu1  ;;  %5573 = vrcp.f32 %v2774_v50 }
0x1cb7   :  { %v2548_v45 = vmul.f32 %v5570_v41, %v2545_v27 }
0x1cb9   :  { %v2552_v28 = vrot.slane %v2548_v45, %v5771_v4 }
0x1cbb   :  { %5250 = vmatpush3.msk.msra.mxu0 %vm7663_vm13, %v2552_v28  ;;  %v2554_v21 = vsel %vm7663_vm13, %v2552_v28, 0.0  ;;  %vm7670_vm13 = vmmov %vm7666_vm10 }
0x1cbc   :  { %5251 = vmatprep.subr.mxu0 %v7575_v60  ;;  %v2788_v0 = vsel %vm7670_vm13, %v2786_v8, 0.0  ;;  %vm7673_vm14 = vmmov %vm7670_vm13  ;;  %vm7674_vm13 = vcmp.eq.s32.totalorder %v5942_v5, 12 }
0x1cbd   :  { %5252 = vmatpush3.msra.mxu0 %v6725_v49  ;;  %v2790_v17 = vrot.slane %v2788_v0, 4 }
0x1cbe   :  { %5254 = vmatmul.mubr.msk.f32.vlgmr.msra.gmra.mxu0 %vm7664_vm0, %v2583_v38  ;;  %5263 = vmatprep.subr.mxu0 %v7575_v60  ;;  %vm7668_vm0 = vcmp.eq.s32.totalorder %v5942_v5, 9 }
0x1cbf   :  { %5267 = vmatprep.mubr.msk.f32.mxu0 %vm7623_vm9, %v7575_v60  ;;  %v2791_v27 = vadd.f32 %v2790_v17, %v2788_v0 }
0x1cc1   :  { %v2792_v23 = vrot.slane %v2791_v27, 2 }
0x1cc3   :  { %v2793_v45 = vadd.f32 %v2792_v23, %v2791_v27  ;;  %v5574_v63 = vpop.eup %5573 }
0x1cc5   :  { %v2794_v1 = vrot.slane %v2793_v45, 1 }
0x1cc7   :  { %v2795_v36 = vadd.f32 %v2794_v1, %v2793_v45  ;;  %v3002_v45 = vstv %s5431_s14 }
0x1d7e   :  { %v2653_v31 = vpop.f32.mrf.mxu0 }
0x1d7f   :  { %v2659_v14 = vsub.f32 %v5037_v18, %v2653_v31  ;;  %v2900_v31 = vsel %vm7674_vm13, %v6564_v52, 0.0 }
0x1d80   :  { %v5255_v19 = vpop.f32.mrf.mxu0 }
0x1d81   :  { %v2662_v44 = vmul.f32 %v5572_v35, %v2659_v14  ;;  %v2888_v14 = vstv %s5429_s13 }
0x1d82   :  { %5575 = vrcp.f32 %v2888_v14 }
0x1d83   :  { %v2666_v11 = vrot.slane %v2662_v44, %v5771_v4  ;;  %5577 = vrcp.f32 %v3002_v45 }
0x1d85   :  { %v2668_v51 = vsel %vm7668_vm0, %v2666_v11, 0.0  ;;  %vm7671_vm0 = vcmp.eq.s32.totalorder %v5776_v33, 10 }
0x1d86   :  { %v2670_v39 = vadd.f32 %v2668_v51, %v2554_v21  ;;  %v5039_v41 = vsel %vm7671_vm0, 1.0, %v7575_v60  ;;  %vm7675_vm0 = vmmov %vm7673_vm14 }
0x1d87   :  { %v2902_v53 = vsel %vm7675_vm0, %v2900_v31, 0.0  ;;  %vm7678_vm13 = vmmov %vm7675_vm0  ;;  %vm7679_vm0 = vcmp.eq.s32.totalorder %v5942_v5, 13 }
0x1d88   :  { %5257 = vmatpush3.msra.mxu1 %v2670_v39  ;;  %v2904_v35 = vrot.slane %v2902_v53, 4 }
0x1d89   :  { %5258 = vmatprep.subr.mxu1 %v7575_v60 }
0x1d8a   :  { %5259 = vmatpush3.msra.mxu1 %v6725_v49  ;;  %v2905_v19 = vadd.f32 %v2904_v35, %v2902_v53 }
0x1d8b   :  { %5261 = vmatmul.mubr.msk.f32.vlgmr.msra.gmra.mxu1 %vm7666_vm10, %v2697_v62  ;;  %5270 = vmatprep.subr.mxu1 %v7575_v60  ;;  %vm2810_vm10 = vcmp.lt.s32.totalorder %v5776_v33, 11 }
0x1d8c   :  { %5274 = vmatprep.mubr.msk.f32.mxu1 %vm7623_vm9, %v7575_v60  ;;  %v2811_v18 = vsel %vm2810_vm10, %v2795_v36, 0.0  ;;  %v2906_v44 = vrot.slane %v2905_v19, 2  ;;  %vm7677_vm10 = vcmp.eq.s32.totalorder %v5942_v5, 11 }
0x1d8e   :  { %v2907_v21 = vadd.f32 %v2906_v44, %v2905_v19 }
0x1d90   :  { %v2908_v8 = vrot.slane %v2907_v21, 1 }
0x1d92   :  { %v2909_v27 = vadd.f32 %v2908_v8, %v2907_v21  ;;  %v3116_v21 = vstv %s5433_s0 }
0x1d93   :  { %5579 = vrcp.f32 %v3116_v21 }
0x1e4b   :  { %v2767_v9 = vpop.f32.mrf.mxu1 }
0x1e4c   :  { %v2773_v28 = vsub.f32 %v5039_v41, %v2767_v9  ;;  %v3014_v41 = vsel %vm7679_vm0, %v6564_v52, 0.0 }
0x1e4d   :  { %v5262_v38 = vpop.f32.mrf.mxu1 }
0x1e4e   :  { %v2776_v40 = vmul.f32 %v5574_v63, %v2773_v28 }
0x1e50   :  { %v2780_v57 = vrot.slane %v2776_v40, %v5771_v4 }
0x1e52   :  { %v2782_v48 = vsel %vm7672_vm15, %v2780_v57, 0.0  ;;  %vm7676_vm15 = vcmp.eq.s32.totalorder %v5776_v33, 11 }
0x1e53   :  { %v2784_v59 = vadd.f32 %v2782_v48, %v2670_v39  ;;  %v5041_v43 = vsel %vm7676_vm15, 1.0, %v7575_v60  ;;  %v5576_v39 = vpop.eup %5575  ;;  %vm7680_vm15 = vmmov %vm7678_vm13 }
0x1e54   :  { %v3016_v9 = vsel %vm7680_vm15, %v3014_v41, 0.0  ;;  %vm7683_vm0 = vmmov %vm7680_vm15  ;;  %vm7684_vm15 = vcmp.eq.s32.totalorder %v5942_v5, 14 }
0x1e55   :  { %5264 = vmatpush3.msra.mxu0 %v2784_v59  ;;  %v3018_v28 = vrot.slane %v3016_v9, 4 }
0x1e56   :  { %5265 = vmatprep.subr.mxu0 %v7575_v60 }
0x1e57   :  { %5266 = vmatpush3.msra.mxu0 %v6725_v49  ;;  %v3019_v63 = vadd.f32 %v3018_v28, %v3016_v9 }
0x1e58   :  { %5268 = vmatmul.mubr.msk.f32.vlgmr.msra.gmra.mxu0 %vm7673_vm14, %v2811_v18  ;;  %5277 = vmatprep.subr.mxu0 %v7575_v60  ;;  %vm2924_vm14 = vcmp.lt.s32.totalorder %v5776_v33, 12 }
0x1e59   :  { %5281 = vmatprep.mubr.msk.f32.mxu0 %vm7623_vm9, %v7575_v60  ;;  %v2925_v23 = vsel %vm2924_vm14, %v2909_v27, 0.0  ;;  %v3020_v38 = vrot.slane %v3019_v63, 2  ;;  %vm7682_vm14 = vcmp.eq.s32.totalorder %v5942_v5, 12 }
0x1e5b   :  { %v3021_v57 = vadd.f32 %v3020_v38, %v3019_v63 }
0x1e5d   :  { %v3022_v31 = vrot.slane %v3021_v57, 1 }
0x1e5f   :  { %v3023_v19 = vadd.f32 %v3022_v31, %v3021_v57  ;;  %v3230_v57 = vstv %s5435_s1 }
0x1e60   :  { %5581 = vrcp.f32 %v3230_v57  ;;  %v3589_v57 = vpop.permute.xlu0 %3588 }
0x1f18   :  { %v2881_v11 = vpop.f32.mrf.mxu0 }
0x1f19   :  { %v2887_v51 = vsub.f32 %v5041_v43, %v2881_v11  ;;  %v3128_v43 = vsel %vm7684_vm15, %v6564_v52, 0.0 }
0x1f1a   :  { %v5269_v25 = vpop.f32.mrf.mxu0 }
0x1f1b   :  { %v2890_v62 = vmul.f32 %v5576_v39, %v2887_v51 }
0x1f1d   :  { %v2894_v0 = vrot.slane %v2890_v62, %v5771_v4 }
0x1f1f   :  { %v2896_v50 = vsel %vm7677_vm10, %v2894_v0, 0.0  ;;  %vm7681_vm10 = vcmp.eq.s32.totalorder %v5776_v33, 12 }
0x1f20   :  { %v2898_v17 = vadd.f32 %v2896_v50, %v2784_v59  ;;  %v5043_v40 = vsel %vm7681_vm10, 1.0, %v7575_v60  ;;  %v5578_v59 = vpop.eup %5577  ;;  %vm7685_vm10 = vmmov %vm7683_vm0 }
0x1f21   :  { %v3130_v11 = vsel %vm7685_vm10, %v3128_v43, 0.0  ;;  %vm7688_vm15 = vmmov %vm7685_vm10 }
0x1f22   :  { %5271 = vmatpush3.msra.mxu1 %v2898_v17  ;;  %v3132_v51 = vrot.slane %v3130_v11, 4 }
0x1f23   :  { %5272 = vmatprep.subr.mxu1 %v7575_v60 }
0x1f24   :  { %5273 = vmatpush3.msra.mxu1 %v6725_v49  ;;  %v3133_v39 = vadd.f32 %v3132_v51, %v3130_v11 }
0x1f25   :  { %5275 = vmatmul.mubr.msk.f32.vlgmr.msra.gmra.mxu1 %vm7678_vm13, %v2925_v23  ;;  %5284 = vmatprep.subr.mxu1 %v7575_v60  ;;  %vm3038_vm13 = vcmp.lt.s32.totalorder %v5776_v33, 13 }
0x1f26   :  { %5288 = vmatprep.mubr.msk.f32.mxu1 %vm7623_vm9, %v7575_v60  ;;  %v3039_v44 = vsel %vm3038_vm13, %v3023_v19, 0.0  ;;  %v3134_v25 = vrot.slane %v3133_v39, 2  ;;  %vm7687_vm13 = vcmp.eq.s32.totalorder %v5942_v5, 13 }
0x1f28   :  { %v3135_v0 = vadd.f32 %v3134_v25, %v3133_v39  ;;  %v3356_v25 = vld [vmem:[%s7304_s2 + $0x8] sm:$0xff] }
0x1f2a   :  { %v3136_v41 = vrot.slane %v3135_v0, 1 }
0x1f2c   :  { %v3137_v63 = vadd.f32 %v3136_v41, %v3135_v0 }
0x1fe5   :  { %v2995_v1 = vpop.f32.mrf.mxu1 }
0x1fe6   :  { %v3001_v48 = vsub.f32 %v5043_v40, %v2995_v1 }
0x1fe7   :  { %v5276_v36 = vpop.f32.mrf.mxu1 }
0x1fe8   :  { %v3004_v18 = vmul.f32 %v5578_v59, %v3001_v48 }
0x1fea   :  { %v3008_v53 = vrot.slane %v3004_v18, %v5771_v4 }
0x1fec   :  { %v3010_v14 = vsel %vm7682_vm14, %v3008_v53, 0.0  ;;  %vm7686_vm14 = vcmp.eq.s32.totalorder %v5776_v33, 13 }
0x1fed   :  { %v3012_v35 = vadd.f32 %v3010_v14, %v2898_v17  ;;  %v5045_v62 = vsel %vm7686_vm14, 1.0, %v7575_v60  ;;  %v5580_v17 = vpop.eup %5579  ;;  %vm7689_vm14 = vcmp.eq.s32.totalorder %v5942_v5, 15 }
0x1fee   :  { %v3242_v40 = vsel %vm7689_vm14, %v6564_v52, 0.0 }
0x1fef   :  { %5278 = vmatpush3.msra.mxu0 %v3012_v35 }
0x1ff0   :  { %5279 = vmatprep.subr.mxu0 %v7575_v60 }
0x1ff1   :  { %5280 = vmatpush3.msra.mxu0 %v6725_v49 }
0x1ff2   :  { %5282 = vmatmul.mubr.msk.f32.vlgmr.msra.gmra.mxu0 %vm7683_vm0, %v3039_v44  ;;  %5291 = vmatprep.subr.mxu0 %v7575_v60  ;;  %vm3152_vm0 = vcmp.lt.s32.totalorder %v5776_v33, 14 }
0x1ff3   :  { %5295 = vmatprep.mubr.msk.f32.mxu0 %vm7623_vm9, %v7575_v60  ;;  %v3153_v38 = vsel %vm3152_vm0, %v3137_v63, 0.0  ;;  %vm7691_vm0 = vcmp.eq.s32.totalorder %v5776_v33, 14 }
0x1ff4   :  { %v5047_v18 = vsel %vm7691_vm0, 1.0, %v7575_v60  ;;  %vm7695_vm0 = vcmp.eq.s32.totalorder %v5942_v5, 15 }
0x20b2   :  { %v3109_v8 = vpop.f32.mrf.mxu0 }
0x20b3   :  { %v3115_v50 = vsub.f32 %v5045_v62, %v3109_v8  ;;  %v3355_v62 = vld [vmem:[%s7304_s2] sm:$0xff]  ;;  %v6856_v8 = vstv %s4991_s15  ;;  %s5682_s2 = smov 16  }
0x20b4   :  { %v5283_v27 = vpop.f32.mrf.mxu0  ;;  %v3359_v0 = vsub.f32 %v3356_v25, %v6856_v8 }
0x20b5   :  { %v3118_v23 = vmul.f32 %v5580_v17, %v3115_v50  ;;  %v3358_v50 = vsub.f32 %v3355_v62, %v6856_v8  ;;  %v3344_v17 = vstv %s5437_s20 }
0x20b6   :  { %5583 = vrcp.f32 %v3344_v17 }
0x20b7   :  { %v3122_v9 = vrot.slane %v3118_v23, %v5771_v4 }
0x20b9   :  { %v3124_v45 = vsel %vm7687_vm13, %v3122_v9, 0.0  ;;  %vm7690_vm13 = vmmov %vm7685_vm10 }
0x20ba   :  { %v3126_v28 = vadd.f32 %v3124_v45, %v3012_v35  ;;  %v3244_v1 = vsel %vm7690_vm13, %v3242_v40, 0.0  ;;  %v5582_v35 = vpop.eup %5581  ;;  %vm7693_vm14 = vmmov %vm7690_vm13  ;;  %vm7694_vm13 = vcmp.eq.s32.totalorder %v5776_v33, 15 }
0x20bb   :  { %v3246_v48 = vrot.slane %v3244_v1, 4  ;;  %v5049_v27 = vsel %vm7694_vm13, 1.0, %v7575_v60 }
0x20bc   :  { %5285 = vmatpush3.msra.mxu1 %v3126_v28 }
0x20bd   :  { %5286 = vmatprep.subr.mxu1 %v7575_v60  ;;  %v3247_v59 = vadd.f32 %v3246_v48, %v3244_v1  ;;  %v3591_v1 = vpop.permute.xlu1 %3590 }
0x20be   :  { %5287 = vmatpush3.msra.mxu1 %v6725_v49 }
0x20bf   :  { %5289 = vmatmul.mubr.msk.f32.vlgmr.msra.gmra.mxu1 %vm7688_vm15, %v3153_v38  ;;  %v3248_v36 = vrot.slane %v3247_v59, 2  ;;  %vm7692_vm15 = vcmp.eq.s32.totalorder %v5942_v5, 14  ;;  %5298 = vmatprep.subr.mxu1 %v3359_v0 }
0x20c0   :  { %5302 = vmatprep.mubr.msk.f32.mxu1 %vm7685_vm10, %v6725_v49  ;;  %vm3266_vm10 = vcmp.lt.s32.totalorder %v5776_v33, 15  ;;  %5299 = vmatpush3.msra.mxu1 %v3359_v0 }
0x20c1   :  { %v3249_v53 = vadd.f32 %v3248_v36, %v3247_v59  ;;  %5300 = vmatprep.subr.mxu1 %v3358_v50 }
0x20c2   :  { %5301 = vmatpush3.msra.mxu1 %v3358_v50 }
0x20c3   :  { %v3250_v43 = vrot.slane %v3249_v53, 1  ;;  %5312 = vmatprep.subr.mxu1 %v7575_v60  ;;  %v5584_v9 = vpop.eup %5583 }
0x20c5   :  { %v3251_v51 = vadd.f32 %v3250_v43, %v3249_v53 }
0x20c7   :  { %v3267_v39 = vsel %vm3266_vm10, %v3251_v51, 0.0  ;;  %vm7697_vm10 = vmmov %vm7693_vm14 }
0x217f   :  { %v3223_v31 = vpop.f32.mrf.mxu1 }
0x2180   :  { %v3229_v14 = vsub.f32 %v5047_v18, %v3223_v31 }
0x2181   :  { %v5290_v19 = vpop.f32.mrf.mxu1 }
0x2182   :  { %v3232_v44 = vmul.f32 %v5582_v35, %v3229_v14 }
0x2184   :  { %v3236_v52 = vrot.slane %v3232_v44, %v5771_v4 }
0x2186   :  { %v3238_v11 = vsel %vm7692_vm15, %v3236_v52, 0.0  ;;  %vm7696_vm15 = vmmov %vm7693_vm14 }
0x2187   :  { %v3240_v21 = vadd.f32 %v3238_v11, %v3126_v28 }
0x2189   :  { %5292 = vmatpush3.msra.mxu0 %v3240_v21 }
0x218a   :  { %5293 = vmatprep.subr.mxu0 %v7575_v60 }
0x218b   :  { %5294 = vmatpush3.msra.mxu0 %v6725_v49 }
0x218c   :  { %5296 = vmatmul.mubr.msk.f32.vlgmr.msra.gmra.mxu0 %vm7693_vm14, %v3267_v39  ;;  %vm7698_vm14 = vmmov %vm7697_vm10 }
0x224c   :  { %v3337_v23 = vpop.f32.mrf.mxu0 }
0x224d   :  { %v3343_v41 = vsub.f32 %v5049_v27, %v3337_v23 }
0x224e   :  { %v5297_v45 = vpop.f32.mrf.mxu0 }
0x224f   :  { %v3346_v28 = vmul.f32 %v5584_v9, %v3343_v41 }
0x2251   :  { %v3350_v63 = vrot.slane %v3346_v28, %v5771_v4 }
0x2253   :  { %v3352_v38 = vsel %vm7695_vm0, %v3350_v63, 0.0 }
0x2254   :  { %v3354_v40 = vadd.f32 %v3352_v38, %v3240_v21 }
0x2256   :  { %3442 = vxpose.xlu1.b32.end [2/2] (short) (narrow) %v3354_v40, 16  ;;  %5303 = vmatmul.mubr.msk.f32.vlgmr.msra.gmra.mxu1 %vm7696_vm15, %v3354_v40 }
0x2257   :  { %5313 = vmatpush3.msra.mxu1 %v3591_v1  ;;  %5316 = vmatprep.mubr.msk.f32.mxu1 %vm7623_vm9, %v7575_v60  ;;  %vm7699_vm9 = vmmov %vm7697_vm10 }
0x2258   :  { %5314 = vmatprep.subr.mxu1 %v7575_v60  ;;  %vm7700_vm13 = vmmov %vm7699_vm9 }
0x2259   :  { %5315 = vmatpush3.msra.mxu1 %v3589_v57  ;;  %vm7701_vm0 = vmmov %vm7699_vm9 }
0x225a   :  { %vm7702_vm15 = vmmov %vm7701_vm0 }
0x22ce   :  { %v3457_v48 = vpop.trf.xlu1 }
0x22cf   :  { %5309 = vmatprep.mubr.msk.f32.mxu0 %vm7697_vm10, %v3457_v48  ;;  %vm7703_vm10 = vmmov %vm7701_vm0 }
0x22d2   :  { %v3458_v36 = vpop.trf.xlu1 }
0x2316   :  { %v5304_v59 = vpop.f32.mrf.mxu1 }
0x2317   :  { %5305 = vmatprep.subr.mxu0 %v5304_v59 }
0x2318   :  { %v3432_v5 = vpop.f32.mrf.mxu1  ;;  %5306 = vmatpush3.msra.mxu0 %v5304_v59 }
0x2319   :  { %5307 = vmatprep.subr.mxu0 %v3432_v5 }
0x231a   :  { %5308 = vmatpush3.msra.mxu0 %v3432_v5 }
0x231b   :  { %5310 = vmatmul.mubr.msk.f32.vlgmr.msra.gmra.mxu0 %vm7698_vm14, %v3458_v36  ;;  %5319 = vmatprep.subr.mxu0 %v3591_v1  ;;  %vm7704_vm14 = vcmp.eq.s32.totalorder %v5776_v33, 0 }
0x231c   :  { %5320 = vmatpush3.msra.mxu0 %v3591_v1  ;;  %5323 = vmatprep.mubr.msk.f32.mxu0 %vm7699_vm9, %v6725_v49  ;;  %vm7705_vm9 = vmmov %vm7701_vm0 }
0x231d   :  { %5321 = vmatprep.subr.mxu0 %v3589_v57 }
0x231e   :  { %5322 = vmatpush3.msra.mxu0 %v3589_v57 }
0x231f   :  { %5324 = vmatmul.mubr.msk.f32.vlgmr.msra.gmra.mxu0 %vm7700_vm13, %v3354_v40  ;;  %vm7706_vm13 = vmmov %vm7701_vm0 }
0x23db   :  { %v5311_v18 = vpop.f32.mrf.mxu0 }
0x23dd   :  { %v3545_v31 = vpop.f32.mrf.mxu0 }
0x23de   :  { %3554 = vxpose.xlu0.b32.start [1/2] (short) (narrow) %v3545_v31, 8 }
0x23df   :  { %v5325_v53 = vpop.f32.mrf.mxu0 }
0x23e0   :  { %5326 = vmatprep.subr.mxu1 %v5325_v53 }
0x23e1   :  { %v3734_v14 = vpop.f32.mrf.mxu0 }
0x23e2   :  { %3555 = vxpose.xlu0.b32.end [2/2] (short) (narrow) %v5311_v18, 8 }
0x23e6   :  { %3743 = vxpose.xlu0.b32.start [1/2] (short) (narrow) %v3734_v14, 16 }
0x23ea   :  { %3744 = vxpose.xlu0.b32.end [2/2] (short) (narrow) %v5325_v53, 16 }
0x2413   :  { %3868 = vrot.lane.b32.xlu0 %v5784_v37, %s5682_s2 }
0x245a   :  { %v3570_v35 = vpop.trf.xlu0 }
0x245b   :  { %5317 = vmatmul.mubr.msk.f32.vlgmr.msra.gmra.mxu1 %vm7701_vm0, %v3570_v35 }
0x245c   :  { %5327 = vmatpush3.msra.mxu1 %v5325_v53 }
0x245d   :  { %5328 = vmatprep.subr.mxu1 %v3734_v14 }
0x245e   :  { %5329 = vmatpush3.msra.mxu1 %v3734_v14 }
0x2462   :  { %v3759_v49 = vpop.trf.xlu0 }
0x2463   :  { %5330 = vmatprep.mubr.msk.f32.mxu1 %vm7702_vm15, %v3759_v49  ;;  %vm7708_vm15 = vnez %v7420_v15 }
0x2466   :  { %v3760_v19 = vpop.trf.xlu0 }
0x2467   :  { %5331 = vmatmul.mubr.msk.f32.vlgmr.msra.gmra.mxu1 %vm7703_vm10, %v3760_v19  ;;  %vm7709_vm10 = vmmov %vm7701_vm0 }
0x2485   :  { %v3869_v51 = vpop.permute.xlu0 %3868 }
0x251b   :  { %v6881_v44 = vpop.f32.mrf.mxu1 }
0x251d   :  { %v5318_v43 = vpop.f32.mrf.mxu1 }
0x2527   :  { %v6883_v52 = vpop.f32.mrf.mxu1 }
0x2529   :  { %v3847_v11 = vpop.f32.mrf.mxu1 }
0x252a   :  { %3858 = vrot.lane.b32.xlu1 %v3847_v11, %s5682_s2 }
0x259c   :  { %v3859_v21 = vpop.permute.xlu1 %3858 }
0x259d   :  { %v3864_v39 = vsub.f32 %v5802_v46, %v3859_v21 }
0x259f   :  { %v3874_v25 = vadd.f32 %v3869_v51, %v3864_v39 }
0x25a1   :  { %3878 = vrot.lane.b32.xlu1 %v3874_v25, %s5681_s25 }
0x2613   :  { %v3879_v62 = vpop.permute.xlu1 %3878 }
0x2614   :  { %v3901_v0 = vsel %vm7704_vm14, %v3879_v62, 0.0  ;;  %v3884_v37 = vsel %vm5794_vm6, %v3879_v62, 0.0  ;;  %vm7707_vm6 = vcmp.eq.s32.totalorder %v5768_v2, 0  ;;  %vm7710_vm14 = vmmov %vm7701_vm0 }
0x2615   :  { %v3903_v50 = vsel %vm7705_vm9, %v3901_v0, 0.0  ;;  %v3886_v17 = vsel %vm7706_vm13, %v3884_v37, 0.0  ;;  %v3912_v42 = vsel %vm7707_vm6, %v3879_v62, 0.0  ;;  %vm7712_vm9 = vmmov %vm7701_vm0  ;;  %vm7713_vm13 = vcmp.eq.s32.totalorder %v5776_v33, 0 }
0x2616   :  { %3904 = vadd.xlane.f32.xlu0 %v3903_v50  ;;  %3889 = vadd.xlane.f32.xlu1 %v3886_v17  ;;  %v3914_v40 = vsel %vm7701_vm0, %v3912_v42, 0.0  ;;  %vm7714_vm6 = vcmp.eq.s32.totalorder %v5776_v33, 1  ;;  %vm7715_vm0 = vnez %v7426_v56 }
0x2617   :  { %v3917_v1 = vrot.slane %v3914_v40, 4 }
0x2619   :  { %v3918_v57 = vadd.f32 %v3917_v1, %v3914_v40 }
0x261b   :  { %v3919_v48 = vrot.slane %v3918_v57, 2 }
0x261d   :  { %v3920_v59 = vadd.f32 %v3919_v48, %v3918_v57 }
0x261f   :  { %v3921_v5 = vrot.slane %v3920_v59, 1 }
0x2621   :  { %v3922_v36 = vadd.f32 %v3921_v5, %v3920_v59 }
0x269f   :  { %v3890_v27 = vpop.xlane.xlu1 %3889  ;;  %v3905_v18 = vpop.xlane.xlu0 %3904 }
0x26a0   :  { %v3891_v23 = vrot.slane %v3890_v27, 4 }
0x26a2   :  { %v3892_v41 = vadd.f32 %v3891_v23, %v3890_v27 }
0x26a4   :  { %v3893_v46 = vrot.slane %v3892_v41, 2 }
0x26a6   :  { %v3894_v9 = vadd.f32 %v3893_v46, %v3892_v41 }
0x26a8   :  { %v3895_v45 = vrot.slane %v3894_v9, 1 }
0x26aa   :  { %v3896_v28 = vadd.f32 %v3895_v45, %v3894_v9 }
0x26ac   :  { %5438 = vpush %v3896_v28 }
0x26dd   :  { %s5439_s21 = spop %5438 }
0x26de   :  { %v3898_v63 = vstv %s5439_s21 }
0x26df   :  { %5585 = vrsqrt.f32 %v3898_v63 }
0x26ec   :  { %v5586_v38 = vpop.eup %5585 }
0x26ed   :  { %5440 = vpush %v5586_v38 }
0x271e   :  { %s5441_s22 = spop %5440 }
0x271f   :  { %v6897_v31 = vstv %s5441_s22 }
0x2720   :  { %v3910_v53 = vmul.f32 %v6897_v31, %v3905_v18  ;;  %v6901_v14 = vmul.f32 %v3922_v36, %v6897_v31 }
0x2722   :  { %v3928_v2 = vmul.f32 %v6901_v14, %v3910_v53 }
0x2724   :  { %3932 = vrot.lane.b32.xlu1 %v3928_v2, %s5682_s2 }
0x2796   :  { %v3933_v35 = vpop.permute.xlu1 %3932 }
0x2797   :  { %v3938_v49 = vsub.f32 %v3874_v25, %v3933_v35 }
0x2799   :  { %3942 = vrot.lane.b32.xlu0 %v3938_v49, %s5681_s25 }
0x280b   :  { %v3943_v19 = vpop.permute.xlu0 %3942 }
0x280c   :  { %v3965_v43 = vsel %vm7708_vm15, %v3943_v19, 0.0  ;;  %v3948_v11 = vsel %vm5829_vm11, %v3943_v19, 0.0  ;;  %vm7711_vm11 = vnez %v7422_v29  ;;  %v3924_v29 = vsel %vm7713_vm13, %v3910_v53, 0.0  ;;  %vm7716_vm15 = vmmov %vm7712_vm9 }
0x280d   :  { %v3967_v21 = vsel %vm7709_vm10, %v3965_v43, 0.0  ;;  %v3950_v51 = vsel %vm7710_vm14, %v3948_v11, 0.0  ;;  %v3976_v13 = vsel %vm7711_vm11, %v3943_v19, 0.0  ;;  %vm7717_vm10 = vmmov %vm7712_vm9  ;;  %vm7720_vm11 = vcmp.eq.s32.totalorder %v5776_v33, 2 }
0x280e   :  { %3968 = vadd.xlane.f32.xlu0 %v3967_v21  ;;  %3953 = vadd.xlane.f32.xlu1 %v3950_v51  ;;  %v3978_v23 = vsel %vm7712_vm9, %v3976_v13, 0.0  ;;  %vm7719_vm14 = vmmov %vm7712_vm9  ;;  %vm7721_vm13 = vnez %v7432_v32 }
0x280f   :  { %v3981_v41 = vrot.slane %v3978_v23, 4 }
0x2811   :  { %v3982_v46 = vadd.f32 %v3981_v41, %v3978_v23 }
0x2813   :  { %v3983_v9 = vrot.slane %v3982_v46, 2 }
0x2815   :  { %v3984_v45 = vadd.f32 %v3983_v9, %v3982_v46 }
0x2817   :  { %v3985_v28 = vrot.slane %v3984_v45, 1 }
0x2819   :  { %v3986_v63 = vadd.f32 %v3985_v28, %v3984_v45 }
0x2897   :  { %v3954_v39 = vpop.xlane.xlu1 %3953  ;;  %v3969_v38 = vpop.xlane.xlu0 %3968 }
0x2898   :  { %v3955_v62 = vrot.slane %v3954_v39, 4 }
0x289a   :  { %v3956_v0 = vadd.f32 %v3955_v62, %v3954_v39 }
0x289c   :  { %v3957_v37 = vrot.slane %v3956_v0, 2 }
0x289e   :  { %v3958_v25 = vadd.f32 %v3957_v37, %v3956_v0 }
0x28a0   :  { %v3959_v50 = vrot.slane %v3958_v25, 1 }
0x28a2   :  { %v3960_v17 = vadd.f32 %v3959_v50, %v3958_v25 }
0x28a4   :  { %5442 = vpush %v3960_v17 }
0x28d5   :  { %s5443_s23 = spop %5442 }
0x28d6   :  { %v3962_v15 = vstv %s5443_s23 }
0x28d7   :  { %5587 = vrsqrt.f32 %v3962_v15 }
0x28e4   :  { %v5588_v27 = vpop.eup %5587 }
0x28e5   :  { %5444 = vpush %v5588_v27 }
0x2916   :  { %s5445_s24 = spop %5444 }
0x2917   :  { %v6915_v42 = vstv %s5445_s24 }
0x2918   :  { %v3974_v40 = vmul.f32 %v6915_v42, %v3969_v38  ;;  %v6919_v1 = vmul.f32 %v3986_v63, %v6915_v42 }
0x291a   :  { %v3988_v57 = vsel %vm7714_vm6, %v3974_v40, 0.0  ;;  %v3992_v48 = vmul.f32 %v6919_v1, %v3974_v40  ;;  %vm7722_vm6 = vcmp.eq.s32.totalorder %v5776_v33, 0 }
0x291b   :  { %v3990_v59 = vadd.f32 %v3988_v57, %v3924_v29 }
0x291c   :  { %3996 = vrot.lane.b32.xlu1 %v3992_v48, %s5682_s2 }
0x298e   :  { %v3997_v5 = vpop.permute.xlu1 %3996 }
0x298f   :  { %v4002_v36 = vsub.f32 %v3938_v49, %v3997_v5 }
0x2991   :  { %4006 = vrot.lane.b32.xlu0 %v4002_v36, %s5681_s25 }
0x2a03   :  { %v4007_v18 = vpop.permute.xlu0 %4006 }
0x2a04   :  { %v4029_v2 = vsel %vm7715_vm0, %v4007_v18, 0.0  ;;  %v4012_v35 = vsel %vm5873_vm2, %v4007_v18, 0.0  ;;  %vm7718_vm2 = vnez %v7428_v10  ;;  %vm7723_vm0 = vmmov %vm7712_vm9 }
0x2a05   :  { %v4031_v53 = vsel %vm7716_vm15, %v4029_v2, 0.0  ;;  %v4014_v19 = vsel %vm7717_vm10, %v4012_v35, 0.0  ;;  %v4040_v0 = vsel %vm7718_vm2, %v4007_v18, 0.0  ;;  %vm7724_vm15 = vmmov %vm7723_vm0  ;;  %vm7727_vm2 = vcmp.eq.s32.totalorder %v5776_v33, 3 }
0x2a06   :  { %4032 = vadd.xlane.f32.xlu0 %v4031_v53  ;;  %4017 = vadd.xlane.f32.xlu1 %v4014_v19  ;;  %v4042_v37 = vsel %vm7719_vm14, %v4040_v0, 0.0  ;;  %vm7726_vm10 = vmmov %vm7723_vm0  ;;  %vm7728_vm14 = vcmp.eq.s32.totalorder %v5776_v33, 1 }
0x2a07   :  { %v4045_v25 = vrot.slane %v4042_v37, 4 }
0x2a1c   :  { %3860 = vrot.lane.b32.xlu0 %v6883_v52, %s5682_s2  ;;  %v4046_v52 = vadd.f32 %v4045_v25, %v4042_v37 }
0x2a1e   :  { %v4047_v50 = vrot.slane %v4046_v52, 2 }
0x2a20   :  { %v4048_v17 = vadd.f32 %v4047_v50, %v4046_v52 }
0x2a22   :  { %v4049_v15 = vrot.slane %v4048_v17, 1 }
0x2a24   :  { %v4050_v27 = vadd.f32 %v4049_v15, %v4048_v17 }
0x2a8f   :  { %v4018_v43 = vpop.xlane.xlu1 %4017  ;;  %v4033_v13 = vpop.xlane.xlu0 %4032 }
0x2a90   :  { %v4019_v49 = vrot.slane %v4018_v43, 4 }
0x2a92   :  { %v4020_v11 = vadd.f32 %v4019_v49, %v4018_v43 }
0x2a93   :  { %v3861_v28 = vpop.permute.xlu0 %3860 }
0x2a94   :  { %v4021_v21 = vrot.slane %v4020_v11, 2  ;;  %v3865_v40 = vsub.f32 %v5804_v47, %v3861_v28 }
0x2a96   :  { %v4022_v51 = vadd.f32 %v4021_v21, %v4020_v11 }
0x2a98   :  { %v4023_v39 = vrot.slane %v4022_v51, 1 }
0x2a9a   :  { %v4024_v56 = vadd.f32 %v4023_v39, %v4022_v51 }
0x2a9c   :  { %5446 = vpush %v4024_v56 }
0x2acd   :  { %s5447_s26 = spop %5446 }
0x2ace   :  { %v4026_v54 = vstv %s5447_s26 }
0x2acf   :  { %5589 = vrsqrt.f32 %v4026_v54 }
0x2adc   :  { %v5590_v62 = vpop.eup %5589 }
0x2add   :  { %5448 = vpush %v5590_v62 }
0x2b0e   :  { %s5449_s29 = spop %5448 }
0x2b0f   :  { %v6939_v23 = vstv %s5449_s29 }
0x2b10   :  { %v4038_v41 = vmul.f32 %v6939_v23, %v4033_v13  ;;  %v6943_v46 = vmul.f32 %v4050_v27, %v6939_v23 }
0x2b12   :  { %v4052_v10 = vsel %vm7720_vm11, %v4038_v41, 0.0  ;;  %v4056_v9 = vmul.f32 %v6943_v46, %v4038_v41  ;;  %vm7729_vm11 = vmmov %vm7723_vm0 }
0x2b13   :  { %v4054_v45 = vadd.f32 %v4052_v10, %v3990_v59 }
0x2b14   :  { %4060 = vrot.lane.b32.xlu1 %v4056_v9, %s5682_s2 }
0x2b18   :  { %3870 = vrot.lane.b32.xlu1 %v5969_v22, %s5682_s2 }
0x2b86   :  { %v4061_v63 = vpop.permute.xlu1 %4060 }
0x2b87   :  { %v4066_v38 = vsub.f32 %v4002_v36, %v4061_v63 }
0x2b89   :  { %4070 = vrot.lane.b32.xlu1 %v4066_v38, %s5681_s25 }
0x2b8a   :  { %v3871_v29 = vpop.permute.xlu1 %3870 }
0x2b8b   :  { %v3875_v57 = vadd.f32 %v3871_v29, %v3865_v40 }
0x2b8d   :  { %3880 = vrot.lane.b32.xlu1 %v3875_v57, %s5681_s25 }
0x2bfb   :  { %v4071_v48 = vpop.permute.xlu1 %4070 }
0x2bfc   :  { %v4076_v59 = vsel %vm5915_vm4, %v4071_v48, 0.0  ;;  %v4093_v22 = vsel %vm7721_vm13, %v4071_v48, 0.0  ;;  %vm7725_vm4 = vnez %v7434_v58  ;;  %vm7731_vm13 = vmmov %vm7722_vm6 }
0x2bfd   :  { %v4078_v5 = vsel %vm7712_vm9, %v4076_v59, 0.0  ;;  %v4095_v2 = vsel %vm7724_vm15, %v4093_v22, 0.0  ;;  %v4104_v54 = vsel %vm7725_vm4, %v4071_v48, 0.0  ;;  %vm7730_vm9 = vmmov %vm7723_vm0  ;;  %vm7734_vm15 = vcmp.eq.s32.totalorder %v5776_v33, 2 }
0x2bfe   :  { %4081 = vadd.xlane.f32.xlu0 %v4078_v5  ;;  %v4106_v62 = vsel %vm7726_vm10, %v4104_v54, 0.0  ;;  %vm7735_vm4 = vmmov %vm7723_vm0  ;;  %vm7736_vm10 = vnez %v7445_v55 }
0x2bff   :  { %v3881_v18 = vpop.permute.xlu1 %3880  ;;  %v4109_v0 = vrot.slane %v4106_v62, 4 }
0x2c00   :  { %v3902_v47 = vsel %vm7722_vm6, %v3881_v18, 0.0  ;;  %vm7732_vm6 = vmmov %vm7728_vm14 }
0x2c01   :  { %v3906_v36 = vsel %vm7723_vm0, %v3902_v47, 0.0 }
0x2c02   :  { %4096 = vadd.xlane.f32.xlu0 %v4095_v2  ;;  %3907 = vadd.xlane.f32.xlu1 %v3906_v36 }
0x2c87   :  { %v4082_v35 = vpop.xlane.xlu0 %4081 }
0x2c88   :  { %v4083_v53 = vrot.slane %v4082_v35, 4 }
0x2c8a   :  { %v4084_v30 = vadd.f32 %v4083_v53, %v4082_v35 }
0x2c8b   :  { %v3908_v19 = vpop.xlane.xlu1 %3907 }
0x2c8c   :  { %v4085_v43 = vrot.slane %v4084_v30, 2  ;;  %v3911_v49 = vmul.f32 %v6897_v31, %v3908_v19  ;;  %v4110_v31 = vadd.f32 %v4109_v0, %v4106_v62 }
0x2c8e   :  { %v3929_v32 = vmul.f32 %v6901_v14, %v3911_v49  ;;  %v4086_v11 = vadd.f32 %v4085_v43, %v4084_v30  ;;  %v4111_v37 = vrot.slane %v4110_v31, 2  ;;  %v4097_v14 = vpop.xlane.xlu0 %4096  ;;  %v3925_v18 = vsel %vm7731_vm13, %v3911_v49, 0.0  ;;  %vm7741_vm13 = vmmov %vm7723_vm0 }
0x2c90   :  { %3934 = vrot.lane.b32.xlu0 %v3929_v32, %s5682_s2  ;;  %v4087_v21 = vrot.slane %v4086_v11, 1  ;;  %v4112_v25 = vadd.f32 %v4111_v37, %v4110_v31 }
0x2c92   :  { %v4088_v51 = vadd.f32 %v4087_v21, %v4086_v11  ;;  %v4113_v50 = vrot.slane %v4112_v25, 1 }
0x2c94   :  { %5450 = vpush %v4088_v51  ;;  %v4114_v15 = vadd.f32 %v4113_v50, %v4112_v25 }
0x2cc5   :  { %s5451_s30 = spop %5450 }
0x2cc6   :  { %v4090_v39 = vstv %s5451_s30 }
0x2cc7   :  { %5591 = vrsqrt.f32 %v4090_v39 }
0x2cd4   :  { %v5592_v56 = vpop.eup %5591 }
0x2cd5   :  { %5452 = vpush %v5592_v56 }
0x2d02   :  { %v3935_v52 = vpop.permute.xlu0 %3934 }
0x2d03   :  { %v3939_v17 = vsub.f32 %v3875_v57, %v3935_v52 }
0x2d05   :  { %3944 = vrot.lane.b32.xlu1 %v3939_v17, %s5681_s25 }
0x2d06   :  { %s5453_s7 = spop %5452 }
0x2d07   :  { %v6970_v27 = vstv %s5453_s7 }
0x2d08   :  { %v4102_v13 = vmul.f32 %v6970_v27, %v4097_v14  ;;  %v6974_v58 = vmul.f32 %v4114_v15, %v6970_v27 }
0x2d0a   :  { %v4116_v41 = vsel %vm7727_vm2, %v4102_v13, 0.0  ;;  %v4120_v10 = vmul.f32 %v6974_v58, %v4102_v13  ;;  %vm7737_vm2 = vmmov %vm7723_vm0 }
0x2d0b   :  { %v4118_v9 = vadd.f32 %v4116_v41, %v4054_v45 }
0x2d0c   :  { %4124 = vrot.lane.b32.xlu1 %v4120_v10, %s5682_s2 }
0x2d77   :  { %v3945_v28 = vpop.permute.xlu1 %3944 }
0x2d78   :  { %v3966_v63 = vsel %vm7728_vm14, %v3945_v28, 0.0  ;;  %vm7738_vm14 = vcmp.eq.s32.totalorder %v5776_v33, 4 }
0x2d79   :  { %v3970_v40 = vsel %vm7729_vm11, %v3966_v63, 0.0  ;;  %vm7739_vm11 = vmmov %vm7734_vm15 }
0x2d7a   :  { %3971 = vadd.xlane.f32.xlu0 %v3970_v40 }
0x2d7e   :  { %v4125_v29 = vpop.permute.xlu1 %4124 }
0x2d7f   :  { %v6983_v57 = vsub.f32 %v4066_v38, %v4125_v29 }
0x2d81   :  { %4134 = vrot.lane.b32.xlu1 %v6983_v57, %s5681_s25 }
0x2df3   :  { %v4135_v48 = vpop.permute.xlu1 %4134 }
0x2df4   :  { %v4140_v59 = vsel %vm5963_vm7, %v4135_v48, 0.0  ;;  %vm7733_vm7 = vnez %v7438_v24  ;;  %v4168_v54 = vsel %vm7736_vm10, %v4135_v48, 0.0  ;;  %vm7750_vm10 = vcmp.eq.s32.totalorder %v5776_v33, 5 }
0x2df5   :  { %v4142_v45 = vsel %vm7730_vm9, %v4140_v59, 0.0  ;;  %v4157_v49 = vsel %vm7733_vm7, %v4135_v48, 0.0  ;;  %v4170_v24 = vsel %vm7737_vm2, %v4168_v54, 0.0  ;;  %vm7740_vm9 = vcmp.eq.s32.totalorder %v5776_v33, 3  ;;  %vm7745_vm7 = vmmov %vm7723_vm0 }
0x2df6   :  { %4145 = vadd.xlane.f32.xlu1 %v4142_v45  ;;  %v4173_v62 = vrot.slane %v4170_v24, 4  ;;  %vm7751_vm2 = vmmov %vm7738_vm14 }
0x2df8   :  { %v4174_v0 = vadd.f32 %v4173_v62, %v4170_v24 }
0x2dfa   :  { %v4175_v31 = vrot.slane %v4174_v0, 2 }
0x2dfc   :  { %v4176_v37 = vadd.f32 %v4175_v31, %v4174_v0 }
0x2dfe   :  { %v4177_v14 = vrot.slane %v4176_v37, 1 }
0x2e00   :  { %v4178_v52 = vadd.f32 %v4177_v14, %v4176_v37 }
0x2e03   :  { %v3972_v5 = vpop.xlane.xlu0 %3971 }
0x2e04   :  { %v3975_v22 = vmul.f32 %v6915_v42, %v3972_v5 }
0x2e06   :  { %v3989_v38 = vsel %vm7732_vm6, %v3975_v22, 0.0  ;;  %v3993_v47 = vmul.f32 %v6919_v1, %v3975_v22  ;;  %v4159_v1 = vsel %vm7723_vm0, %v4157_v49, 0.0 }
0x2e07   :  { %v3991_v36 = vadd.f32 %v3989_v38, %v3925_v18  ;;  %v7742_v18 = vld [vmem:[#allocation12_spill] sm:$0xff] }
0x2e08   :  { %3998 = vrot.lane.b32.xlu0 %v3993_v47, %s5682_s2  ;;  %vm7743_vm6 = vnez %v7742_v18 }
0x2e7a   :  { %v3999_v2 = vpop.permute.xlu0 %3998 }
0x2e7b   :  { %v4003_v20 = vsub.f32 %v3939_v17, %v3999_v2 }
0x2e7d   :  { %4008 = vrot.lane.b32.xlu1 %v4003_v20, %s5681_s25 }
0x2e7f   :  { %v4146_v35 = vpop.xlane.xlu1 %4145 }
0x2e80   :  { %v4147_v53 = vrot.slane %v4146_v35, 4 }
0x2e82   :  { %v4148_v30 = vadd.f32 %v4147_v53, %v4146_v35 }
0x2e84   :  { %v4149_v19 = vrot.slane %v4148_v30, 2 }
0x2e86   :  { %v4150_v42 = vadd.f32 %v4149_v19, %v4148_v30 }
0x2e88   :  { %v4151_v43 = vrot.slane %v4150_v42, 1 }
0x2e8a   :  { %v4152_v32 = vadd.f32 %v4151_v43, %v4150_v42 }
0x2e8c   :  { %5454 = vpush %v4152_v32 }
0x2ea1   :  { %4160 = vadd.xlane.f32.xlu1 %v4159_v1 }
0x2ebd   :  { %s5455_s5 = spop %5454 }
0x2ebe   :  { %v4154_v11 = vstv %s5455_s5 }
0x2ebf   :  { %5593 = vrsqrt.f32 %v4154_v11 }
0x2ecc   :  { %v5594_v21 = vpop.eup %5593 }
0x2ecd   :  { %5456 = vpush %v5594_v21 }
0x2eef   :  { %v4009_v51 = vpop.permute.xlu1 %4008 }
0x2ef0   :  { %v4030_v39 = vsel %vm7734_vm15, %v4009_v51, 0.0  ;;  %vm7746_vm15 = vmmov %vm7740_vm9 }
0x2ef1   :  { %v4034_v56 = vsel %vm7735_vm4, %v4030_v39, 0.0  ;;  %v7747_v39 = vld [vmem:[#allocation13_spill] sm:$0xff]  ;;  %vm7749_vm4 = vmmov %vm7723_vm0 }
0x2ef2   :  { %4035 = vadd.xlane.f32.xlu0 %v4034_v56 }
0x2efe   :  { %s5457_s8 = spop %5456 }
0x2eff   :  { %v7007_v25 = vstv %s5457_s8  ;;  %s5683_s8 = smov [#allocation7]  }
0x2f00   :  { %v7010_v17 = vmul.f32 %v4178_v52, %v7007_v25 }
0x2f2a   :  { %v4161_v50 = vpop.xlane.xlu1 %4160 }
0x2f2b   :  { %v4166_v15 = vmul.f32 %v7007_v25, %v4161_v50 }
0x2f2d   :  { %v4180_v55 = vsel %vm7738_vm14, %v4166_v15, 0.0  ;;  %v4184_v13 = vmul.f32 %v7010_v17, %v4166_v15  ;;  %vm7752_vm14 = vmmov %vm7723_vm0 }
0x2f2e   :  { %v4182_v41 = vadd.f32 %v4180_v55, %v4118_v9 }
0x2f2f   :  { %4188 = vrot.lane.b32.xlu1 %v4184_v13, %s5682_s2 }
0x2f7b   :  { %v4036_v10 = vpop.xlane.xlu0 %4035 }
0x2f7c   :  { %v4039_v28 = vmul.f32 %v6939_v23, %v4036_v10 }
0x2f7e   :  { %v4053_v63 = vsel %vm7739_vm11, %v4039_v28, 0.0  ;;  %v4057_v40 = vmul.f32 %v6943_v46, %v4039_v28  ;;  %vm7753_vm11 = vmmov %vm7751_vm2 }
0x2f7f   :  { %v4055_v29 = vadd.f32 %v4053_v63, %v3991_v36 }
0x2f80   :  { %4062 = vrot.lane.b32.xlu0 %v4057_v40, %s5682_s2 }
0x2fa1   :  { %v4189_v45 = vpop.permute.xlu1 %4188 }
0x2fa2   :  { %v4194_v9 = vsub.f32 %v6983_v57, %v4189_v45 }
0x2ff2   :  { %v4063_v48 = vpop.permute.xlu0 %4062 }
0x2ff3   :  { %v4067_v59 = vsub.f32 %v4003_v20, %v4063_v48 }
0x2ff5   :  { %4072 = vrot.lane.b32.xlu0 %v4067_v59, %s5681_s25 }
0x2ff9   :  { %4198 = vrot.lane.b32.xlu0 %v4194_v9, %s5681_s25 }
0x3067   :  { %v4073_v5 = vpop.permute.xlu0 %4072 }
0x3068   :  { %v4094_v23 = vsel %vm7740_vm9, %v4073_v5, 0.0  ;;  %vm7755_vm9 = vmmov %vm7723_vm0 }
0x3069   :  { %v4098_v22 = vsel %vm7741_vm13, %v4094_v23, 0.0 }
0x306a   :  { %4099 = vadd.xlane.f32.xlu1 %v4098_v22 }
0x306b   :  { %v4199_v46 = vpop.permute.xlu0 %4198 }
0x306c   :  { %v4221_v38 = vsel %vm7743_vm6, %v4199_v46, 0.0  ;;  %v4204_v36 = vsel %vm6015_vm5, %v4199_v46, 0.0  ;;  %vm7748_vm5 = vnez %v7747_v39  ;;  %vm7758_vm6 = vmmov %vm7723_vm0 }
0x306d   :  { %v4223_v2 = vsel %vm7745_vm7, %v4221_v38, 0.0  ;;  %v4206_v57 = vsel %vm7723_vm0, %v4204_v36, 0.0  ;;  %v4232_v56 = vsel %vm7748_vm5, %v4199_v46, 0.0  ;;  %vm7760_vm7 = vmmov %vm7723_vm0  ;;  %vm7761_vm0 = vcmp.eq.s32.totalorder %v5776_v33, 6 }
0x306e   :  { %4224 = vadd.xlane.f32.xlu1 %v4223_v2  ;;  %4209 = vadd.xlane.f32.xlu0 %v4206_v57 }
0x30f3   :  { %v4100_v20 = vpop.xlane.xlu1 %4099 }
0x30f4   :  { %v4103_v35 = vmul.f32 %v6970_v27, %v4100_v20 }
0x30f6   :  { %v4117_v53 = vsel %vm7746_vm15, %v4103_v35, 0.0  ;;  %v4121_v30 = vmul.f32 %v6974_v58, %v4103_v35  ;;  %v4234_v58 = vsel %vm7749_vm4, %v4232_v56, 0.0  ;;  %vm7762_vm15 = vmmov %vm7750_vm10 }
0x30f7   :  { %v4119_v19 = vadd.f32 %v4117_v53, %v4055_v29  ;;  %v4210_v42 = vpop.xlane.xlu0 %4209  ;;  %v4237_v54 = vrot.slane %v4234_v58, 4  ;;  %v4225_v50 = vpop.xlane.xlu1 %4224 }
0x30f8   :  { %v4211_v43 = vrot.slane %v4210_v42, 4  ;;  %4126 = vrot.lane.b32.xlu0 %v4121_v30, %s5682_s2 }
0x30f9   :  { %v4238_v24 = vadd.f32 %v4237_v54, %v4234_v58 }
0x30fa   :  { %v4212_v32 = vadd.f32 %v4211_v43, %v4210_v42 }
0x30fb   :  { %v4239_v62 = vrot.slane %v4238_v24, 2 }
0x30fc   :  { %v4213_v49 = vrot.slane %v4212_v32, 2 }
0x30fd   :  { %v4240_v37 = vadd.f32 %v4239_v62, %v4238_v24 }
0x30fe   :  { %v4214_v1 = vadd.f32 %v4213_v49, %v4212_v32 }
0x30ff   :  { %v4241_v14 = vrot.slane %v4240_v37, 1 }
0x3100   :  { %v4215_v11 = vrot.slane %v4214_v1, 1 }
0x3101   :  { %v4242_v52 = vadd.f32 %v4241_v14, %v4240_v37  ;;  %v7763_v37 = vld [vmem:[#allocation16_spill] sm:$0xff] }
0x3102   :  { %v4216_v21 = vadd.f32 %v4215_v11, %v4214_v1  ;;  %vm7764_vm5 = vnez %v7763_v37 }
0x3104   :  { %5458 = vpush %v4216_v21 }
0x3135   :  { %s5459_s9 = spop %5458 }
0x3136   :  { %v4218_v51 = vstv %s5459_s9  ;;  %s4976_s9 = sshll.u32 %s5683_s8, 4  ;;  %s4977_s9 = int_to_ptr.vmem [resolvable:$true] %s4976_s9 }
0x3137   :  { %5595 = vrsqrt.f32 %v4218_v51  ;;  %p5654_p11 = scmp.lt.s32.totalorder %s4977_s9, %s4977_s9 }
0x3144   :  { %v5596_v27 = vpop.eup %5595 }
0x3145   :  { %5460 = vpush %v5596_v27 }
0x316a   :  { %v4127_v0 = vpop.permute.xlu0 %4126 }
0x316b   :  { %v4131_v31 = vsub.f32 %v4067_v59, %v4127_v0 }
0x316d   :  { %4136 = vrot.lane.b32.xlu1 %v4131_v31, %s5681_s25 }
0x3176   :  { %s5461_s4 = spop %5460 }
0x3177   :  { %v4229_v15 = vstv %s5461_s4  ;;  %s5649_s4 = scalar_lea.vmem %s4977_s9, 256 }
0x3178   :  { %v4230_v55 = vmul.f32 %v4229_v15, %v4225_v50  ;;  %v4243_v13 = vmul.f32 %v4242_v52, %v4229_v15  ;;  %p5650_p10 = scmp.ne.s32.totalorder %s4977_s9, %s5649_s4  ;;  %p5655_p12 = scmp.lt.s32.totalorder %s5649_s4, %s5649_s4 }
0x317a   :  { %v4244_v10 = vsel %vm7750_vm10, %v4230_v55, 0.0  ;;  %v4248_v28 = vmul.f32 %v4243_v13, %v4230_v55  ;;  %p5656_p13 = por %p5655_p12, %p5654_p11 }
0x317b   :  { %v4246_v63 = vadd.f32 %v4244_v10, %v4182_v41 }
0x317c   :  { %4252 = vrot.lane.b32.xlu1 %v4248_v28, %s5682_s2  ;;  %p5657_p0 = pnand %p5656_p13, %p5650_p10 }
0x31df   :  { %v4137_v40 = vpop.permute.xlu1 %4136 }
0x31e0   :  { %v4158_v29 = vsel %vm7751_vm2, %v4137_v40, 0.0  ;;  %vm7766_vm2 = vmmov %vm7749_vm4 }
0x31e1   :  { %v4162_v48 = vsel %vm7752_vm14, %v4158_v29, 0.0 }
0x31e2   :  { %4163 = vadd.xlane.f32.xlu0 %v4162_v48 }
0x31ee   :  { %v4253_v59 = vpop.permute.xlu1 %4252 }
0x31ef   :  { %v7049_v45 = vsub.f32 %v4194_v9, %v4253_v59 }
0x31f1   :  { %4262 = vrot.lane.b32.xlu1 %v7049_v45, %s5681_s25 }
0x3263   :  { %v4263_v18 = vpop.permute.xlu1 %4262 }
0x3264   :  { %v4268_v47 = vsel %vm7598_vm12, %v4263_v18, 0.0  ;;  %vm7759_vm12 = vmmov %vm7750_vm10  ;;  %v4296_v14 = vsel %vm7764_vm5, %v4263_v18, 0.0  ;;  %vm7778_vm5 = vnez %v7501_v3  ;;  %v7781_v3 = vld [vmem:[#allocation19_spill] sm:$0xff] }
0x3265   :  { %v4270_v9 = vsel %vm7755_vm9, %v4268_v47, 0.0  ;;  %v4298_v52 = vsel %vm7749_vm4, %v4296_v14, 0.0  ;;  %vm7765_vm10 = vmmov %vm7761_vm0 }
0x3266   :  { %v4301_v50 = vrot.slane %v4298_v52, 4  ;;  %vm7770_vm9 = vmmov %vm7761_vm0 }
0x3267   :  { %vm7779_vm4 = vmmov %vm7766_vm2 }
0x3268   :  { %v4302_v55 = vadd.f32 %v4301_v50, %v4298_v52 }
0x326a   :  { %v4303_v10 = vrot.slane %v4302_v55, 2 }
0x326b   :  { %v4164_v5 = vpop.xlane.xlu0 %4163 }
0x326c   :  { %v4167_v23 = vmul.f32 %v7007_v25, %v4164_v5  ;;  %v7756_v25 = vld [vmem:[#allocation15_spill] sm:$0xff]  ;;  %v4304_v28 = vadd.f32 %v4303_v10, %v4302_v55 }
0x326d   :  { %vm7757_vm13 = vnez %v7756_v25 }
0x326e   :  { %v4181_v41 = vsel %vm7753_vm11, %v4167_v23, 0.0  ;;  %v4185_v22 = vmul.f32 %v7010_v17, %v4167_v23  ;;  %v4285_v57 = vsel %vm7757_vm13, %v4263_v18, 0.0  ;;  %v7767_v18 = vld [vmem:[#allocation17_spill] sm:$0xff]  ;;  %vm7769_vm11 = vmmov %vm7766_vm2  ;;  %vm7771_vm13 = vcmp.eq.s32.totalorder %v5776_v33, 7 }
0x326f   :  { %v4183_v46 = vadd.f32 %v4181_v41, %v4119_v19  ;;  %v4287_v20 = vsel %vm7758_vm6, %v4285_v57, 0.0  ;;  %vm7768_vm14 = vnez %v7767_v18  ;;  %vm7772_vm6 = vmmov %vm7766_vm2 }
0x3270   :  { %4190 = vrot.lane.b32.xlu1 %v4185_v22, %s5682_s2 }
0x3294   :  { %4273 = vadd.xlane.f32.xlu1 %v4270_v9 }
0x32e2   :  { %v4191_v36 = vpop.permute.xlu1 %4190 }
0x32e3   :  { %v4195_v2 = vsub.f32 %v4131_v31, %v4191_v36 }
0x32e5   :  { %4200 = vrot.lane.b32.xlu0 %v4195_v2, %s5681_s25 }
0x3304   :  { %4288 = vadd.xlane.f32.xlu0 %v4287_v20 }
0x331d   :  { %v4274_v17 = vpop.xlane.xlu1 %4273 }
0x331e   :  { %v4275_v35 = vrot.slane %v4274_v17, 4 }
0x3320   :  { %v4276_v53 = vadd.f32 %v4275_v35, %v4274_v17 }
0x3322   :  { %v4277_v30 = vrot.slane %v4276_v53, 2 }
0x3324   :  { %v4278_v19 = vadd.f32 %v4277_v30, %v4276_v53 }
0x3326   :  { %v4279_v42 = vrot.slane %v4278_v19, 1 }
0x3328   :  { %v4280_v43 = vadd.f32 %v4279_v42, %v4278_v19 }
0x332a   :  { %5462 = vpush %v4280_v43 }
0x3357   :  { %v4201_v32 = vpop.permute.xlu0 %4200 }
0x3358   :  { %v4222_v49 = vsel %vm7759_vm12, %v4201_v32, 0.0 }
0x3359   :  { %v4226_v1 = vsel %vm7760_vm7, %v4222_v49, 0.0  ;;  %vm7775_vm7 = vmmov %vm7766_vm2 }
0x335a   :  { %4227 = vadd.xlane.f32.xlu1 %v4226_v1 }
0x335b   :  { %s5463_s10 = spop %5462 }
0x335c   :  { %v4282_v11 = vstv %s5463_s10 }
0x335d   :  { %5597 = vrsqrt.f32 %v4282_v11 }
0x336a   :  { %v5598_v21 = vpop.eup %5597 }
0x336b   :  { %5464 = vpush %v5598_v21 }
0x338d   :  { %v4289_v51 = vpop.xlane.xlu0 %4288 }
0x339c   :  { %s5465_s11 = spop %5464 }
0x339d   :  { %v4293_v27 = vstv %s5465_s11 }
0x339e   :  { %v4294_v39 = vmul.f32 %v4293_v27, %v4289_v51  ;;  %v7773_v51 = vld [vmem:[#allocation18_spill] sm:$0xff] }
0x339f   :  { %vm7774_vm12 = vnez %v7773_v51 }
0x33a0   :  { %v4308_v56 = vsel %vm7761_vm0, %v4294_v39, 0.0  ;;  %vm7776_vm0 = vmmov %vm7771_vm13 }
0x33a1   :  { %v7070_v58 = vadd.f32 %v4308_v56, %v4246_v63  ;;  %v4305_v63 = vrot.slane %v4304_v28, 1 }
0x33a3   :  { %v4306_v40 = vadd.f32 %v4305_v63, %v4304_v28 }
0x33e3   :  { %v4228_v54 = vpop.xlane.xlu1 %4227 }
0x33e4   :  { %v4231_v24 = vmul.f32 %v4229_v15, %v4228_v54  ;;  %v4307_v15 = vmul.f32 %v4306_v40, %v4293_v27 }
0x33e6   :  { %v4245_v62 = vsel %vm7762_vm15, %v4231_v24, 0.0  ;;  %v4249_v0 = vmul.f32 %v4243_v13, %v4231_v24  ;;  %v4312_v13 = vmul.f32 %v4307_v15, %v4294_v39  ;;  %vm7777_vm15 = vcmp.eq.s32.totalorder %v5776_v33, 8 }
0x33e7   :  { %v4247_v31 = vadd.f32 %v4245_v62, %v4183_v46 }
0x33e8   :  { %4254 = vrot.lane.b32.xlu1 %v4249_v0, %s5682_s2 }
0x345a   :  { %v4255_v29 = vpop.permute.xlu1 %4254 }
0x345b   :  { %v4259_v48 = vsub.f32 %v4195_v2, %v4255_v29 }
0x345d   :  { %4264 = vrot.lane.b32.xlu1 %v4259_v48, %s5681_s25 }
0x3461   :  { %4316 = vrot.lane.b32.xlu1 %v4312_v13, %s5682_s2 }
0x34cf   :  { %v4265_v59 = vpop.permute.xlu1 %4264 }
0x34d0   :  { %v4286_v5 = vsel %vm7765_vm10, %v4265_v59, 0.0  ;;  %vm7780_vm10 = vmmov %vm7766_vm2 }
0x34d1   :  { %v4290_v23 = vsel %vm7766_vm2, %v4286_v5, 0.0  ;;  %vm7782_vm2 = vnez %v7781_v3 }
0x34d2   :  { %4291 = vadd.xlane.f32.xlu1 %v4290_v23 }
0x34d3   :  { %v4317_v41 = vpop.permute.xlu1 %4316 }
0x34d4   :  { %v4322_v22 = vsub.f32 %v7049_v45, %v4317_v41 }
0x34d6   :  { %4326 = vrot.lane.b32.xlu0 %v4322_v22, %s5681_s25 }
0x3548   :  { %v7085_v46 = vpop.permute.xlu0 %4326 }
0x3549   :  { %v4332_v38 = vsel %vm7768_vm14, %v7085_v46, 0.0  ;;  %vm7783_vm14 = vmmov %vm7779_vm4 }
0x354a   :  { %v4334_v47 = vsel %vm7769_vm11, %v4332_v38, 0.0  ;;  %vm7784_vm11 = vmmov %vm7777_vm15 }
0x354b   :  { %4337 = vadd.xlane.f32.xlu0 %v4334_v47 }
0x355b   :  { %v4292_v9 = vpop.xlane.xlu1 %4291 }
0x355c   :  { %v4295_v36 = vmul.f32 %v4293_v27, %v4292_v9  ;;  %v4360_v27 = vsel %vm7774_vm12, %v7085_v46, 0.0  ;;  %vm7789_vm12 = vmmov %vm7779_vm4 }
0x355d   :  { %v4362_v39 = vsel %vm7775_vm7, %v4360_v27, 0.0  ;;  %v7785_v27 = vld [vmem:[#allocation20_spill] sm:$0xff] }
0x355e   :  { %v4309_v2 = vsel %vm7770_vm9, %v4295_v36, 0.0  ;;  %v4313_v25 = vmul.f32 %v4307_v15, %v4295_v36  ;;  %v4365_v56 = vrot.slane %v4362_v39, 4  ;;  %vm7786_vm9 = vnez %v7785_v27 }
0x355f   :  { %v4311_v57 = vadd.f32 %v4309_v2, %v4247_v31 }
0x3560   :  { %4318 = vrot.lane.b32.xlu1 %v4313_v25, %s5682_s2  ;;  %v4366_v54 = vadd.f32 %v4365_v56, %v4362_v39 }
0x3562   :  { %v4367_v24 = vrot.slane %v4366_v54, 2 }
0x3564   :  { %v4368_v62 = vadd.f32 %v4367_v24, %v4366_v54 }
0x3566   :  { %v4369_v0 = vrot.slane %v4368_v62, 1 }
0x3568   :  { %v4370_v37 = vadd.f32 %v4369_v0, %v4368_v62 }
0x35d2   :  { %v4319_v45 = vpop.permute.xlu1 %4318 }
0x35d3   :  { %v4323_v20 = vsub.f32 %v4259_v48, %v4319_v45 }
0x35d4   :  { %v4338_v17 = vpop.xlane.xlu0 %4337 }
0x35d5   :  { %v4339_v35 = vrot.slane %v4338_v17, 4  ;;  %4328 = vrot.lane.b32.xlu1 %v4323_v20, %s5681_s25 }
0x35d7   :  { %v4340_v53 = vadd.f32 %v4339_v35, %v4338_v17 }
0x35d9   :  { %v4341_v30 = vrot.slane %v4340_v53, 2 }
0x35db   :  { %v4342_v19 = vadd.f32 %v4341_v30, %v4340_v53 }
0x35dd   :  { %v4343_v42 = vrot.slane %v4342_v19, 1 }
0x35df   :  { %v4344_v43 = vadd.f32 %v4343_v42, %v4342_v19 }
0x35e1   :  { %5466 = vpush %v4344_v43 }
0x3612   :  { %s5467_s12 = spop %5466 }
0x3613   :  { %v4346_v32 = vstv %s5467_s12 }
0x3614   :  { %5599 = vrsqrt.f32 %v4346_v32 }
0x3621   :  { %v5600_v49 = vpop.eup %5599 }
0x3622   :  { %5468 = vpush %v5600_v49 }
0x3647   :  { %v4329_v1 = vpop.permute.xlu1 %4328 }
0x3648   :  { %v4350_v11 = vsel %vm7771_vm13, %v4329_v1, 0.0  ;;  %vm7787_vm13 = vnez %v7508_v7  ;;  %v7790_v7 = vld [vmem:[#allocation21_spill] sm:$0xff] }
0x3649   :  { %v4354_v21 = vsel %vm7772_vm6, %v4350_v11, 0.0  ;;  %vm7788_vm6 = vmmov %vm7779_vm4  ;;  %vm7791_vm7 = vnez %v7790_v7 }
0x364a   :  { %4355 = vadd.xlane.f32.xlu1 %v4354_v21 }
0x3653   :  { %s5469_s13 = spop %5468 }
0x3654   :  { %v7102_v31 = vstv %s5469_s13 }
0x3655   :  { %v4371_v52 = vmul.f32 %v4370_v37, %v7102_v31 }
0x36d3   :  { %v4356_v14 = vpop.xlane.xlu1 %4355 }
0x36d4   :  { %v4359_v50 = vmul.f32 %v7102_v31, %v4356_v14 }
0x36d6   :  { %v4373_v55 = vsel %vm7776_vm0, %v4359_v50, 0.0  ;;  %v4377_v10 = vmul.f32 %v4371_v52, %v4359_v50  ;;  %vm7792_vm0 = vmmov %vm7779_vm4 }
0x36d7   :  { %v4375_v28 = vadd.f32 %v4373_v55, %v4311_v57 }
0x36d8   :  { %4382 = vrot.lane.b32.xlu0 %v4377_v10, %s5682_s2 }
0x374a   :  { %v4383_v63 = vpop.permute.xlu0 %4382 }
0x374b   :  { %v4387_v40 = vsub.f32 %v4323_v20, %v4383_v63 }
0x374d   :  { %4392 = vrot.lane.b32.xlu0 %v4387_v40, %s5681_s25 }
0x37bf   :  { %v4393_v29 = vpop.permute.xlu0 %4392 }
0x37c0   :  { %v4414_v15 = vsel %vm7777_vm15, %v4393_v29, 0.0  ;;  %v4397_v48 = vsel %vm7778_vm5, %v4393_v29, 0.0  ;;  %v4425_v2 = vsel %vm7782_vm2, %v4393_v29, 0.0  ;;  %vm7793_vm15 = vcmp.eq.s32.totalorder %v5776_v33, 9  ;;  %vm7800_vm2 = vmmov %vm7792_vm0 }
0x37c1   :  { %v4418_v13 = vsel %vm7779_vm4, %v4414_v15, 0.0  ;;  %v4399_v59 = vsel %vm7780_vm10, %v4397_v48, 0.0  ;;  %v4427_v25 = vsel %vm7783_vm14, %v4425_v2, 0.0  ;;  %vm7796_vm4 = vmmov %vm7792_vm0  ;;  %vm7801_vm14 = vcmp.eq.s32.totalorder %v5776_v33, 10 }
0x37c2   :  { %4419 = vadd.xlane.f32.xlu1 %v4418_v13  ;;  %4401 = vadd.xlane.f32.xlu0 %v4399_v59  ;;  %v4429_v57 = vrot.slane %v4427_v25, 4  ;;  %vm7797_vm10 = vmmov %vm7792_vm0 }
0x37c4   :  { %v4430_v45 = vadd.f32 %v4429_v57, %v4427_v25  ;;  %v7794_v25 = vld [vmem:[#allocation22_spill] sm:$0xff] }
0x37c5   :  { %vm7795_vm5 = vnez %v7794_v25 }
0x37c6   :  { %v4431_v20 = vrot.slane %v4430_v45, 2 }
0x37c8   :  { %v4432_v17 = vadd.f32 %v4431_v20, %v4430_v45 }
0x37ca   :  { %v4433_v35 = vrot.slane %v4432_v17, 1 }
0x37cc   :  { %v4434_v53 = vadd.f32 %v4433_v35, %v4432_v17 }
0x384b   :  { %v4402_v5 = vpop.xlane.xlu0 %4401  ;;  %v4420_v30 = vpop.xlane.xlu1 %4419 }
0x384c   :  { %v4403_v23 = vrot.slane %v4402_v5, 4 }
0x384e   :  { %v4404_v41 = vadd.f32 %v4403_v23, %v4402_v5 }
0x3850   :  { %v4405_v22 = vrot.slane %v4404_v41, 2 }
0x3852   :  { %v4406_v18 = vadd.f32 %v4405_v22, %v4404_v41 }
0x3854   :  { %v4407_v38 = vrot.slane %v4406_v18, 1 }
0x3856   :  { %v4408_v47 = vadd.f32 %v4407_v38, %v4406_v18 }
0x3858   :  { %5470 = vpush %v4408_v47 }
0x3889   :  { %s5471_s14 = spop %5470 }
0x388a   :  { %v4410_v9 = vstv %s5471_s14 }
0x388b   :  { %5601 = vrsqrt.f32 %v4410_v9 }
0x3898   :  { %v5602_v36 = vpop.eup %5601 }
0x3899   :  { %5472 = vpush %v5602_v36 }
0x38ca   :  { %s5473_s0 = spop %5472 }
0x38cb   :  { %v7119_v19 = vstv %s5473_s0 }
0x38cc   :  { %v4423_v42 = vmul.f32 %v7119_v19, %v4420_v30  ;;  %v4435_v43 = vmul.f32 %v4434_v53, %v7119_v19 }
0x38ce   :  { %v4437_v32 = vsel %vm7784_vm11, %v4423_v42, 0.0  ;;  %v4441_v49 = vmul.f32 %v4435_v43, %v4423_v42 }
0x38cf   :  { %v4439_v1 = vadd.f32 %v4437_v32, %v4375_v28 }
0x38d0   :  { %4446 = vrot.lane.b32.xlu1 %v4441_v49, %s5682_s2 }
0x3942   :  { %v4447_v11 = vpop.permute.xlu1 %4446 }
0x3943   :  { %v4451_v21 = vsub.f32 %v4387_v40, %v4447_v11 }
0x3945   :  { %4456 = vrot.lane.b32.xlu1 %v4451_v21, %s5681_s25 }
0x39b7   :  { %v4457_v51 = vpop.permute.xlu1 %4456 }
0x39b8   :  { %v4478_v39 = vsel %vm7786_vm9, %v4457_v51, 0.0  ;;  %v4461_v56 = vsel %vm7787_vm13, %v4457_v51, 0.0  ;;  %v4489_v63 = vsel %vm7791_vm7, %v4457_v51, 0.0  ;;  %vm7804_vm9 = vnez %v7534_v12  ;;  %vm7805_vm13 = vmmov %vm7792_vm0  ;;  %v7807_v12 = vld [vmem:[#allocation25_spill] sm:$0xff] }
0x39b9   :  { %v4482_v54 = vsel %vm7788_vm6, %v4478_v39, 0.0  ;;  %v4463_v24 = vsel %vm7789_vm12, %v4461_v56, 0.0  ;;  %v4491_v40 = vsel %vm7792_vm0, %v4489_v63, 0.0  ;;  %vm7806_vm6 = vmmov %vm7792_vm0  ;;  %vm7808_vm12 = vnez %v7807_v12 }
0x39ba   :  { %4483 = vadd.xlane.f32.xlu1 %v4482_v54  ;;  %4465 = vadd.xlane.f32.xlu0 %v4463_v24  ;;  %v4493_v29 = vrot.slane %v4491_v40, 4  ;;  %vm7809_vm7 = vmmov %vm7792_vm0  ;;  %vm7810_vm0 = vcmp.eq.s32.totalorder %v5776_v33, 11 }
0x39bc   :  { %v4494_v15 = vadd.f32 %v4493_v29, %v4491_v40  ;;  %v7802_v40 = vld [vmem:[#allocation24_spill] sm:$0xff] }
0x39bd   :  { %vm7803_vm11 = vnez %v7802_v40 }
0x39be   :  { %v4495_v48 = vrot.slane %v4494_v15, 2 }
0x39c0   :  { %v4496_v13 = vadd.f32 %v4495_v48, %v4494_v15 }
0x39c2   :  { %v4497_v59 = vrot.slane %v4496_v13, 1 }
0x39c4   :  { %v4498_v5 = vadd.f32 %v4497_v59, %v4496_v13 }
0x3a43   :  { %v4466_v62 = vpop.xlane.xlu0 %4465  ;;  %v4484_v23 = vpop.xlane.xlu1 %4483 }
0x3a44   :  { %v4467_v0 = vrot.slane %v4466_v62, 4 }
0x3a46   :  { %v4468_v37 = vadd.f32 %v4467_v0, %v4466_v62 }
0x3a48   :  { %v4469_v14 = vrot.slane %v4468_v37, 2 }
0x3a4a   :  { %v4470_v52 = vadd.f32 %v4469_v14, %v4468_v37 }
0x3a4c   :  { %v4471_v50 = vrot.slane %v4470_v52, 1 }
0x3a4e   :  { %v4472_v55 = vadd.f32 %v4471_v50, %v4470_v52 }
0x3a50   :  { %5474 = vpush %v4472_v55 }
0x3a81   :  { %s5475_s1 = spop %5474 }
0x3a82   :  { %v4474_v10 = vstv %s5475_s1 }
0x3a83   :  { %5603 = vrsqrt.f32 %v4474_v10 }
0x3a90   :  { %v5604_v28 = vpop.eup %5603 }
0x3a91   :  { %5476 = vpush %v5604_v28 }
0x3ac2   :  { %s5477_s15 = spop %5476 }
0x3ac3   :  { %v7136_v41 = vstv %s5477_s15 }
0x3ac4   :  { %v4487_v22 = vmul.f32 %v7136_v41, %v4484_v23  ;;  %v4499_v18 = vmul.f32 %v4498_v5, %v7136_v41 }
0x3ac6   :  { %v4501_v38 = vsel %vm7793_vm15, %v4487_v22, 0.0  ;;  %v4505_v47 = vmul.f32 %v4499_v18, %v4487_v22 }
0x3ac7   :  { %v4503_v9 = vadd.f32 %v4501_v38, %v4439_v1 }
0x3ac8   :  { %4510 = vrot.lane.b32.xlu0 %v4505_v47, %s5682_s2 }
0x3b3a   :  { %v4511_v36 = vpop.permute.xlu0 %4510 }
0x3b3b   :  { %v4515_v3 = vsub.f32 %v4451_v21, %v4511_v36 }
0x3b3d   :  { %4520 = vrot.lane.b32.xlu0 %v4515_v3, %s5681_s25 }
0x3baf   :  { %v4521_v2 = vpop.permute.xlu0 %4520 }
0x3bb0   :  { %v4542_v57 = vsel %vm7795_vm5, %v4521_v2, 0.0  ;;  %v4525_v45 = vsel %vm7611_vm1, %v4521_v2, 0.0  ;;  %vm7799_vm1 = vnez %v7798_v16  ;;  %vm7813_vm5 = vmmov %vm7800_vm2 }
0x3bb1   :  { %v4546_v20 = vsel %vm7796_vm4, %v4542_v57, 0.0  ;;  %v4527_v17 = vsel %vm7797_vm10, %v4525_v45, 0.0  ;;  %v4553_v21 = vsel %vm7799_vm1, %v4521_v2, 0.0  ;;  %vm7814_vm4 = vmmov %vm7800_vm2  ;;  %vm7818_vm1 = vcmp.eq.s32.totalorder %v5776_v33, 12 }
0x3bb2   :  { %4547 = vadd.xlane.f32.xlu1 %v4546_v20  ;;  %4529 = vadd.xlane.f32.xlu0 %v4527_v17  ;;  %v4555_v51 = vsel %vm7800_vm2, %v4553_v21, 0.0  ;;  %vm7817_vm10 = vmmov %vm7800_vm2 }
0x3bb3   :  { %v4557_v27 = vrot.slane %v4555_v51, 4 }
0x3bb5   :  { %v4558_v39 = vadd.f32 %v4557_v27, %v4555_v51  ;;  %v7811_v51 = vld [vmem:[#allocation26_spill] sm:$0xff] }
0x3bb6   :  { %vm7812_vm15 = vnez %v7811_v51 }
0x3bb7   :  { %v4559_v56 = vrot.slane %v4558_v39, 2 }
0x3bb9   :  { %v4560_v54 = vadd.f32 %v4559_v56, %v4558_v39 }
0x3bbb   :  { %v4561_v24 = vrot.slane %v4560_v54, 1 }
0x3bbd   :  { %v4562_v62 = vadd.f32 %v4561_v24, %v4560_v54 }
0x3c3b   :  { %v4530_v35 = vpop.xlane.xlu0 %4529  ;;  %v4548_v0 = vpop.xlane.xlu1 %4547 }
0x3c3c   :  { %v4531_v53 = vrot.slane %v4530_v35, 4 }
0x3c3e   :  { %v4532_v30 = vadd.f32 %v4531_v53, %v4530_v35 }
0x3c40   :  { %v4533_v42 = vrot.slane %v4532_v30, 2 }
0x3c42   :  { %v4534_v43 = vadd.f32 %v4533_v42, %v4532_v30 }
0x3c44   :  { %v4535_v32 = vrot.slane %v4534_v43, 1 }
0x3c46   :  { %v4536_v49 = vadd.f32 %v4535_v32, %v4534_v43 }
0x3c48   :  { %5478 = vpush %v4536_v49 }
0x3c79   :  { %s5479_s16 = spop %5478 }
0x3c7a   :  { %v4538_v1 = vstv %s5479_s16 }
0x3c7b   :  { %5605 = vrsqrt.f32 %v4538_v1 }
0x3c88   :  { %v5606_v11 = vpop.eup %5605 }
0x3c89   :  { %5480 = vpush %v5606_v11 }
0x3cba   :  { %s5481_s17 = spop %5480 }
0x3cbb   :  { %v7153_v37 = vstv %s5481_s17 }
0x3cbc   :  { %v4551_v14 = vmul.f32 %v7153_v37, %v4548_v0  ;;  %v4563_v52 = vmul.f32 %v4562_v62, %v7153_v37 }
0x3cbe   :  { %v4565_v50 = vsel %vm7801_vm14, %v4551_v14, 0.0  ;;  %v4569_v55 = vmul.f32 %v4563_v52, %v4551_v14  ;;  %vm7821_vm14 = vmmov %vm7814_vm4 }
0x3cbf   :  { %v4567_v10 = vadd.f32 %v4565_v50, %v4503_v9 }
0x3cc0   :  { %4574 = vrot.lane.b32.xlu1 %v4569_v55, %s5682_s2 }
0x3d32   :  { %v4575_v28 = vpop.permute.xlu1 %4574 }
0x3d33   :  { %v4579_v7 = vsub.f32 %v4515_v3, %v4575_v28 }
0x3d35   :  { %4584 = vrot.lane.b32.xlu1 %v4579_v7, %s5681_s25 }
0x3da7   :  { %v4585_v63 = vpop.permute.xlu1 %4584 }
0x3da8   :  { %v4606_v29 = vsel %vm7803_vm11, %v4585_v63, 0.0  ;;  %v4589_v15 = vsel %vm7804_vm9, %v4585_v63, 0.0  ;;  %v4617_v3 = vsel %vm7808_vm12, %v4585_v63, 0.0  ;;  %vm7822_vm11 = vmmov %vm7814_vm4  ;;  %vm7829_vm12 = vnez %v7567_v34  ;;  %v7832_v34 = vld [vmem:[#allocation32_spill] sm:$0xff] }
0x3da9   :  { %v4610_v48 = vsel %vm7805_vm13, %v4606_v29, 0.0  ;;  %v4591_v13 = vsel %vm7806_vm6, %v4589_v15, 0.0  ;;  %v4619_v2 = vsel %vm7809_vm7, %v4617_v3, 0.0  ;;  %vm7825_vm9 = vmmov %vm7814_vm4  ;;  %vm7826_vm13 = vcmp.eq.s32.totalorder %v5776_v33, 13 }
0x3daa   :  { %4611 = vadd.xlane.f32.xlu1 %v4610_v48  ;;  %4593 = vadd.xlane.f32.xlu0 %v4591_v13  ;;  %v4621_v25 = vrot.slane %v4619_v2, 4  ;;  %vm7830_vm7 = vmmov %vm7814_vm4 }
0x3dac   :  { %v4622_v57 = vadd.f32 %v4621_v25, %v4619_v2  ;;  %v7819_v2 = vld [vmem:[#allocation28_spill] sm:$0xff] }
0x3dad   :  { %vm7820_vm2 = vnez %v7819_v2 }
0x3dae   :  { %v4623_v45 = vrot.slane %v4622_v57, 2 }
0x3db0   :  { %v4624_v20 = vadd.f32 %v4623_v45, %v4622_v57 }
0x3db2   :  { %v4625_v17 = vrot.slane %v4624_v20, 1 }
0x3db4   :  { %v4626_v35 = vadd.f32 %v4625_v17, %v4624_v20 }
0x3e33   :  { %v4594_v59 = vpop.xlane.xlu0 %4593  ;;  %v4612_v53 = vpop.xlane.xlu1 %4611 }
0x3e34   :  { %v4595_v5 = vrot.slane %v4594_v59, 4 }
0x3e36   :  { %v4596_v23 = vadd.f32 %v4595_v5, %v4594_v59 }
0x3e38   :  { %v4597_v22 = vrot.slane %v4596_v23, 2 }
0x3e3a   :  { %v4598_v18 = vadd.f32 %v4597_v22, %v4596_v23 }
0x3e3c   :  { %v4599_v38 = vrot.slane %v4598_v18, 1 }
0x3e3e   :  { %v4600_v47 = vadd.f32 %v4599_v38, %v4598_v18 }
0x3e40   :  { %5482 = vpush %v4600_v47 }
0x3e71   :  { %s5483_s18 = spop %5482 }
0x3e72   :  { %v4602_v9 = vstv %s5483_s18 }
0x3e73   :  { %5607 = vrsqrt.f32 %v4602_v9 }
0x3e80   :  { %v5608_v36 = vpop.eup %5607 }
0x3e81   :  { %5484 = vpush %v5608_v36 }
0x3eb2   :  { %s5485_s19 = spop %5484 }
0x3eb3   :  { %v7170_v30 = vstv %s5485_s19 }
0x3eb4   :  { %v4615_v42 = vmul.f32 %v7170_v30, %v4612_v53  ;;  %v4627_v43 = vmul.f32 %v4626_v35, %v7170_v30 }
0x3eb6   :  { %v4629_v32 = vsel %vm7810_vm0, %v4615_v42, 0.0  ;;  %v4633_v49 = vmul.f32 %v4627_v43, %v4615_v42  ;;  %vm7831_vm0 = vmmov %vm7814_vm4 }
0x3eb7   :  { %v4631_v1 = vadd.f32 %v4629_v32, %v4567_v10 }
0x3eb8   :  { %4638 = vrot.lane.b32.xlu0 %v4633_v49, %s5682_s2 }
0x3f2a   :  { %v4639_v11 = vpop.permute.xlu0 %4638 }
0x3f2b   :  { %v4643_v16 = vsub.f32 %v4579_v7, %v4639_v11 }
0x3f2d   :  { %4648 = vrot.lane.b32.xlu0 %v4643_v16, %s5681_s25 }
0x3f9f   :  { %v4649_v21 = vpop.permute.xlu0 %4648 }
0x3fa0   :  { %v4670_v27 = vsel %vm7812_vm15, %v4649_v21, 0.0  ;;  %v4653_v39 = vsel %vm7615_vm3, %v4649_v21, 0.0  ;;  %vm7816_vm3 = vnez %v7815_v26  ;;  %vm7833_vm15 = vnez %v7832_v34 }
0x3fa1   :  { %v4674_v56 = vsel %vm7813_vm5, %v4670_v27, 0.0  ;;  %v4655_v54 = vsel %vm7814_vm4, %v4653_v39, 0.0  ;;  %v4681_v7 = vsel %vm7816_vm3, %v4649_v21, 0.0  ;;  %vm7834_vm5 = vmmov %vm7831_vm0  ;;  %vm7835_vm4 = vcmp.eq.s32.totalorder %v5776_v33, 14 }
0x3fa2   :  { %4675 = vadd.xlane.f32.xlu1 %v4674_v56  ;;  %4657 = vadd.xlane.f32.xlu0 %v4655_v54  ;;  %v4683_v63 = vsel %vm7817_vm10, %v4681_v7, 0.0  ;;  %vm7838_vm10 = vmmov %vm7831_vm0 }
0x3fa3   :  { %v4685_v40 = vrot.slane %v4683_v63, 4 }
0x3fa5   :  { %v4686_v29 = vadd.f32 %v4685_v40, %v4683_v63  ;;  %v7827_v63 = vld [vmem:[#allocation30_spill] sm:$0xff] }
0x3fa6   :  { %vm7828_vm6 = vnez %v7827_v63 }
0x3fa7   :  { %v4687_v15 = vrot.slane %v4686_v29, 2 }
0x3fa9   :  { %v4688_v48 = vadd.f32 %v4687_v15, %v4686_v29 }
0x3fab   :  { %v4689_v13 = vrot.slane %v4688_v48, 1 }
0x3fad   :  { %v4690_v59 = vadd.f32 %v4689_v13, %v4688_v48 }
0x402b   :  { %v4658_v24 = vpop.xlane.xlu0 %4657  ;;  %v4676_v5 = vpop.xlane.xlu1 %4675 }
0x402c   :  { %v4659_v62 = vrot.slane %v4658_v24, 4 }
0x402e   :  { %v4660_v0 = vadd.f32 %v4659_v62, %v4658_v24 }
0x4030   :  { %v4661_v14 = vrot.slane %v4660_v0, 2 }
0x4032   :  { %v4662_v52 = vadd.f32 %v4661_v14, %v4660_v0 }
0x4034   :  { %v4663_v50 = vrot.slane %v4662_v52, 1 }
0x4036   :  { %v4664_v55 = vadd.f32 %v4663_v50, %v4662_v52 }
0x4038   :  { %5486 = vpush %v4664_v55 }
0x4069   :  { %s5487_s20 = spop %5486 }
0x406a   :  { %v4666_v10 = vstv %s5487_s20 }
0x406b   :  { %5609 = vrsqrt.f32 %v4666_v10 }
0x4078   :  { %v5610_v28 = vpop.eup %5609 }
0x4079   :  { %5488 = vpush %v5610_v28 }
0x40aa   :  { %s5489_s21 = spop %5488 }
0x40ab   :  { %v7187_v23 = vstv %s5489_s21 }
0x40ac   :  { %v4679_v22 = vmul.f32 %v7187_v23, %v4676_v5  ;;  %v4691_v18 = vmul.f32 %v4690_v59, %v7187_v23 }
0x40ae   :  { %v4693_v38 = vsel %vm7818_vm1, %v4679_v22, 0.0  ;;  %v4697_v47 = vmul.f32 %v4691_v18, %v4679_v22  ;;  %vm7839_vm1 = vnez %v7581_v6 }
0x40af   :  { %v4695_v9 = vadd.f32 %v4693_v38, %v4631_v1 }
0x40b0   :  { %4702 = vrot.lane.b32.xlu1 %v4697_v47, %s5682_s2 }
0x4122   :  { %v4703_v36 = vpop.permute.xlu1 %4702 }
0x4123   :  { %v4707_v12 = vsub.f32 %v4643_v16, %v4703_v36 }
0x4125   :  { %4712 = vrot.lane.b32.xlu1 %v4707_v12, %s5681_s25 }
0x4197   :  { %v4713_v3 = vpop.permute.xlu1 %4712 }
0x4198   :  { %v4734_v25 = vsel %vm7820_vm2, %v4713_v3, 0.0  ;;  %v4717_v57 = vsel %vm7614_vm8, %v4713_v3, 0.0  ;;  %vm7824_vm8 = vnez %v7823_v61  ;;  %vm7840_vm2 = vmmov %vm7831_vm0 }
0x4199   :  { %v4738_v45 = vsel %vm7821_vm14, %v4734_v25, 0.0  ;;  %v4719_v20 = vsel %vm7822_vm11, %v4717_v57, 0.0  ;;  %v4745_v16 = vsel %vm7824_vm8, %v4713_v3, 0.0  ;;  %vm7843_vm11 = vmmov %vm7831_vm0 }
0x419a   :  { %4739 = vadd.xlane.f32.xlu1 %v4738_v45  ;;  %4721 = vadd.xlane.f32.xlu0 %v4719_v20  ;;  %v4747_v21 = vsel %vm7825_vm9, %v4745_v16, 0.0  ;;  %v7836_v16 = vld [vmem:[#allocation31_spill] sm:$0xff]  ;;  %vm7844_vm8 = vmmov %vm7831_vm0  ;;  %vm7845_vm9 = vcmp.eq.s32.totalorder %v5776_v33, 7 }
0x419b   :  { %v4749_v51 = vrot.slane %v4747_v21, 4  ;;  %vm7837_vm3 = vnez %v7836_v16 }
0x419d   :  { %v4750_v27 = vadd.f32 %v4749_v51, %v4747_v21  ;;  %v4349_v21 = vsel %vm7837_vm3, %v7085_v46, 0.0  ;;  %v7841_v46 = vld [vmem:[#allocation33_spill] sm:$0xff] }
0x419e   :  { %v4351_v51 = vsel %vm7838_vm10, %v4349_v21, 0.0  ;;  %vm7842_vm14 = vnez %v7841_v46  ;;  %vm7855_vm10 = vmmov %vm7840_vm2  ;;  %v4877_v21 = vld [vmem:[%s7305_s3 + $0x8] sm:$0xff] }
0x419f   :  { %v4751_v39 = vrot.slane %v4750_v27, 2 }
0x41a1   :  { %v4752_v56 = vadd.f32 %v4751_v39, %v4750_v27 }
0x41a3   :  { %v4753_v54 = vrot.slane %v4752_v56, 1 }
0x41a5   :  { %v4754_v24 = vadd.f32 %v4753_v54, %v4752_v56 }
0x4223   :  { %v4722_v17 = vpop.xlane.xlu0 %4721  ;;  %v4740_v62 = vpop.xlane.xlu1 %4739 }
0x4224   :  { %v4723_v35 = vrot.slane %v4722_v17, 4 }
0x4226   :  { %v4724_v53 = vadd.f32 %v4723_v35, %v4722_v17 }
0x4228   :  { %v4725_v42 = vrot.slane %v4724_v53, 2 }
0x422a   :  { %v4726_v43 = vadd.f32 %v4725_v42, %v4724_v53 }
0x422c   :  { %v4727_v32 = vrot.slane %v4726_v43, 1 }
0x422e   :  { %v4728_v49 = vadd.f32 %v4727_v32, %v4726_v43 }
0x4230   :  { %5490 = vpush %v4728_v49 }
0x4261   :  { %s5491_s22 = spop %5490 }
0x4262   :  { %v4730_v1 = vstv %s5491_s22 }
0x4263   :  { %5611 = vrsqrt.f32 %v4730_v1 }
0x4270   :  { %v5612_v11 = vpop.eup %5611 }
0x4271   :  { %5492 = vpush %v5612_v11 }
0x42a2   :  { %s5493_s23 = spop %5492 }
0x42a3   :  { %v7204_v0 = vstv %s5493_s23 }
0x42a4   :  { %v4743_v14 = vmul.f32 %v7204_v0, %v4740_v62  ;;  %v4755_v52 = vmul.f32 %v4754_v24, %v7204_v0 }
0x42a6   :  { %v4757_v50 = vsel %vm7826_vm13, %v4743_v14, 0.0  ;;  %v4761_v55 = vmul.f32 %v4755_v52, %v4743_v14  ;;  %vm7846_vm13 = vcmp.eq.s32.totalorder %v5776_v33, 8 }
0x42a7   :  { %v4759_v10 = vadd.f32 %v4757_v50, %v4695_v9 }
0x42a8   :  { %4766 = vrot.lane.b32.xlu0 %v4761_v55, %s5682_s2 }
0x431a   :  { %v4767_v28 = vpop.permute.xlu0 %4766 }
0x431b   :  { %v4771_v26 = vsub.f32 %v4707_v12, %v4767_v28  ;;  %v4876_v28 = vld [vmem:[%s7305_s3] sm:$0xff] }
0x431c   :  { %5337 = vmatprep.mubr.msk.f32.mxu0 %vm7844_vm8, %v4876_v28 }
0x431d   :  { %4776 = vrot.lane.b32.xlu0 %v4771_v26, %s5681_s25 }
0x438f   :  { %v4777_v7 = vpop.permute.xlu0 %4776 }
0x4390   :  { %v4798_v40 = vsel %vm7828_vm6, %v4777_v7, 0.0  ;;  %v4781_v29 = vsel %vm7829_vm12, %v4777_v7, 0.0  ;;  %v4809_v12 = vsel %vm7833_vm15, %v4777_v7, 0.0  ;;  %vm7847_vm6 = vcmp.eq.s32.totalorder %v5776_v33, 9 }
0x4391   :  { %v4802_v15 = vsel %vm7830_vm7, %v4798_v40, 0.0  ;;  %v4783_v48 = vsel %vm7831_vm0, %v4781_v29, 0.0  ;;  %v4811_v3 = vsel %vm7834_vm5, %v4809_v12, 0.0  ;;  %vm7848_vm12 = vcmp.eq.s32.totalorder %v5776_v33, 10  ;;  %vm7852_vm5 = vmmov %vm7835_vm4 }
0x4392   :  { %4803 = vadd.xlane.f32.xlu1 %v4802_v15  ;;  %4785 = vadd.xlane.f32.xlu0 %v4783_v48  ;;  %v4813_v2 = vrot.slane %v4811_v3, 4  ;;  %vm7849_vm7 = vcmp.eq.s32.totalorder %v5776_v33, 11  ;;  %vm7850_vm0 = vcmp.eq.s32.totalorder %v5776_v33, 12  ;;  %vm7851_vm15 = vcmp.eq.s32.totalorder %v5776_v33, 13 }
0x4394   :  { %v4814_v25 = vadd.f32 %v4813_v2, %v4811_v3 }
0x4396   :  { %v4815_v57 = vrot.slane %v4814_v25, 2 }
0x4398   :  { %v4816_v45 = vadd.f32 %v4815_v57, %v4814_v25 }
0x439a   :  { %v4817_v20 = vrot.slane %v4816_v45, 1 }
0x439c   :  { %v4818_v17 = vadd.f32 %v4817_v20, %v4816_v45 }
0x441b   :  { %v4786_v13 = vpop.xlane.xlu0 %4785  ;;  %v4804_v35 = vpop.xlane.xlu1 %4803 }
0x441c   :  { %v4787_v59 = vrot.slane %v4786_v13, 4 }
0x441e   :  { %v4788_v5 = vadd.f32 %v4787_v59, %v4786_v13 }
0x4420   :  { %v4789_v22 = vrot.slane %v4788_v5, 2 }
0x4422   :  { %v4790_v18 = vadd.f32 %v4789_v22, %v4788_v5 }
0x4424   :  { %v4791_v38 = vrot.slane %v4790_v18, 1 }
0x4426   :  { %v4792_v47 = vadd.f32 %v4791_v38, %v4790_v18 }
0x4428   :  { %5494 = vpush %v4792_v47 }
0x4459   :  { %s5495_s24 = spop %5494 }
0x445a   :  { %v4794_v9 = vstv %s5495_s24 }
0x445b   :  { %5613 = vrsqrt.f32 %v4794_v9 }
0x4468   :  { %v5614_v36 = vpop.eup %5613 }
0x4469   :  { %5496 = vpush %v5614_v36 }
0x449a   :  { %s5497_s26 = spop %5496 }
0x449b   :  { %v7221_v53 = vstv %s5497_s26 }
0x449c   :  { %v4807_v42 = vmul.f32 %v7221_v53, %v4804_v35  ;;  %v4819_v43 = vmul.f32 %v4818_v17, %v7221_v53 }
0x449e   :  { %v4821_v32 = vsel %vm7835_vm4, %v4807_v42, 0.0  ;;  %v4825_v49 = vmul.f32 %v4819_v43, %v4807_v42  ;;  %vm7853_vm4 = vcmp.eq.s32.totalorder %v5776_v33, 15  ;;  %v3667_v33 = vadd.f32 %v6881_v44, %v6856_v8 }
0x449f   :  { %v7227_v1 = vadd.f32 %v4821_v32, %v4759_v10  ;;  %vm7854_vm3 = vmmov %vm7853_vm4 }
0x44a0   :  { %4830 = vrot.lane.b32.xlu1 %v4825_v49, %s5682_s2 }
0x4512   :  { %v4831_v11 = vpop.permute.xlu1 %4830 }
0x4513   :  { %v4835_v61 = vsub.f32 %v4771_v26, %v4831_v11 }
0x4515   :  { %4840 = vrot.lane.b32.xlu1 %v4835_v61, %s5681_s25 }
0x4539   :  { %4352 = vadd.xlane.f32.xlu1 %v4351_v51 }
0x4587   :  { %v4841_v27 = vpop.permute.xlu1 %4840 }
0x4588   :  { %v4845_v39 = vsel %vm7839_vm1, %v4841_v27, 0.0  ;;  %v4862_v54 = vsel %vm7842_vm14, %v4841_v27, 0.0  ;;  %vm7856_vm1 = vmmov %vm7840_vm2 }
0x4589   :  { %v4847_v56 = vsel %vm7840_vm2, %v4845_v39, 0.0  ;;  %v4866_v6 = vsel %vm7843_vm11, %v4862_v54, 0.0  ;;  %vm7857_vm2 = vmmov %vm7856_vm1 }
0x458a   :  { %4849 = vadd.xlane.f32.xlu0 %v4847_v56  ;;  %vm7858_vm14 = vmmov %vm7856_vm1 }
0x458b   :  { %vm7859_vm11 = vmmov %vm7856_vm1 }
0x458c   :  { %vm7860_vm8 = vmmov %vm7856_vm1 }
0x458e   :  { %4416 = vadd.xlane.f32.xlu0 %v7575_v60 }
0x4592   :  { %4480 = vadd.xlane.f32.xlu0 %v7575_v60 }
0x4596   :  { %4544 = vadd.xlane.f32.xlu0 %v7575_v60 }
0x459a   :  { %4608 = vadd.xlane.f32.xlu0 %v7575_v60 }
0x459e   :  { %4672 = vadd.xlane.f32.xlu0 %v7575_v60 }
0x45a2   :  { %4736 = vadd.xlane.f32.xlu0 %v7575_v60 }
0x45a6   :  { %4800 = vadd.xlane.f32.xlu0 %v7575_v60 }
0x45aa   :  { %4867 = vadd.xlane.f32.xlu0 %v4866_v6 }
0x45ae   :  { %4864 = vadd.xlane.f32.xlu0 %v7575_v60 }
0x45c2   :  { %v4353_v48 = vpop.xlane.xlu1 %4352 }
0x45c3   :  { %v4358_v59 = vmul.f32 %v7102_v31, %v4353_v48 }
0x45c5   :  { %v4372_v22 = vsel %vm7845_vm9, %v4358_v59, 0.0  ;;  %vm7861_vm9 = vmmov %vm7856_vm1 }
0x45c6   :  { %v4374_v36 = vadd.f32 %v4372_v22, %v7070_v58 }
0x4613   :  { %v4850_v24 = vpop.xlane.xlu0 %4849 }
0x4614   :  { %v4851_v62 = vrot.slane %v4850_v24, 4 }
0x4616   :  { %v4852_v14 = vadd.f32 %v4851_v62, %v4850_v24 }
0x4617   :  { %v4417_v60 = vpop.xlane.xlu0 %4416 }
0x4618   :  { %v4853_v52 = vrot.slane %v4852_v14, 2  ;;  %v4422_v5 = vmul.f32 %v7119_v19, %v4417_v60 }
0x461a   :  { %v4854_v50 = vadd.f32 %v4853_v52, %v4852_v14  ;;  %v4436_v47 = vsel %vm7846_vm13, %v4422_v5, 0.0 }
0x461b   :  { %v4481_v63 = vpop.xlane.xlu0 %4480  ;;  %v4438_v12 = vadd.f32 %v4436_v47, %v4374_v36 }
0x461c   :  { %v4855_v55 = vrot.slane %v4854_v50, 1  ;;  %v4486_v18 = vmul.f32 %v7136_v41, %v4481_v63 }
0x461e   :  { %v4856_v10 = vadd.f32 %v4855_v55, %v4854_v50  ;;  %v4500_v34 = vsel %vm7847_vm6, %v4486_v18, 0.0 }
0x461f   :  { %v4545_v40 = vpop.xlane.xlu0 %4544  ;;  %v4502_v41 = vadd.f32 %v4500_v34, %v4438_v12 }
0x4620   :  { %5498 = vpush %v4856_v10  ;;  %v4550_v9 = vmul.f32 %v7153_v37, %v4545_v40 }
0x4622   :  { %v4564_v19 = vsel %vm7848_vm12, %v4550_v9, 0.0 }
0x4623   :  { %v4609_v29 = vpop.xlane.xlu0 %4608  ;;  %v4566_v57 = vadd.f32 %v4564_v19, %v4502_v41 }
0x4624   :  { %v4614_v31 = vmul.f32 %v7170_v30, %v4609_v29 }
0x4626   :  { %v4628_v25 = vsel %vm7849_vm7, %v4614_v31, 0.0 }
0x4627   :  { %v4673_v15 = vpop.xlane.xlu0 %4672  ;;  %v4630_v30 = vadd.f32 %v4628_v25, %v4566_v57 }
0x4628   :  { %v4678_v3 = vmul.f32 %v7187_v23, %v4673_v15 }
0x462a   :  { %v4692_v58 = vsel %vm7850_vm0, %v4678_v3, 0.0 }
0x462b   :  { %v4737_v13 = vpop.xlane.xlu0 %4736  ;;  %v4694_v23 = vadd.f32 %v4692_v58, %v4630_v30 }
0x462c   :  { %v4742_v37 = vmul.f32 %v7204_v0, %v4737_v13 }
0x462e   :  { %v4756_v17 = vsel %vm7851_vm15, %v4742_v37, 0.0 }
0x462f   :  { %v4801_v38 = vpop.xlane.xlu0 %4800  ;;  %v4758_v0 = vadd.f32 %v4756_v17, %v4694_v23 }
0x4630   :  { %v4806_v45 = vmul.f32 %v7221_v53, %v4801_v38 }
0x4632   :  { %v4820_v42 = vsel %vm7852_vm5, %v4806_v45, 0.0 }
0x4633   :  { %v4868_v2 = vpop.xlane.xlu0 %4867  ;;  %v4822_v11 = vadd.f32 %v4820_v42, %v4758_v0 }
0x4637   :  { %v4865_v20 = vpop.xlane.xlu0 %4864 }
0x4651   :  { %s5499_s29 = spop %5498 }
0x4652   :  { %v4858_v26 = vstv %s5499_s29 }
0x4653   :  { %5615 = vrsqrt.f32 %v4858_v26 }
0x4660   :  { %v5616_v7 = vpop.eup %5615 }
0x4661   :  { %5500 = vpush %v5616_v7 }
0x4692   :  { %s5501_s30 = spop %5500 }
0x4693   :  { %v4869_v35 = vstv %s5501_s30 }
0x4694   :  { %v4871_v43 = vmul.f32 %v4869_v35, %v4868_v2  ;;  %v4870_v32 = vmul.f32 %v4869_v35, %v4865_v20 }
0x4696   :  { %v4873_v49 = vsel %vm7853_vm4, %v4871_v43, 0.0  ;;  %v4872_v53 = vsel %vm7854_vm3, %v4870_v32, 0.0 }
0x4697   :  { %v4875_v61 = vadd.f32 %v4873_v49, %v7227_v1  ;;  %v4874_v16 = vadd.f32 %v4872_v53, %v4822_v11  ;;  %v4881_v1 = vrot.slane %v3667_v33, %v5771_v4 }
0x4699   :  { %5333 = vmatprep.subr.msk.mxu0 %vm7855_vm10, %v4875_v61 }
0x469a   :  { %5334 = vmatpush3.xpose.msk.msra.mxu0 %vm7856_vm1, %v4875_v61 }
0x469b   :  { %5335 = vmatprep.subr.msk.mxu0 %vm7857_vm2, %v4874_v16 }
0x469e   :  { %5336 = vmatpush3.xpose.msk.msra.mxu0 %vm7858_vm14, %v4874_v16 }
0x46a1   :  { %5338 = vmatmul.mubr.msk.f32.vlgmr.msra.gmra.mxu0 %vm7859_vm11, %v4877_v21 }
0x4761   :  { %v5339_v51 = vpop.f32.mrf.mxu0 }
0x4762   :  { %v4966_v27 = vadd.f32 %v5339_v51, %v4881_v1 }
0x4763   :  { %v4960_v39 = vpop.f32.mrf.mxu0 }
0x4764   :  { %4970 = vst.msk [vmem:[#allocation7 + $0x8] sm:$0xff] %vm7860_vm8, %v4966_v27  ;;  %v4961_v56 = vadd.f32 %v4960_v39, %v4881_v1 }
0x4766   :  { %4969 = vst.msk [vmem:[#allocation7] sm:$0xff] %vm7861_vm9, %v4961_v56 }
0x4767   :  { %5660 = shalt.err (!%p5657_p0)
}
0x4768   :  { %4982 = dma.vmem_to_hbm [thread:$0]  %s4977_s9, 256, %s7308_s6, [#allocation4], %s5676_s27, %s5676_s27, %s5677_s28  }
0x4769   :  { %5673 = dma.done.wait [#allocation4], 256  }
0x476a   :  { %5674 = vsyncadd [#allocation4], 4294967040 }
0x476b   :  { %4986 = vsyncpa [#allocation3], 1 }
0x476c   :  { %4987 = vsyncpa [#allocation4], 1 }
0x476d   :  { %4988 = vsyncpa [#allocation5], 1 }

</bundles_post_ra>
